<compile_context>
chip_gen: v7x
topology: tpu7x:2x2x1
jax: 0.10.0
libtpu: 0.0.40
codegen_flags: <defaults>
</compile_context>

<pallas_src>
import math

import jax
import jax.numpy as jnp
from jax import lax
from jax.experimental import pallas as pl
from jax.experimental.pallas import tpu as pltpu

# ----- model config (small test sizes, consistent with Transformer.__init__) -----
NN_NUMS = 8          # sequence length (nn_nums; out2 = Linear(nn_nums, 1))
FEATURE_NUMS = 16    # feature_nums
N_LAYERS = 2         # n_layers
HIDDEN = 64          # hidden_size
FILTER = 128         # filter_size
HEADS = 8            # MultiHeadAttention head_size
ATT = HIDDEN // HEADS
EPS = 1e-6

assert HIDDEN % HEADS == 0


# ---------------------------------------------------------------------------
# Slab layouts: one (128, W_COLS) matrix slab (column segments 128-aligned),
# one (V_ROWS, 192) bias / head slab.  Offsets are static Python ints.
# ---------------------------------------------------------------------------
def _r128(n):
    return ((n + 127) // 128) * 128


def _build_w_layout():
    off, col = {}, 0

    def add(name, cols):
        nonlocal col
        off[name] = col
        col += _r128(cols)

    add("emb", HIDDEN)
    for l in range(N_LAYERS):
        add(f"wqkv{l}", 3 * HIDDEN)
        add(f"wo{l}", HIDDEN)
        add(f"w1{l}", FILTER)
        add(f"w2{l}", HIDDEN)
    return off, col


W_OFF, W_COLS = _build_w_layout()
W_ROWS = 128                                   # max row count (FILTER); others zero-padded

ROW_EMB_B = 0
ROW_BQKV = 1                                   # rows [1, 1+L)
ROW_B1 = 1 + N_LAYERS                          # rows [1+L, 1+2L)
ROW_B2 = 1 + 2 * N_LAYERS                      # rows [1+2L, 1+3L)
ROW_OUT1 = 1 + 3 * N_LAYERS                    # out1 weight as a (1, H) row
ROW_OUT2 = 2 + 3 * N_LAYERS                    # out2 weight as an (S, 1) column
ROW_CHEAD = 2 + 3 * N_LAYERS + NN_NUMS         # folded head constant C at [row, 0]
V_ROWS = ROW_CHEAD + 1
V_COLS = 3 * HIDDEN                            # widest bias row (bqkv)


# ---------------------------------------------------------------------------
# Fused kernel: whole forward for one batch block per grid step.
# ---------------------------------------------------------------------------
def _make_kernel(b_blk):
    S = NN_NUMS
    R = b_blk * S
    BH = b_blk * HEADS
    f32 = jnp.float32

    def kernel(x_ref, w_ref, v_ref, o_ref):
        x = x_ref[...].reshape(R, FEATURE_NUMS)                 # flatten batch block
        V = v_ref[...]                                          # (V_ROWS, 192) resident

        # input_normalize (folded) + i_vocab_embedding1  -> (R, HIDDEN)
        emb_w = w_ref[0:FEATURE_NUMS, W_OFF["emb"]:W_OFF["emb"] + HIDDEN]
        h = jnp.dot(x, emb_w, preferred_element_type=f32) \
            + V[ROW_EMB_B:ROW_EMB_B + 1, 0:HIDDEN]
        # `input_embedded * -emb_scale` is discarded in the reference -> no-op.
        # All Dropouts are identity (inference).

        for l in range(N_LAYERS):                               # static unroll
            cq = W_OFF[f"wqkv{l}"]
            wqkv = w_ref[0:HIDDEN, cq:cq + 3 * HIDDEN]
            wo = w_ref[0:HIDDEN, W_OFF[f"wo{l}"]:W_OFF[f"wo{l}"] + HIDDEN]
            w1 = w_ref[0:HIDDEN, W_OFF[f"w1{l}"]:W_OFF[f"w1{l}"] + FILTER]
            w2 = w_ref[0:FILTER, W_OFF[f"w2{l}"]:W_OFF[f"w2{l}"] + HIDDEN]
            bqkv = V[ROW_BQKV + l:ROW_BQKV + l + 1, 0:3 * HIDDEN]
            b1 = V[ROW_B1 + l:ROW_B1 + l + 1, 0:FILTER]
            b2 = V[ROW_B2 + l:ROW_B2 + l + 1, 0:HIDDEN]

            # ---- self-attention (bn1 + attention scale folded into wqkv) ----
            qkv = jnp.dot(h, wqkv, preferred_element_type=f32) + bqkv   # (R, 3H)

            def head_stack(col):
                # -> (B_blk*HEADS, S, ATT), heads stacked head-major along sublanes
                parts = []
                for b in range(b_blk):
                    rows = slice(b * S, (b + 1) * S)
                    for hd in range(HEADS):
                        parts.append(qkv[rows, col + hd * ATT:col + (hd + 1) * ATT])
                return jnp.concatenate(parts, axis=0).reshape(BH, S, ATT)

            q = head_stack(0)                         # pre-scaled by att_size**-0.5
            k = head_stack(HIDDEN)
            v = head_stack(2 * HIDDEN)

            # one batched score matmul + ONE softmax pass over all heads
            s = jnp.einsum("hqd,hkd->hqk", q, k, preferred_element_type=f32)
            s = s - jnp.max(s, axis=-1, keepdims=True)
            p = jnp.exp(s)
            p = p / jnp.sum(p, axis=-1, keepdims=True)           # exact softmax
            c = jnp.einsum("hqk,hkd->hqd", p, v, preferred_element_type=f32)
            c = c.reshape(BH * S, ATT)

            # merge heads back to (R, HIDDEN) and do a SINGLE output projection
            ctx = jnp.concatenate(
                [jnp.concatenate(
                    [c[(b * HEADS + hd) * S:(b * HEADS + hd + 1) * S, :]
                     for hd in range(HEADS)], axis=1)
                 for b in range(b_blk)], axis=0)                  # (R, HIDDEN)
            h = h + jnp.dot(ctx, wo, preferred_element_type=f32)  # residual

            # ---- feed-forward (bn2 folded into w1) ----
            ff = jnp.dot(h, w1, preferred_element_type=f32) + b1
            ff = jnp.maximum(ff, 0.0)
            h = h + jnp.dot(ff, w2, preferred_element_type=f32) + b2

        # ---- head: last_bn folded into out1; out1/out2 folded algebraically ----
        #   o2[b] = (sum_s out2_w[s] * h[b,s,:]) . out1_w'  +  C
        h3 = h.reshape(b_blk, S, HIDDEN)
        w2col = V[ROW_OUT2:ROW_OUT2 + S, 0:1]                     # (S, 1)
        g = jnp.sum(h3 * w2col.reshape(1, S, 1), axis=1)          # (b_blk, HIDDEN)
        out1_row = V[ROW_OUT1:ROW_OUT1 + 1, 0:HIDDEN]             # (1, HIDDEN)
        o2 = lax.dot_general(out1_row, g, (((1,), (1,)), ((), ())),
                             preferred_element_type=f32)          # (1, b_blk) lane-dense
        o2 = o2 + V[ROW_CHEAD:ROW_CHEAD + 1, 0:1]
        o_ref[...] = o2.reshape(1, 1, b_blk)

    return kernel


def _num_grid_blocks(batch):
    """1 grid step on single-TensorCore chips (v5e/v6e); 2 parallel steps on v7x."""
    kind = ""
    try:
        kind = jax.devices()[0].device_kind.lower()
    except Exception:
        pass
    if "v7" in kind and batch >= 2 and batch % 2 == 0:
        return 2
    return 1


def transformer_forward(params, inputs, targets=None):
    """inputs: (B, S, F). `targets` is unused, exactly as in the reference forward."""
    del targets
    B, S, F = inputs.shape
    assert S == NN_NUMS and F == FEATURE_NUMS
    nb = _num_grid_blocks(B)
    b_blk = B // nb

    out = pl.pallas_call(
        _make_kernel(b_blk),
        grid=(nb,),
        in_specs=[
            pl.BlockSpec((b_blk, S, F), lambda i: (i, 0, 0)),       # activations
            pl.BlockSpec((W_ROWS, W_COLS), lambda i: (0, 0)),       # all matrices: 1 DMA
            pl.BlockSpec((V_ROWS, V_COLS), lambda i: (0, 0)),       # all biases/head: 1 DMA
        ],
        out_specs=pl.BlockSpec((1, 1, b_blk), lambda i: (i, 0, 0)),  # lane-dense store
        out_shape=jax.ShapeDtypeStruct((nb, 1, b_blk), jnp.float32),
        compiler_params=pltpu.CompilerParams(dimension_semantics=("parallel",)),
    )(inputs, params["W"], params["V"])
    return out.reshape(B)


# ---------------------------------------------------------------------------
# Parameter construction (shapes from the module __init__).  BN stats/biases get
# non-trivial random values so the folding paths are actually exercised.
# ---------------------------------------------------------------------------
def _xavier(key, shape):
    fan_in, fan_out = shape
    lim = math.sqrt(6.0 / (fan_in + fan_out))
    return jax.random.uniform(key, shape, jnp.float32, -lim, lim)


def _bn_params(key, c):
    k1, k2, k3, k4 = jax.random.split(key, 4)
    gamma = jax.random.uniform(k1, (c,), jnp.float32, 0.5, 1.5)
    beta = 0.1 * jax.random.normal(k2, (c,), jnp.float32)
    mean = 0.1 * jax.random.normal(k3, (c,), jnp.float32)
    var = jax.random.uniform(k4, (c,), jnp.float32, 0.5, 1.5)
    return gamma, beta, mean, var


def _bn_scale_shift(gamma, beta, mean, var):
    scale = gamma / jnp.sqrt(var + EPS)
    return scale, beta - mean * scale


def init_params(key):
    keys = iter(jax.random.split(key, 64))
    nk = lambda: next(keys)
    p = {"in_bn": _bn_params(nk(), FEATURE_NUMS)}
    p["emb_w"] = jax.random.normal(nk(), (FEATURE_NUMS, HIDDEN), jnp.float32) * HIDDEN ** (-0.5)
    p["emb_b"] = 0.1 * jax.random.normal(nk(), (1, HIDDEN), jnp.float32)
    layers = []
    for _ in range(N_LAYERS):
        layers.append({
            "bn1": _bn_params(nk(), HIDDEN),
            "wq": _xavier(nk(), (HIDDEN, HIDDEN)),
            "wk": _xavier(nk(), (HIDDEN, HIDDEN)),
            "wv": _xavier(nk(), (HIDDEN, HIDDEN)),
            "wo": _xavier(nk(), (HIDDEN, HIDDEN)),
            "bn2": _bn_params(nk(), HIDDEN),
            "w1": _xavier(nk(), (HIDDEN, FILTER)),
            "b1": 0.1 * jax.random.normal(nk(), (1, FILTER), jnp.float32),
            "w2": _xavier(nk(), (FILTER, HIDDEN)),
            "b2": 0.1 * jax.random.normal(nk(), (1, HIDDEN), jnp.float32),
        })
    p["layers"] = layers
    p["last_bn"] = _bn_params(nk(), HIDDEN)
    p["out1_w"] = _xavier(nk(), (HIDDEN, 1))
    p["out1_b"] = 0.1 * jax.random.normal(nk(), (1, 1), jnp.float32)
    p["out2_w"] = _xavier(nk(), (NN_NUMS, 1))
    p["out2_b"] = 0.1 * jax.random.normal(nk(), (1, 1), jnp.float32)
    return p


def fold_params(p):
    """One-time host prep: fold eval-mode BatchNorms into adjacent linears, fuse
    Q/K/V (scale into Q), fold out1/out2, and pack into two lane-dense slabs."""
    att_scale = ATT ** (-0.5)
    W = jnp.zeros((W_ROWS, W_COLS), jnp.float32)
    V = jnp.zeros((V_ROWS, V_COLS), jnp.float32)

    def putw(W, name, arr):
        r, c = arr.shape
        off = W_OFF[name]
        return W.at[0:r, off:off + c].set(arr)

    s0, t0 = _bn_scale_shift(*p["in_bn"])
    W = putw(W, "emb", s0[:, None] * p["emb_w"])
    V = V.at[ROW_EMB_B, 0:HIDDEN].set((t0[None, :] @ p["emb_w"] + p["emb_b"])[0])

    for l, layer in enumerate(p["layers"]):
        s1, t1 = _bn_scale_shift(*layer["bn1"])
        wqkv_raw = jnp.concatenate(
            [att_scale * layer["wq"], layer["wk"], layer["wv"]], axis=1)     # (H, 3H)
        W = putw(W, f"wqkv{l}", s1[:, None] * wqkv_raw)
        V = V.at[ROW_BQKV + l, 0:3 * HIDDEN].set((t1[None, :] @ wqkv_raw)[0])
        W = putw(W, f"wo{l}", layer["wo"])

        s2, t2 = _bn_scale_shift(*layer["bn2"])
        W = putw(W, f"w1{l}", s2[:, None] * layer["w1"])
        V = V.at[ROW_B1 + l, 0:FILTER].set((t2[None, :] @ layer["w1"] + layer["b1"])[0])
        W = putw(W, f"w2{l}", layer["w2"])
        V = V.at[ROW_B2 + l, 0:HIDDEN].set(layer["b2"][0])

    sl, tl = _bn_scale_shift(*p["last_bn"])
    out1_w = sl[:, None] * p["out1_w"]                           # (H, 1)
    out1_b = tl[None, :] @ p["out1_w"] + p["out1_b"]             # (1, 1)
    c_head = out1_b * jnp.sum(p["out2_w"]) + p["out2_b"]         # (1, 1)
    V = V.at[ROW_OUT1, 0:HIDDEN].set(out1_w[:, 0])
    V = V.at[ROW_OUT2:ROW_OUT2 + NN_NUMS, 0].set(p["out2_w"][:, 0])
    V = V.at[ROW_CHEAD, 0].set(c_head[0, 0])
    return {"W": W, "V": V}


# ---------------------------------------------------------------------------
# Pure-JAX reference (mirrors the PyTorch forward literally, unfolded params).
# ---------------------------------------------------------------------------
def _ref_forward(p, inputs):
    def bn(x, stats):   # eval-mode BatchNorm1d over the channel (last) dim
        gamma, beta, mean, var = stats
        return (x - mean) / jnp.sqrt(var + EPS) * gamma + beta

    B = inputs.shape[0]
    scale = ATT ** (-0.5)
    h = bn(inputs, p["in_bn"]) @ p["emb_w"] + p["emb_b"]
    for layer in p["layers"]:
        y = bn(h, layer["bn1"])
        q = (y @ layer["wq"]).reshape(B, NN_NUMS, HEADS, ATT).transpose(0, 2, 1, 3) * scale
        k = (y @ layer["wk"]).reshape(B, NN_NUMS, HEADS, ATT).transpose(0, 2, 1, 3)
        v = (y @ layer["wv"]).reshape(B, NN_NUMS, HEADS, ATT).transpose(0, 2, 1, 3)
        a = jax.nn.softmax(jnp.einsum("bhqd,bhkd->bhqk", q, k), axis=-1)
        o = jnp.einsum("bhqk,bhkd->bhqd", a, v).transpose(0, 2, 1, 3).reshape(B, NN_NUMS, HIDDEN)
        h = h + o @ layer["wo"]
        y = bn(h, layer["bn2"])
        h = h + jnp.maximum(y @ layer["w1"] + layer["b1"], 0.0) @ layer["w2"] + layer["b2"]
    h = bn(h, p["last_bn"])
    o1 = (h @ p["out1_w"] + p["out1_b"])[..., 0]                 # (B, S)
    return o1 @ p["out2_w"][:, 0] + p["out2_b"][0, 0]            # (B,)


if __name__ == "__main__":
    jax.config.update("jax_default_matmul_precision", "float32")

    key = jax.random.PRNGKey(0)
    pkey, xkey, tkey = jax.random.split(key, 3)
    raw_params = init_params(pkey)
    params = fold_params(raw_params)

    inputs = jax.random.normal(xkey, (2, NN_NUMS, FEATURE_NUMS), jnp.float32)
    targets = jax.random.normal(tkey, (2, NN_NUMS, 1), jnp.float32)  # unused, as in reference

    out = jax.jit(transformer_forward)(params, inputs, targets)
    jax.block_until_ready(out)
    assert out.shape == (2,), out.shape
    assert bool(jnp.all(jnp.isfinite(out)))

    ref = _ref_forward(raw_params, inputs)
    assert bool(jnp.allclose(out, ref, rtol=5e-3, atol=5e-3)), (out, ref)
    print("KERNEL_OK")
</pallas_src>

<mosaic_0001>
module attributes {stable_mosaic.version = 11 : i64} {
  func.func @kernel(%arg0: i32, %arg1: memref<2x8x16xf32, #tpu.memory_space<vmem>>, %arg2: memref<128x1408xf32, #tpu.memory_space<vmem>>, %arg3: memref<17x192xf32, #tpu.memory_space<vmem>>, %arg4: memref<1x1x2xf32, #tpu.memory_space<vmem>>) attributes {dimension_semantics = [#tpu.dimension_semantics<parallel>], iteration_bounds = array<i64: 1>, scalar_prefetch = 0 : i64, scratch_operands = 0 : i64, tpu.core_type = #tpu.core_type<tc>, window_params = [{transform_indices = @transform_0, window_bounds = array<i64: 2, 8, 16>}, {pipeline_mode = #tpu.pipeline_mode<synchronous>, transform_indices = @transform_1, window_bounds = array<i64: 128, 1408>}, {pipeline_mode = #tpu.pipeline_mode<synchronous>, transform_indices = @transform_2, window_bounds = array<i64: 17, 192>}, {transform_indices = @transform_3, window_bounds = array<i64: 1, 1, 2>}]} {
    %c0 = arith.constant 0 : index
    %c0_0 = arith.constant 0 : index
    %c0_1 = arith.constant 0 : index
    %0 = vector.load %arg1[%c0, %c0_0, %c0_1] : memref<2x8x16xf32, #tpu.memory_space<vmem>>, vector<2x8x16xf32>
    %1 = vector.shape_cast %0 : vector<2x8x16xf32> to vector<16x16xf32>
    %c0_2 = arith.constant 0 : index
    %c0_3 = arith.constant 0 : index
    %2 = vector.load %arg3[%c0_2, %c0_3] : memref<17x192xf32, #tpu.memory_space<vmem>>, vector<17x192xf32>
    %c0_4 = arith.constant 0 : index
    %c0_5 = arith.constant 0 : index
    %3 = vector.load %arg2[%c0_4, %c0_5] : memref<128x1408xf32, #tpu.memory_space<vmem>>, vector<16x64xf32>
    %cst = arith.constant dense<0.000000e+00> : vector<16x64xf32>
    %4 = tpu.matmul %1, %3, %cst {dimension_numbers = #tpu.dot_dimension_numbers<[1], [0], [0], [1], [0, 0, 1, 1], [], []>, precision = #tpu.contract_precision<fp32>} : vector<16x16xf32>, vector<16x64xf32>, vector<16x64xf32> -> vector<16x64xf32>
    %5 = vector.extract_strided_slice %2 {offsets = [0, 0], sizes = [1, 64], strides = [1, 1]} : vector<17x192xf32> to vector<1x64xf32>
    %6 = vector.broadcast %5 : vector<1x64xf32> to vector<16x64xf32>
    %7 = arith.addf %4, %6 : vector<16x64xf32>
    %c0_6 = arith.constant 0 : index
    %c128 = arith.constant 128 : index
    %8 = vector.load %arg2[%c0_6, %c128] : memref<128x1408xf32, #tpu.memory_space<vmem>>, vector<64x192xf32>
    %c0_7 = arith.constant 0 : index
    %c384 = arith.constant 384 : index
    %9 = vector.load %arg2[%c0_7, %c384] : memref<128x1408xf32, #tpu.memory_space<vmem>>, vector<64x64xf32>
    %c0_8 = arith.constant 0 : index
    %c512 = arith.constant 512 : index
    %10 = vector.load %arg2[%c0_8, %c512] : memref<128x1408xf32, #tpu.memory_space<vmem>>, vector<64x128xf32>
    %c0_9 = arith.constant 0 : index
    %c640 = arith.constant 640 : index
    %11 = vector.load %arg2[%c0_9, %c640] : memref<128x1408xf32, #tpu.memory_space<vmem>>, vector<128x64xf32>
    %12 = vector.extract_strided_slice %2 {offsets = [1, 0], sizes = [1, 192], strides = [1, 1]} : vector<17x192xf32> to vector<1x192xf32>
    %13 = vector.extract_strided_slice %2 {offsets = [3, 0], sizes = [1, 128], strides = [1, 1]} : vector<17x192xf32> to vector<1x128xf32>
    %14 = vector.extract_strided_slice %2 {offsets = [5, 0], sizes = [1, 64], strides = [1, 1]} : vector<17x192xf32> to vector<1x64xf32>
    %cst_10 = arith.constant dense<0.000000e+00> : vector<16x192xf32>
    %15 = tpu.matmul %7, %8, %cst_10 {dimension_numbers = #tpu.dot_dimension_numbers<[1], [0], [0], [1], [0, 0, 1, 1], [], []>, precision = #tpu.contract_precision<fp32>} : vector<16x64xf32>, vector<64x192xf32>, vector<16x192xf32> -> vector<16x192xf32>
    %16 = vector.broadcast %12 : vector<1x192xf32> to vector<16x192xf32>
    %17 = arith.addf %15, %16 : vector<16x192xf32>
    %18 = vector.extract_strided_slice %17 {offsets = [0, 0], sizes = [8, 8], strides = [1, 1]} : vector<16x192xf32> to vector<8x8xf32>
    %19 = vector.extract_strided_slice %17 {offsets = [0, 8], sizes = [8, 8], strides = [1, 1]} : vector<16x192xf32> to vector<8x8xf32>
    %20 = vector.extract_strided_slice %17 {offsets = [0, 16], sizes = [8, 8], strides = [1, 1]} : vector<16x192xf32> to vector<8x8xf32>
    %21 = vector.extract_strided_slice %17 {offsets = [0, 24], sizes = [8, 8], strides = [1, 1]} : vector<16x192xf32> to vector<8x8xf32>
    %22 = vector.extract_strided_slice %17 {offsets = [0, 32], sizes = [8, 8], strides = [1, 1]} : vector<16x192xf32> to vector<8x8xf32>
    %23 = vector.extract_strided_slice %17 {offsets = [0, 40], sizes = [8, 8], strides = [1, 1]} : vector<16x192xf32> to vector<8x8xf32>
    %24 = vector.extract_strided_slice %17 {offsets = [0, 48], sizes = [8, 8], strides = [1, 1]} : vector<16x192xf32> to vector<8x8xf32>
    %25 = vector.extract_strided_slice %17 {offsets = [0, 56], sizes = [8, 8], strides = [1, 1]} : vector<16x192xf32> to vector<8x8xf32>
    %26 = vector.extract_strided_slice %17 {offsets = [8, 0], sizes = [8, 8], strides = [1, 1]} : vector<16x192xf32> to vector<8x8xf32>
    %27 = vector.extract_strided_slice %17 {offsets = [8, 8], sizes = [8, 8], strides = [1, 1]} : vector<16x192xf32> to vector<8x8xf32>
    %28 = vector.extract_strided_slice %17 {offsets = [8, 16], sizes = [8, 8], strides = [1, 1]} : vector<16x192xf32> to vector<8x8xf32>
    %29 = vector.extract_strided_slice %17 {offsets = [8, 24], sizes = [8, 8], strides = [1, 1]} : vector<16x192xf32> to vector<8x8xf32>
    %30 = vector.extract_strided_slice %17 {offsets = [8, 32], sizes = [8, 8], strides = [1, 1]} : vector<16x192xf32> to vector<8x8xf32>
    %31 = vector.extract_strided_slice %17 {offsets = [8, 40], sizes = [8, 8], strides = [1, 1]} : vector<16x192xf32> to vector<8x8xf32>
    %32 = vector.extract_strided_slice %17 {offsets = [8, 48], sizes = [8, 8], strides = [1, 1]} : vector<16x192xf32> to vector<8x8xf32>
    %33 = vector.extract_strided_slice %17 {offsets = [8, 56], sizes = [8, 8], strides = [1, 1]} : vector<16x192xf32> to vector<8x8xf32>
    %34 = tpu.concatenate %18, %19, %20, %21, %22, %23, %24, %25, %26, %27, %28, %29, %30, %31, %32, %33 in 0 : vector<8x8xf32>, vector<8x8xf32>, vector<8x8xf32>, vector<8x8xf32>, vector<8x8xf32>, vector<8x8xf32>, vector<8x8xf32>, vector<8x8xf32>, vector<8x8xf32>, vector<8x8xf32>, vector<8x8xf32>, vector<8x8xf32>, vector<8x8xf32>, vector<8x8xf32>, vector<8x8xf32>, vector<8x8xf32> -> vector<128x8xf32>
    %35 = vector.shape_cast %34 : vector<128x8xf32> to vector<16x8x8xf32>
    %36 = vector.extract_strided_slice %17 {offsets = [0, 64], sizes = [8, 8], strides = [1, 1]} : vector<16x192xf32> to vector<8x8xf32>
    %37 = vector.extract_strided_slice %17 {offsets = [0, 72], sizes = [8, 8], strides = [1, 1]} : vector<16x192xf32> to vector<8x8xf32>
    %38 = vector.extract_strided_slice %17 {offsets = [0, 80], sizes = [8, 8], strides = [1, 1]} : vector<16x192xf32> to vector<8x8xf32>
    %39 = vector.extract_strided_slice %17 {offsets = [0, 88], sizes = [8, 8], strides = [1, 1]} : vector<16x192xf32> to vector<8x8xf32>
    %40 = vector.extract_strided_slice %17 {offsets = [0, 96], sizes = [8, 8], strides = [1, 1]} : vector<16x192xf32> to vector<8x8xf32>
    %41 = vector.extract_strided_slice %17 {offsets = [0, 104], sizes = [8, 8], strides = [1, 1]} : vector<16x192xf32> to vector<8x8xf32>
    %42 = vector.extract_strided_slice %17 {offsets = [0, 112], sizes = [8, 8], strides = [1, 1]} : vector<16x192xf32> to vector<8x8xf32>
    %43 = vector.extract_strided_slice %17 {offsets = [0, 120], sizes = [8, 8], strides = [1, 1]} : vector<16x192xf32> to vector<8x8xf32>
    %44 = vector.extract_strided_slice %17 {offsets = [8, 64], sizes = [8, 8], strides = [1, 1]} : vector<16x192xf32> to vector<8x8xf32>
    %45 = vector.extract_strided_slice %17 {offsets = [8, 72], sizes = [8, 8], strides = [1, 1]} : vector<16x192xf32> to vector<8x8xf32>
    %46 = vector.extract_strided_slice %17 {offsets = [8, 80], sizes = [8, 8], strides = [1, 1]} : vector<16x192xf32> to vector<8x8xf32>
    %47 = vector.extract_strided_slice %17 {offsets = [8, 88], sizes = [8, 8], strides = [1, 1]} : vector<16x192xf32> to vector<8x8xf32>
    %48 = vector.extract_strided_slice %17 {offsets = [8, 96], sizes = [8, 8], strides = [1, 1]} : vector<16x192xf32> to vector<8x8xf32>
    %49 = vector.extract_strided_slice %17 {offsets = [8, 104], sizes = [8, 8], strides = [1, 1]} : vector<16x192xf32> to vector<8x8xf32>
    %50 = vector.extract_strided_slice %17 {offsets = [8, 112], sizes = [8, 8], strides = [1, 1]} : vector<16x192xf32> to vector<8x8xf32>
    %51 = vector.extract_strided_slice %17 {offsets = [8, 120], sizes = [8, 8], strides = [1, 1]} : vector<16x192xf32> to vector<8x8xf32>
    %52 = tpu.concatenate %36, %37, %38, %39, %40, %41, %42, %43, %44, %45, %46, %47, %48, %49, %50, %51 in 0 : vector<8x8xf32>, vector<8x8xf32>, vector<8x8xf32>, vector<8x8xf32>, vector<8x8xf32>, vector<8x8xf32>, vector<8x8xf32>, vector<8x8xf32>, vector<8x8xf32>, vector<8x8xf32>, vector<8x8xf32>, vector<8x8xf32>, vector<8x8xf32>, vector<8x8xf32>, vector<8x8xf32>, vector<8x8xf32> -> vector<128x8xf32>
    %53 = vector.shape_cast %52 : vector<128x8xf32> to vector<16x8x8xf32>
    %54 = vector.extract_strided_slice %17 {offsets = [0, 128], sizes = [8, 8], strides = [1, 1]} : vector<16x192xf32> to vector<8x8xf32>
    %55 = vector.extract_strided_slice %17 {offsets = [0, 136], sizes = [8, 8], strides = [1, 1]} : vector<16x192xf32> to vector<8x8xf32>
    %56 = vector.extract_strided_slice %17 {offsets = [0, 144], sizes = [8, 8], strides = [1, 1]} : vector<16x192xf32> to vector<8x8xf32>
    %57 = vector.extract_strided_slice %17 {offsets = [0, 152], sizes = [8, 8], strides = [1, 1]} : vector<16x192xf32> to vector<8x8xf32>
    %58 = vector.extract_strided_slice %17 {offsets = [0, 160], sizes = [8, 8], strides = [1, 1]} : vector<16x192xf32> to vector<8x8xf32>
    %59 = vector.extract_strided_slice %17 {offsets = [0, 168], sizes = [8, 8], strides = [1, 1]} : vector<16x192xf32> to vector<8x8xf32>
    %60 = vector.extract_strided_slice %17 {offsets = [0, 176], sizes = [8, 8], strides = [1, 1]} : vector<16x192xf32> to vector<8x8xf32>
    %61 = vector.extract_strided_slice %17 {offsets = [0, 184], sizes = [8, 8], strides = [1, 1]} : vector<16x192xf32> to vector<8x8xf32>
    %62 = vector.extract_strided_slice %17 {offsets = [8, 128], sizes = [8, 8], strides = [1, 1]} : vector<16x192xf32> to vector<8x8xf32>
    %63 = vector.extract_strided_slice %17 {offsets = [8, 136], sizes = [8, 8], strides = [1, 1]} : vector<16x192xf32> to vector<8x8xf32>
    %64 = vector.extract_strided_slice %17 {offsets = [8, 144], sizes = [8, 8], strides = [1, 1]} : vector<16x192xf32> to vector<8x8xf32>
    %65 = vector.extract_strided_slice %17 {offsets = [8, 152], sizes = [8, 8], strides = [1, 1]} : vector<16x192xf32> to vector<8x8xf32>
    %66 = vector.extract_strided_slice %17 {offsets = [8, 160], sizes = [8, 8], strides = [1, 1]} : vector<16x192xf32> to vector<8x8xf32>
    %67 = vector.extract_strided_slice %17 {offsets = [8, 168], sizes = [8, 8], strides = [1, 1]} : vector<16x192xf32> to vector<8x8xf32>
    %68 = vector.extract_strided_slice %17 {offsets = [8, 176], sizes = [8, 8], strides = [1, 1]} : vector<16x192xf32> to vector<8x8xf32>
    %69 = vector.extract_strided_slice %17 {offsets = [8, 184], sizes = [8, 8], strides = [1, 1]} : vector<16x192xf32> to vector<8x8xf32>
    %70 = tpu.concatenate %54, %55, %56, %57, %58, %59, %60, %61, %62, %63, %64, %65, %66, %67, %68, %69 in 0 : vector<8x8xf32>, vector<8x8xf32>, vector<8x8xf32>, vector<8x8xf32>, vector<8x8xf32>, vector<8x8xf32>, vector<8x8xf32>, vector<8x8xf32>, vector<8x8xf32>, vector<8x8xf32>, vector<8x8xf32>, vector<8x8xf32>, vector<8x8xf32>, vector<8x8xf32>, vector<8x8xf32>, vector<8x8xf32> -> vector<128x8xf32>
    %71 = vector.shape_cast %70 : vector<128x8xf32> to vector<16x8x8xf32>
    "tpu.trace_start"() <{level = 10 : i32, message = "hqd,hkd->hqk"}> : () -> ()
    %cst_11 = arith.constant dense<0.000000e+00> : vector<16x8x8xf32>
    %72 = tpu.matmul %35, %53, %cst_11 {dimension_numbers = #tpu.dot_dimension_numbers<[2], [2], [1], [1], [0, 0, 0, 1, 1, 1], [0], [0]>, precision = #tpu.contract_precision<fp32>} : vector<16x8x8xf32>, vector<16x8x8xf32>, vector<16x8x8xf32> -> vector<16x8x8xf32>
    "tpu.trace_stop"() : () -> ()
    %cst_12 = arith.constant dense<0xFF800000> : vector<16x8xf32>
    %73 = vector.multi_reduction <maximumf>, %72, %cst_12 [2] : vector<16x8x8xf32> to vector<16x8xf32>
    %74 = vector.shape_cast %73 : vector<16x8xf32> to vector<16x8x1xf32>
    %75 = vector.broadcast %74 : vector<16x8x1xf32> to vector<16x8x8xf32>
    %76 = arith.subf %72, %75 : vector<16x8x8xf32>
    %77 = math.exp %76 : vector<16x8x8xf32>
    %cst_13 = arith.constant dense<0.000000e+00> : vector<16x8xf32>
    %78 = vector.multi_reduction <add>, %77, %cst_13 [2] : vector<16x8x8xf32> to vector<16x8xf32>
    %79 = vector.shape_cast %78 : vector<16x8xf32> to vector<16x8x1xf32>
    %80 = vector.broadcast %79 : vector<16x8x1xf32> to vector<16x8x8xf32>
    %81 = arith.divf %77, %80 : vector<16x8x8xf32>
    "tpu.trace_start"() <{level = 10 : i32, message = "hqk,hkd->hqd"}> : () -> ()
    %cst_14 = arith.constant dense<0.000000e+00> : vector<16x8x8xf32>
    %82 = tpu.matmul %81, %71, %cst_14 {dimension_numbers = #tpu.dot_dimension_numbers<[2], [1], [1], [2], [0, 0, 0, 1, 1, 2], [0], [0]>, precision = #tpu.contract_precision<fp32>} : vector<16x8x8xf32>, vector<16x8x8xf32>, vector<16x8x8xf32> -> vector<16x8x8xf32>
    "tpu.trace_stop"() : () -> ()
    %83 = vector.shape_cast %82 : vector<16x8x8xf32> to vector<128x8xf32>
    %84 = vector.extract_strided_slice %83 {offsets = [0, 0], sizes = [8, 8], strides = [1, 1]} : vector<128x8xf32> to vector<8x8xf32>
    %85 = vector.extract_strided_slice %83 {offsets = [8, 0], sizes = [8, 8], strides = [1, 1]} : vector<128x8xf32> to vector<8x8xf32>
    %86 = vector.extract_strided_slice %83 {offsets = [16, 0], sizes = [8, 8], strides = [1, 1]} : vector<128x8xf32> to vector<8x8xf32>
    %87 = vector.extract_strided_slice %83 {offsets = [24, 0], sizes = [8, 8], strides = [1, 1]} : vector<128x8xf32> to vector<8x8xf32>
    %88 = vector.extract_strided_slice %83 {offsets = [32, 0], sizes = [8, 8], strides = [1, 1]} : vector<128x8xf32> to vector<8x8xf32>
    %89 = vector.extract_strided_slice %83 {offsets = [40, 0], sizes = [8, 8], strides = [1, 1]} : vector<128x8xf32> to vector<8x8xf32>
    %90 = vector.extract_strided_slice %83 {offsets = [48, 0], sizes = [8, 8], strides = [1, 1]} : vector<128x8xf32> to vector<8x8xf32>
    %91 = vector.extract_strided_slice %83 {offsets = [56, 0], sizes = [8, 8], strides = [1, 1]} : vector<128x8xf32> to vector<8x8xf32>
    %92 = tpu.concatenate %84, %85, %86, %87, %88, %89, %90, %91 in 1 : vector<8x8xf32>, vector<8x8xf32>, vector<8x8xf32>, vector<8x8xf32>, vector<8x8xf32>, vector<8x8xf32>, vector<8x8xf32>, vector<8x8xf32> -> vector<8x64xf32>
    %93 = vector.extract_strided_slice %83 {offsets = [64, 0], sizes = [8, 8], strides = [1, 1]} : vector<128x8xf32> to vector<8x8xf32>
    %94 = vector.extract_strided_slice %83 {offsets = [72, 0], sizes = [8, 8], strides = [1, 1]} : vector<128x8xf32> to vector<8x8xf32>
    %95 = vector.extract_strided_slice %83 {offsets = [80, 0], sizes = [8, 8], strides = [1, 1]} : vector<128x8xf32> to vector<8x8xf32>
    %96 = vector.extract_strided_slice %83 {offsets = [88, 0], sizes = [8, 8], strides = [1, 1]} : vector<128x8xf32> to vector<8x8xf32>
    %97 = vector.extract_strided_slice %83 {offsets = [96, 0], sizes = [8, 8], strides = [1, 1]} : vector<128x8xf32> to vector<8x8xf32>
    %98 = vector.extract_strided_slice %83 {offsets = [104, 0], sizes = [8, 8], strides = [1, 1]} : vector<128x8xf32> to vector<8x8xf32>
    %99 = vector.extract_strided_slice %83 {offsets = [112, 0], sizes = [8, 8], strides = [1, 1]} : vector<128x8xf32> to vector<8x8xf32>
    %100 = vector.extract_strided_slice %83 {offsets = [120, 0], sizes = [8, 8], strides = [1, 1]} : vector<128x8xf32> to vector<8x8xf32>
    %101 = tpu.concatenate %93, %94, %95, %96, %97, %98, %99, %100 in 1 : vector<8x8xf32>, vector<8x8xf32>, vector<8x8xf32>, vector<8x8xf32>, vector<8x8xf32>, vector<8x8xf32>, vector<8x8xf32>, vector<8x8xf32> -> vector<8x64xf32>
    %102 = tpu.concatenate %92, %101 in 0 : vector<8x64xf32>, vector<8x64xf32> -> vector<16x64xf32>
    %cst_15 = arith.constant dense<0.000000e+00> : vector<16x64xf32>
    %103 = tpu.matmul %102, %9, %cst_15 {dimension_numbers = #tpu.dot_dimension_numbers<[1], [0], [0], [1], [0, 0, 1, 1], [], []>, precision = #tpu.contract_precision<fp32>} : vector<16x64xf32>, vector<64x64xf32>, vector<16x64xf32> -> vector<16x64xf32>
    %104 = arith.addf %7, %103 : vector<16x64xf32>
    %cst_16 = arith.constant dense<0.000000e+00> : vector<16x128xf32>
    %105 = tpu.matmul %104, %10, %cst_16 {dimension_numbers = #tpu.dot_dimension_numbers<[1], [0], [0], [1], [0, 0, 1, 1], [], []>, precision = #tpu.contract_precision<fp32>} : vector<16x64xf32>, vector<64x128xf32>, vector<16x128xf32> -> vector<16x128xf32>
    %106 = vector.broadcast %13 : vector<1x128xf32> to vector<16x128xf32>
    %107 = arith.addf %105, %106 : vector<16x128xf32>
    %cst_17 = arith.constant 0.000000e+00 : f32
    %108 = vector.broadcast %cst_17 : f32 to vector<16x128xf32>
    %109 = arith.maximumf %107, %108 : vector<16x128xf32>
    %cst_18 = arith.constant dense<0.000000e+00> : vector<16x64xf32>
    %110 = tpu.matmul %109, %11, %cst_18 {dimension_numbers = #tpu.dot_dimension_numbers<[1], [0], [0], [1], [0, 0, 1, 1], [], []>, precision = #tpu.contract_precision<fp32>} : vector<16x128xf32>, vector<128x64xf32>, vector<16x64xf32> -> vector<16x64xf32>
    %111 = arith.addf %104, %110 : vector<16x64xf32>
    %112 = vector.broadcast %14 : vector<1x64xf32> to vector<16x64xf32>
    %113 = arith.addf %111, %112 : vector<16x64xf32>
    %c0_19 = arith.constant 0 : index
    %c768 = arith.constant 768 : index
    %114 = vector.load %arg2[%c0_19, %c768] : memref<128x1408xf32, #tpu.memory_space<vmem>>, vector<64x192xf32>
    %c0_20 = arith.constant 0 : index
    %c1024 = arith.constant 1024 : index
    %115 = vector.load %arg2[%c0_20, %c1024] : memref<128x1408xf32, #tpu.memory_space<vmem>>, vector<64x64xf32>
    %c0_21 = arith.constant 0 : index
    %c1152 = arith.constant 1152 : index
    %116 = vector.load %arg2[%c0_21, %c1152] : memref<128x1408xf32, #tpu.memory_space<vmem>>, vector<64x128xf32>
    %c0_22 = arith.constant 0 : index
    %c1280 = arith.constant 1280 : index
    %117 = vector.load %arg2[%c0_22, %c1280] : memref<128x1408xf32, #tpu.memory_space<vmem>>, vector<128x64xf32>
    %118 = vector.extract_strided_slice %2 {offsets = [2, 0], sizes = [1, 192], strides = [1, 1]} : vector<17x192xf32> to vector<1x192xf32>
    %119 = vector.extract_strided_slice %2 {offsets = [4, 0], sizes = [1, 128], strides = [1, 1]} : vector<17x192xf32> to vector<1x128xf32>
    %120 = vector.extract_strided_slice %2 {offsets = [6, 0], sizes = [1, 64], strides = [1, 1]} : vector<17x192xf32> to vector<1x64xf32>
    %cst_23 = arith.constant dense<0.000000e+00> : vector<16x192xf32>
    %121 = tpu.matmul %113, %114, %cst_23 {dimension_numbers = #tpu.dot_dimension_numbers<[1], [0], [0], [1], [0, 0, 1, 1], [], []>, precision = #tpu.contract_precision<fp32>} : vector<16x64xf32>, vector<64x192xf32>, vector<16x192xf32> -> vector<16x192xf32>
    %122 = vector.broadcast %118 : vector<1x192xf32> to vector<16x192xf32>
    %123 = arith.addf %121, %122 : vector<16x192xf32>
    %124 = vector.extract_strided_slice %123 {offsets = [0, 0], sizes = [8, 8], strides = [1, 1]} : vector<16x192xf32> to vector<8x8xf32>
    %125 = vector.extract_strided_slice %123 {offsets = [0, 8], sizes = [8, 8], strides = [1, 1]} : vector<16x192xf32> to vector<8x8xf32>
    %126 = vector.extract_strided_slice %123 {offsets = [0, 16], sizes = [8, 8], strides = [1, 1]} : vector<16x192xf32> to vector<8x8xf32>
    %127 = vector.extract_strided_slice %123 {offsets = [0, 24], sizes = [8, 8], strides = [1, 1]} : vector<16x192xf32> to vector<8x8xf32>
    %128 = vector.extract_strided_slice %123 {offsets = [0, 32], sizes = [8, 8], strides = [1, 1]} : vector<16x192xf32> to vector<8x8xf32>
    %129 = vector.extract_strided_slice %123 {offsets = [0, 40], sizes = [8, 8], strides = [1, 1]} : vector<16x192xf32> to vector<8x8xf32>
    %130 = vector.extract_strided_slice %123 {offsets = [0, 48], sizes = [8, 8], strides = [1, 1]} : vector<16x192xf32> to vector<8x8xf32>
    %131 = vector.extract_strided_slice %123 {offsets = [0, 56], sizes = [8, 8], strides = [1, 1]} : vector<16x192xf32> to vector<8x8xf32>
    %132 = vector.extract_strided_slice %123 {offsets = [8, 0], sizes = [8, 8], strides = [1, 1]} : vector<16x192xf32> to vector<8x8xf32>
    %133 = vector.extract_strided_slice %123 {offsets = [8, 8], sizes = [8, 8], strides = [1, 1]} : vector<16x192xf32> to vector<8x8xf32>
    %134 = vector.extract_strided_slice %123 {offsets = [8, 16], sizes = [8, 8], strides = [1, 1]} : vector<16x192xf32> to vector<8x8xf32>
    %135 = vector.extract_strided_slice %123 {offsets = [8, 24], sizes = [8, 8], strides = [1, 1]} : vector<16x192xf32> to vector<8x8xf32>
    %136 = vector.extract_strided_slice %123 {offsets = [8, 32], sizes = [8, 8], strides = [1, 1]} : vector<16x192xf32> to vector<8x8xf32>
    %137 = vector.extract_strided_slice %123 {offsets = [8, 40], sizes = [8, 8], strides = [1, 1]} : vector<16x192xf32> to vector<8x8xf32>
    %138 = vector.extract_strided_slice %123 {offsets = [8, 48], sizes = [8, 8], strides = [1, 1]} : vector<16x192xf32> to vector<8x8xf32>
    %139 = vector.extract_strided_slice %123 {offsets = [8, 56], sizes = [8, 8], strides = [1, 1]} : vector<16x192xf32> to vector<8x8xf32>
    %140 = tpu.concatenate %124, %125, %126, %127, %128, %129, %130, %131, %132, %133, %134, %135, %136, %137, %138, %139 in 0 : vector<8x8xf32>, vector<8x8xf32>, vector<8x8xf32>, vector<8x8xf32>, vector<8x8xf32>, vector<8x8xf32>, vector<8x8xf32>, vector<8x8xf32>, vector<8x8xf32>, vector<8x8xf32>, vector<8x8xf32>, vector<8x8xf32>, vector<8x8xf32>, vector<8x8xf32>, vector<8x8xf32>, vector<8x8xf32> -> vector<128x8xf32>
    %141 = vector.shape_cast %140 : vector<128x8xf32> to vector<16x8x8xf32>
    %142 = vector.extract_strided_slice %123 {offsets = [0, 64], sizes = [8, 8], strides = [1, 1]} : vector<16x192xf32> to vector<8x8xf32>
    %143 = vector.extract_strided_slice %123 {offsets = [0, 72], sizes = [8, 8], strides = [1, 1]} : vector<16x192xf32> to vector<8x8xf32>
    %144 = vector.extract_strided_slice %123 {offsets = [0, 80], sizes = [8, 8], strides = [1, 1]} : vector<16x192xf32> to vector<8x8xf32>
    %145 = vector.extract_strided_slice %123 {offsets = [0, 88], sizes = [8, 8], strides = [1, 1]} : vector<16x192xf32> to vector<8x8xf32>
    %146 = vector.extract_strided_slice %123 {offsets = [0, 96], sizes = [8, 8], strides = [1, 1]} : vector<16x192xf32> to vector<8x8xf32>
    %147 = vector.extract_strided_slice %123 {offsets = [0, 104], sizes = [8, 8], strides = [1, 1]} : vector<16x192xf32> to vector<8x8xf32>
    %148 = vector.extract_strided_slice %123 {offsets = [0, 112], sizes = [8, 8], strides = [1, 1]} : vector<16x192xf32> to vector<8x8xf32>
    %149 = vector.extract_strided_slice %123 {offsets = [0, 120], sizes = [8, 8], strides = [1, 1]} : vector<16x192xf32> to vector<8x8xf32>
    %150 = vector.extract_strided_slice %123 {offsets = [8, 64], sizes = [8, 8], strides = [1, 1]} : vector<16x192xf32> to vector<8x8xf32>
    %151 = vector.extract_strided_slice %123 {offsets = [8, 72], sizes = [8, 8], strides = [1, 1]} : vector<16x192xf32> to vector<8x8xf32>
    %152 = vector.extract_strided_slice %123 {offsets = [8, 80], sizes = [8, 8], strides = [1, 1]} : vector<16x192xf32> to vector<8x8xf32>
    %153 = vector.extract_strided_slice %123 {offsets = [8, 88], sizes = [8, 8], strides = [1, 1]} : vector<16x192xf32> to vector<8x8xf32>
    %154 = vector.extract_strided_slice %123 {offsets = [8, 96], sizes = [8, 8], strides = [1, 1]} : vector<16x192xf32> to vector<8x8xf32>
    %155 = vector.extract_strided_slice %123 {offsets = [8, 104], sizes = [8, 8], strides = [1, 1]} : vector<16x192xf32> to vector<8x8xf32>
    %156 = vector.extract_strided_slice %123 {offsets = [8, 112], sizes = [8, 8], strides = [1, 1]} : vector<16x192xf32> to vector<8x8xf32>
    %157 = vector.extract_strided_slice %123 {offsets = [8, 120], sizes = [8, 8], strides = [1, 1]} : vector<16x192xf32> to vector<8x8xf32>
    %158 = tpu.concatenate %142, %143, %144, %145, %146, %147, %148, %149, %150, %151, %152, %153, %154, %155, %156, %157 in 0 : vector<8x8xf32>, vector<8x8xf32>, vector<8x8xf32>, vector<8x8xf32>, vector<8x8xf32>, vector<8x8xf32>, vector<8x8xf32>, vector<8x8xf32>, vector<8x8xf32>, vector<8x8xf32>, vector<8x8xf32>, vector<8x8xf32>, vector<8x8xf32>, vector<8x8xf32>, vector<8x8xf32>, vector<8x8xf32> -> vector<128x8xf32>
    %159 = vector.shape_cast %158 : vector<128x8xf32> to vector<16x8x8xf32>
    %160 = vector.extract_strided_slice %123 {offsets = [0, 128], sizes = [8, 8], strides = [1, 1]} : vector<16x192xf32> to vector<8x8xf32>
    %161 = vector.extract_strided_slice %123 {offsets = [0, 136], sizes = [8, 8], strides = [1, 1]} : vector<16x192xf32> to vector<8x8xf32>
    %162 = vector.extract_strided_slice %123 {offsets = [0, 144], sizes = [8, 8], strides = [1, 1]} : vector<16x192xf32> to vector<8x8xf32>
    %163 = vector.extract_strided_slice %123 {offsets = [0, 152], sizes = [8, 8], strides = [1, 1]} : vector<16x192xf32> to vector<8x8xf32>
    %164 = vector.extract_strided_slice %123 {offsets = [0, 160], sizes = [8, 8], strides = [1, 1]} : vector<16x192xf32> to vector<8x8xf32>
    %165 = vector.extract_strided_slice %123 {offsets = [0, 168], sizes = [8, 8], strides = [1, 1]} : vector<16x192xf32> to vector<8x8xf32>
    %166 = vector.extract_strided_slice %123 {offsets = [0, 176], sizes = [8, 8], strides = [1, 1]} : vector<16x192xf32> to vector<8x8xf32>
    %167 = vector.extract_strided_slice %123 {offsets = [0, 184], sizes = [8, 8], strides = [1, 1]} : vector<16x192xf32> to vector<8x8xf32>
    %168 = vector.extract_strided_slice %123 {offsets = [8, 128], sizes = [8, 8], strides = [1, 1]} : vector<16x192xf32> to vector<8x8xf32>
    %169 = vector.extract_strided_slice %123 {offsets = [8, 136], sizes = [8, 8], strides = [1, 1]} : vector<16x192xf32> to vector<8x8xf32>
    %170 = vector.extract_strided_slice %123 {offsets = [8, 144], sizes = [8, 8], strides = [1, 1]} : vector<16x192xf32> to vector<8x8xf32>
    %171 = vector.extract_strided_slice %123 {offsets = [8, 152], sizes = [8, 8], strides = [1, 1]} : vector<16x192xf32> to vector<8x8xf32>
    %172 = vector.extract_strided_slice %123 {offsets = [8, 160], sizes = [8, 8], strides = [1, 1]} : vector<16x192xf32> to vector<8x8xf32>
    %173 = vector.extract_strided_slice %123 {offsets = [8, 168], sizes = [8, 8], strides = [1, 1]} : vector<16x192xf32> to vector<8x8xf32>
    %174 = vector.extract_strided_slice %123 {offsets = [8, 176], sizes = [8, 8], strides = [1, 1]} : vector<16x192xf32> to vector<8x8xf32>
    %175 = vector.extract_strided_slice %123 {offsets = [8, 184], sizes = [8, 8], strides = [1, 1]} : vector<16x192xf32> to vector<8x8xf32>
    %176 = tpu.concatenate %160, %161, %162, %163, %164, %165, %166, %167, %168, %169, %170, %171, %172, %173, %174, %175 in 0 : vector<8x8xf32>, vector<8x8xf32>, vector<8x8xf32>, vector<8x8xf32>, vector<8x8xf32>, vector<8x8xf32>, vector<8x8xf32>, vector<8x8xf32>, vector<8x8xf32>, vector<8x8xf32>, vector<8x8xf32>, vector<8x8xf32>, vector<8x8xf32>, vector<8x8xf32>, vector<8x8xf32>, vector<8x8xf32> -> vector<128x8xf32>
    %177 = vector.shape_cast %176 : vector<128x8xf32> to vector<16x8x8xf32>
    "tpu.trace_start"() <{level = 10 : i32, message = "hqd,hkd->hqk"}> : () -> ()
    %cst_24 = arith.constant dense<0.000000e+00> : vector<16x8x8xf32>
    %178 = tpu.matmul %141, %159, %cst_24 {dimension_numbers = #tpu.dot_dimension_numbers<[2], [2], [1], [1], [0, 0, 0, 1, 1, 1], [0], [0]>, precision = #tpu.contract_precision<fp32>} : vector<16x8x8xf32>, vector<16x8x8xf32>, vector<16x8x8xf32> -> vector<16x8x8xf32>
    "tpu.trace_stop"() : () -> ()
    %cst_25 = arith.constant dense<0xFF800000> : vector<16x8xf32>
    %179 = vector.multi_reduction <maximumf>, %178, %cst_25 [2] : vector<16x8x8xf32> to vector<16x8xf32>
    %180 = vector.shape_cast %179 : vector<16x8xf32> to vector<16x8x1xf32>
    %181 = vector.broadcast %180 : vector<16x8x1xf32> to vector<16x8x8xf32>
    %182 = arith.subf %178, %181 : vector<16x8x8xf32>
    %183 = math.exp %182 : vector<16x8x8xf32>
    %cst_26 = arith.constant dense<0.000000e+00> : vector<16x8xf32>
    %184 = vector.multi_reduction <add>, %183, %cst_26 [2] : vector<16x8x8xf32> to vector<16x8xf32>
    %185 = vector.shape_cast %184 : vector<16x8xf32> to vector<16x8x1xf32>
    %186 = vector.broadcast %185 : vector<16x8x1xf32> to vector<16x8x8xf32>
    %187 = arith.divf %183, %186 : vector<16x8x8xf32>
    "tpu.trace_start"() <{level = 10 : i32, message = "hqk,hkd->hqd"}> : () -> ()
    %cst_27 = arith.constant dense<0.000000e+00> : vector<16x8x8xf32>
    %188 = tpu.matmul %187, %177, %cst_27 {dimension_numbers = #tpu.dot_dimension_numbers<[2], [1], [1], [2], [0, 0, 0, 1, 1, 2], [0], [0]>, precision = #tpu.contract_precision<fp32>} : vector<16x8x8xf32>, vector<16x8x8xf32>, vector<16x8x8xf32> -> vector<16x8x8xf32>
    "tpu.trace_stop"() : () -> ()
    %189 = vector.shape_cast %188 : vector<16x8x8xf32> to vector<128x8xf32>
    %190 = vector.extract_strided_slice %189 {offsets = [0, 0], sizes = [8, 8], strides = [1, 1]} : vector<128x8xf32> to vector<8x8xf32>
    %191 = vector.extract_strided_slice %189 {offsets = [8, 0], sizes = [8, 8], strides = [1, 1]} : vector<128x8xf32> to vector<8x8xf32>
    %192 = vector.extract_strided_slice %189 {offsets = [16, 0], sizes = [8, 8], strides = [1, 1]} : vector<128x8xf32> to vector<8x8xf32>
    %193 = vector.extract_strided_slice %189 {offsets = [24, 0], sizes = [8, 8], strides = [1, 1]} : vector<128x8xf32> to vector<8x8xf32>
    %194 = vector.extract_strided_slice %189 {offsets = [32, 0], sizes = [8, 8], strides = [1, 1]} : vector<128x8xf32> to vector<8x8xf32>
    %195 = vector.extract_strided_slice %189 {offsets = [40, 0], sizes = [8, 8], strides = [1, 1]} : vector<128x8xf32> to vector<8x8xf32>
    %196 = vector.extract_strided_slice %189 {offsets = [48, 0], sizes = [8, 8], strides = [1, 1]} : vector<128x8xf32> to vector<8x8xf32>
    %197 = vector.extract_strided_slice %189 {offsets = [56, 0], sizes = [8, 8], strides = [1, 1]} : vector<128x8xf32> to vector<8x8xf32>
    %198 = tpu.concatenate %190, %191, %192, %193, %194, %195, %196, %197 in 1 : vector<8x8xf32>, vector<8x8xf32>, vector<8x8xf32>, vector<8x8xf32>, vector<8x8xf32>, vector<8x8xf32>, vector<8x8xf32>, vector<8x8xf32> -> vector<8x64xf32>
    %199 = vector.extract_strided_slice %189 {offsets = [64, 0], sizes = [8, 8], strides = [1, 1]} : vector<128x8xf32> to vector<8x8xf32>
    %200 = vector.extract_strided_slice %189 {offsets = [72, 0], sizes = [8, 8], strides = [1, 1]} : vector<128x8xf32> to vector<8x8xf32>
    %201 = vector.extract_strided_slice %189 {offsets = [80, 0], sizes = [8, 8], strides = [1, 1]} : vector<128x8xf32> to vector<8x8xf32>
    %202 = vector.extract_strided_slice %189 {offsets = [88, 0], sizes = [8, 8], strides = [1, 1]} : vector<128x8xf32> to vector<8x8xf32>
    %203 = vector.extract_strided_slice %189 {offsets = [96, 0], sizes = [8, 8], strides = [1, 1]} : vector<128x8xf32> to vector<8x8xf32>
    %204 = vector.extract_strided_slice %189 {offsets = [104, 0], sizes = [8, 8], strides = [1, 1]} : vector<128x8xf32> to vector<8x8xf32>
    %205 = vector.extract_strided_slice %189 {offsets = [112, 0], sizes = [8, 8], strides = [1, 1]} : vector<128x8xf32> to vector<8x8xf32>
    %206 = vector.extract_strided_slice %189 {offsets = [120, 0], sizes = [8, 8], strides = [1, 1]} : vector<128x8xf32> to vector<8x8xf32>
    %207 = tpu.concatenate %199, %200, %201, %202, %203, %204, %205, %206 in 1 : vector<8x8xf32>, vector<8x8xf32>, vector<8x8xf32>, vector<8x8xf32>, vector<8x8xf32>, vector<8x8xf32>, vector<8x8xf32>, vector<8x8xf32> -> vector<8x64xf32>
    %208 = tpu.concatenate %198, %207 in 0 : vector<8x64xf32>, vector<8x64xf32> -> vector<16x64xf32>
    %cst_28 = arith.constant dense<0.000000e+00> : vector<16x64xf32>
    %209 = tpu.matmul %208, %115, %cst_28 {dimension_numbers = #tpu.dot_dimension_numbers<[1], [0], [0], [1], [0, 0, 1, 1], [], []>, precision = #tpu.contract_precision<fp32>} : vector<16x64xf32>, vector<64x64xf32>, vector<16x64xf32> -> vector<16x64xf32>
    %210 = arith.addf %113, %209 : vector<16x64xf32>
    %cst_29 = arith.constant dense<0.000000e+00> : vector<16x128xf32>
    %211 = tpu.matmul %210, %116, %cst_29 {dimension_numbers = #tpu.dot_dimension_numbers<[1], [0], [0], [1], [0, 0, 1, 1], [], []>, precision = #tpu.contract_precision<fp32>} : vector<16x64xf32>, vector<64x128xf32>, vector<16x128xf32> -> vector<16x128xf32>
    %212 = vector.broadcast %119 : vector<1x128xf32> to vector<16x128xf32>
    %213 = arith.addf %211, %212 : vector<16x128xf32>
    %cst_30 = arith.constant 0.000000e+00 : f32
    %214 = vector.broadcast %cst_30 : f32 to vector<16x128xf32>
    %215 = arith.maximumf %213, %214 : vector<16x128xf32>
    %cst_31 = arith.constant dense<0.000000e+00> : vector<16x64xf32>
    %216 = tpu.matmul %215, %117, %cst_31 {dimension_numbers = #tpu.dot_dimension_numbers<[1], [0], [0], [1], [0, 0, 1, 1], [], []>, precision = #tpu.contract_precision<fp32>} : vector<16x128xf32>, vector<128x64xf32>, vector<16x64xf32> -> vector<16x64xf32>
    %217 = arith.addf %210, %216 : vector<16x64xf32>
    %218 = vector.broadcast %120 : vector<1x64xf32> to vector<16x64xf32>
    %219 = arith.addf %217, %218 : vector<16x64xf32>
    %220 = vector.shape_cast %219 : vector<16x64xf32> to vector<2x8x64xf32>
    %221 = vector.extract_strided_slice %2 {offsets = [8, 0], sizes = [8, 1], strides = [1, 1]} : vector<17x192xf32> to vector<8x1xf32>
    %222 = vector.shape_cast %221 : vector<8x1xf32> to vector<1x8x1xf32>
    %223 = vector.broadcast %222 : vector<1x8x1xf32> to vector<2x8x64xf32>
    %224 = arith.mulf %220, %223 : vector<2x8x64xf32>
    %cst_32 = arith.constant dense<0.000000e+00> : vector<2x64xf32>
    %225 = vector.multi_reduction <add>, %224, %cst_32 [1] : vector<2x8x64xf32> to vector<2x64xf32>
    %226 = vector.extract_strided_slice %2 {offsets = [7, 0], sizes = [1, 64], strides = [1, 1]} : vector<17x192xf32> to vector<1x64xf32>
    %cst_33 = arith.constant dense<0.000000e+00> : vector<1x2xf32>
    %227 = tpu.matmul %226, %225, %cst_33 {dimension_numbers = #tpu.dot_dimension_numbers<[1], [1], [0], [0], [0, 0, 1, 0], [], []>, precision = #tpu.contract_precision<fp32>} : vector<1x64xf32>, vector<2x64xf32>, vector<1x2xf32> -> vector<1x2xf32>
    %228 = vector.extract_strided_slice %2 {offsets = [16, 0], sizes = [1, 1], strides = [1, 1]} : vector<17x192xf32> to vector<1x1xf32>
    %229 = vector.broadcast %228 : vector<1x1xf32> to vector<1x2xf32>
    %230 = arith.addf %227, %229 : vector<1x2xf32>
    %231 = vector.shape_cast %230 : vector<1x2xf32> to vector<1x1x2xf32>
    %c0_34 = arith.constant 0 : index
    %c0_35 = arith.constant 0 : index
    %c0_36 = arith.constant 0 : index
    %232 = vector.load %arg4[%c0_34, %c0_35, %c0_36] : memref<1x1x2xf32, #tpu.memory_space<vmem>>, vector<1x1x2xf32>
    tpu.vector_store %arg4[%c0_34, %c0_35, %c0_36], %231 {strides = array<i32>} : memref<1x1x2xf32, #tpu.memory_space<vmem>>, vector<1x1x2xf32>,
    return
  }
  func.func @transform_0(%arg0: i32) -> (i32, i32, i32) {
    %c0_i32 = arith.constant 0 : i32
    %c0_i32_0 = arith.constant 0 : i32
    %c0_i32_1 = arith.constant 0 : i32
    return %arg0, %c0_i32, %c0_i32_0 : i32, i32, i32
  }
  func.func @transform_1(%arg0: i32) -> (i32, i32) {
    %c0_i32 = arith.constant 0 : i32
    %c0_i32_0 = arith.constant 0 : i32
    %c0_i32_1 = arith.constant 0 : i32
    return %c0_i32, %c0_i32_0 : i32, i32
  }
  func.func @transform_2(%arg0: i32) -> (i32, i32) {
    %c0_i32 = arith.constant 0 : i32
    %c0_i32_0 = arith.constant 0 : i32
    %c0_i32_1 = arith.constant 0 : i32
    return %c0_i32, %c0_i32_0 : i32, i32
  }
  func.func @transform_3(%arg0: i32) -> (i32, i32, i32) {
    %c0_i32 = arith.constant 0 : i32
    %c0_i32_0 = arith.constant 0 : i32
    %c0_i32_1 = arith.constant 0 : i32
    return %arg0, %c0_i32, %c0_i32_0 : i32, i32, i32
  }
}

</mosaic_0001>

<bundles_post_ra>
// kernel: transformer_forward.1
= control target key start
LH: loop header
LB: loop body
LE: loop exit
PB: predicated region body
PF: predicated region fallthrough
CT: control target
= control target key end

     0   :  { %8 = vsyncpa [#allocation3], 0  ;;  %s46146_s0 = inlined_call_operand.hbm [shape: f32[2,8,16], index: 0, kind: input, shape index: {}]   ;;  %s46147_s1 = inlined_call_operand.hbm [shape: f32[128,1408], index: 1, kind: input, shape index: {}]   ;;  %s46148_s2 = inlined_call_operand.hbm [shape: f32[17,192], index: 2, kind: input, shape index: {}]   ;;  %s46149_s3 = inlined_call_operand.hbm [shape: f32[1,1,2], index: 3, kind: output, shape index: {}]  }
   0x1   :  { %9 = vsyncpa [#allocation6], 0 }
   0x2   :  { %10 = vsyncpa [#allocation4], 0  ;;  %s41954_s12 = smov [#allocation5]   ;;  %s41860_s16 = scalar_lea.hbm %s46147_s1, 22528 }
   0x3   :  { %s28_s13 = sshll.u32 %s41954_s12, 4  ;;  %p41861_p0 = scmp.ne.s32.totalorder %s46147_s1, %s41860_s16  ;;  %s29_s13 = int_to_ptr.vmem [resolvable:$true] %s28_s13 }
   0x4   :  { %p41864_p1 = scmp.lt.u32.totalorder %s41860_s16, %s46147_s1 }
   0x6   :  { %p41866_p2 = pnand %p41864_p1, %p41861_p0 }
   0x8   :  { %41869 = shalt.err (!%p41866_p2)
}
   0x9   :  { %s41870_s21 = scalar_lea.vmem %s29_s13, 22528  ;;  %p41875_p4 = scmp.lt.s32.totalorder %s29_s13, %s29_s13 }
   0xa   :  { %p41871_p3 = scmp.ne.s32.totalorder %s29_s13, %s41870_s21  ;;  %p41876_p5 = scmp.lt.s32.totalorder %s41870_s21, %s41870_s21 }
   0xc   :  { %p41877_p6 = por %p41876_p5, %p41875_p4 }
   0xe   :  { %p41878_p7 = pnand %p41877_p6, %p41871_p3 }
  0x10   :  { %41881 = shalt.err (!%p41878_p7)
}
  0x11   :  { %s41955_s22 = smov 1408   ;;  %s41956_s23 = smov 88  }
  0x12   :  { %34 = dma.hbm_to_vmem [thread:$0]  %s46147_s1, 22528, %s29_s13, [#allocation6], %s41955_s22, %s41955_s22, %s41956_s23  }
  0x13   :  { %s41957_s26 = smov [#allocation2]   ;;  %s41882_s30 = scalar_lea.hbm %s46146_s0, 256 }
  0x14   :  { %s16_s27 = sshll.u32 %s41957_s26, 4  ;;  %p41883_p8 = scmp.ne.s32.totalorder %s46146_s0, %s41882_s30  ;;  %s17_s27 = int_to_ptr.vmem [resolvable:$true] %s16_s27 }
  0x15   :  { %p41886_p9 = scmp.lt.u32.totalorder %s41882_s30, %s46146_s0 }
  0x17   :  { %p41888_p10 = pnand %p41886_p9, %p41883_p8 }
  0x19   :  { %41891 = shalt.err (!%p41888_p10)
}
  0x1a   :  { %s41892_s8 = scalar_lea.vmem %s17_s27, 256  ;;  %p41897_p12 = scmp.lt.s32.totalorder %s17_s27, %s17_s27 }
  0x1b   :  { %p41893_p11 = scmp.ne.s32.totalorder %s17_s27, %s41892_s8  ;;  %p41898_p13 = scmp.lt.s32.totalorder %s41892_s8, %s41892_s8 }
  0x1d   :  { %p41899_p0 = por %p41898_p13, %p41897_p12 }
  0x1f   :  { %p41900_p1 = pnand %p41899_p0, %p41893_p11 }
  0x21   :  { %41903 = shalt.err (!%p41900_p1)
}
  0x22   :  { %s41958_s1 = smov 128   ;;  %s41959_s9 = smov 8  }
  0x23   :  { %22 = dma.hbm_to_vmem [thread:$0]  %s46146_s0, 256, %s17_s27, [#allocation3], %s41958_s1, %s41958_s1, %s41959_s9  }
  0x24   :  { %s41960_s12 = smov [#allocation7]   ;;  %s41904_s16 = scalar_lea.hbm %s46148_s2, 768 }
  0x25   :  { %s40_s13 = sshll.u32 %s41960_s12, 4  ;;  %p41905_p2 = scmp.ne.s32.totalorder %s46148_s2, %s41904_s16  ;;  %s41_s13 = int_to_ptr.vmem [resolvable:$true] %s40_s13 }
  0x26   :  { %p41908_p3 = scmp.lt.u32.totalorder %s41904_s16, %s46148_s2 }
  0x28   :  { %p41910_p4 = pnand %p41908_p3, %p41905_p2 }
  0x2a   :  { %41913 = shalt.err (!%p41910_p4)
}
  0x2b   :  { %s41914_s21 = scalar_lea.vmem %s41_s13, 768  ;;  %p41919_p6 = scmp.lt.s32.totalorder %s41_s13, %s41_s13 }
  0x2c   :  { %p41915_p5 = scmp.ne.s32.totalorder %s41_s13, %s41914_s21  ;;  %p41920_p7 = scmp.lt.s32.totalorder %s41914_s21, %s41914_s21 }
  0x2e   :  { %p41921_p8 = por %p41920_p7, %p41919_p6 }
  0x30   :  { %p41922_p9 = pnand %p41921_p8, %p41915_p5 }
  0x32   :  { %41925 = shalt.err (!%p41922_p9)
}
  0x33   :  { %s41961_s0 = smov 256   ;;  %s41962_s22 = smov 16  }
  0x34   :  { %46 = dma.hbm_to_vmem [thread:$0]  %s46148_s2, 768, %s41_s13, [#allocation6], %s41961_s0, %s41961_s0, %s41962_s22  }
  0x35   :  { %41948 = dma.done.wait [#allocation3], 256  }
  0x36   :  { %41949 = vsyncadd [#allocation3], 4294967040 }
  0x37   :  { %41950 = dma.done.wait [#allocation6], 23296  }
  0x38   :  { %41951 = vsyncadd [#allocation6], 4294944000  ;;  %vm68_vm0 = vcmask 130048   ;;  %v62_v0 = vld [vmem:[#allocation5] sm:$0xff]  ;;  %v63_v1 = vld [vmem:[#allocation5 + $0x58] sm:$0xff]  ;;  %vm633_vm1 = vcmask 523264  }
  0x39   :  { %v56_v2 = vld [vmem:[#allocation2] sm:$0xff]  ;;  %v76_v3 = vand.u32 4294901760, %v62_v0  ;;  %v79_v4 = vand.u32 4294901760, %v63_v1  ;;  %v57_v6 = vld [vmem:[#allocation2 + $0x8] sm:$0xff]  ;;  %v580_v8 = vld [vmem:[#allocation5 + $0x68] sm:$0xff]  ;;  %vm41964_vm2 = vmmov 0  }
  0x3a   :  { %v70_v5 = vsel %vm68_vm0, %v56_v2, 0  ;;  %v578_v7 = vld [vmem:[#allocation5 + $0x10] sm:$0xff]  ;;  %v73_v10 = vsel %vm68_vm0, %v57_v6, 0  ;;  %v644_v12 = vand.u32 4294901760, %v580_v8  ;;  %v577_v17 = vld [vmem:[#allocation5 + $0x8] sm:$0xff]  ;;  %v579_v18 = vld [vmem:[#allocation5 + $0x60] sm:$0xff] }
  0x3b   :  { %v142_v9 = vand.u32 4294901760, %v70_v5  ;;  %v640_v11 = vand.u32 4294901760, %v578_v7  ;;  %v39944_v13 = vpack.c.bf16 %v79_v4, %v76_v3  ;;  %v152_v14 = vand.u32 4294901760, %v73_v10  ;;  %v582_v44 = vld [vmem:[#allocation5 + $0xc0] sm:$0xff]  ;;  %v584_v45 = vld [vmem:[#allocation5 + $0x118] sm:$0xff]  ;;  %v583_v49 = vld [vmem:[#allocation5 + $0x110] sm:$0xff] }
  0x3c   :  { %v164_v15 = vsub.f32 %v62_v0, %v76_v3  ;;  %v171_v16 = vsub.f32 %v63_v1, %v79_v4  ;;  %v42044_v22 = vsub.f32 %v580_v8, %v644_v12  ;;  %v642_v27 = vand.u32 4294901760, %v577_v17  ;;  %v581_v48 = vld [vmem:[#allocation5 + $0xb8] sm:$0xff]  ;;  %v586_v54 = vld [vmem:[#allocation5 + $0x170] sm:$0xff]  ;;  %v588_v55 = vld [vmem:[#allocation5 + $0x1c8] sm:$0xff]  ;;  %s41965_s2 = smov 112   ;;  %s41966_s26 = smov 120  }
  0x3d   :  { %v143_v19 = vsub.f32 %v70_v5, %v142_v9  ;;  %v42040_v20 = vpack.c.bf16 %v644_v12, %v640_v11  ;;  %v42042_v21 = vsub.f32 %v578_v7, %v640_v11  ;;  %39945 = vmatprep.subr.bf16.mxu0 %v39944_v13  ;;  %v153_v23 = vsub.f32 %v73_v10, %v152_v14  ;;  %v585_v58 = vld [vmem:[#allocation5 + $0x168] sm:$0xff]  ;;  %v587_v59 = vld [vmem:[#allocation5 + $0x1c0] sm:$0xff]  ;;  %v592_v1 = vld [vmem:[#allocation5 + $0x278] sm:$0xff]  ;;  %s41967_s27 = smov 64   ;;  %s41968_s28 = smov 104  }
  0x3e   :  { %v165_v24 = vand.u32 4294901760, %v164_v15  ;;  %v172_v25 = vand.u32 4294901760, %v171_v16  ;;  %39947 = vmatpush3.bf16.msra.mxu0 %v39944_v13  ;;  %v646_v28 = vand.u32 4294901760, %v579_v18  ;;  %v42049_v34 = vsub.f32 %v577_v17, %v642_v27  ;;  %v590_v0 = vld [vmem:[#allocation5 + $0x220] sm:$0xff]  ;;  %v589_v4 = vld [vmem:[#allocation5 + $0x218] sm:$0xff]  ;;  %v591_v11 = vld [vmem:[#allocation5 + $0x270] sm:$0xff] }
  0x3f   :  { %v144_v26 = vand.u32 4294901760, %v143_v19  ;;  %39969 = vmatprep.subr.bf16.mxu1 %v42040_v20  ;;  %v154_v29 = vand.u32 4294901760, %v153_v23  ;;  %v39952_v42 = vpack.c.bf16 %v171_v16, %v164_v15  ;;  %v648_v46 = vand.u32 4294901760, %v582_v44  ;;  %s41969_s29 = smov 96   ;;  %s41970_s30 = smov 80  }
  0x40   :  { %v166_v30 = vsub.f32 %v164_v15, %v165_v24  ;;  %v173_v31 = vsub.f32 %v171_v16, %v172_v25  ;;  %v42047_v33 = vpack.c.bf16 %v646_v28, %v642_v27  ;;  %v42051_v35 = vsub.f32 %v579_v18, %v646_v28  ;;  %s41971_s4 = smov 72   ;;  %s41972_s5 = smov 24  }
  0x41   :  { %v145_v32 = vsub.f32 %v143_v19, %v144_v26  ;;  %v155_v36 = vsub.f32 %v153_v23, %v154_v29  ;;  %v39960_v43 = vpack.c.bf16 %v172_v25, %v165_v24  ;;  %v652_v47 = vand.u32 4294901760, %v584_v45  ;;  %s41973_s6 = smov 32   ;;  %s41974_s7 = smov 40  }
  0x42   :  { %v167_v37 = vand.u32 4294901760, %v166_v30  ;;  %v174_v38 = vand.u32 4294901760, %v173_v31  ;;  %39971 = vmatpush1.bf16.msra.mxu1 %v42047_v33  ;;  %v650_v50 = vand.u32 4294901760, %v581_v48  ;;  %v654_v51 = vand.u32 4294901760, %v583_v49  ;;  %s41975_s8 = smov 48   ;;  %s41976_s1 = smov 56  }
  0x43   :  { %v146_v39 = vand.u32 4294901760, %v145_v32  ;;  %v156_v40 = vand.u32 4294901760, %v155_v36  ;;  %v42054_v52 = vpack.c.bf16 %v652_v47, %v648_v46  ;;  %v656_v56 = vand.u32 4294901760, %v586_v54 }
  0x44   :  { %v39948_v41 = vpack.c.bf16 %v174_v38, %v167_v37  ;;  %v42056_v53 = vpack.c.bf16 %v654_v51, %v650_v50  ;;  %v660_v57 = vand.u32 4294901760, %v588_v55  ;;  %v658_v60 = vand.u32 4294901760, %v585_v58 }
  0x45   :  { %37080 = vmatprep.mubr.f32.mxu0 %v146_v39  ;;  %39973 = vmatprep.subr.bf16.mxu1 %v42054_v52  ;;  %v662_v61 = vand.u32 4294901760, %v587_v59  ;;  %v664_v2 = vand.u32 4294901760, %v590_v0  ;;  %v668_v3 = vand.u32 4294901760, %v592_v1  ;;  %v745_v5 = vand.u32 4294901760, %v42042_v21 }
  0x46   :  { %37081 = vmatmul.mubr.f32.vlgmr.msra.gmra.mrb[0].mxu0 %v156_v40  ;;  %39949 = vmatprep.subr.bf16.mxu0 %v39948_v41  ;;  %v42060_v62 = vpack.c.bf16 %v660_v57, %v656_v56  ;;  %v757_v6 = vand.u32 4294901760, %v42044_v22  ;;  %v42067_v7 = vsub.f32 %v582_v44, %v648_v46  ;;  %v42069_v8 = vsub.f32 %v584_v45, %v652_v47 }
  0x47   :  { %39951 = vmatpush3.bf16.msra.mxu0 %v39948_v41  ;;  %37087 = vmatprep.mubr.f32.mxu0 %v142_v9  ;;  %v42062_v63 = vpack.c.bf16 %v662_v61, %v658_v60  ;;  %v42073_v10 = vsub.f32 %v583_v49, %v654_v51  ;;  %v42076_v12 = vsub.f32 %v586_v54, %v656_v56  ;;  %v46150_v27 = vmov 0.0  }
  0x48   :  { %39953 = vmatprep.subr.bf16.mxu0 %v39952_v42  ;;  %39975 = vmatpush1.bf16.msra.mxu1 %v42056_v53  ;;  %v42082_v15 = vsub.f32 %v587_v59, %v662_v61  ;;  %v42084_v16 = vpack.c.bf16 %v668_v3, %v664_v2  ;;  %v42086_v17 = vsub.f32 %v590_v0, %v664_v2  ;;  %v751_v28 = vand.u32 4294901760, %v42049_v34 }
  0x49   :  { %39977 = vmatprep.subr.bf16.mxu1 %v42060_v62  ;;  %v42088_v18 = vsub.f32 %v592_v1, %v668_v3  ;;  %v746_v24 = vsub.f32 %v42042_v21, %v745_v5  ;;  %v758_v25 = vsub.f32 %v42044_v22, %v757_v6  ;;  %720 = vmatprep.mubr.f32.mxu1 %v46150_v27  ;;  %v769_v30 = vand.u32 4294901760, %v42067_v7 }
  0x4a   :  { %v752_v38 = vsub.f32 %v42049_v34, %v751_v28  ;;  %v781_v41 = vand.u32 4294901760, %v42069_v8  ;;  %v787_v44 = vand.u32 4294901760, %v42073_v10  ;;  %v793_v51 = vand.u32 4294901760, %v42076_v12 }
  0x4b   :  { %v747_v36 = vand.u32 4294901760, %v746_v24  ;;  %v759_v37 = vand.u32 4294901760, %v758_v25  ;;  %v770_v40 = vsub.f32 %v42067_v7, %v769_v30  ;;  %v829_v24 = vand.u32 4294901760, %v42088_v18 }
  0x4c   :  { %39979 = vmatpush1.bf16.msra.mxu1 %v42062_v63  ;;  %v753_v45 = vand.u32 4294901760, %v752_v38  ;;  %v794_v61 = vsub.f32 %v42076_v12, %v793_v51  ;;  %vm1412_vm3 = vcmask 64512   ;;  %vm16033_vm4 = vcmask 195584  }
  0x4d   :  { %39981 = vmatprep.subr.bf16.mxu1 %v42084_v16  ;;  %v771_v47 = vand.u32 4294901760, %v770_v40  ;;  %v830_v40 = vsub.f32 %v42088_v18, %v829_v24  ;;  %vm16035_vm5 = vcmask 261120   ;;  %vm16037_vm6 = vcmask 326656  }
  0x4e   :  { %37088 = vmatmul.mubr.f32.vlgmr.msra.gmra.mrb[0].mxu0 %v152_v14  ;;  %vm16039_vm7 = vcmask 392192   ;;  %vm16041_vm8 = vcmask 457728   ;;  %vm35346_vm9 = vcmask 1041409   ;;  %vm35798_vm10 = vcmask 8192  }
  0x4f   :  { %39955 = vmatpush3.bf16.msra.mxu0 %v39952_v42  ;;  %37094 = vmatprep.mubr.f32.mxu0 %v143_v19  ;;  %v666_v19 = vand.u32 4294901760, %v589_v4  ;;  %v39984_v42 = vpack.c.bf16 %v759_v37, %v747_v36 }
  0x50   :  { %39957 = vmatprep.subr.bf16.mxu0 %v39944_v13 }
  0x56   :  { %37095 = vmatmul.mubr.f32.vlgmr.msra.gmra.mrb[0].mxu0 %v153_v23  ;;  %v670_v23 = vand.u32 4294901760, %v591_v11 }
  0x57   :  { %39959 = vmatpush3.bf16.msra.mxu0 %v39944_v13  ;;  %37101 = vmatprep.mubr.f32.mxu0 %v144_v26  ;;  %v42097_v26 = vsub.f32 %v589_v4, %v666_v19  ;;  %v817_v4 = vand.u32 4294901760, %v42086_v17 }
  0x58   :  { %39961 = vmatprep.subr.bf16.mxu0 %v39960_v43  ;;  %v42103_v31 = vpack.c.bf16 %v670_v23, %v666_v19  ;;  %v42105_v32 = vsub.f32 %v591_v11, %v670_v23  ;;  %v795_v19 = vand.u32 4294901760, %v794_v61  ;;  %v40000_v61 = vpack.c.bf16 %v42044_v22, %v42042_v21 }
  0x59   :  { %v818_v37 = vsub.f32 %v42086_v17, %v817_v4  ;;  %v823_v38 = vand.u32 4294901760, %v42097_v26  ;;  %v42182_v21 = vpack.c.bf16 %v829_v24, %v817_v4 }
  0x5a   :  { %39983 = vmatpush1.bf16.msra.mxu1 %v42103_v31 }
  0x5b   :  { %39985 = vmatprep.subr.bf16.mxu1 %v39984_v42  ;;  %v835_v42 = vand.u32 4294901760, %v42105_v32 }
  0x5d   :  { %v42184_v22 = vpack.c.bf16 %v835_v42, %v823_v38 }
  0x5e   :  { %37102 = vmatmul.mubr.f32.vlgmr.msra.gmra.mrb[0].mxu0 %v154_v29  ;;  %v763_v29 = vand.u32 4294901760, %v42051_v35 }
  0x5f   :  { %39963 = vmatpush3.bf16.msra.mxu0 %v39960_v43  ;;  %37108 = vmatprep.mubr.f32.mxu0 %v142_v9 }
  0x60   :  { %39965 = vmatprep.subr.bf16.mxu0 %v39944_v13  ;;  %v764_v39 = vsub.f32 %v42051_v35, %v763_v29 }
  0x62   :  { %v765_v46 = vand.u32 4294901760, %v764_v39 }
  0x66   :  { %37109 = vmatmul.mubr.f32.vlgmr.msra.gmra.mrb[0].mxu0 %v152_v14 }
  0x67   :  { %39967 = vmatpush3.bf16.msra.mxu0 %v39944_v13  ;;  %37115 = vmatprep.mubr.f32.mxu0 %v142_v9  ;;  %v42071_v9 = vsub.f32 %v581_v48, %v650_v50  ;;  %v42078_v13 = vsub.f32 %v588_v55, %v660_v57  ;;  %v782_v48 = vsub.f32 %v42069_v8, %v781_v41 }
  0x68   :  { %37118 = vmatprep.subr.mxu0 %v46150_v27  ;;  %v788_v50 = vsub.f32 %v42073_v10, %v787_v44  ;;  %v42126_v55 = vpack.c.bf16 %v765_v46, %v753_v45  ;;  %v819_v46 = vand.u32 4294901760, %v818_v37 }
  0x69   :  { %v775_v43 = vand.u32 4294901760, %v42071_v9  ;;  %v805_v54 = vand.u32 4294901760, %v42078_v13  ;;  %v783_v56 = vand.u32 4294901760, %v782_v48  ;;  %v831_v48 = vand.u32 4294901760, %v830_v40 }
  0x6b   :  { %v776_v49 = vsub.f32 %v42071_v9, %v775_v43  ;;  %v806_v0 = vsub.f32 %v42078_v13, %v805_v54  ;;  %v42132_v1 = vpack.c.bf16 %v783_v56, %v771_v47  ;;  %v824_v47 = vsub.f32 %v42097_v26, %v823_v38 }
  0x6c   :  { %v39996_v56 = vpack.c.bf16 %v831_v48, %v819_v46 }
  0x6d   :  { %v777_v59 = vand.u32 4294901760, %v776_v49  ;;  %v807_v23 = vand.u32 4294901760, %v806_v0  ;;  %v836_v49 = vsub.f32 %v42105_v32, %v835_v42  ;;  %v40002_v0 = vpack.c.bf16 %v42051_v35, %v42049_v34 }
  0x6e   :  { %37116 = vmatmul.mubr.f32.vlgmr.msra.gmra.mrb[0].mxu0 %v152_v14  ;;  %v42080_v14 = vsub.f32 %v585_v58, %v658_v60  ;;  %v811_v58 = vand.u32 4294901760, %v42082_v15  ;;  %v789_v60 = vand.u32 4294901760, %v788_v50  ;;  %v825_v50 = vand.u32 4294901760, %v824_v47 }
  0x6f   :  { %v39992_v39 = vpack.c.bf16 %v807_v23, %v795_v19  ;;  %v40008_v19 = vpack.c.bf16 %v42078_v13, %v42076_v12  ;;  %v42176_v12 = vpack.c.bf16 %v787_v44, %v775_v43  ;;  %v42178_v13 = vpack.c.bf16 %v805_v54, %v793_v51  ;;  %37120 = vmatprep.mubr.msk.f32.mxu0 %vm41964_vm2, %v46150_v27 }
  0x70   :  { %v799_v57 = vand.u32 4294901760, %v42080_v14  ;;  %v812_v3 = vsub.f32 %v42082_v15, %v811_v58  ;;  %v39990_v11 = vpack.c.bf16 %v789_v60, %v777_v59  ;;  %v837_v59 = vand.u32 4294901760, %v836_v49 }
  0x71   :  { %v40010_v23 = vpack.c.bf16 %v42082_v15, %v42080_v14 }
  0x72   :  { %v800_v2 = vsub.f32 %v42080_v14, %v799_v57  ;;  %v813_v36 = vand.u32 4294901760, %v812_v3  ;;  %v39998_v60 = vpack.c.bf16 %v837_v59, %v825_v50  ;;  %v40006_v3 = vpack.c.bf16 %v42073_v10, %v42071_v9 }
  0x73   :  { %v42170_v9 = vpack.c.bf16 %v763_v29, %v751_v28  ;;  %v42174_v10 = vpack.c.bf16 %v781_v41, %v769_v30  ;;  %v42180_v14 = vpack.c.bf16 %v811_v58, %v799_v57 }
  0x74   :  { %v801_v25 = vand.u32 4294901760, %v800_v2  ;;  %v40004_v2 = vpack.c.bf16 %v42069_v8, %v42067_v7  ;;  %v42164_v8 = vpack.c.bf16 %v757_v6, %v745_v5  ;;  %v64_v5 = vlaneseq  ;;  %v42189_v6 = vld [vmem:[#allocation7] sm:$0xff] }
  0x76   :  { %v39994_v45 = vpack.c.bf16 %v813_v36, %v801_v25  ;;  %v40012_v25 = vpack.c.bf16 %v42088_v18, %v42086_v17  ;;  %v40014_v36 = vpack.c.bf16 %v42105_v32, %v42097_v26  ;;  %v42186_v34 = vshrl.u32 %v64_v5, 7 }
  0x78   :  { %v66_v35 = vsub.s32 0, %v42186_v34 }
  0x7a   :  { %v67_v7 = vrot.slane %v42189_v6, %v66_v35 }
 0x141   :  { %v37117_v15 = vpop.f32.mrb[0].mxu0 }
 0x142   :  { %v42192_v17 = vadd.f32 %v37117_v15, %v67_v7  ;;  %v567_v18 = vpop.f32.mrb[1].mxu0 }
 0x143   :  { %v42194_v26 = vadd.f32 %v567_v18, %v67_v7 }
 0x144   :  { %v638_v28 = vsel %vm633_vm1, %v42192_v17, 0 }
 0x145   :  { %v42198_v29 = vand.u32 4294901760, %v638_v28  ;;  %v635_v30 = vsel %vm633_vm1, %v42194_v26, 0 }
 0x146   :  { %v42202_v32 = vand.u32 4294901760, %v635_v30 }
 0x147   :  { %v733_v41 = vsub.f32 %v638_v28, %v42198_v29 }
 0x148   :  { %v722_v43 = vsub.f32 %v635_v30, %v42202_v32 }
 0x149   :  { %v734_v51 = vand.u32 4294901760, %v733_v41 }
 0x14a   :  { %v723_v44 = vand.u32 4294901760, %v722_v43 }
 0x14b   :  { %v735_v58 = vsub.f32 %v733_v41, %v734_v51 }
 0x14c   :  { %v724_v54 = vsub.f32 %v722_v43, %v723_v44 }
 0x14d   :  { %v736_v4 = vand.u32 4294901760, %v735_v58 }
 0x14e   :  { %v725_v57 = vand.u32 4294901760, %v724_v54 }
 0x150   :  { %726 = vmatmul.mubr.f32.vlgmr.msra.gmra.mrb[0].mxu1 %v725_v57 }
 0x151   :  { %39987 = vmatpush1.bf16.msra.mxu1 %v42126_v55  ;;  %731 = vmatprep.mubr.f32.mxu1 %v46150_v27 }
 0x152   :  { %39989 = vmatprep.subr.bf16.mxu1 %v42132_v1 }
 0x154   :  { %737 = vmatmul.mubr.f32.gmra.mrb[2].mxu1 %v736_v4 }
 0x155   :  { %39991 = vmatpush1.bf16.msra.mxu1 %v39990_v11  ;;  %887 = vmatprep.mubr.f32.mxu1 %v46150_v27 }
 0x156   :  { %39993 = vmatprep.subr.bf16.mxu1 %v39992_v39 }
 0x159   :  { %39995 = vmatpush1.bf16.msra.mxu1 %v39994_v45 }
 0x15a   :  { %39997 = vmatprep.subr.bf16.mxu1 %v39996_v56 }
 0x15d   :  { %39999 = vmatpush1.bf16.msra.mxu1 %v39998_v60 }
 0x15e   :  { %40001 = vmatprep.subr.bf16.mxu1 %v40000_v61 }
 0x160   :  { %889 = vmatmul.mubr.f32.vlgmr.msra.gmra.mrb[0].mxu1 %v42202_v32 }
 0x161   :  { %40003 = vmatpush1.bf16.msra.mxu1 %v40002_v0  ;;  %894 = vmatprep.mubr.f32.mxu1 %v46150_v27 }
 0x162   :  { %40005 = vmatprep.subr.bf16.mxu1 %v40004_v2 }
 0x164   :  { %896 = vmatmul.mubr.f32.gmra.mrb[2].mxu1 %v42198_v29 }
 0x165   :  { %40007 = vmatpush1.bf16.msra.mxu1 %v40006_v3  ;;  %998 = vmatprep.mubr.f32.mxu1 %v46150_v27 }
 0x166   :  { %40009 = vmatprep.subr.bf16.mxu1 %v40008_v19 }
 0x169   :  { %40011 = vmatpush1.bf16.msra.mxu1 %v40010_v23 }
 0x16a   :  { %40013 = vmatprep.subr.bf16.mxu1 %v40012_v25 }
 0x16d   :  { %40015 = vmatpush1.bf16.msra.mxu1 %v40014_v36 }
 0x16e   :  { %40017 = vmatprep.subr.bf16.mxu1 %v42040_v20 }
 0x170   :  { %1001 = vmatmul.mubr.f32.vlgmr.msra.gmra.mrb[0].mxu1 %v722_v43 }
 0x171   :  { %40019 = vmatpush1.bf16.msra.mxu1 %v42047_v33  ;;  %1006 = vmatprep.mubr.f32.mxu1 %v46150_v27 }
 0x172   :  { %40021 = vmatprep.subr.bf16.mxu1 %v42054_v52 }
 0x174   :  { %1009 = vmatmul.mubr.f32.gmra.mrb[2].mxu1 %v733_v41 }
 0x175   :  { %40023 = vmatpush1.bf16.msra.mxu1 %v42056_v53  ;;  %1095 = vmatprep.mubr.f32.mxu1 %v46150_v27 }
 0x176   :  { %40025 = vmatprep.subr.bf16.mxu1 %v42060_v62 }
 0x179   :  { %40027 = vmatpush1.bf16.msra.mxu1 %v42062_v63 }
 0x17a   :  { %40029 = vmatprep.subr.bf16.mxu1 %v42084_v16 }
 0x17d   :  { %40031 = vmatpush1.bf16.msra.mxu1 %v42103_v31 }
 0x17e   :  { %40033 = vmatprep.subr.bf16.mxu1 %v42164_v8 }
 0x180   :  { %1099 = vmatmul.mubr.f32.vlgmr.msra.gmra.mrb[0].mxu1 %v723_v44 }
 0x181   :  { %40035 = vmatpush1.bf16.msra.mxu1 %v42170_v9  ;;  %1104 = vmatprep.mubr.f32.mxu1 %v46150_v27 }
 0x182   :  { %40037 = vmatprep.subr.bf16.mxu1 %v42174_v10 }
 0x184   :  { %1108 = vmatmul.mubr.f32.gmra.mrb[2].mxu1 %v734_v51 }
 0x185   :  { %40039 = vmatpush1.bf16.msra.mxu1 %v42176_v12  ;;  %1226 = vmatprep.mubr.f32.mxu1 %v46150_v27 }
 0x186   :  { %40041 = vmatprep.subr.bf16.mxu1 %v42178_v13 }
 0x189   :  { %40043 = vmatpush1.bf16.msra.mxu1 %v42180_v14 }
 0x18a   :  { %40045 = vmatprep.subr.bf16.mxu1 %v42182_v21 }
 0x18d   :  { %40047 = vmatpush1.bf16.msra.mxu1 %v42184_v22 }
 0x18e   :  { %40049 = vmatprep.subr.bf16.mxu1 %v42040_v20  ;;  %v627_v20 = vsub.s32 1, %v42186_v34 }
 0x190   :  { %1228 = vmatmul.mubr.f32.vlgmr.msra.gmra.mrb[0].mxu1 %v42202_v32 }
 0x191   :  { %40051 = vmatpush1.bf16.msra.mxu1 %v42047_v33  ;;  %1233 = vmatprep.mubr.f32.mxu1 %v46150_v27  ;;  %v628_v33 = vrot.slane %v42189_v6, %v627_v20 }
 0x192   :  { %40053 = vmatprep.subr.bf16.mxu1 %v42054_v52 }
 0x194   :  { %1235 = vmatmul.mubr.f32.gmra.mrb[2].mxu1 %v42198_v29 }
 0x195   :  { %40055 = vmatpush1.bf16.msra.mxu1 %v42056_v53  ;;  %1321 = vmatprep.mubr.f32.mxu1 %v46150_v27 }
 0x196   :  { %40057 = vmatprep.subr.bf16.mxu1 %v42060_v62  ;;  %v59_v62 = vld [vmem:[#allocation7 + $0x8] sm:$0xff] }
 0x199   :  { %40059 = vmatpush1.bf16.msra.mxu1 %v42062_v63 }
 0x19a   :  { %40061 = vmatprep.subr.bf16.mxu1 %v42084_v16  ;;  %v42260_v16 = vrot.slane %v59_v62, %v627_v20 }
 0x19d   :  { %40063 = vmatpush1.bf16.msra.mxu1 %v42103_v31 }
 0x19e   :  { %37248 = vmatprep.subr.mxu1 %v46150_v27 }
 0x1a0   :  { %1323 = vmatmul.mubr.f32.vlgmr.msra.gmra.mrb[0].mxu1 %v42202_v32 }
 0x1a1   :  { %1328 = vmatprep.mubr.f32.mxu1 %v46150_v27 }
 0x1a4   :  { %1330 = vmatmul.mubr.f32.gmra.mrb[2].mxu1 %v42198_v29 }
 0x1a5   :  { %37250 = vmatprep.mubr.msk.f32.mxu1 %vm41964_vm2, %v46150_v27 }
 0x273   :  { %v1324_v52 = vpop.f32.mrb[0].mxu1 }
 0x274   :  { %v40930_v53 = vadd.f32 %v1324_v52, %v628_v33  ;;  %v42256_v63 = vpop.f32.mrb[1].mxu1 }
 0x276   :  { %1339 = vrot.lane.b32.xlu1 %v40930_v53, %s41965_s2  ;;  %1337 = vrot.lane.b32.xlu0 %v40930_v53, %s41966_s26  ;;  %v1413_v24 = vsel %vm1412_vm3, %v40930_v53, 0 }
 0x277   :  { %v1331_v31 = vpop.f32.mrb[2].mxu1  ;;  %v1483_v37 = vand.u32 4294901760, %v1413_v24 }
 0x278   :  { %v42262_v55 = vadd.f32 %v1331_v31, %v628_v33  ;;  %v1333_v1 = vpop.f32.mrb[3].mxu1 }
 0x279   :  { %v42265_v11 = vadd.f32 %v1333_v1, %v42260_v16  ;;  %v1484_v38 = vsub.f32 %v1413_v24, %v1483_v37 }
 0x27a   :  { %1410 = vrot.lane.b32.xlu0 %v40930_v53, %s41967_s27 }
 0x27b   :  { %v1485_v40 = vand.u32 4294901760, %v1484_v38 }
 0x27d   :  { %v1486_v47 = vsub.f32 %v1484_v38, %v1485_v40 }
 0x27e   :  { %1341 = vrot.lane.b32.xlu0 %v40930_v53, %s41968_s28 }
 0x27f   :  { %v1487_v56 = vand.u32 4294901760, %v1486_v47 }
 0x282   :  { %1343 = vrot.lane.b32.xlu0 %v40930_v53, %s41969_s29 }
 0x2e8   :  { %v1338_v39 = vpop.permute.xlu0 %1337  ;;  %v42272_v42 = vpop.permute.xlu1 %1339 }
 0x2e9   :  { %1863 = vrot.lane.b32.xlu1 %v1338_v39, %s41967_s27  ;;  %v1865_v2 = vsel %vm1412_vm3, %v1338_v39, 0  ;;  %v2317_v54 = vsel %vm1412_vm3, %v42272_v42, 0 }
 0x2ea   :  { %v42306_v3 = vand.u32 4294901760, %v1865_v2  ;;  %v2387_v4 = vand.u32 4294901760, %v2317_v54 }
 0x2ec   :  { %v1411_v45 = vpop.permute.xlu0 %1410  ;;  %v1936_v19 = vsub.f32 %v1865_v2, %v42306_v3  ;;  %v2388_v33 = vsub.f32 %v2317_v54, %v2387_v4 }
 0x2ed   :  { %v1415_v46 = vsel %vm1412_vm3, %v1411_v45, 0  ;;  %2315 = vrot.lane.b32.xlu1 %v42272_v42, %s41967_s27 }
 0x2ee   :  { %v1418_v48 = vand.u32 4294901760, %v1415_v46  ;;  %v1937_v23 = vand.u32 4294901760, %v1936_v19 }
 0x2f0   :  { %v1495_v49 = vsub.f32 %v1415_v46, %v1418_v48  ;;  %37119 = vmatpush3.xpose.msra.mxu0 %v1418_v48  ;;  %v42277_v50 = vpop.permute.xlu0 %1341  ;;  %v1938_v8 = vsub.f32 %v1936_v19, %v1937_v23 }
 0x2f1   :  { %1345 = vrot.lane.b32.xlu1 %v40930_v53, %s41956_s23  ;;  %2767 = vrot.lane.b32.xlu0 %v42277_v50, %s41967_s27 }
 0x2f2   :  { %v1496_v59 = vand.u32 4294901760, %v1495_v49  ;;  %37123 = vmatprep.subr.mxu0 %v46150_v27  ;;  %v1939_v13 = vand.u32 4294901760, %v1938_v8 }
 0x2f3   :  { %37121 = vmatmul.mubr.f32.vlgmr.msra.gmra.mrb[2].mxu0 %v1487_v56 }
 0x2f4   :  { %v1497_v60 = vsub.f32 %v1495_v49, %v1496_v59  ;;  %37125 = vmatprep.mubr.msk.f32.mxu0 %vm41964_vm2, %v46150_v27  ;;  %v1344_v0 = vpop.permute.xlu0 %1343 }
 0x2f5   :  { %1347 = vrot.lane.b32.xlu1 %v40930_v53, %s41970_s30  ;;  %1349 = vrot.lane.b32.xlu0 %v40930_v53, %s41971_s4  ;;  %v3221_v15 = vsel %vm1412_vm3, %v1344_v0, 0  ;;  %v2389_v53 = vand.u32 4294901760, %v2388_v33 }
 0x2f6   :  { %v1498_v61 = vand.u32 4294901760, %v1497_v60  ;;  %v42344_v30 = vand.u32 4294901760, %v3221_v15 }
 0x2f7   :  { %v2390_v31 = vsub.f32 %v2388_v33, %v2389_v53 }
 0x2f8   :  { %37124 = vmatpush3.xpose.msra.mxu0 %v1498_v61  ;;  %v42354_v44 = vsub.f32 %v3221_v15, %v42344_v30 }
 0x2f9   :  { %3219 = vrot.lane.b32.xlu1 %v1344_v0, %s41967_s27  ;;  %37128 = vmatprep.subr.mxu0 %v46150_v27  ;;  %v2391_v24 = vand.u32 4294901760, %v2390_v31 }
 0x2fa   :  { %v3293_v58 = vand.u32 4294901760, %v42354_v44 }
 0x2fb   :  { %37126 = vmatmul.mubr.f32.vlgmr.msra.gmra.mrb[2].mxu0 %v1483_v37 }
 0x2fc   :  { %37129 = vmatpush3.xpose.msra.mxu0 %v1495_v49  ;;  %37130 = vmatprep.mubr.msk.f32.mxu0 %vm41964_vm2, %v46150_v27 }
 0x2fd   :  { %1352 = vrot.lane.b32.xlu1 %v42262_v55, %s41966_s26  ;;  %37133 = vmatprep.subr.mxu0 %v46150_v27 }
 0x303   :  { %37131 = vmatmul.mubr.f32.vlgmr.msra.gmra.mrb[2].mxu0 %v1484_v38  ;;  %v2769_v38 = vsel %vm1412_vm3, %v42277_v50, 0 }
 0x304   :  { %37134 = vmatpush3.xpose.msra.mxu0 %v1418_v48  ;;  %37135 = vmatprep.mubr.msk.f32.mxu0 %vm41964_vm2, %v46150_v27 }
 0x305   :  { %37138 = vmatprep.subr.mxu0 %v46150_v27 }
 0x30b   :  { %37136 = vmatmul.mubr.f32.vlgmr.msra.gmra.mrb[2].mxu0 %v1485_v40  ;;  %v42416_v40 = vand.u32 4294901760, %v2769_v38 }
 0x30c   :  { %37139 = vmatpush3.xpose.msra.mxu0 %v1496_v59  ;;  %37140 = vmatprep.mubr.msk.f32.mxu0 %vm41964_vm2, %v46150_v27 }
 0x30d   :  { %37143 = vmatprep.subr.mxu0 %v46150_v27  ;;  %v2840_v45 = vsub.f32 %v2769_v38, %v42416_v40 }
 0x30f   :  { %v2841_v47 = vand.u32 4294901760, %v2840_v45 }
 0x311   :  { %v2842_v49 = vsub.f32 %v2840_v45, %v2841_v47 }
 0x313   :  { %37141 = vmatmul.mubr.f32.vlgmr.msra.gmra.mrb[2].mxu0 %v1483_v37  ;;  %v2843_v56 = vand.u32 4294901760, %v2842_v49 }
 0x314   :  { %37144 = vmatpush3.xpose.msra.mxu0 %v1418_v48  ;;  %37145 = vmatprep.mubr.msk.f32.mxu0 %vm41964_vm2, %v46150_v27 }
 0x315   :  { %37148 = vmatprep.subr.mxu0 %v46150_v27 }
 0x31b   :  { %37146 = vmatmul.mubr.f32.vlgmr.msra.gmra.mrb[2].mxu0 %v1483_v37 }
 0x31c   :  { %37150 = vmatprep.mubr.msk.f32.mxu0 %vm41964_vm2, %v46150_v27 }
 0x35b   :  { %v1864_v25 = vpop.permute.xlu1 %1863 }
 0x35c   :  { %v1867_v36 = vsel %vm1412_vm3, %v1864_v25, 0 }
 0x35d   :  { %v42310_v9 = vand.u32 4294901760, %v1867_v36 }
 0x35f   :  { %v1947_v10 = vsub.f32 %v1867_v36, %v42310_v9  ;;  %v2316_v12 = vpop.permute.xlu1 %2315  ;;  %37149 = vmatpush3.xpose.msra.mxu0 %v42310_v9 }
 0x360   :  { %37153 = vmatprep.subr.mxu0 %v46150_v27  ;;  %v2319_v57 = vsel %vm1412_vm3, %v2316_v12, 0 }
 0x361   :  { %v1948_v14 = vand.u32 4294901760, %v1947_v10  ;;  %v2322_v20 = vand.u32 4294901760, %v2319_v57 }
 0x362   :  { %37151 = vmatmul.mubr.f32.vlgmr.msra.gmra.mrb[4].mxu0 %v1939_v13 }
 0x363   :  { %v1949_v21 = vsub.f32 %v1947_v10, %v1948_v14  ;;  %v42315_v22 = vpop.permute.xlu1 %1345  ;;  %v42317_v5 = vpop.permute.xlu0 %2767  ;;  %37155 = vmatprep.mubr.msk.f32.mxu0 %vm41964_vm2, %v46150_v27  ;;  %v2399_v52 = vsub.f32 %v2319_v57, %v2322_v20 }
 0x364   :  { %3671 = vrot.lane.b32.xlu0 %v42315_v22, %s41967_s27  ;;  %v2771_v39 = vsel %vm1412_vm3, %v42317_v5, 0 }
 0x365   :  { %v1950_v35 = vand.u32 4294901760, %v1949_v21  ;;  %v2400_v62 = vand.u32 4294901760, %v2399_v52  ;;  %v2774_v42 = vand.u32 4294901760, %v2771_v39 }
 0x367   :  { %v42323_v6 = vpop.permute.xlu1 %1347  ;;  %v42325_v7 = vpop.permute.xlu0 %1349  ;;  %37154 = vmatpush3.xpose.msra.mxu0 %v1950_v35  ;;  %v2401_v1 = vsub.f32 %v2399_v52, %v2400_v62  ;;  %v2851_v46 = vsub.f32 %v2771_v39, %v2774_v42  ;;  %v3294_v35 = vsub.f32 %v42354_v44, %v3293_v58 }
 0x368   :  { %4123 = vrot.lane.b32.xlu0 %v42323_v6, %s41967_s27  ;;  %4575 = vrot.lane.b32.xlu1 %v42325_v7, %s41967_s27  ;;  %v4125_v60 = vsel %vm1412_vm3, %v42323_v6, 0 }
 0x369   :  { %37158 = vmatprep.subr.mxu0 %v46150_v27  ;;  %v2402_v37 = vand.u32 4294901760, %v2401_v1  ;;  %v2852_v48 = vand.u32 4294901760, %v2851_v46  ;;  %v42438_v61 = vand.u32 4294901760, %v4125_v60 }
 0x36a   :  { %37156 = vmatmul.mubr.f32.vlgmr.msra.gmra.mrb[4].mxu0 %v42306_v3 }
 0x36b   :  { %v3220_v18 = vpop.permute.xlu1 %3219  ;;  %37159 = vmatpush3.xpose.msra.mxu0 %v1947_v10  ;;  %37160 = vmatprep.mubr.msk.f32.mxu0 %vm41964_vm2, %v46150_v27  ;;  %v2853_v50 = vsub.f32 %v2851_v46, %v2852_v48  ;;  %v42441_v0 = vsub.f32 %v4125_v60, %v42438_v61 }
 0x36c   :  { %v3223_v28 = vsel %vm1412_vm3, %v3220_v18, 0  ;;  %1354 = vrot.lane.b32.xlu0 %v42262_v55, %s41965_s2  ;;  %1356 = vrot.lane.b32.xlu1 %v42262_v55, %s41968_s28 }
 0x36d   :  { %v42341_v29 = vand.u32 4294901760, %v3223_v28  ;;  %37163 = vmatprep.subr.mxu0 %v46150_v27  ;;  %v2854_v59 = vand.u32 4294901760, %v2853_v50 }
 0x36f   :  { %v3303_v32 = vsub.f32 %v3223_v28, %v42341_v29  ;;  %v42347_v41 = vpop.permute.xlu1 %1352 }
 0x370   :  { %5027 = vrot.lane.b32.xlu0 %v42262_v55, %s41967_s27  ;;  %5479 = vrot.lane.b32.xlu1 %v42347_v41, %s41967_s27 }
 0x371   :  { %v3304_v43 = vand.u32 4294901760, %v3303_v32  ;;  %37249 = vmatpush3.xpose.msra.mxu1 %v3303_v32 }
 0x372   :  { %37161 = vmatmul.mubr.f32.vlgmr.msra.gmra.mrb[4].mxu0 %v1936_v19  ;;  %37253 = vmatprep.subr.mxu1 %v46150_v27 }
 0x373   :  { %v42357_v51 = vsub.f32 %v3303_v32, %v3304_v43  ;;  %37164 = vmatpush3.xpose.msra.mxu0 %v42310_v9  ;;  %37165 = vmatprep.mubr.msk.f32.mxu0 %vm41964_vm2, %v46150_v27 }
 0x374   :  { %1358 = vrot.lane.b32.xlu0 %v42262_v55, %s41969_s29  ;;  %37251 = vmatmul.mubr.f32.vlgmr.msra.gmra.mrb[4].mxu1 %v42354_v44 }
 0x375   :  { %1360 = vrot.lane.b32.xlu1 %v42262_v55, %s41956_s23  ;;  %37254 = vmatpush3.xpose.msra.mxu1 %v42341_v29 }
 0x376   :  { %37168 = vmatprep.subr.mxu0 %v46150_v27  ;;  %37255 = vmatprep.mubr.msk.f32.mxu1 %vm41964_vm2, %v46150_v27 }
 0x377   :  { %37258 = vmatprep.subr.mxu1 %v46150_v27 }
 0x37a   :  { %37166 = vmatmul.mubr.f32.vlgmr.msra.gmra.mrb[4].mxu0 %v1937_v23 }
 0x37b   :  { %37169 = vmatpush3.xpose.msra.mxu0 %v1948_v14  ;;  %37170 = vmatprep.mubr.msk.f32.mxu0 %vm41964_vm2, %v46150_v27 }
 0x37c   :  { %37256 = vmatmul.mubr.f32.vlgmr.msra.gmra.mrb[4].mxu1 %v3293_v58  ;;  %37173 = vmatprep.subr.mxu0 %v46150_v27 }
 0x37d   :  { %37259 = vmatpush3.xpose.msra.mxu1 %v3304_v43  ;;  %37260 = vmatprep.mubr.msk.f32.mxu1 %vm41964_vm2, %v46150_v27  ;;  %v3295_v43 = vand.u32 4294901760, %v3294_v35 }
 0x37e   :  { %37263 = vmatprep.subr.mxu1 %v46150_v27 }
 0x382   :  { %37171 = vmatmul.mubr.f32.vlgmr.msra.gmra.mrb[4].mxu0 %v42306_v3 }
 0x383   :  { %37174 = vmatpush3.xpose.msra.mxu0 %v42310_v9  ;;  %37175 = vmatprep.mubr.msk.f32.mxu0 %vm41964_vm2, %v46150_v27  ;;  %v3673_v9 = vsel %vm1412_vm3, %v42315_v22, 0 }
 0x384   :  { %37261 = vmatmul.mubr.f32.vlgmr.msra.gmra.mrb[4].mxu1 %v42344_v30  ;;  %37178 = vmatprep.subr.mxu0 %v46150_v27  ;;  %v42474_v5 = vand.u32 4294901760, %v3673_v9 }
 0x385   :  { %37264 = vmatpush3.xpose.msra.mxu1 %v42341_v29  ;;  %37265 = vmatprep.mubr.msk.f32.mxu1 %vm41964_vm2, %v46150_v27 }
 0x386   :  { %37298 = vmatprep.subr.mxu1 %v46150_v27  ;;  %v42491_v32 = vsub.f32 %v3673_v9, %v42474_v5 }
 0x38a   :  { %37176 = vmatmul.mubr.f32.vlgmr.msra.gmra.mrb[4].mxu0 %v42306_v3  ;;  %v4197_v3 = vand.u32 4294901760, %v42441_v0 }
 0x38b   :  { %37179 = vmatpush3.xpose.msra.mxu0 %v2322_v20  ;;  %37180 = vmatprep.mubr.msk.f32.mxu0 %vm41964_vm2, %v46150_v27 }
 0x38c   :  { %37266 = vmatmul.mubr.f32.vlgmr.msra.gmra.mrb[4].mxu1 %v42344_v30  ;;  %37183 = vmatprep.subr.mxu0 %v46150_v27  ;;  %v4198_v36 = vsub.f32 %v42441_v0, %v4197_v3 }
 0x38d   :  { %37300 = vmatprep.mubr.msk.f32.mxu1 %vm41964_vm2, %v46150_v27 }
 0x38e   :  { %37181 = vmatmul.mubr.f32.vlgmr.msra.gmra.mrb[6].mxu0 %v2391_v24  ;;  %v4199_v21 = vand.u32 4294901760, %v4198_v36 }
 0x38f   :  { %37184 = vmatpush3.xpose.msra.mxu0 %v2402_v37  ;;  %37185 = vmatprep.mubr.msk.f32.mxu0 %vm41964_vm2, %v46150_v27 }
 0x390   :  { %37188 = vmatprep.subr.mxu0 %v46150_v27 }
 0x396   :  { %37186 = vmatmul.mubr.f32.vlgmr.msra.gmra.mrb[6].mxu0 %v2387_v4 }
 0x397   :  { %37189 = vmatpush3.xpose.msra.mxu0 %v2399_v52  ;;  %37190 = vmatprep.mubr.msk.f32.mxu0 %vm41964_vm2, %v46150_v27 }
 0x398   :  { %37193 = vmatprep.subr.mxu0 %v46150_v27 }
 0x39e   :  { %37191 = vmatmul.mubr.f32.vlgmr.msra.gmra.mrb[6].mxu0 %v2388_v33 }
 0x39f   :  { %37194 = vmatpush3.xpose.msra.mxu0 %v2322_v20  ;;  %37195 = vmatprep.mubr.msk.f32.mxu0 %vm41964_vm2, %v46150_v27 }
 0x3a0   :  { %37198 = vmatprep.subr.mxu0 %v46150_v27 }
 0x3a6   :  { %37196 = vmatmul.mubr.f32.vlgmr.msra.gmra.mrb[6].mxu0 %v2389_v53 }
 0x3a7   :  { %37199 = vmatpush3.xpose.msra.mxu0 %v2400_v62  ;;  %37200 = vmatprep.mubr.msk.f32.mxu0 %vm41964_vm2, %v46150_v27 }
 0x3a8   :  { %37203 = vmatprep.subr.mxu0 %v46150_v27 }
 0x3ae   :  { %37201 = vmatmul.mubr.f32.vlgmr.msra.gmra.mrb[6].mxu0 %v2387_v4 }
 0x3af   :  { %37204 = vmatpush3.xpose.msra.mxu0 %v2322_v20  ;;  %37205 = vmatprep.mubr.msk.f32.mxu0 %vm41964_vm2, %v46150_v27 }
 0x3b0   :  { %37208 = vmatprep.subr.mxu0 %v46150_v27 }
 0x3b6   :  { %37206 = vmatmul.mubr.f32.vlgmr.msra.gmra.mrb[6].mxu0 %v2387_v4  ;;  %v3745_v4 = vand.u32 4294901760, %v42491_v32 }
 0x3b7   :  { %37209 = vmatpush3.xpose.msra.mxu0 %v2774_v42  ;;  %37210 = vmatprep.mubr.msk.f32.mxu0 %vm41964_vm2, %v46150_v27 }
 0x3b8   :  { %37213 = vmatprep.subr.mxu0 %v46150_v27  ;;  %v3746_v20 = vsub.f32 %v42491_v32, %v3745_v4 }
 0x3ba   :  { %37211 = vmatmul.mubr.f32.vlgmr.msra.gmra.mrb[8].mxu0 %v2843_v56  ;;  %v3747_v62 = vand.u32 4294901760, %v3746_v20 }
 0x3bb   :  { %37214 = vmatpush3.xpose.msra.mxu0 %v2854_v59  ;;  %37215 = vmatprep.mubr.msk.f32.mxu0 %vm41964_vm2, %v46150_v27 }
 0x3bc   :  { %37218 = vmatprep.subr.mxu0 %v46150_v27 }
 0x3c2   :  { %37216 = vmatmul.mubr.f32.vlgmr.msra.gmra.mrb[8].mxu0 %v42416_v40 }
 0x3c3   :  { %37219 = vmatpush3.xpose.msra.mxu0 %v2851_v46  ;;  %37220 = vmatprep.mubr.msk.f32.mxu0 %vm41964_vm2, %v46150_v27 }
 0x3c4   :  { %37223 = vmatprep.subr.mxu0 %v46150_v27 }
 0x3ca   :  { %37221 = vmatmul.mubr.f32.vlgmr.msra.gmra.mrb[8].mxu0 %v2840_v45  ;;  %v4577_v45 = vsel %vm1412_vm3, %v42325_v7, 0 }
 0x3cb   :  { %37224 = vmatpush3.xpose.msra.mxu0 %v2774_v42  ;;  %37225 = vmatprep.mubr.msk.f32.mxu0 %vm41964_vm2, %v46150_v27 }
 0x3cc   :  { %37228 = vmatprep.subr.mxu0 %v46150_v27 }
 0x3d2   :  { %37226 = vmatmul.mubr.f32.vlgmr.msra.gmra.mrb[8].mxu0 %v2841_v47 }
 0x3d3   :  { %37229 = vmatpush3.xpose.msra.mxu0 %v2852_v48  ;;  %37230 = vmatprep.mubr.msk.f32.mxu0 %vm41964_vm2, %v46150_v27  ;;  %v42575_v48 = vand.u32 4294901760, %v4577_v45 }
 0x3d4   :  { %37233 = vmatprep.subr.mxu0 %v46150_v27 }
 0x3d5   :  { %v4648_v56 = vsub.f32 %v4577_v45, %v42575_v48 }
 0x3d6   :  { %v3672_v2 = vpop.permute.xlu0 %3671 }
 0x3d7   :  { %v3675_v10 = vsel %vm1412_vm3, %v3672_v2, 0  ;;  %v4649_v60 = vand.u32 4294901760, %v4648_v56 }
 0x3d8   :  { %v42481_v6 = vand.u32 4294901760, %v3675_v10 }
 0x3da   :  { %v42447_v19 = vpop.permute.xlu1 %4575  ;;  %v4124_v23 = vpop.permute.xlu0 %4123  ;;  %37231 = vmatmul.mubr.f32.vlgmr.msra.gmra.mrb[8].mxu0 %v42416_v40  ;;  %v42498_v44 = vsub.f32 %v3675_v10, %v42481_v6 }
 0x3db   :  { %v4127_v25 = vsel %vm1412_vm3, %v4124_v23, 0  ;;  %37234 = vmatpush3.xpose.msra.mxu0 %v2774_v42  ;;  %37235 = vmatprep.mubr.msk.f32.mxu0 %vm41964_vm2, %v46150_v27  ;;  %v4579_v47 = vsel %vm1412_vm3, %v42447_v19, 0  ;;  %v5481_v23 = vsel %vm1412_vm3, %v42347_v41, 0 }
 0x3dc   :  { %v42456_v8 = vand.u32 4294901760, %v4127_v25  ;;  %37238 = vmatprep.subr.mxu0 %v46150_v27  ;;  %v42580_v50 = vand.u32 4294901760, %v4579_v47  ;;  %v42634_v36 = vand.u32 4294901760, %v5481_v23 }
 0x3de   :  { %v42463_v12 = vsub.f32 %v4127_v25, %v42456_v8  ;;  %v42465_v13 = vpop.permute.xlu1 %1356  ;;  %37299 = vmatpush3.xpose.msra.mxu1 %v42456_v8  ;;  %v42468_v14 = vpop.permute.xlu0 %1354  ;;  %v4659_v59 = vsub.f32 %v4579_v47, %v42580_v50  ;;  %v5552_v41 = vsub.f32 %v5481_v23, %v42634_v36 }
 0x3df   :  { %6383 = vrot.lane.b32.xlu1 %v42465_v13, %s41967_s27  ;;  %5931 = vrot.lane.b32.xlu0 %v42468_v14, %s41967_s27 }
 0x3e0   :  { %v4208_v22 = vand.u32 4294901760, %v42463_v12  ;;  %37303 = vmatprep.subr.mxu1 %v46150_v27  ;;  %v5553_v10 = vand.u32 4294901760, %v5552_v41 }
 0x3e1   :  { %37301 = vmatmul.mubr.f32.vlgmr.msra.gmra.mrb[6].mxu1 %v4199_v21  ;;  %v5933_v21 = vsel %vm1412_vm3, %v42468_v14, 0 }
 0x3e2   :  { %v4209_v15 = vsub.f32 %v42463_v12, %v4208_v22  ;;  %v42484_v18 = vpop.permute.xlu1 %5479  ;;  %v5028_v28 = vpop.permute.xlu0 %5027  ;;  %37236 = vmatmul.mubr.f32.vlgmr.msra.gmra.mrb[8].mxu0 %v42416_v40  ;;  %37305 = vmatprep.mubr.msk.f32.mxu1 %vm41964_vm2, %v46150_v27  ;;  %v42650_v35 = vand.u32 4294901760, %v5933_v21 }
 0x3e3   :  { %37239 = vmatpush3.xpose.msra.mxu0 %v42341_v29  ;;  %1364 = vrot.lane.b32.xlu1 %v42262_v55, %s41971_s4  ;;  %v3306_v29 = vand.u32 4294901760, %v42357_v51  ;;  %v3756_v51 = vand.u32 4294901760, %v42498_v44  ;;  %v5031_v1 = vsel %vm1412_vm3, %v5028_v28, 0  ;;  %v5483_v25 = vsel %vm1412_vm3, %v42484_v18, 0 }
 0x3e4   :  { %1362 = vrot.lane.b32.xlu0 %v42262_v55, %s41970_s30  ;;  %37240 = vmatprep.mubr.msk.f32.mxu0 %vm41964_vm2, %v46150_v27  ;;  %v4210_v54 = vand.u32 4294901760, %v4209_v15  ;;  %v42552_v37 = vand.u32 4294901760, %v5031_v1  ;;  %v42658_v18 = vsub.f32 %v5933_v21, %v42650_v35 }
 0x3e5   :  { %37243 = vmatprep.subr.mxu0 %v46150_v27  ;;  %v3757_v33 = vsub.f32 %v42498_v44, %v3756_v51 }
 0x3e6   :  { %v42504_v57 = vpop.permute.xlu0 %1358  ;;  %37241 = vmatmul.mubr.f32.vlgmr.msra.gmra.mrb[10].mxu0 %v3295_v43  ;;  %37304 = vmatpush3.xpose.msra.mxu1 %v4210_v54  ;;  %v5111_v38 = vsub.f32 %v5031_v1, %v42552_v37  ;;  %v6005_v14 = vand.u32 4294901760, %v42658_v18 }
 0x3e7   :  { %v42506_v58 = vpop.permute.xlu1 %1360  ;;  %37244 = vmatpush3.xpose.msra.mxu0 %v3306_v29  ;;  %37308 = vmatprep.subr.mxu1 %v46150_v27  ;;  %v3758_v31 = vand.u32 4294901760, %v3757_v33  ;;  %v6837_v47 = vsel %vm1412_vm3, %v42504_v57, 0 }
 0x3e8   :  { %7287 = vrot.lane.b32.xlu1 %v42506_v58, %s41967_s27  ;;  %6835 = vrot.lane.b32.xlu0 %v42504_v57, %s41967_s27  ;;  %v5112_v40 = vand.u32 4294901760, %v5111_v38 }
 0x3e9   :  { %37245 = vmatprep.mubr.msk.f32.mxu0 %vm41964_vm2, %v46150_v27  ;;  %37306 = vmatmul.mubr.f32.vlgmr.msra.gmra.mrb[6].mxu1 %v42438_v61 }
 0x3ea   :  { %37268 = vmatprep.subr.mxu0 %v46150_v27  ;;  %37309 = vmatpush3.xpose.msra.mxu1 %v42463_v12  ;;  %v5113_v46 = vsub.f32 %v5111_v38, %v5112_v40 }
 0x3eb   :  { %37310 = vmatprep.mubr.msk.f32.mxu1 %vm41964_vm2, %v46150_v27  ;;  %37313 = vmatprep.subr.mxu1 %v46150_v27 }
 0x3ec   :  { %v5114_v7 = vand.u32 4294901760, %v5113_v46 }
 0x3ee   :  { %v42525_v52 = vpop.f32.mrb[2].mxu0  ;;  %37246 = vmatmul.mubr.f32.vlgmr.msra.gmra.mrb[10].mxu0 %v42344_v30  ;;  %v5029_v30 = vsel %vm1412_vm3, %v42262_v55, 0 }
 0x3ef   :  { %37269 = vmatpush3.xpose.msra.mxu0 %v42481_v6  ;;  %v37147_v53 = vpop.f32.mrb[3].mxu0  ;;  %37270 = vmatprep.mubr.msk.f32.mxu0 %vm41964_vm2, %v46150_v27  ;;  %v42550_v24 = vand.u32 4294901760, %v5029_v30 }
 0x3f0   :  { %37273 = vmatprep.subr.mxu0 %v46150_v27 }
 0x3f1   :  { %37311 = vmatmul.mubr.f32.vlgmr.msra.gmra.mrb[6].mxu1 %v42441_v0  ;;  %v5100_v55 = vsub.f32 %v5029_v30, %v42550_v24  ;;  %v4650_v0 = vsub.f32 %v4648_v56, %v4649_v60 }
 0x3f2   :  { %37271 = vmatmul.mubr.f32.vlgmr.msra.gmra.mrb[12].mxu0 %v3747_v62  ;;  %37314 = vmatpush3.xpose.msra.mxu1 %v42456_v8 }
 0x3f3   :  { %37274 = vmatpush3.xpose.msra.mxu0 %v3758_v31  ;;  %37315 = vmatprep.mubr.msk.f32.mxu1 %vm41964_vm2, %v46150_v27  ;;  %v5101_v39 = vand.u32 4294901760, %v5100_v55 }
 0x3f4   :  { %37318 = vmatprep.subr.mxu1 %v46150_v27  ;;  %37275 = vmatprep.mubr.msk.f32.mxu0 %vm41964_vm2, %v46150_v27 }
 0x3f5   :  { %37278 = vmatprep.subr.mxu0 %v46150_v27  ;;  %v5102_v42 = vsub.f32 %v5100_v55, %v5101_v39 }
 0x3f7   :  { %v5103_v49 = vand.u32 4294901760, %v5102_v42 }
 0x3f9   :  { %37316 = vmatmul.mubr.f32.vlgmr.msra.gmra.mrb[6].mxu1 %v4197_v3  ;;  %v4651_v3 = vand.u32 4294901760, %v4650_v0 }
 0x3fa   :  { %37276 = vmatmul.mubr.f32.vlgmr.msra.gmra.mrb[12].mxu0 %v42474_v5  ;;  %37319 = vmatpush3.xpose.msra.mxu1 %v4208_v22 }
 0x3fb   :  { %37279 = vmatpush3.xpose.msra.mxu0 %v42498_v44  ;;  %37320 = vmatprep.mubr.msk.f32.mxu1 %vm41964_vm2, %v46150_v27  ;;  %v6006_v44 = vsub.f32 %v42658_v18, %v6005_v14 }
 0x3fc   :  { %37323 = vmatprep.subr.mxu1 %v46150_v27  ;;  %37280 = vmatprep.mubr.msk.f32.mxu0 %vm41964_vm2, %v46150_v27 }
 0x3fd   :  { %37283 = vmatprep.subr.mxu0 %v46150_v27  ;;  %v6007_v20 = vand.u32 4294901760, %v6006_v44 }
 0x401   :  { %37321 = vmatmul.mubr.f32.vlgmr.msra.gmra.mrb[6].mxu1 %v42438_v61 }
 0x402   :  { %37281 = vmatmul.mubr.f32.vlgmr.msra.gmra.mrb[12].mxu0 %v42491_v32  ;;  %37324 = vmatpush3.xpose.msra.mxu1 %v42456_v8  ;;  %v42639_v8 = vand.u32 4294901760, %v5483_v25 }
 0x403   :  { %37284 = vmatpush3.xpose.msra.mxu0 %v42481_v6  ;;  %37325 = vmatprep.mubr.msk.f32.mxu1 %vm41964_vm2, %v46150_v27 }
 0x404   :  { %37358 = vmatprep.subr.mxu1 %v46150_v27  ;;  %37285 = vmatprep.mubr.msk.f32.mxu0 %vm41964_vm2, %v46150_v27  ;;  %v5563_v9 = vsub.f32 %v5483_v25, %v42639_v8 }
 0x405   :  { %37288 = vmatprep.subr.mxu0 %v46150_v27 }
 0x406   :  { %v5564_v12 = vand.u32 4294901760, %v5563_v9 }
 0x408   :  { %v5565_v22 = vsub.f32 %v5563_v9, %v5564_v12 }
 0x409   :  { %37326 = vmatmul.mubr.f32.vlgmr.msra.gmra.mrb[6].mxu1 %v42438_v61  ;;  %v4660_v61 = vand.u32 4294901760, %v4659_v59 }
 0x40a   :  { %37286 = vmatmul.mubr.f32.vlgmr.msra.gmra.mrb[12].mxu0 %v3745_v4  ;;  %37359 = vmatpush3.xpose.msra.mxu1 %v42552_v37  ;;  %v5566_v15 = vand.u32 4294901760, %v5565_v22 }
 0x40b   :  { %37289 = vmatpush3.xpose.msra.mxu0 %v3756_v51  ;;  %37360 = vmatprep.mubr.msk.f32.mxu1 %vm41964_vm2, %v46150_v27  ;;  %v4661_v2 = vsub.f32 %v4659_v59, %v4660_v61 }
 0x40c   :  { %37363 = vmatprep.subr.mxu1 %v46150_v27  ;;  %37290 = vmatprep.mubr.msk.f32.mxu0 %vm41964_vm2, %v46150_v27 }
 0x40d   :  { %37293 = vmatprep.subr.mxu0 %v46150_v27  ;;  %37361 = vmatmul.mubr.f32.vlgmr.msra.gmra.mrb[8].mxu1 %v5103_v49  ;;  %v4662_v19 = vand.u32 4294901760, %v4661_v2 }
 0x40e   :  { %37364 = vmatpush3.xpose.msra.mxu1 %v5114_v7  ;;  %37365 = vmatprep.mubr.msk.f32.mxu1 %vm41964_vm2, %v46150_v27  ;;  %v42737_v7 = vand.u32 4294901760, %v6837_v47 }
 0x40f   :  { %37368 = vmatprep.subr.mxu1 %v46150_v27 }
 0x412   :  { %37291 = vmatmul.mubr.f32.vlgmr.msra.gmra.mrb[12].mxu0 %v42474_v5 }
 0x413   :  { %37294 = vmatpush3.xpose.msra.mxu0 %v42481_v6  ;;  %37295 = vmatprep.mubr.msk.f32.mxu0 %vm41964_vm2, %v46150_v27 }
 0x414   :  { %37328 = vmatprep.subr.mxu0 %v46150_v27 }
 0x415   :  { %37366 = vmatmul.mubr.f32.vlgmr.msra.gmra.mrb[8].mxu1 %v42550_v24 }
 0x416   :  { %37369 = vmatpush3.xpose.msra.mxu1 %v5111_v38  ;;  %37370 = vmatprep.mubr.msk.f32.mxu1 %vm41964_vm2, %v46150_v27 }
 0x417   :  { %37373 = vmatprep.subr.mxu1 %v46150_v27 }
 0x41a   :  { %37296 = vmatmul.mubr.f32.vlgmr.msra.gmra.mrb[12].mxu0 %v42474_v5  ;;  %v5554_v5 = vsub.f32 %v5552_v41, %v5553_v10 }
 0x41b   :  { %37329 = vmatpush3.xpose.msra.mxu0 %v42580_v50  ;;  %37330 = vmatprep.mubr.msk.f32.mxu0 %vm41964_vm2, %v46150_v27 }
 0x41c   :  { %37333 = vmatprep.subr.mxu0 %v46150_v27  ;;  %v5555_v6 = vand.u32 4294901760, %v5554_v5  ;;  %v7289_v5 = vsel %vm1412_vm3, %v42506_v58, 0 }
 0x41d   :  { %37371 = vmatmul.mubr.f32.vlgmr.msra.gmra.mrb[8].mxu1 %v5100_v55 }
 0x41e   :  { %37331 = vmatmul.mubr.f32.vlgmr.msra.gmra.mrb[14].mxu0 %v4651_v3  ;;  %37374 = vmatpush3.xpose.msra.mxu1 %v42552_v37 }
 0x41f   :  { %37334 = vmatpush3.xpose.msra.mxu0 %v4662_v19  ;;  %37375 = vmatprep.mubr.msk.f32.mxu1 %vm41964_vm2, %v46150_v27 }
 0x420   :  { %37378 = vmatprep.subr.mxu1 %v46150_v27  ;;  %37335 = vmatprep.mubr.msk.f32.mxu0 %vm41964_vm2, %v46150_v27 }
 0x421   :  { %37338 = vmatprep.subr.mxu0 %v46150_v27 }
 0x425   :  { %37376 = vmatmul.mubr.f32.vlgmr.msra.gmra.mrb[8].mxu1 %v5101_v39 }
 0x426   :  { %37336 = vmatmul.mubr.f32.vlgmr.msra.gmra.mrb[14].mxu0 %v42575_v48  ;;  %37379 = vmatpush3.xpose.msra.mxu1 %v5112_v40 }
 0x427   :  { %37339 = vmatpush3.xpose.msra.mxu0 %v4659_v59  ;;  %37380 = vmatprep.mubr.msk.f32.mxu1 %vm41964_vm2, %v46150_v27  ;;  %v8643_v59 = vsel %vm1412_vm3, %v42525_v52, -inf }
 0x428   :  { %37383 = vmatprep.subr.mxu1 %v46150_v27  ;;  %37340 = vmatprep.mubr.msk.f32.mxu0 %vm41964_vm2, %v46150_v27 }
 0x429   :  { %37343 = vmatprep.subr.mxu0 %v46150_v27 }
 0x42d   :  { %37381 = vmatmul.mubr.f32.vlgmr.msra.gmra.mrb[8].mxu1 %v42550_v24 }
 0x42e   :  { %37341 = vmatmul.mubr.f32.vlgmr.msra.gmra.mrb[14].mxu0 %v4648_v56  ;;  %37384 = vmatpush3.xpose.msra.mxu1 %v42552_v37  ;;  %v6385_v37 = vsel %vm1412_vm3, %v42465_v13, 0 }
 0x42f   :  { %37344 = vmatpush3.xpose.msra.mxu0 %v42580_v50  ;;  %37385 = vmatprep.mubr.msk.f32.mxu1 %vm41964_vm2, %v46150_v27  ;;  %v42703_v38 = vand.u32 4294901760, %v6385_v37 }
 0x430   :  { %37345 = vmatprep.mubr.msk.f32.mxu0 %vm41964_vm2, %v46150_v27  ;;  %37348 = vmatprep.subr.mxu0 %v46150_v27 }
 0x431   :  { %37418 = vmatprep.subr.mxu1 %v46150_v27  ;;  %v42709_v13 = vsub.f32 %v6385_v37, %v42703_v38 }
 0x433   :  { %v6457_v42 = vand.u32 4294901760, %v42709_v13 }
 0x435   :  { %37386 = vmatmul.mubr.f32.vlgmr.msra.gmra.mrb[8].mxu1 %v42550_v24  ;;  %v6458_v49 = vsub.f32 %v42709_v13, %v6457_v42 }
 0x436   :  { %37346 = vmatmul.mubr.f32.vlgmr.msra.gmra.mrb[14].mxu0 %v4649_v60  ;;  %37420 = vmatprep.mubr.msk.f32.mxu1 %vm41964_vm2, %v46150_v27 }
 0x437   :  { %37349 = vmatpush3.xpose.msra.mxu0 %v4660_v61  ;;  %37350 = vmatprep.mubr.msk.f32.mxu0 %vm41964_vm2, %v46150_v27  ;;  %v6459_v56 = vand.u32 4294901760, %v6458_v49  ;;  %v42750_v61 = vsub.f32 %v6837_v47, %v42737_v7 }
 0x438   :  { %37353 = vmatprep.subr.mxu0 %v46150_v27 }
 0x439   :  { %v6909_v3 = vand.u32 4294901760, %v42750_v61 }
 0x43b   :  { %v6910_v23 = vsub.f32 %v42750_v61, %v6909_v3 }
 0x43e   :  { %37351 = vmatmul.mubr.f32.vlgmr.msra.gmra.mrb[14].mxu0 %v42575_v48 }
 0x43f   :  { %37354 = vmatpush3.xpose.msra.mxu0 %v42580_v50  ;;  %37355 = vmatprep.mubr.msk.f32.mxu0 %vm41964_vm2, %v46150_v27 }
 0x440   :  { %37388 = vmatprep.subr.mxu0 %v46150_v27 }
 0x446   :  { %37356 = vmatmul.mubr.f32.vlgmr.msra.gmra.mrb[14].mxu0 %v42575_v48 }
 0x447   :  { %37389 = vmatpush3.xpose.msra.mxu0 %v42639_v8  ;;  %37390 = vmatprep.mubr.msk.f32.mxu0 %vm41964_vm2, %v46150_v27 }
 0x448   :  { %37393 = vmatprep.subr.mxu0 %v46150_v27 }
 0x44a   :  { %37391 = vmatmul.mubr.f32.vlgmr.msra.gmra.mrb[16].mxu0 %v5555_v6 }
 0x44b   :  { %37394 = vmatpush3.xpose.msra.mxu0 %v5566_v15  ;;  %37395 = vmatprep.mubr.msk.f32.mxu0 %vm41964_vm2, %v46150_v27 }
 0x44c   :  { %37398 = vmatprep.subr.mxu0 %v46150_v27 }
 0x451   :  { %v6384_v28 = vpop.permute.xlu1 %6383  ;;  %v5932_v32 = vpop.permute.xlu0 %5931 }
 0x452   :  { %v5935_v43 = vsel %vm1412_vm3, %v5932_v32, 0  ;;  %37396 = vmatmul.mubr.f32.vlgmr.msra.gmra.mrb[16].mxu0 %v42634_v36  ;;  %v6387_v55 = vsel %vm1412_vm3, %v6384_v28, 0 }
 0x453   :  { %v42667_v54 = vand.u32 4294901760, %v5935_v43  ;;  %37399 = vmatpush3.xpose.msra.mxu0 %v5563_v9  ;;  %37400 = vmatprep.mubr.msk.f32.mxu0 %vm41964_vm2, %v46150_v27  ;;  %v42706_v39 = vand.u32 4294901760, %v6387_v55 }
 0x454   :  { %37403 = vmatprep.subr.mxu0 %v46150_v27 }
 0x455   :  { %v6015_v29 = vsub.f32 %v5935_v43, %v42667_v54  ;;  %v42673_v4 = vpop.permute.xlu1 %1364  ;;  %37419 = vmatpush3.xpose.msra.mxu1 %v42667_v54  ;;  %v42713_v40 = vsub.f32 %v6387_v55, %v42706_v39 }
 0x456   :  { %v42676_v51 = vpop.permute.xlu0 %1362  ;;  %8191 = vrot.lane.b32.xlu1 %v42673_v4, %s41967_s27  ;;  %37423 = vmatprep.subr.mxu1 %v46150_v27 }
 0x457   :  { %v6016_v33 = vand.u32 4294901760, %v6015_v29  ;;  %7739 = vrot.lane.b32.xlu0 %v42676_v51, %s41967_s27  ;;  %v6468_v45 = vand.u32 4294901760, %v42713_v40 }
 0x458   :  { %37421 = vmatmul.mubr.f32.vlgmr.msra.gmra.mrb[10].mxu1 %v6007_v20  ;;  %v7741_v20 = vsel %vm1412_vm3, %v42676_v51, 0 }
 0x459   :  { %v6017_v53 = vsub.f32 %v6015_v29, %v6016_v33  ;;  %37425 = vmatprep.mubr.msk.f32.mxu1 %vm41964_vm2, %v46150_v27  ;;  %v6469_v50 = vsub.f32 %v42713_v40, %v6468_v45 }
 0x45a   :  { %37401 = vmatmul.mubr.f32.vlgmr.msra.gmra.mrb[16].mxu0 %v5552_v41  ;;  %v6836_v46 = vpop.permute.xlu0 %6835  ;;  %v42789_v41 = vadd.f32 %v42256_v63, %v42260_v16  ;;  %v7288_v21 = vpop.permute.xlu1 %7287  ;;  %v42811_v16 = vand.u32 4294901760, %v7289_v5 }
 0x45b   :  { %37404 = vmatpush3.xpose.msra.mxu0 %v42639_v8  ;;  %v6018_v62 = vand.u32 4294901760, %v6017_v53  ;;  %37405 = vmatprep.mubr.msk.f32.mxu0 %vm41964_vm2, %v46150_v27  ;;  %v6839_v48 = vsel %vm1412_vm3, %v6836_v46, 0  ;;  %v6470_v60 = vand.u32 4294901760, %v6469_v50  ;;  %v7291_v63 = vsel %vm1412_vm3, %v7288_v21, 0 }
 0x45c   :  { %37408 = vmatprep.subr.mxu0 %v46150_v27  ;;  %v42741_v57 = vand.u32 4294901760, %v6839_v48  ;;  %v7294_v58 = vand.u32 4294901760, %v7291_v63  ;;  %v7360_v22 = vsub.f32 %v7289_v5, %v42811_v16  ;;  %v42863_v53 = vand.u32 4294901760, %v7741_v20 }
 0x45d   :  { %v42689_v31 = vpop.f32.mrb[4].mxu0  ;;  %37424 = vmatpush3.xpose.msra.mxu1 %v6018_v62 }
 0x45e   :  { %v37177_v30 = vpop.f32.mrb[5].mxu0  ;;  %37428 = vmatprep.subr.mxu1 %v46150_v27  ;;  %v42753_v0 = vsub.f32 %v6839_v48, %v42741_v57  ;;  %v8646_v2 = vsel %vm1412_vm3, %v42689_v31, -inf  ;;  %v7361_v6 = vand.u32 4294901760, %v7360_v22 }
 0x45f   :  { %v42692_v1 = vpop.f32.mrb[4].mxu1 }
 0x460   :  { %v37267_v24 = vpop.f32.mrb[5].mxu1  ;;  %37426 = vmatmul.mubr.f32.vlgmr.msra.gmra.mrb[10].mxu1 %v42650_v35  ;;  %v6920_v19 = vand.u32 4294901760, %v42753_v0 }
 0x461   :  { %37429 = vmatpush3.xpose.msra.mxu1 %v6015_v29  ;;  %37430 = vmatprep.mubr.msk.f32.mxu1 %vm41964_vm2, %v46150_v27  ;;  %v8193_v29 = vsel %vm1412_vm3, %v42673_v4, 0  ;;  %v7812_v4 = vsub.f32 %v7741_v20, %v42863_v53 }
 0x462   :  { %37406 = vmatmul.mubr.f32.vlgmr.msra.gmra.mrb[16].mxu0 %v5553_v10  ;;  %37433 = vmatprep.subr.mxu1 %v46150_v27  ;;  %v6921_v25 = vsub.f32 %v42753_v0, %v6920_v19 }
 0x463   :  { %37409 = vmatpush3.xpose.msra.mxu0 %v5564_v12  ;;  %37410 = vmatprep.mubr.msk.f32.mxu0 %vm41964_vm2, %v46150_v27 }
 0x464   :  { %37413 = vmatprep.subr.mxu0 %v46150_v27 }
 0x468   :  { %37431 = vmatmul.mubr.f32.vlgmr.msra.gmra.mrb[10].mxu1 %v42658_v18  ;;  %v7362_v18 = vsub.f32 %v7360_v22, %v7361_v6 }
 0x469   :  { %37434 = vmatpush3.xpose.msra.mxu1 %v42667_v54  ;;  %37435 = vmatprep.mubr.msk.f32.mxu1 %vm41964_vm2, %v46150_v27 }
 0x46a   :  { %37411 = vmatmul.mubr.f32.vlgmr.msra.gmra.mrb[16].mxu0 %v42634_v36  ;;  %37438 = vmatprep.subr.mxu1 %v46150_v27  ;;  %v7363_v28 = vand.u32 4294901760, %v7362_v18 }
 0x46b   :  { %37414 = vmatpush3.xpose.msra.mxu0 %v42639_v8  ;;  %37415 = vmatprep.mubr.msk.f32.mxu0 %vm41964_vm2, %v46150_v27  ;;  %v6922_v8 = vand.u32 4294901760, %v6921_v25 }
 0x46c   :  { %37448 = vmatprep.subr.mxu0 %v46150_v27 }
 0x470   :  { %37436 = vmatmul.mubr.f32.vlgmr.msra.gmra.mrb[10].mxu1 %v6005_v14 }
 0x471   :  { %37439 = vmatpush3.xpose.msra.mxu1 %v6016_v33  ;;  %37440 = vmatprep.mubr.msk.f32.mxu1 %vm41964_vm2, %v46150_v27  ;;  %v42861_v33 = vand.u32 4294901760, %v8193_v29 }
 0x472   :  { %37416 = vmatmul.mubr.f32.vlgmr.msra.gmra.mrb[16].mxu0 %v42634_v36  ;;  %37443 = vmatprep.subr.mxu1 %v46150_v27  ;;  %v6911_v36 = vand.u32 4294901760, %v6910_v23 }
 0x473   :  { %37449 = vmatpush3.xpose.msra.mxu0 %v42706_v39  ;;  %37450 = vmatprep.mubr.msk.f32.mxu0 %vm41964_vm2, %v46150_v27  ;;  %v42866_v62 = vsub.f32 %v8193_v29, %v42861_v33 }
 0x474   :  { %37453 = vmatprep.subr.mxu0 %v46150_v27 }
 0x475   :  { %v8265_v55 = vand.u32 4294901760, %v42866_v62 }
 0x476   :  { %8644 = vmax.xlane.f32.xlu0 %v8643_v59  ;;  %37451 = vmatmul.mubr.f32.vlgmr.msra.gmra.mrb[18].mxu0 %v6459_v56 }
 0x477   :  { %37454 = vmatpush3.xpose.msra.mxu0 %v6470_v60  ;;  %37455 = vmatprep.mubr.msk.f32.mxu0 %vm41964_vm2, %v46150_v27 }
 0x478   :  { %37441 = vmatmul.mubr.f32.vlgmr.msra.gmra.mrb[10].mxu1 %v42650_v35  ;;  %37458 = vmatprep.subr.mxu0 %v46150_v27 }
 0x479   :  { %37444 = vmatpush3.xpose.msra.mxu1 %v42667_v54  ;;  %37445 = vmatprep.mubr.msk.f32.mxu1 %vm41964_vm2, %v46150_v27 }
 0x47a   :  { %8647 = vmax.xlane.f32.xlu1 %v8646_v2  ;;  %37478 = vmatprep.subr.mxu1 %v46150_v27 }
 0x47e   :  { %37456 = vmatmul.mubr.f32.vlgmr.msra.gmra.mrb[18].mxu0 %v42703_v38 }
 0x47f   :  { %37459 = vmatpush3.xpose.msra.mxu0 %v42713_v40  ;;  %37460 = vmatprep.mubr.msk.f32.mxu0 %vm41964_vm2, %v46150_v27  ;;  %v8266_v40 = vsub.f32 %v42866_v62, %v8265_v55 }
 0x480   :  { %37446 = vmatmul.mubr.f32.vlgmr.msra.gmra.mrb[10].mxu1 %v42650_v35  ;;  %37463 = vmatprep.subr.mxu0 %v46150_v27  ;;  %v7371_v35 = vsub.f32 %v7291_v63, %v7294_v58 }
 0x481   :  { %37479 = vmatpush3.xpose.msra.mxu1 %v42741_v57  ;;  %37480 = vmatprep.mubr.msk.f32.mxu1 %vm41964_vm2, %v46150_v27  ;;  %v8267_v50 = vand.u32 4294901760, %v8266_v40 }
 0x482   :  { %37483 = vmatprep.subr.mxu1 %v46150_v27  ;;  %v7372_v15 = vand.u32 4294901760, %v7371_v35 }
 0x484   :  { %37481 = vmatmul.mubr.f32.vlgmr.msra.gmra.mrb[12].mxu1 %v6911_v36  ;;  %v7373_v14 = vsub.f32 %v7371_v35, %v7372_v15  ;;  %v42930_v36 = vand.u32 4294901760, %v42789_v41 }
 0x485   :  { %37484 = vmatpush3.xpose.msra.mxu1 %v6922_v8  ;;  %37485 = vmatprep.mubr.msk.f32.mxu1 %vm41964_vm2, %v46150_v27 }
 0x486   :  { %37461 = vmatmul.mubr.f32.vlgmr.msra.gmra.mrb[18].mxu0 %v42709_v13  ;;  %37488 = vmatprep.subr.mxu1 %v46150_v27  ;;  %v7374_v32 = vand.u32 4294901760, %v7373_v14 }
 0x487   :  { %37464 = vmatpush3.xpose.msra.mxu0 %v42706_v39  ;;  %37465 = vmatprep.mubr.msk.f32.mxu0 %vm41964_vm2, %v46150_v27 }
 0x488   :  { %37468 = vmatprep.subr.mxu0 %v46150_v27 }
 0x489   :  { %v42791_v9 = vpop.f32.mrb[6].mxu0 }
 0x48a   :  { %v37207_v10 = vpop.f32.mrb[7].mxu0  ;;  %v8649_v12 = vsel %vm1412_vm3, %v42791_v9, -inf }
 0x48b   :  { %1367 = vrot.lane.b32.xlu1 %v42789_v41, %s41966_s26  ;;  %8650 = vmax.xlane.f32.xlu0 %v8649_v12 }
 0x48c   :  { %37486 = vmatmul.mubr.f32.vlgmr.msra.gmra.mrb[12].mxu1 %v42737_v7 }
 0x48d   :  { %37489 = vmatpush3.xpose.msra.mxu1 %v42753_v0  ;;  %37490 = vmatprep.mubr.msk.f32.mxu1 %vm41964_vm2, %v46150_v27 }
 0x48e   :  { %37466 = vmatmul.mubr.f32.vlgmr.msra.gmra.mrb[18].mxu0 %v6457_v42  ;;  %37493 = vmatprep.subr.mxu1 %v46150_v27 }
 0x48f   :  { %37469 = vmatpush3.xpose.msra.mxu0 %v6468_v45  ;;  %37470 = vmatprep.mubr.msk.f32.mxu0 %vm41964_vm2, %v46150_v27 }
 0x490   :  { %37473 = vmatprep.subr.mxu0 %v46150_v27 }
 0x494   :  { %37491 = vmatmul.mubr.f32.vlgmr.msra.gmra.mrb[12].mxu1 %v42750_v61 }
 0x495   :  { %37494 = vmatpush3.xpose.msra.mxu1 %v42741_v57  ;;  %37495 = vmatprep.mubr.msk.f32.mxu1 %vm41964_vm2, %v46150_v27 }
 0x496   :  { %37471 = vmatmul.mubr.f32.vlgmr.msra.gmra.mrb[18].mxu0 %v42703_v38  ;;  %37498 = vmatprep.subr.mxu1 %v46150_v27 }
 0x497   :  { %37474 = vmatpush3.xpose.msra.mxu0 %v42706_v39  ;;  %37475 = vmatprep.mubr.msk.f32.mxu0 %vm41964_vm2, %v46150_v27 }
 0x498   :  { %37508 = vmatprep.subr.mxu0 %v46150_v27 }
 0x49c   :  { %37496 = vmatmul.mubr.f32.vlgmr.msra.gmra.mrb[12].mxu1 %v6909_v3 }
 0x49d   :  { %37499 = vmatpush3.xpose.msra.mxu1 %v6920_v19  ;;  %37500 = vmatprep.mubr.msk.f32.mxu1 %vm41964_vm2, %v46150_v27 }
 0x49e   :  { %37476 = vmatmul.mubr.f32.vlgmr.msra.gmra.mrb[18].mxu0 %v42703_v38  ;;  %37503 = vmatprep.subr.mxu1 %v46150_v27  ;;  %v7813_v38 = vand.u32 4294901760, %v7812_v4 }
 0x49f   :  { %37509 = vmatpush3.xpose.msra.mxu0 %v7294_v58  ;;  %37510 = vmatprep.mubr.msk.f32.mxu0 %vm41964_vm2, %v46150_v27 }
 0x4a0   :  { %37513 = vmatprep.subr.mxu0 %v46150_v27  ;;  %v7814_v46 = vsub.f32 %v7812_v4, %v7813_v38 }
 0x4a2   :  { %37511 = vmatmul.mubr.f32.vlgmr.msra.gmra.mrb[20].mxu0 %v7363_v28 }
 0x4a3   :  { %37514 = vmatpush3.xpose.msra.mxu0 %v7374_v32  ;;  %37515 = vmatprep.mubr.msk.f32.mxu0 %vm41964_vm2, %v46150_v27 }
 0x4a4   :  { %37501 = vmatmul.mubr.f32.vlgmr.msra.gmra.mrb[12].mxu1 %v42737_v7  ;;  %37518 = vmatprep.subr.mxu0 %v46150_v27 }
 0x4a5   :  { %37504 = vmatpush3.xpose.msra.mxu1 %v42741_v57  ;;  %37505 = vmatprep.mubr.msk.f32.mxu1 %vm41964_vm2, %v46150_v27  ;;  %v7815_v57 = vand.u32 4294901760, %v7814_v46 }
 0x4a6   :  { %37538 = vmatprep.subr.mxu1 %v46150_v27 }
 0x4aa   :  { %37516 = vmatmul.mubr.f32.vlgmr.msra.gmra.mrb[20].mxu0 %v42811_v16 }
 0x4ab   :  { %37519 = vmatpush3.xpose.msra.mxu0 %v7371_v35  ;;  %37520 = vmatprep.mubr.msk.f32.mxu0 %vm41964_vm2, %v46150_v27 }
 0x4ac   :  { %37506 = vmatmul.mubr.f32.vlgmr.msra.gmra.mrb[12].mxu1 %v42737_v7  ;;  %37523 = vmatprep.subr.mxu0 %v46150_v27 }
 0x4ad   :  { %37540 = vmatprep.mubr.msk.f32.mxu1 %vm41964_vm2, %v46150_v27 }
 0x4b2   :  { %37521 = vmatmul.mubr.f32.vlgmr.msra.gmra.mrb[20].mxu0 %v7360_v22 }
 0x4b3   :  { %37524 = vmatpush3.xpose.msra.mxu0 %v7294_v58  ;;  %37525 = vmatprep.mubr.msk.f32.mxu0 %vm41964_vm2, %v46150_v27 }
 0x4b4   :  { %37528 = vmatprep.subr.mxu0 %v46150_v27 }
 0x4b5   :  { %v42850_v43 = vpop.f32.mrb[8].mxu0 }
 0x4b6   :  { %v37237_v44 = vpop.f32.mrb[9].mxu0  ;;  %v8652_v54 = vsel %vm1412_vm3, %v42850_v43, -inf }
 0x4b7   :  { %8653 = vmax.xlane.f32.xlu0 %v8652_v54 }
 0x4ba   :  { %37526 = vmatmul.mubr.f32.vlgmr.msra.gmra.mrb[20].mxu0 %v7361_v6 }
 0x4bb   :  { %37529 = vmatpush3.xpose.msra.mxu0 %v7372_v15  ;;  %37530 = vmatprep.mubr.msk.f32.mxu0 %vm41964_vm2, %v46150_v27 }
 0x4bc   :  { %37533 = vmatprep.subr.mxu0 %v46150_v27 }
 0x4c1   :  { %v3373_v30 = vpop.f32.mrb[10].mxu0 }
 0x4c2   :  { %v42870_v24 = vadd.f32 %v42692_v1, %v3373_v30  ;;  %v37247_v51 = vpop.f32.mrb[11].mxu0  ;;  %37531 = vmatmul.mubr.f32.vlgmr.msra.gmra.mrb[20].mxu0 %v42811_v16 }
 0x4c3   :  { %37534 = vmatpush3.xpose.msra.mxu0 %v7294_v58  ;;  %37535 = vmatprep.mubr.msk.f32.mxu0 %vm41964_vm2, %v46150_v27 }
 0x4c4   :  { %v8655_v37 = vsel %vm1412_vm3, %v42870_v24, -inf  ;;  %37568 = vmatprep.subr.mxu0 %v46150_v27 }
 0x4c5   :  { %8656 = vmax.xlane.f32.xlu1 %v8655_v37 }
 0x4c8   :  { %v8192_v39 = vpop.permute.xlu1 %8191 }
 0x4c9   :  { %v8195_v1 = vsel %vm1412_vm3, %v8192_v39, 0  ;;  %v7740_v13 = vpop.permute.xlu0 %7739 }
 0x4ca   :  { %v8198_v42 = vand.u32 4294901760, %v8195_v1  ;;  %v7743_v45 = vsel %vm1412_vm3, %v7740_v13, 0  ;;  %37536 = vmatmul.mubr.f32.vlgmr.msra.gmra.mrb[20].mxu0 %v42811_v16 }
 0x4cb   :  { %v7746_v47 = vand.u32 4294901760, %v7743_v45  ;;  %37570 = vmatprep.mubr.msk.f32.mxu0 %vm41964_vm2, %v46150_v27 }
 0x4cc   :  { %v8275_v48 = vsub.f32 %v8195_v1, %v8198_v42  ;;  %37569 = vmatpush3.xpose.msra.mxu0 %v8198_v42 }
 0x4cd   :  { %v7823_v49 = vsub.f32 %v7743_v45, %v7746_v47  ;;  %37539 = vmatpush3.xpose.msra.mxu1 %v7746_v47  ;;  %37573 = vmatprep.subr.mxu0 %v46150_v27 }
 0x4ce   :  { %v8276_v7 = vand.u32 4294901760, %v8275_v48  ;;  %37543 = vmatprep.subr.mxu1 %v46150_v27 }
 0x4cf   :  { %v7824_v56 = vand.u32 4294901760, %v7823_v49  ;;  %37571 = vmatmul.mubr.f32.vlgmr.msra.gmra.mrb[22].mxu0 %v8267_v50 }
 0x4d0   :  { %v8277_v59 = vsub.f32 %v8275_v48, %v8276_v7  ;;  %37541 = vmatmul.mubr.f32.vlgmr.msra.gmra.mrb[14].mxu1 %v7815_v57  ;;  %37575 = vmatprep.mubr.msk.f32.mxu0 %vm41964_vm2, %v46150_v27 }
 0x4d1   :  { %v7825_v60 = vsub.f32 %v7823_v49, %v7824_v56  ;;  %37545 = vmatprep.mubr.msk.f32.mxu1 %vm41964_vm2, %v46150_v27 }
 0x4d2   :  { %v8278_v61 = vand.u32 4294901760, %v8277_v59 }
 0x4d3   :  { %v7826_v0 = vand.u32 4294901760, %v7825_v60 }
 0x4d4   :  { %37574 = vmatpush3.xpose.msra.mxu0 %v8278_v61 }
 0x4d5   :  { %37544 = vmatpush3.xpose.msra.mxu1 %v7826_v0  ;;  %37578 = vmatprep.subr.mxu0 %v46150_v27 }
 0x4d6   :  { %37548 = vmatprep.subr.mxu1 %v46150_v27 }
 0x4d7   :  { %37576 = vmatmul.mubr.f32.vlgmr.msra.gmra.mrb[22].mxu0 %v42861_v33 }
 0x4d8   :  { %37546 = vmatmul.mubr.f32.vlgmr.msra.gmra.mrb[14].mxu1 %v42863_v53  ;;  %37579 = vmatpush3.xpose.msra.mxu0 %v8275_v48 }
 0x4d9   :  { %37549 = vmatpush3.xpose.msra.mxu1 %v7823_v49  ;;  %37550 = vmatprep.mubr.msk.f32.mxu1 %vm41964_vm2, %v46150_v27 }
 0x4da   :  { %37553 = vmatprep.subr.mxu1 %v46150_v27  ;;  %37580 = vmatprep.mubr.msk.f32.mxu0 %vm41964_vm2, %v46150_v27 }
 0x4db   :  { %37583 = vmatprep.subr.mxu0 %v46150_v27 }
 0x4dc   :  { %v42901_v2 = vpop.f32.mrb[6].mxu1 }
 0x4dd   :  { %v37327_v3 = vpop.f32.mrb[7].mxu1  ;;  %v8661_v54 = vsel %vm1412_vm3, %v42901_v2, -inf }
 0x4df   :  { %37581 = vmatmul.mubr.f32.vlgmr.msra.gmra.mrb[22].mxu0 %v42866_v62 }
 0x4e0   :  { %37551 = vmatmul.mubr.f32.vlgmr.msra.gmra.mrb[14].mxu1 %v7812_v4  ;;  %37584 = vmatpush3.xpose.msra.mxu0 %v8198_v42 }
 0x4e1   :  { %37554 = vmatpush3.xpose.msra.mxu1 %v7746_v47  ;;  %37555 = vmatprep.mubr.msk.f32.mxu1 %vm41964_vm2, %v46150_v27 }
 0x4e2   :  { %37558 = vmatprep.subr.mxu1 %v46150_v27  ;;  %37585 = vmatprep.mubr.msk.f32.mxu0 %vm41964_vm2, %v46150_v27 }
 0x4e3   :  { %37588 = vmatprep.subr.mxu0 %v46150_v27 }
 0x4e7   :  { %37586 = vmatmul.mubr.f32.vlgmr.msra.gmra.mrb[22].mxu0 %v8265_v55 }
 0x4e8   :  { %37556 = vmatmul.mubr.f32.vlgmr.msra.gmra.mrb[14].mxu1 %v7813_v38  ;;  %37589 = vmatpush3.xpose.msra.mxu0 %v8276_v7 }
 0x4e9   :  { %37559 = vmatpush3.xpose.msra.mxu1 %v7824_v56  ;;  %37560 = vmatprep.mubr.msk.f32.mxu1 %vm41964_vm2, %v46150_v27 }
 0x4ea   :  { %37563 = vmatprep.subr.mxu1 %v46150_v27  ;;  %37590 = vmatprep.mubr.msk.f32.mxu0 %vm41964_vm2, %v46150_v27 }
 0x4eb   :  { %37593 = vmatprep.subr.mxu0 %v46150_v27 }
 0x4ed   :  { %v42916_v19 = vpop.f32.mrb[12].mxu0 }
 0x4ee   :  { %v37297_v23 = vpop.f32.mrb[13].mxu0  ;;  %v8658_v25 = vsel %vm1412_vm3, %v42916_v19, -inf }
 0x4ef   :  { %37591 = vmatmul.mubr.f32.vlgmr.msra.gmra.mrb[22].mxu0 %v42861_v33  ;;  %8659 = vmax.xlane.f32.xlu1 %v8658_v25 }
 0x4f0   :  { %37561 = vmatmul.mubr.f32.vlgmr.msra.gmra.mrb[14].mxu1 %v42863_v53  ;;  %37594 = vmatpush3.xpose.msra.mxu0 %v8198_v42 }
 0x4f1   :  { %37564 = vmatpush3.xpose.msra.mxu1 %v7746_v47  ;;  %37565 = vmatprep.mubr.msk.f32.mxu1 %vm41964_vm2, %v46150_v27 }
 0x4f2   :  { %37595 = vmatprep.mubr.msk.f32.mxu0 %vm41964_vm2, %v46150_v27  ;;  %37598 = vmatprep.subr.mxu1 %v46150_v27 }
 0x4f3   :  { %37628 = vmatprep.subr.mxu0 %v46150_v27 }
 0x4f7   :  { %37596 = vmatmul.mubr.f32.vlgmr.msra.gmra.mrb[22].mxu0 %v42861_v33 }
 0x4f8   :  { %37566 = vmatmul.mubr.f32.vlgmr.msra.gmra.mrb[14].mxu1 %v42863_v53  ;;  %37630 = vmatprep.mubr.msk.f32.mxu0 %vm41964_vm2, %v46150_v27 }
 0x4f9   :  { %37599 = vmatpush3.msra.mxu1 %v42930_v36  ;;  %37600 = vmatprep.mubr.msk.f32.mxu1 %vm41964_vm2, %v46150_v27 }
 0x4fa   :  { %37603 = vmatprep.subr.mxu1 %v46150_v27 }
 0x500   :  { %1370 = vrot.lane.b32.xlu1 %v42789_v41, %s41965_s2 }
 0x503   :  { %v8645_v8 = vpop.xlane.xlu0 %8644 }
 0x504   :  { %v8691_v10 = vsub.f32 %v42525_v52, %v8645_v8 }
 0x506   :  { %v8707_v12 = vmul.f32 1.442695, %v8691_v10  ;;  %v43010_v10 = vsub.f32 %v42789_v41, %v42930_v36 }
 0x507   :  { %v8648_v21 = vpop.xlane.xlu1 %8647 }
 0x508   :  { %41729 = vpow2.f32 %v8707_v12  ;;  %v8692_v5 = vsub.f32 %v42689_v31, %v8648_v21  ;;  %v42943_v63 = vpop.f32.mrb[8].mxu1 }
 0x509   :  { %v37387_v58 = vpop.f32.mrb[9].mxu1  ;;  %v8667_v20 = vsel %vm1412_vm3, %v42943_v63, -inf }
 0x50a   :  { %v8709_v16 = vmul.f32 1.442695, %v8692_v5 }
 0x50b   :  { %v42945_v22 = vpop.permute.xlu1 %1367 }
 0x50c   :  { %41731 = vpow2.f32 %v8709_v16  ;;  %v42948_v35 = vand.u32 4294901760, %v42945_v22 }
 0x50e   :  { %37629 = vmatpush3.msra.mxu0 %v42948_v35  ;;  %v43017_v16 = vsub.f32 %v42945_v22, %v42948_v35 }
 0x50f   :  { %37633 = vmatprep.subr.mxu0 %v46150_v27 }
 0x512   :  { %v42952_v52 = vpop.eup %41729 }
 0x513   :  { %v8739_v6 = vsel %vm1412_vm3, %v42952_v52, 0.0 }
 0x514   :  { %8740 = vadd.xlane.f32.xlu0 %v8739_v6 }
 0x516   :  { %v42956_v31 = vpop.eup %41731 }
 0x517   :  { %v8742_v15 = vsel %vm1412_vm3, %v42956_v31, 0.0 }
 0x518   :  { %v8651_v18 = vpop.xlane.xlu0 %8650  ;;  %8743 = vadd.xlane.f32.xlu0 %v8742_v15 }
 0x519   :  { %v8693_v14 = vsub.f32 %v42791_v9, %v8651_v18  ;;  %v42961_v28 = vpop.f32.mrb[14].mxu0 }
 0x51a   :  { %v37357_v32 = vpop.f32.mrb[15].mxu0  ;;  %v8664_v29 = vsel %vm1412_vm3, %v42961_v28, -inf }
 0x51b   :  { %v8711_v44 = vmul.f32 1.442695, %v8693_v14 }
 0x51c   :  { %8662 = vmax.xlane.f32.xlu0 %v8661_v54 }
 0x51d   :  { %41733 = vpow2.f32 %v8711_v44  ;;  %v9350_v44 = vand.u32 4294901760, %v43017_v16 }
 0x520   :  { %8665 = vmax.xlane.f32.xlu0 %v8664_v29 }
 0x524   :  { %8668 = vmax.xlane.f32.xlu1 %v8667_v20 }
 0x527   :  { %v42969_v33 = vpop.eup %41733 }
 0x528   :  { %v8745_v9 = vsel %vm1412_vm3, %v42969_v33, 0.0 }
 0x529   :  { %8746 = vadd.xlane.f32.xlu0 %v8745_v9 }
 0x544   :  { %v8654_v53 = vpop.xlane.xlu0 %8653 }
 0x545   :  { %v8694_v62 = vsub.f32 %v42850_v43, %v8654_v53  ;;  %v42974_v30 = vpop.f32.mrb[16].mxu0 }
 0x546   :  { %v37417_v4 = vpop.f32.mrb[17].mxu0  ;;  %v8670_v51 = vsel %vm1412_vm3, %v42974_v30, -inf }
 0x547   :  { %v8713_v37 = vmul.f32 1.442695, %v8694_v62  ;;  %8671 = vmax.xlane.f32.xlu1 %v8670_v51 }
 0x549   :  { %41735 = vpow2.f32 %v8713_v37 }
 0x552   :  { %v8657_v43 = vpop.xlane.xlu1 %8656 }
 0x553   :  { %v42978_v55 = vpop.eup %41735  ;;  %v42980_v38 = vpop.f32.mrb[10].mxu1  ;;  %v8695_v42 = vsub.f32 %v42870_v24, %v8657_v43 }
 0x554   :  { %v37447_v39 = vpop.f32.mrb[11].mxu1  ;;  %v8748_v1 = vsel %vm1412_vm3, %v42978_v55, 0.0  ;;  %v8673_v43 = vsel %vm1412_vm3, %v42980_v38, -inf }
 0x555   :  { %8749 = vadd.xlane.f32.xlu0 %v8748_v1  ;;  %v8715_v45 = vmul.f32 1.442695, %v8695_v42 }
 0x557   :  { %41737 = vpow2.f32 %v8715_v45 }
 0x561   :  { %v42992_v7 = vpop.eup %41737 }
 0x562   :  { %v8751_v57 = vsel %vm1412_vm3, %v42992_v7, 0.0 }
 0x56b   :  { %1373 = vrot.lane.b32.xlu0 %v42789_v41, %s41968_s28 }
 0x571   :  { %v42986_v13 = vpop.f32.mrb[18].mxu0 }
 0x572   :  { %v37477_v40 = vpop.f32.mrb[19].mxu0 }
 0x573   :  { %v8676_v40 = vsel %vm1412_vm3, %v42986_v13, -inf }
 0x57c   :  { %v8660_v46 = vpop.xlane.xlu1 %8659 }
 0x57d   :  { %v8696_v47 = vsub.f32 %v42916_v19, %v8660_v46 }
 0x57f   :  { %v8717_v48 = vmul.f32 1.442695, %v8696_v47  ;;  %v42990_v49 = vpop.f32.mrb[12].mxu1 }
 0x580   :  { %v37507_v50 = vpop.f32.mrb[13].mxu1 }
 0x581   :  { %41739 = vpow2.f32 %v8717_v48 }
 0x58a   :  { %8752 = vadd.xlane.f32.xlu0 %v8751_v57 }
 0x58b   :  { %v42996_v56 = vpop.eup %41739 }
 0x58c   :  { %v8754_v24 = vsel %vm1412_vm3, %v42996_v56, 0.0 }
 0x58d   :  { %8755 = vadd.xlane.f32.xlu1 %v8754_v24 }
 0x59d   :  { %v43000_v59 = vpop.f32.mrb[20].mxu0 }
 0x59e   :  { %1376 = vrot.lane.b32.xlu1 %v42789_v41, %s41969_s29  ;;  %v37537_v60 = vpop.f32.mrb[21].mxu0 }
 0x5a0   :  { %1379 = vrot.lane.b32.xlu0 %v42789_v41, %s41956_s23 }
 0x5a1   :  { %v8741_v61 = vpop.xlane.xlu0 %8740 }
 0x5a2   :  { %41741 = vrcp.f32 %v8741_v61  ;;  %v1371_v61 = vpop.permute.xlu1 %1370 }
 0x5a5   :  { %v8744_v0 = vpop.xlane.xlu0 %8743 }
 0x5a6   :  { %41743 = vrcp.f32 %v8744_v0  ;;  %v43083_v0 = vand.u32 4294901760, %v1371_v61 }
 0x5a9   :  { %v8663_v3 = vpop.xlane.xlu0 %8662 }
 0x5aa   :  { %v8697_v19 = vsub.f32 %v42901_v2, %v8663_v3 }
 0x5ac   :  { %v41742_v23 = vpop.eup %41741  ;;  %v8719_v8 = vmul.f32 1.442695, %v8697_v19  ;;  %v43096_v19 = vsub.f32 %v1371_v61, %v43083_v0 }
 0x5ad   :  { %v8788_v25 = vmul.f32 %v41742_v23, %v42952_v52  ;;  %v8666_v2 = vpop.xlane.xlu0 %8665  ;;  %v8901_v52 = vand.u32 4294901760, %v43010_v10 }
 0x5ae   :  { %41745 = vpow2.f32 %v8719_v8  ;;  %v8698_v18 = vsub.f32 %v42961_v28, %v8666_v2  ;;  %v9351_v28 = vsub.f32 %v43017_v16, %v9350_v44  ;;  %v9799_v8 = vand.u32 4294901760, %v43096_v19 }
 0x5af   :  { %v8820_v12 = vsel %vm1412_vm3, %v8788_v25, 0  ;;  %v8902_v22 = vsub.f32 %v43010_v10, %v8901_v52 }
 0x5b0   :  { %v41744_v21 = vpop.eup %41743  ;;  %v43013_v5 = vand.u32 4294901760, %v8820_v12  ;;  %v8721_v29 = vmul.f32 1.442695, %v8698_v18  ;;  %v9352_v39 = vand.u32 4294901760, %v9351_v28  ;;  %v8679_v28 = vsel %vm1412_vm3, %v42990_v49, -inf }
 0x5b1   :  { %v8790_v58 = vmul.f32 %v41744_v21, %v42956_v31  ;;  %v8903_v53 = vand.u32 4294901760, %v8902_v22  ;;  %v8669_v23 = vpop.xlane.xlu1 %8668 }
 0x5b2   :  { %v8889_v6 = vsub.f32 %v8820_v12, %v43013_v5  ;;  %41747 = vpow2.f32 %v8721_v29  ;;  %v8682_v29 = vsel %vm1412_vm3, %v43000_v59, -inf }
 0x5b3   :  { %v9269_v15 = vsel %vm1412_vm3, %v8790_v58, 0 }
 0x5b4   :  { %v8890_v14 = vand.u32 4294901760, %v8889_v6  ;;  %v43024_v32 = vand.u32 4294901760, %v9269_v15 }
 0x5b6   :  { %v8891_v31 = vsub.f32 %v8889_v6, %v8890_v14  ;;  %v9338_v54 = vsub.f32 %v9269_v15, %v43024_v32  ;;  %v8747_v37 = vpop.xlane.xlu0 %8746 }
 0x5b7   :  { %41749 = vrcp.f32 %v8747_v37 }
 0x5b8   :  { %v8892_v20 = vand.u32 4294901760, %v8891_v31  ;;  %v9339_v9 = vand.u32 4294901760, %v9338_v54  ;;  %v43034_v4 = vpop.eup %41745 }
 0x5b9   :  { %v8757_v1 = vsel %vm1412_vm3, %v43034_v4, 0.0 }
 0x5ba   :  { %37601 = vmatmul.mubr.f32.vlgmr.msra.gmra.mrb[16].mxu1 %v8892_v20  ;;  %v9340_v62 = vsub.f32 %v9338_v54, %v9339_v9 }
 0x5bb   :  { %37604 = vmatpush3.msra.mxu1 %v8903_v53  ;;  %37605 = vmatprep.mubr.msk.f32.mxu1 %vm41964_vm2, %v46150_v27 }
 0x5bc   :  { %v9341_v51 = vand.u32 4294901760, %v9340_v62  ;;  %37608 = vmatprep.subr.mxu1 %v46150_v27  ;;  %v43053_v42 = vpop.eup %41747 }
 0x5bd   :  { %v8760_v45 = vsel %vm1412_vm3, %v43053_v42, 0.0 }
 0x5be   :  { %37631 = vmatmul.mubr.f32.vlgmr.msra.gmra.mrb[24].mxu0 %v9341_v51 }
 0x5bf   :  { %37634 = vmatpush3.msra.mxu0 %v9352_v39  ;;  %8758 = vadd.xlane.f32.xlu0 %v8757_v1 }
 0x5c0   :  { %37635 = vmatprep.mubr.msk.f32.mxu0 %vm41964_vm2, %v46150_v27  ;;  %37638 = vmatprep.subr.mxu0 %v46150_v27 }
 0x5c1   :  { %v41750_v46 = vpop.eup %41749 }
 0x5c2   :  { %37606 = vmatmul.mubr.f32.vlgmr.msra.gmra.mrb[16].mxu1 %v43013_v5  ;;  %8674 = vmax.xlane.f32.xlu1 %v8673_v43  ;;  %v8792_v24 = vmul.f32 %v41750_v46, %v42969_v33 }
 0x5c3   :  { %37609 = vmatpush3.msra.mxu1 %v43010_v10  ;;  %37610 = vmatprep.mubr.msk.f32.mxu1 %vm41964_vm2, %v46150_v27  ;;  %v8699_v10 = vsub.f32 %v42943_v63, %v8669_v23 }
 0x5c4   :  { %37613 = vmatprep.subr.mxu1 %v46150_v27  ;;  %v9718_v60 = vsel %vm1412_vm3, %v8792_v24, 0 }
 0x5c5   :  { %v43081_v33 = vand.u32 4294901760, %v9718_v60  ;;  %v8723_v12 = vmul.f32 1.442695, %v8699_v10 }
 0x5c6   :  { %37636 = vmatmul.mubr.f32.vlgmr.msra.gmra.mrb[24].mxu0 %v43024_v32  ;;  %8677 = vmax.xlane.f32.xlu1 %v8676_v40 }
 0x5c7   :  { %37639 = vmatpush3.msra.mxu0 %v43017_v16  ;;  %37640 = vmatprep.mubr.msk.f32.mxu0 %vm41964_vm2, %v46150_v27  ;;  %v43093_v3 = vsub.f32 %v9718_v60, %v43081_v33 }
 0x5c8   :  { %37643 = vmatprep.subr.mxu0 %v46150_v27 }
 0x5c9   :  { %v9788_v25 = vand.u32 4294901760, %v43093_v3 }
 0x5ca   :  { %37611 = vmatmul.mubr.f32.vlgmr.msra.gmra.mrb[16].mxu1 %v8889_v6  ;;  %8761 = vadd.xlane.f32.xlu1 %v8760_v45  ;;  %v43062_v47 = vpop.f32.mrb[22].mxu0 }
 0x5cb   :  { %37614 = vmatpush3.msra.mxu1 %v42930_v36  ;;  %v43065_v48 = vpop.f32.mrb[14].mxu1  ;;  %v37597_v50 = vpop.f32.mrb[23].mxu0  ;;  %37615 = vmatprep.mubr.msk.f32.mxu1 %vm41964_vm2, %v46150_v27 }
 0x5cc   :  { %v37567_v57 = vpop.f32.mrb[15].mxu1  ;;  %37618 = vmatprep.subr.mxu1 %v46150_v27  ;;  %v8685_v37 = vsel %vm1412_vm3, %v43065_v48, -inf }
 0x5ce   :  { %37641 = vmatmul.mubr.f32.vlgmr.msra.gmra.mrb[24].mxu0 %v9338_v54 }
 0x5cf   :  { %37644 = vmatpush3.msra.mxu0 %v42948_v35  ;;  %37645 = vmatprep.mubr.msk.f32.mxu0 %vm41964_vm2, %v46150_v27 }
 0x5d0   :  { %37648 = vmatprep.subr.mxu0 %v46150_v27 }
 0x5d2   :  { %37616 = vmatmul.mubr.f32.vlgmr.msra.gmra.mrb[16].mxu1 %v8890_v14 }
 0x5d3   :  { %37619 = vmatpush3.msra.mxu1 %v8901_v52  ;;  %37620 = vmatprep.mubr.msk.f32.mxu1 %vm41964_vm2, %v46150_v27 }
 0x5d4   :  { %37623 = vmatprep.subr.mxu1 %v46150_v27 }
 0x5d5   :  { %1382 = vrot.lane.b32.xlu0 %v42789_v41, %s41970_s30 }
 0x5d6   :  { %37646 = vmatmul.mubr.f32.vlgmr.msra.gmra.mrb[24].mxu0 %v9339_v9 }
 0x5d7   :  { %37649 = vmatpush3.msra.mxu0 %v9350_v44  ;;  %37650 = vmatprep.mubr.msk.f32.mxu0 %vm41964_vm2, %v46150_v27 }
 0x5d8   :  { %37653 = vmatprep.subr.mxu0 %v46150_v27 }
 0x5da   :  { %37621 = vmatmul.mubr.f32.vlgmr.msra.gmra.mrb[16].mxu1 %v43013_v5 }
 0x5db   :  { %37624 = vmatpush3.msra.mxu1 %v42930_v36  ;;  %1385 = vrot.lane.b32.xlu1 %v42789_v41, %s41971_s4  ;;  %v9789_v41 = vsub.f32 %v43093_v3, %v9788_v25  ;;  %v9800_v36 = vsub.f32 %v43096_v19, %v9799_v8 }
 0x5dc   :  { %37625 = vmatprep.mubr.msk.f32.mxu1 %vm41964_vm2, %v46150_v27  ;;  %37658 = vmatprep.subr.mxu1 %v46150_v27 }
 0x5dd   :  { %v9790_v63 = vand.u32 4294901760, %v9789_v41 }
 0x5de   :  { %37651 = vmatmul.mubr.f32.vlgmr.msra.gmra.mrb[24].mxu0 %v43024_v32 }
 0x5df   :  { %37654 = vmatpush3.msra.mxu0 %v42948_v35  ;;  %37655 = vmatprep.mubr.msk.f32.mxu0 %vm41964_vm2, %v46150_v27  ;;  %v9801_v35 = vand.u32 4294901760, %v9800_v36 }
 0x5e0   :  { %37688 = vmatprep.subr.mxu0 %v46150_v27 }
 0x5e2   :  { %37626 = vmatmul.mubr.f32.vlgmr.msra.gmra.mrb[16].mxu1 %v43013_v5  ;;  %v8750_v21 = vpop.xlane.xlu0 %8749  ;;  %v8672_v5 = vpop.xlane.xlu1 %8671 }
 0x5e3   :  { %37659 = vmatpush3.msra.mxu1 %v43083_v0  ;;  %41751 = vrcp.f32 %v8750_v21  ;;  %37660 = vmatprep.mubr.msk.f32.mxu1 %vm41964_vm2, %v46150_v27  ;;  %v8700_v52 = vsub.f32 %v42974_v30, %v8672_v5 }
 0x5e4   :  { %37663 = vmatprep.subr.mxu1 %v46150_v27  ;;  %41753 = vpow2.f32 %v8723_v12 }
 0x5e6   :  { %37661 = vmatmul.mubr.f32.vlgmr.msra.gmra.mrb[18].mxu1 %v9790_v63  ;;  %37656 = vmatmul.mubr.f32.vlgmr.msra.gmra.mrb[24].mxu0 %v43024_v32  ;;  %v1374_v16 = vpop.permute.xlu0 %1373  ;;  %v8725_v32 = vmul.f32 1.442695, %v8700_v52 }
 0x5e7   :  { %37664 = vmatpush3.msra.mxu1 %v9801_v35  ;;  %v43123_v58 = vand.u32 4294901760, %v1374_v16  ;;  %37665 = vmatprep.mubr.msk.f32.mxu1 %vm41964_vm2, %v46150_v27 }
 0x5e8   :  { %37668 = vmatprep.subr.mxu1 %v46150_v27  ;;  %37690 = vmatprep.mubr.msk.f32.mxu0 %vm41964_vm2, %v46150_v27  ;;  %41755 = vpow2.f32 %v8725_v32 }
 0x5e9   :  { %37689 = vmatpush3.msra.mxu0 %v43123_v58  ;;  %v10247_v15 = vsub.f32 %v1374_v16, %v43123_v58 }
 0x5ea   :  { %37693 = vmatprep.subr.mxu0 %v46150_v27 }
 0x5eb   :  { %v10248_v30 = vand.u32 4294901760, %v10247_v15 }
 0x5ed   :  { %v41752_v2 = vpop.eup %41751  ;;  %v10249_v54 = vsub.f32 %v10247_v15, %v10248_v30 }
 0x5ee   :  { %v8794_v6 = vmul.f32 %v41752_v2, %v42978_v55  ;;  %37666 = vmatmul.mubr.f32.vlgmr.msra.gmra.mrb[18].mxu1 %v43081_v33  ;;  %v43139_v18 = vpop.eup %41753 }
 0x5ef   :  { %37669 = vmatpush3.msra.mxu1 %v43096_v19  ;;  %37670 = vmatprep.mubr.msk.f32.mxu1 %vm41964_vm2, %v46150_v27  ;;  %v8763_v55 = vsel %vm1412_vm3, %v43139_v18, 0.0  ;;  %v10250_v53 = vand.u32 4294901760, %v10249_v54 }
 0x5f0   :  { %37673 = vmatprep.subr.mxu1 %v46150_v27  ;;  %v10167_v14 = vsel %vm1412_vm3, %v8794_v6, 0 }
 0x5f1   :  { %v43143_v44 = vand.u32 4294901760, %v10167_v14 }
 0x5f2   :  { %v43160_v62 = vpop.eup %41755 }
 0x5f3   :  { %v10236_v22 = vsub.f32 %v10167_v14, %v43143_v44  ;;  %v8766_v51 = vsel %vm1412_vm3, %v43160_v62, 0.0 }
 0x5f4   :  { %8764 = vadd.xlane.f32.xlu0 %v8763_v55 }
 0x5f5   :  { %v10237_v31 = vand.u32 4294901760, %v10236_v22 }
 0x5f6   :  { %37671 = vmatmul.mubr.f32.vlgmr.msra.gmra.mrb[18].mxu1 %v43093_v3 }
 0x5f7   :  { %37674 = vmatpush3.msra.mxu1 %v43083_v0  ;;  %v10238_v20 = vsub.f32 %v10236_v22, %v10237_v31  ;;  %37675 = vmatprep.mubr.msk.f32.mxu1 %vm41964_vm2, %v46150_v27 }
 0x5f8   :  { %8683 = vmax.xlane.f32.xlu0 %v8682_v29  ;;  %37678 = vmatprep.subr.mxu1 %v46150_v27 }
 0x5f9   :  { %v10239_v9 = vand.u32 4294901760, %v10238_v20 }
 0x5fb   :  { %37691 = vmatmul.mubr.f32.vlgmr.msra.gmra.mrb[26].mxu0 %v10239_v9 }
 0x5fc   :  { %37694 = vmatpush3.msra.mxu0 %v10250_v53  ;;  %37695 = vmatprep.mubr.msk.f32.mxu0 %vm41964_vm2, %v46150_v27 }
 0x5fd   :  { %37698 = vmatprep.subr.mxu0 %v46150_v27 }
 0x5fe   :  { %37676 = vmatmul.mubr.f32.vlgmr.msra.gmra.mrb[18].mxu1 %v9788_v25 }
 0x5ff   :  { %37679 = vmatpush3.msra.mxu1 %v9799_v8  ;;  %8680 = vmax.xlane.f32.xlu1 %v8679_v28 }
 0x600   :  { %37680 = vmatprep.mubr.msk.f32.mxu1 %vm41964_vm2, %v46150_v27  ;;  %37683 = vmatprep.subr.mxu1 %v46150_v27 }
 0x603   :  { %37696 = vmatmul.mubr.f32.vlgmr.msra.gmra.mrb[26].mxu0 %v43143_v44  ;;  %8767 = vadd.xlane.f32.xlu1 %v8766_v51 }
 0x604   :  { %37699 = vmatpush3.msra.mxu0 %v10247_v15  ;;  %37700 = vmatprep.mubr.msk.f32.mxu0 %vm41964_vm2, %v46150_v27 }
 0x605   :  { %37703 = vmatprep.subr.mxu0 %v46150_v27 }
 0x606   :  { %37681 = vmatmul.mubr.f32.vlgmr.msra.gmra.mrb[18].mxu1 %v43081_v33 }
 0x607   :  { %37684 = vmatpush3.msra.mxu1 %v43083_v0  ;;  %8686 = vmax.xlane.f32.xlu1 %v8685_v37 }
 0x608   :  { %37685 = vmatprep.mubr.msk.f32.mxu1 %vm41964_vm2, %v46150_v27  ;;  %37718 = vmatprep.subr.mxu1 %v46150_v27 }
 0x60b   :  { %37701 = vmatmul.mubr.f32.vlgmr.msra.gmra.mrb[26].mxu0 %v10236_v22 }
 0x60c   :  { %37704 = vmatpush3.msra.mxu0 %v43123_v58  ;;  %37705 = vmatprep.mubr.msk.f32.mxu0 %vm41964_vm2, %v46150_v27 }
 0x60d   :  { %37708 = vmatprep.subr.mxu0 %v46150_v27 }
 0x60e   :  { %37686 = vmatmul.mubr.f32.vlgmr.msra.gmra.mrb[18].mxu1 %v43081_v33  ;;  %1389 = vrot.lane.b32.xlu0 %v42265_v11, %s41966_s26 }
 0x60f   :  { %37720 = vmatprep.mubr.msk.f32.mxu1 %vm41964_vm2, %v46150_v27 }
 0x612   :  { %1395 = vrot.lane.b32.xlu0 %v42265_v11, %s41968_s28 }
 0x613   :  { %37706 = vmatmul.mubr.f32.vlgmr.msra.gmra.mrb[26].mxu0 %v10237_v31 }
 0x614   :  { %37709 = vmatpush3.msra.mxu0 %v10248_v30  ;;  %37710 = vmatprep.mubr.msk.f32.mxu0 %vm41964_vm2, %v46150_v27 }
 0x615   :  { %37713 = vmatprep.subr.mxu0 %v46150_v27 }
 0x617   :  { %v8753_v39 = vpop.xlane.xlu0 %8752 }
 0x618   :  { %41757 = vrcp.f32 %v8753_v39 }
 0x61a   :  { %v8756_v1 = vpop.xlane.xlu1 %8755 }
 0x61b   :  { %41759 = vrcp.f32 %v8756_v1  ;;  %37711 = vmatmul.mubr.f32.vlgmr.msra.gmra.mrb[26].mxu0 %v43143_v44  ;;  %v1380_v40 = vpop.permute.xlu0 %1379 }
 0x61c   :  { %37714 = vmatpush3.msra.mxu0 %v43123_v58  ;;  %37715 = vmatprep.mubr.msk.f32.mxu0 %vm41964_vm2, %v46150_v27  ;;  %v43202_v50 = vand.u32 4294901760, %v1380_v40 }
 0x61d   :  { %37748 = vmatprep.subr.mxu0 %v46150_v27 }
 0x61e   :  { %v1377_v43 = vpop.permute.xlu1 %1376  ;;  %v11145_v0 = vsub.f32 %v1380_v40, %v43202_v50  ;;  %v8688_v40 = vsel %vm1412_vm3, %v43062_v47, -inf }
 0x61f   :  { %v43199_v45 = vand.u32 4294901760, %v1377_v43 }
 0x620   :  { %v11146_v8 = vand.u32 4294901760, %v11145_v0 }
 0x621   :  { %37719 = vmatpush3.msra.mxu1 %v43199_v45  ;;  %v10696_v24 = vsub.f32 %v1377_v43, %v43199_v45 }
 0x622   :  { %v41758_v46 = vpop.eup %41757  ;;  %37723 = vmatprep.subr.mxu1 %v46150_v27 }
 0x623   :  { %v8796_v57 = vmul.f32 %v41758_v46, %v42992_v7  ;;  %37716 = vmatmul.mubr.f32.vlgmr.msra.gmra.mrb[26].mxu0 %v43143_v44  ;;  %v10697_v7 = vand.u32 4294901760, %v10696_v24 }
 0x624   :  { %37749 = vmatpush3.msra.mxu0 %v43202_v50  ;;  %37750 = vmatprep.mubr.msk.f32.mxu0 %vm41964_vm2, %v46150_v27 }
 0x625   :  { %v41760_v60 = vpop.eup %41759  ;;  %v10616_v61 = vsel %vm1412_vm3, %v8796_v57, 0  ;;  %37753 = vmatprep.subr.mxu0 %v46150_v27  ;;  %v10698_v41 = vsub.f32 %v10696_v24, %v10697_v7 }
 0x626   :  { %v8798_v33 = vmul.f32 %v41760_v60, %v42996_v56  ;;  %v43215_v3 = vand.u32 4294901760, %v10616_v61  ;;  %v11147_v56 = vsub.f32 %v11145_v0, %v11146_v8 }
 0x627   :  { %v10699_v35 = vand.u32 4294901760, %v10698_v41 }
 0x628   :  { %v10685_v19 = vsub.f32 %v10616_v61, %v43215_v3  ;;  %v11065_v23 = vsel %vm1412_vm3, %v8798_v33, 0  ;;  %v11148_v5 = vand.u32 4294901760, %v11147_v56 }
 0x629   :  { %v43219_v25 = vand.u32 4294901760, %v11065_v23 }
 0x62a   :  { %v10686_v10 = vand.u32 4294901760, %v10685_v19 }
 0x62b   :  { %v11134_v36 = vsub.f32 %v11065_v23, %v43219_v25 }
 0x62c   :  { %v10687_v12 = vsub.f32 %v10685_v19, %v10686_v10 }
 0x62d   :  { %v11135_v21 = vand.u32 4294901760, %v11134_v36 }
 0x62e   :  { %v10688_v63 = vand.u32 4294901760, %v10687_v12 }
 0x62f   :  { %v11136_v16 = vsub.f32 %v11134_v36, %v11135_v21 }
 0x630   :  { %37721 = vmatmul.mubr.f32.vlgmr.msra.gmra.mrb[20].mxu1 %v10688_v63 }
 0x631   :  { %37724 = vmatpush3.msra.mxu1 %v10699_v35  ;;  %v11137_v58 = vand.u32 4294901760, %v11136_v16  ;;  %37725 = vmatprep.mubr.msk.f32.mxu1 %vm41964_vm2, %v46150_v27 }
 0x632   :  { %37728 = vmatprep.subr.mxu1 %v46150_v27 }
 0x633   :  { %37751 = vmatmul.mubr.f32.vlgmr.msra.gmra.mrb[28].mxu0 %v11137_v58 }
 0x634   :  { %37754 = vmatpush3.msra.mxu0 %v11148_v5  ;;  %37755 = vmatprep.mubr.msk.f32.mxu0 %vm41964_vm2, %v46150_v27 }
 0x635   :  { %37758 = vmatprep.subr.mxu0 %v46150_v27 }
 0x638   :  { %37726 = vmatmul.mubr.f32.vlgmr.msra.gmra.mrb[20].mxu1 %v43215_v3 }
 0x639   :  { %37729 = vmatpush3.msra.mxu1 %v10696_v24  ;;  %37730 = vmatprep.mubr.msk.f32.mxu1 %vm41964_vm2, %v46150_v27 }
 0x63a   :  { %37733 = vmatprep.subr.mxu1 %v46150_v27 }
 0x63b   :  { %37756 = vmatmul.mubr.f32.vlgmr.msra.gmra.mrb[28].mxu0 %v43219_v25 }
 0x63c   :  { %37759 = vmatpush3.msra.mxu0 %v11145_v0  ;;  %37760 = vmatprep.mubr.msk.f32.mxu0 %vm41964_vm2, %v46150_v27 }
 0x63d   :  { %37763 = vmatprep.subr.mxu0 %v46150_v27 }
 0x640   :  { %37731 = vmatmul.mubr.f32.vlgmr.msra.gmra.mrb[20].mxu1 %v10685_v19 }
 0x641   :  { %37734 = vmatpush3.msra.mxu1 %v43199_v45  ;;  %37735 = vmatprep.mubr.msk.f32.mxu1 %vm41964_vm2, %v46150_v27 }
 0x642   :  { %37738 = vmatprep.subr.mxu1 %v46150_v27 }
 0x643   :  { %37761 = vmatmul.mubr.f32.vlgmr.msra.gmra.mrb[28].mxu0 %v11134_v36  ;;  %v43337_v36 = vand.u32 4294901760, %v42265_v11 }
 0x644   :  { %37764 = vmatpush3.msra.mxu0 %v43202_v50  ;;  %37765 = vmatprep.mubr.msk.f32.mxu0 %vm41964_vm2, %v46150_v27 }
 0x645   :  { %37768 = vmatprep.subr.mxu0 %v46150_v27 }
 0x648   :  { %37736 = vmatmul.mubr.f32.vlgmr.msra.gmra.mrb[20].mxu1 %v10686_v10 }
 0x649   :  { %37739 = vmatpush3.msra.mxu1 %v10697_v7  ;;  %37740 = vmatprep.mubr.msk.f32.mxu1 %vm41964_vm2, %v46150_v27 }
 0x64a   :  { %37743 = vmatprep.subr.mxu1 %v46150_v27 }
 0x64b   :  { %37766 = vmatmul.mubr.f32.vlgmr.msra.gmra.mrb[28].mxu0 %v11135_v21 }
 0x64c   :  { %37769 = vmatpush3.msra.mxu0 %v11146_v8  ;;  %v8759_v2 = vpop.xlane.xlu0 %8758  ;;  %37770 = vmatprep.mubr.msk.f32.mxu0 %vm41964_vm2, %v46150_v27 }
 0x64d   :  { %41761 = vrcp.f32 %v8759_v2  ;;  %37773 = vmatprep.subr.mxu0 %v46150_v27 }
 0x64f   :  { %v8675_v52 = vpop.xlane.xlu1 %8674 }
 0x650   :  { %v8701_v6 = vsub.f32 %v42980_v38, %v8675_v52  ;;  %37741 = vmatmul.mubr.f32.vlgmr.msra.gmra.mrb[20].mxu1 %v43215_v3  ;;  %v1383_v15 = vpop.permute.xlu0 %1382 }
 0x651   :  { %37744 = vmatpush3.msra.mxu1 %v43199_v45  ;;  %37745 = vmatprep.mubr.msk.f32.mxu1 %vm41964_vm2, %v46150_v27  ;;  %v43257_v44 = vand.u32 4294901760, %v1383_v15 }
 0x652   :  { %v8727_v14 = vmul.f32 1.442695, %v8701_v6  ;;  %37778 = vmatprep.subr.mxu1 %v46150_v27 }
 0x653   :  { %37771 = vmatmul.mubr.f32.vlgmr.msra.gmra.mrb[28].mxu0 %v43219_v25  ;;  %v8678_v32 = vpop.xlane.xlu1 %8677  ;;  %v43266_v54 = vsub.f32 %v1383_v15, %v43257_v44 }
 0x654   :  { %41763 = vpow2.f32 %v8727_v14  ;;  %37774 = vmatpush3.msra.mxu0 %v43202_v50  ;;  %v8702_v38 = vsub.f32 %v42986_v13, %v8678_v32  ;;  %37775 = vmatprep.mubr.msk.f32.mxu0 %vm41964_vm2, %v46150_v27 }
 0x655   :  { %37808 = vmatprep.subr.mxu0 %v46150_v27  ;;  %v11595_v20 = vand.u32 4294901760, %v43266_v54 }
 0x656   :  { %v8729_v30 = vmul.f32 1.442695, %v8702_v38 }
 0x657   :  { %v41762_v55 = vpop.eup %41761  ;;  %v8762_v22 = vpop.xlane.xlu1 %8761  ;;  %v11596_v39 = vsub.f32 %v43266_v54, %v11595_v20 }
 0x658   :  { %v8800_v31 = vmul.f32 %v41762_v55, %v43034_v4  ;;  %37746 = vmatmul.mubr.f32.vlgmr.msra.gmra.mrb[20].mxu1 %v43215_v3  ;;  %41765 = vrcp.f32 %v8762_v22 }
 0x659   :  { %37779 = vmatpush3.msra.mxu1 %v43257_v44  ;;  %37780 = vmatprep.mubr.msk.f32.mxu1 %vm41964_vm2, %v46150_v27  ;;  %41767 = vpow2.f32 %v8729_v30  ;;  %v11597_v24 = vand.u32 4294901760, %v11596_v39 }
 0x65a   :  { %37783 = vmatprep.subr.mxu1 %v46150_v27  ;;  %v11514_v13 = vsel %vm1412_vm3, %v8800_v31, 0 }
 0x65b   :  { %37776 = vmatmul.mubr.f32.vlgmr.msra.gmra.mrb[28].mxu0 %v43219_v25  ;;  %v1386_v29 = vpop.permute.xlu1 %1385  ;;  %v43275_v4 = vand.u32 4294901760, %v11514_v13 }
 0x65c   :  { %v43278_v9 = vand.u32 4294901760, %v1386_v29  ;;  %37810 = vmatprep.mubr.msk.f32.mxu0 %vm41964_vm2, %v46150_v27 }
 0x65d   :  { %v11583_v53 = vsub.f32 %v11514_v13, %v43275_v4 }
 0x65e   :  { %v43283_v28 = vpop.eup %41763  ;;  %37809 = vmatpush3.msra.mxu0 %v43278_v9  ;;  %v12043_v57 = vsub.f32 %v1386_v29, %v43278_v9 }
 0x65f   :  { %v8769_v51 = vsel %vm1412_vm3, %v43283_v28, 0.0  ;;  %v11584_v37 = vand.u32 4294901760, %v11583_v53  ;;  %37813 = vmatprep.subr.mxu0 %v46150_v27 }
 0x660   :  { %8770 = vadd.xlane.f32.xlu1 %v8769_v51  ;;  %v12044_v0 = vand.u32 4294901760, %v12043_v57 }
 0x661   :  { %v11585_v1 = vsub.f32 %v11583_v53, %v11584_v37 }
 0x662   :  { %v41766_v43 = vpop.eup %41765  ;;  %v12045_v7 = vsub.f32 %v12043_v57, %v12044_v0 }
 0x663   :  { %v11586_v45 = vand.u32 4294901760, %v11585_v1  ;;  %v43292_v46 = vpop.eup %41767  ;;  %v8802_v50 = vmul.f32 %v41766_v43, %v43053_v42 }
 0x664   :  { %8689 = vmax.xlane.f32.xlu1 %v8688_v40  ;;  %v8772_v61 = vsel %vm1412_vm3, %v43292_v46, 0.0  ;;  %v12046_v25 = vand.u32 4294901760, %v12045_v7 }
 0x665   :  { %37781 = vmatmul.mubr.f32.vlgmr.msra.gmra.mrb[22].mxu1 %v11586_v45  ;;  %v11963_v60 = vsel %vm1412_vm3, %v8802_v50, 0 }
 0x666   :  { %37784 = vmatpush3.msra.mxu1 %v11597_v24  ;;  %37785 = vmatprep.mubr.msk.f32.mxu1 %vm41964_vm2, %v46150_v27  ;;  %v43302_v33 = vand.u32 4294901760, %v11963_v60 }
 0x667   :  { %37788 = vmatprep.subr.mxu1 %v46150_v27 }
 0x668   :  { %8773 = vadd.xlane.f32.xlu1 %v8772_v61  ;;  %v12032_v42 = vsub.f32 %v11963_v60, %v43302_v33 }
 0x66a   :  { %v12033_v3 = vand.u32 4294901760, %v12032_v42 }
 0x66c   :  { %v12034_v19 = vsub.f32 %v12032_v42, %v12033_v3 }
 0x66d   :  { %37786 = vmatmul.mubr.f32.vlgmr.msra.gmra.mrb[22].mxu1 %v43275_v4 }
 0x66e   :  { %37789 = vmatpush3.msra.mxu1 %v43266_v54  ;;  %37790 = vmatprep.mubr.msk.f32.mxu1 %vm41964_vm2, %v46150_v27  ;;  %v12035_v23 = vand.u32 4294901760, %v12034_v19 }
 0x66f   :  { %37793 = vmatprep.subr.mxu1 %v46150_v27 }
 0x670   :  { %37811 = vmatmul.mubr.f32.vlgmr.msra.gmra.mrb[30].mxu0 %v12035_v23 }
 0x671   :  { %37814 = vmatpush3.msra.mxu0 %v12046_v25  ;;  %37815 = vmatprep.mubr.msk.f32.mxu0 %vm41964_vm2, %v46150_v27 }
 0x672   :  { %37818 = vmatprep.subr.mxu0 %v46150_v27 }
 0x675   :  { %37791 = vmatmul.mubr.f32.vlgmr.msra.gmra.mrb[22].mxu1 %v11583_v53 }
 0x676   :  { %37794 = vmatpush3.msra.mxu1 %v43257_v44  ;;  %37795 = vmatprep.mubr.msk.f32.mxu1 %vm41964_vm2, %v46150_v27 }
 0x677   :  { %37798 = vmatprep.subr.mxu1 %v46150_v27 }
 0x678   :  { %37816 = vmatmul.mubr.f32.vlgmr.msra.gmra.mrb[30].mxu0 %v43302_v33 }
 0x679   :  { %1392 = vrot.lane.b32.xlu1 %v42265_v11, %s41965_s2  ;;  %37819 = vmatpush3.msra.mxu0 %v12043_v57 }
 0x67a   :  { %37820 = vmatprep.mubr.msk.f32.mxu0 %vm41964_vm2, %v46150_v27  ;;  %37823 = vmatprep.subr.mxu0 %v46150_v27 }
 0x67d   :  { %37796 = vmatmul.mubr.f32.vlgmr.msra.gmra.mrb[22].mxu1 %v11584_v37 }
 0x67e   :  { %37799 = vmatpush3.msra.mxu1 %v11595_v20  ;;  %37800 = vmatprep.mubr.msk.f32.mxu1 %vm41964_vm2, %v46150_v27 }
 0x67f   :  { %37803 = vmatprep.subr.mxu1 %v46150_v27 }
 0x680   :  { %37821 = vmatmul.mubr.f32.vlgmr.msra.gmra.mrb[30].mxu0 %v12032_v42 }
 0x681   :  { %v8765_v8 = vpop.xlane.xlu0 %8764  ;;  %37824 = vmatpush3.msra.mxu0 %v43278_v9  ;;  %37825 = vmatprep.mubr.msk.f32.mxu0 %vm41964_vm2, %v46150_v27 }
 0x682   :  { %41769 = vrcp.f32 %v8765_v8  ;;  %37828 = vmatprep.subr.mxu0 %v46150_v27 }
 0x685   :  { %37801 = vmatmul.mubr.f32.vlgmr.msra.gmra.mrb[22].mxu1 %v43275_v4  ;;  %v8684_v10 = vpop.xlane.xlu0 %8683 }
 0x686   :  { %37804 = vmatpush3.msra.mxu1 %v43257_v44  ;;  %37805 = vmatprep.mubr.msk.f32.mxu1 %vm41964_vm2, %v46150_v27  ;;  %v8704_v41 = vsub.f32 %v43000_v59, %v8684_v10  ;;  %v43347_v59 = vsub.f32 %v42265_v11, %v43337_v36 }
 0x687   :  { %37838 = vmatprep.subr.mxu1 %v46150_v27 }
 0x688   :  { %37826 = vmatmul.mubr.f32.vlgmr.msra.gmra.mrb[30].mxu0 %v12033_v3  ;;  %v8733_v12 = vmul.f32 1.442695, %v8704_v41 }
 0x689   :  { %37829 = vmatpush3.msra.mxu0 %v12044_v0  ;;  %37830 = vmatprep.mubr.msk.f32.mxu0 %vm41964_vm2, %v46150_v27  ;;  %v1390_v6 = vpop.permute.xlu0 %1389 }
 0x68a   :  { %37833 = vmatprep.subr.mxu0 %v46150_v27  ;;  %41771 = vpow2.f32 %v8733_v12  ;;  %v43364_v32 = vand.u32 4294901760, %v1390_v6 }
 0x68c   :  { %v41770_v21 = vpop.eup %41769  ;;  %v8681_v63 = vpop.xlane.xlu1 %8680  ;;  %v12941_v13 = vsub.f32 %v1390_v6, %v43364_v32 }
 0x68d   :  { %v8804_v56 = vmul.f32 %v41770_v21, %v43139_v18  ;;  %v8703_v35 = vsub.f32 %v42990_v49, %v8681_v63  ;;  %37806 = vmatmul.mubr.f32.vlgmr.msra.gmra.mrb[22].mxu1 %v43275_v4  ;;  %v12493_v49 = vand.u32 4294901760, %v43347_v59 }
 0x68e   :  { %37839 = vmatpush3.msra.mxu1 %v43337_v36  ;;  %37840 = vmatprep.mubr.msk.f32.mxu1 %vm41964_vm2, %v46150_v27 }
 0x68f   :  { %v8731_v16 = vmul.f32 1.442695, %v8703_v35  ;;  %37843 = vmatprep.subr.mxu1 %v46150_v27  ;;  %v12412_v58 = vsel %vm1412_vm3, %v8804_v56, 0  ;;  %v12494_v15 = vsub.f32 %v43347_v59, %v12493_v49 }
 0x690   :  { %v8768_v18 = vpop.xlane.xlu1 %8767  ;;  %v43354_v5 = vand.u32 4294901760, %v12412_v58  ;;  %37831 = vmatmul.mubr.f32.vlgmr.msra.gmra.mrb[30].mxu0 %v43302_v33 }
 0x691   :  { %41773 = vpow2.f32 %v8731_v16  ;;  %37834 = vmatpush3.msra.mxu0 %v43278_v9  ;;  %37835 = vmatprep.mubr.msk.f32.mxu0 %vm41964_vm2, %v46150_v27  ;;  %v12495_v30 = vand.u32 4294901760, %v12494_v15  ;;  %v12942_v9 = vand.u32 4294901760, %v12941_v13 }
 0x692   :  { %41775 = vrcp.f32 %v8768_v18  ;;  %v12481_v2 = vsub.f32 %v12412_v58, %v43354_v5  ;;  %37868 = vmatprep.subr.mxu0 %v46150_v27 }
 0x694   :  { %v12482_v52 = vand.u32 4294901760, %v12481_v2  ;;  %v43366_v38 = vpop.eup %41771  ;;  %v8687_v50 = vpop.xlane.xlu1 %8686 }
 0x695   :  { %v8778_v54 = vsel %vm1412_vm3, %v43366_v38, 0.0  ;;  %v8705_v24 = vsub.f32 %v43065_v48, %v8687_v50  ;;  %v1396_v48 = vpop.permute.xlu0 %1395 }
 0x696   :  { %v12483_v14 = vsub.f32 %v12481_v2, %v12482_v52 }
 0x697   :  { %v8735_v60 = vmul.f32 1.442695, %v8705_v24 }
 0x698   :  { %v12484_v44 = vand.u32 4294901760, %v12483_v14  ;;  %37836 = vmatmul.mubr.f32.vlgmr.msra.gmra.mrb[30].mxu0 %v43302_v33  ;;  %v43431_v33 = vand.u32 4294901760, %v1396_v48 }
 0x699   :  { %37869 = vmatpush3.msra.mxu0 %v43364_v32  ;;  %37870 = vmatprep.mubr.msk.f32.mxu0 %vm41964_vm2, %v46150_v27  ;;  %41777 = vpow2.f32 %v8735_v60 }
 0x69a   :  { %37841 = vmatmul.mubr.f32.vlgmr.msra.gmra.mrb[24].mxu1 %v12484_v44  ;;  %37873 = vmatprep.subr.mxu0 %v46150_v27 }
 0x69b   :  { %v43370_v55 = vpop.eup %41773  ;;  %37844 = vmatpush3.msra.mxu1 %v12495_v30  ;;  %37845 = vmatprep.mubr.msk.f32.mxu1 %vm41964_vm2, %v46150_v27 }
 0x69c   :  { %v41776_v22 = vpop.eup %41775  ;;  %v8775_v31 = vsel %vm1412_vm3, %v43370_v55, 0.0  ;;  %37848 = vmatprep.subr.mxu1 %v46150_v27 }
 0x69d   :  { %v8806_v29 = vmul.f32 %v41776_v22, %v43160_v62  ;;  %8776 = vadd.xlane.f32.xlu0 %v8775_v31  ;;  %8779 = vadd.xlane.f32.xlu1 %v8778_v54  ;;  %v12943_v62 = vsub.f32 %v12941_v13, %v12942_v9 }
 0x69f   :  { %v12861_v4 = vsel %vm1412_vm3, %v8806_v29, 0  ;;  %v12944_v1 = vand.u32 4294901760, %v12943_v62 }
 0x6a0   :  { %v12929_v20 = vand.u32 4294901760, %v12861_v4 }
 0x6a2   :  { %37846 = vmatmul.mubr.f32.vlgmr.msra.gmra.mrb[24].mxu1 %v43354_v5  ;;  %v12930_v53 = vsub.f32 %v12861_v4, %v12929_v20 }
 0x6a3   :  { %37849 = vmatpush3.msra.mxu1 %v43347_v59  ;;  %37850 = vmatprep.mubr.msk.f32.mxu1 %vm41964_vm2, %v46150_v27  ;;  %v43429_v61 = vpop.eup %41777 }
 0x6a4   :  { %37853 = vmatprep.subr.mxu1 %v46150_v27  ;;  %v12931_v51 = vand.u32 4294901760, %v12930_v53  ;;  %v8781_v0 = vsel %vm1412_vm3, %v43429_v61, 0.0 }
 0x6a6   :  { %v12932_v37 = vsub.f32 %v12930_v53, %v12931_v51 }
 0x6a8   :  { %v12933_v39 = vand.u32 4294901760, %v12932_v37 }
 0x6aa   :  { %37871 = vmatmul.mubr.f32.vlgmr.msra.gmra.mrb[32].mxu0 %v12933_v39  ;;  %37851 = vmatmul.mubr.f32.vlgmr.msra.gmra.mrb[24].mxu1 %v12481_v2  ;;  %v13839_v2 = vsub.f32 %v1396_v48, %v43431_v33 }
 0x6ab   :  { %37874 = vmatpush3.msra.mxu0 %v12944_v1  ;;  %37854 = vmatpush3.msra.mxu1 %v43337_v36 }
 0x6ac   :  { %37875 = vmatprep.mubr.msk.f32.mxu0 %vm41964_vm2, %v46150_v27  ;;  %37878 = vmatprep.subr.mxu0 %v46150_v27  ;;  %v13840_v30 = vand.u32 4294901760, %v13839_v2 }
 0x6ad   :  { %37855 = vmatprep.mubr.msk.f32.mxu1 %vm41964_vm2, %v46150_v27  ;;  %37858 = vmatprep.subr.mxu1 %v46150_v27 }
 0x6ae   :  { %1401 = vrot.lane.b32.xlu1 %v42265_v11, %s41956_s23 }
 0x6b2   :  { %37876 = vmatmul.mubr.f32.vlgmr.msra.gmra.mrb[32].mxu0 %v12929_v20  ;;  %37856 = vmatmul.mubr.f32.vlgmr.msra.gmra.mrb[24].mxu1 %v12482_v52 }
 0x6b3   :  { %37879 = vmatpush3.msra.mxu0 %v12941_v13  ;;  %37859 = vmatpush3.msra.mxu1 %v12493_v49 }
 0x6b4   :  { %1398 = vrot.lane.b32.xlu0 %v42265_v11, %s41969_s29  ;;  %37880 = vmatprep.mubr.msk.f32.mxu0 %vm41964_vm2, %v46150_v27 }
 0x6b5   :  { %v43403_v43 = vpop.f32.mrb[16].mxu1  ;;  %37883 = vmatprep.subr.mxu0 %v46150_v27  ;;  %37860 = vmatprep.mubr.msk.f32.mxu1 %vm41964_vm2, %v46150_v27 }
 0x6b6   :  { %v37627_v40 = vpop.f32.mrb[17].mxu1  ;;  %37863 = vmatprep.subr.mxu1 %v46150_v27 }
 0x6b9   :  { %v9713_v45 = vpop.f32.mrb[24].mxu0 }
 0x6ba   :  { %37881 = vmatmul.mubr.f32.vlgmr.msra.gmra.mrb[32].mxu0 %v12930_v53  ;;  %v37657_v57 = vpop.f32.mrb[25].mxu0  ;;  %37861 = vmatmul.mubr.f32.vlgmr.msra.gmra.mrb[24].mxu1 %v43354_v5 }
 0x6bb   :  { %37884 = vmatpush3.msra.mxu0 %v43364_v32  ;;  %37864 = vmatpush3.msra.mxu1 %v43337_v36 }
 0x6bc   :  { %37885 = vmatprep.mubr.msk.f32.mxu0 %vm41964_vm2, %v46150_v27  ;;  %37888 = vmatprep.subr.mxu0 %v46150_v27 }
 0x6bd   :  { %37865 = vmatprep.mubr.msk.f32.mxu1 %vm41964_vm2, %v46150_v27  ;;  %37898 = vmatprep.subr.mxu1 %v46150_v27 }
 0x6c2   :  { %37886 = vmatmul.mubr.f32.vlgmr.msra.gmra.mrb[32].mxu0 %v12931_v51  ;;  %37866 = vmatmul.mubr.f32.vlgmr.msra.gmra.mrb[24].mxu1 %v43354_v5 }
 0x6c3   :  { %37889 = vmatpush3.msra.mxu0 %v12942_v9  ;;  %37890 = vmatprep.mubr.msk.f32.mxu0 %vm41964_vm2, %v46150_v27 }
 0x6c4   :  { %37893 = vmatprep.subr.mxu0 %v46150_v27  ;;  %37900 = vmatprep.mubr.msk.f32.mxu1 %vm41964_vm2, %v46150_v27 }
 0x6ca   :  { %37891 = vmatmul.mubr.f32.vlgmr.msra.gmra.mrb[32].mxu0 %v12929_v20 }
 0x6cb   :  { %37894 = vmatpush3.msra.mxu0 %v43364_v32  ;;  %37895 = vmatprep.mubr.msk.f32.mxu0 %vm41964_vm2, %v46150_v27 }
 0x6cc   :  { %37928 = vmatprep.subr.mxu0 %v46150_v27 }
 0x6d2   :  { %37896 = vmatmul.mubr.f32.vlgmr.msra.gmra.mrb[32].mxu0 %v12929_v20 }
 0x6d3   :  { %37929 = vmatpush3.msra.mxu0 %v43431_v33  ;;  %8782 = vadd.xlane.f32.xlu0 %v8781_v0 }
 0x6d4   :  { %37930 = vmatprep.mubr.msk.f32.mxu0 %vm41964_vm2, %v46150_v27  ;;  %37933 = vmatprep.subr.mxu0 %v46150_v27 }
 0x6e1   :  { %v10162_v42 = vpop.f32.mrb[18].mxu1 }
 0x6e2   :  { %v37687_v3 = vpop.f32.mrb[19].mxu1 }
 0x6e9   :  { %1404 = vrot.lane.b32.xlu0 %v42265_v11, %s41970_s30 }
 0x6ed   :  { %16004 = vrot.lane.b32.xlu0 %v9713_v45, %s41959_s9  ;;  %v8771_v7 = vpop.xlane.xlu1 %8770 }
 0x6ee   :  { %41779 = vrcp.f32 %v8771_v7 }
 0x6f1   :  { %16008 = vrot.lane.b32.xlu0 %v10162_v42, %s41962_s22  ;;  %v8690_v19 = vpop.xlane.xlu1 %8689 }
 0x6f2   :  { %v8706_v23 = vsub.f32 %v43062_v47, %v8690_v19 }
 0x6f4   :  { %v8737_v25 = vmul.f32 1.442695, %v8706_v23 }
 0x6f5   :  { %v8774_v8 = vpop.xlane.xlu1 %8773 }
 0x6f6   :  { %41781 = vpow2.f32 %v8737_v25  ;;  %v10611_v10 = vpop.f32.mrb[26].mxu0 }
 0x6f7   :  { %41783 = vrcp.f32 %v8774_v8  ;;  %v37717_v41 = vpop.f32.mrb[27].mxu0 }
 0x6f8   :  { %v41780_v36 = vpop.eup %41779 }
 0x6f9   :  { %v8808_v12 = vmul.f32 %v41780_v36, %v43283_v28  ;;  %v1393_v21 = vpop.permute.xlu1 %1392 }
 0x6fa   :  { %v13313_v63 = vand.u32 4294901760, %v1393_v21 }
 0x6fb   :  { %v13310_v56 = vsel %vm1412_vm3, %v8808_v12, 0 }
 0x6fc   :  { %v13390_v35 = vsub.f32 %v1393_v21, %v13313_v63  ;;  %37899 = vmatpush3.msra.mxu1 %v13313_v63  ;;  %v43446_v59 = vand.u32 4294901760, %v13310_v56 }
 0x6fd   :  { %37903 = vmatprep.subr.mxu1 %v46150_v27 }
 0x6fe   :  { %v13391_v47 = vand.u32 4294901760, %v13390_v35  ;;  %v13379_v16 = vsub.f32 %v13310_v56, %v43446_v59 }
 0x700   :  { %v43450_v58 = vpop.eup %41781  ;;  %v13380_v18 = vand.u32 4294901760, %v13379_v16  ;;  %v13392_v49 = vsub.f32 %v13390_v35, %v13391_v47 }
 0x701   :  { %v41784_v5 = vpop.eup %41783  ;;  %v8784_v28 = vsel %vm1412_vm3, %v43450_v58, 0.0 }
 0x702   :  { %v8810_v52 = vmul.f32 %v41784_v5, %v43292_v46  ;;  %8785 = vadd.xlane.f32.xlu1 %v8784_v28  ;;  %v13381_v6 = vsub.f32 %v13379_v16, %v13380_v18  ;;  %v13393_v32 = vand.u32 4294901760, %v13392_v49  ;;  %v13841_v46 = vsub.f32 %v13839_v2, %v13840_v30 }
 0x704   :  { %v13382_v15 = vand.u32 4294901760, %v13381_v6  ;;  %v13759_v14 = vsel %vm1412_vm3, %v8810_v52, 0  ;;  %v13842_v29 = vand.u32 4294901760, %v13841_v46 }
 0x705   :  { %v43457_v44 = vand.u32 4294901760, %v13759_v14 }
 0x706   :  { %37901 = vmatmul.mubr.f32.vlgmr.msra.gmra.mrb[26].mxu1 %v13382_v15 }
 0x707   :  { %37904 = vmatpush3.msra.mxu1 %v13393_v32  ;;  %37905 = vmatprep.mubr.msk.f32.mxu1 %vm41964_vm2, %v46150_v27  ;;  %v13828_v22 = vsub.f32 %v13759_v14, %v43457_v44 }
 0x708   :  { %37908 = vmatprep.subr.mxu1 %v46150_v27 }
 0x709   :  { %v13829_v31 = vand.u32 4294901760, %v13828_v22 }
 0x70b   :  { %v13830_v54 = vsub.f32 %v13828_v22, %v13829_v31 }
 0x70d   :  { %v13831_v13 = vand.u32 4294901760, %v13830_v54 }
 0x70e   :  { %37906 = vmatmul.mubr.f32.vlgmr.msra.gmra.mrb[26].mxu1 %v43446_v59 }
 0x70f   :  { %37909 = vmatpush3.msra.mxu1 %v13390_v35  ;;  %37931 = vmatmul.mubr.f32.vlgmr.msra.gmra.mrb[34].mxu0 %v13831_v13 }
 0x710   :  { %37934 = vmatpush3.msra.mxu0 %v13842_v29  ;;  %37910 = vmatprep.mubr.msk.f32.mxu1 %vm41964_vm2, %v46150_v27 }
 0x711   :  { %37913 = vmatprep.subr.mxu1 %v46150_v27  ;;  %37935 = vmatprep.mubr.msk.f32.mxu0 %vm41964_vm2, %v46150_v27 }
 0x712   :  { %37938 = vmatprep.subr.mxu0 %v46150_v27 }
 0x713   :  { %1407 = vrot.lane.b32.xlu1 %v42265_v11, %s41971_s4 }
 0x716   :  { %37911 = vmatmul.mubr.f32.vlgmr.msra.gmra.mrb[26].mxu1 %v13379_v16 }
 0x717   :  { %37914 = vmatpush3.msra.mxu1 %v13313_v63  ;;  %37936 = vmatmul.mubr.f32.vlgmr.msra.gmra.mrb[34].mxu0 %v43457_v44 }
 0x718   :  { %37939 = vmatpush3.msra.mxu0 %v13839_v2  ;;  %16012 = vrot.lane.b32.xlu1 %v10611_v10, %s41972_s5 }
 0x719   :  { %37915 = vmatprep.mubr.msk.f32.mxu1 %vm41964_vm2, %v46150_v27  ;;  %37918 = vmatprep.subr.mxu1 %v46150_v27 }
 0x71a   :  { %37940 = vmatprep.mubr.msk.f32.mxu0 %vm41964_vm2, %v46150_v27  ;;  %37943 = vmatprep.subr.mxu0 %v46150_v27 }
 0x71e   :  { %37916 = vmatmul.mubr.f32.vlgmr.msra.gmra.mrb[26].mxu1 %v13380_v18 }
 0x71f   :  { %37919 = vmatpush3.msra.mxu1 %v13391_v47  ;;  %37941 = vmatmul.mubr.f32.vlgmr.msra.gmra.mrb[34].mxu0 %v13828_v22 }
 0x720   :  { %37944 = vmatpush3.msra.mxu0 %v43431_v33  ;;  %37920 = vmatprep.mubr.msk.f32.mxu1 %vm41964_vm2, %v46150_v27 }
 0x721   :  { %37923 = vmatprep.subr.mxu1 %v46150_v27  ;;  %37945 = vmatprep.mubr.msk.f32.mxu0 %vm41964_vm2, %v46150_v27 }
 0x722   :  { %37948 = vmatprep.subr.mxu0 %v46150_v27 }
 0x726   :  { %37921 = vmatmul.mubr.f32.vlgmr.msra.gmra.mrb[26].mxu1 %v43446_v59 }
 0x727   :  { %37924 = vmatpush3.msra.mxu1 %v13313_v63  ;;  %37946 = vmatmul.mubr.f32.vlgmr.msra.gmra.mrb[34].mxu0 %v13829_v31 }
 0x728   :  { %37949 = vmatpush3.msra.mxu0 %v13840_v30  ;;  %37925 = vmatprep.mubr.msk.f32.mxu1 %vm41964_vm2, %v46150_v27 }
 0x729   :  { %37950 = vmatprep.mubr.msk.f32.mxu0 %vm41964_vm2, %v46150_v27  ;;  %37953 = vmatprep.subr.mxu0 %v46150_v27 }
 0x72a   :  { %v8777_v11 = vpop.xlane.xlu0 %8776  ;;  %v8780_v4 = vpop.xlane.xlu1 %8779  ;;  %37958 = vmatprep.subr.mxu1 %v46150_v27 }
 0x72b   :  { %41785 = vrcp.f32 %v8777_v11  ;;  %v11060_v20 = vpop.f32.mrb[20].mxu1 }
 0x72c   :  { %41787 = vrcp.f32 %v8780_v4  ;;  %v37747_v9 = vpop.f32.mrb[21].mxu1  ;;  %16016 = vrot.lane.b32.xlu1 %v11060_v20, %s41973_s6 }
 0x72e   :  { %v1399_v53 = vpop.permute.xlu0 %1398  ;;  %37926 = vmatmul.mubr.f32.vlgmr.msra.gmra.mrb[26].mxu1 %v43446_v59  ;;  %v11509_v62 = vpop.f32.mrb[28].mxu0 }
 0x72f   :  { %v43496_v51 = vand.u32 4294901760, %v1399_v53  ;;  %37951 = vmatmul.mubr.f32.vlgmr.msra.gmra.mrb[34].mxu0 %v43457_v44  ;;  %37960 = vmatprep.mubr.msk.f32.mxu1 %vm41964_vm2, %v46150_v27  ;;  %v1402_v37 = vpop.permute.xlu1 %1401  ;;  %v37777_v39 = vpop.f32.mrb[29].mxu0 }
 0x730   :  { %37954 = vmatpush3.msra.mxu0 %v43431_v33  ;;  %16020 = vrot.lane.b32.xlu1 %v11509_v62, %s41974_s7  ;;  %v43508_v1 = vand.u32 4294901760, %v1402_v37 }
 0x731   :  { %37959 = vmatpush3.msra.mxu1 %v43496_v51  ;;  %37955 = vmatprep.mubr.msk.f32.mxu0 %vm41964_vm2, %v46150_v27  ;;  %v14288_v57 = vsub.f32 %v1399_v53, %v43496_v51 }
 0x732   :  { %37988 = vmatprep.subr.mxu0 %v46150_v27  ;;  %37963 = vmatprep.subr.mxu1 %v46150_v27  ;;  %v14737_v60 = vsub.f32 %v1402_v37, %v43508_v1 }
 0x733   :  { %v14289_v0 = vand.u32 4294901760, %v14288_v57 }
 0x735   :  { %v41786_v40 = vpop.eup %41785  ;;  %v14290_v23 = vsub.f32 %v14288_v57, %v14289_v0 }
 0x736   :  { %v41788_v45 = vpop.eup %41787  ;;  %v8812_v50 = vmul.f32 %v41786_v40, %v43370_v55 }
 0x737   :  { %v8814_v24 = vmul.f32 %v41788_v45, %v43366_v38  ;;  %37956 = vmatmul.mubr.f32.vlgmr.msra.gmra.mrb[34].mxu0 %v43457_v44  ;;  %v14738_v38 = vand.u32 4294901760, %v14737_v60  ;;  %v14291_v12 = vand.u32 4294901760, %v14290_v23 }
 0x738   :  { %37989 = vmatpush3.msra.mxu0 %v43508_v1  ;;  %37990 = vmatprep.mubr.msk.f32.mxu0 %vm41964_vm2, %v46150_v27  ;;  %v14208_v48 = vsel %vm1412_vm3, %v8812_v50, 0 }
 0x739   :  { %37993 = vmatprep.subr.mxu0 %v46150_v27  ;;  %v43520_v33 = vand.u32 4294901760, %v14208_v48  ;;  %v14657_v55 = vsel %vm1412_vm3, %v8814_v24, 0  ;;  %v14739_v10 = vsub.f32 %v14737_v60, %v14738_v38 }
 0x73a   :  { %v43523_v42 = vand.u32 4294901760, %v14657_v55 }
 0x73b   :  { %v14277_v3 = vsub.f32 %v14208_v48, %v43520_v33  ;;  %v14740_v63 = vand.u32 4294901760, %v14739_v10 }
 0x73c   :  { %v14726_v7 = vsub.f32 %v14657_v55, %v43523_v42 }
 0x73d   :  { %v14278_v19 = vand.u32 4294901760, %v14277_v3 }
 0x73e   :  { %v14727_v25 = vand.u32 4294901760, %v14726_v7 }
 0x73f   :  { %v14279_v8 = vsub.f32 %v14277_v3, %v14278_v19 }
 0x740   :  { %v14728_v41 = vsub.f32 %v14726_v7, %v14727_v25 }
 0x741   :  { %v14280_v36 = vand.u32 4294901760, %v14279_v8 }
 0x742   :  { %v14729_v21 = vand.u32 4294901760, %v14728_v41 }
 0x743   :  { %37961 = vmatmul.mubr.f32.vlgmr.msra.gmra.mrb[28].mxu1 %v14280_v36 }
 0x744   :  { %37964 = vmatpush3.msra.mxu1 %v14291_v12  ;;  %37991 = vmatmul.mubr.f32.vlgmr.msra.gmra.mrb[36].mxu0 %v14729_v21 }
 0x745   :  { %37994 = vmatpush3.msra.mxu0 %v14740_v63  ;;  %37965 = vmatprep.mubr.msk.f32.mxu1 %vm41964_vm2, %v46150_v27 }
 0x746   :  { %37968 = vmatprep.subr.mxu1 %v46150_v27  ;;  %37995 = vmatprep.mubr.msk.f32.mxu0 %vm41964_vm2, %v46150_v27 }
 0x747   :  { %37998 = vmatprep.subr.mxu0 %v46150_v27 }
 0x74b   :  { %37966 = vmatmul.mubr.f32.vlgmr.msra.gmra.mrb[28].mxu1 %v43520_v33 }
 0x74c   :  { %37969 = vmatpush3.msra.mxu1 %v14288_v57  ;;  %37996 = vmatmul.mubr.f32.vlgmr.msra.gmra.mrb[36].mxu0 %v43523_v42 }
 0x74d   :  { %37999 = vmatpush3.msra.mxu0 %v14737_v60  ;;  %37970 = vmatprep.mubr.msk.f32.mxu1 %vm41964_vm2, %v46150_v27 }
 0x74e   :  { %37973 = vmatprep.subr.mxu1 %v46150_v27  ;;  %38000 = vmatprep.mubr.msk.f32.mxu0 %vm41964_vm2, %v46150_v27 }
 0x74f   :  { %38003 = vmatprep.subr.mxu0 %v46150_v27 }
 0x753   :  { %37971 = vmatmul.mubr.f32.vlgmr.msra.gmra.mrb[28].mxu1 %v14277_v3 }
 0x754   :  { %37974 = vmatpush3.msra.mxu1 %v43496_v51  ;;  %38001 = vmatmul.mubr.f32.vlgmr.msra.gmra.mrb[36].mxu0 %v14726_v7 }
 0x755   :  { %38004 = vmatpush3.msra.mxu0 %v43508_v1  ;;  %37975 = vmatprep.mubr.msk.f32.mxu1 %vm41964_vm2, %v46150_v27 }
 0x756   :  { %37978 = vmatprep.subr.mxu1 %v46150_v27  ;;  %38005 = vmatprep.mubr.msk.f32.mxu0 %vm41964_vm2, %v46150_v27 }
 0x757   :  { %38008 = vmatprep.subr.mxu0 %v46150_v27 }
 0x75b   :  { %37976 = vmatmul.mubr.f32.vlgmr.msra.gmra.mrb[28].mxu1 %v14278_v19 }
 0x75c   :  { %37979 = vmatpush3.msra.mxu1 %v14289_v0  ;;  %38006 = vmatmul.mubr.f32.vlgmr.msra.gmra.mrb[36].mxu0 %v14727_v25 }
 0x75d   :  { %38009 = vmatpush3.msra.mxu0 %v14738_v38  ;;  %37980 = vmatprep.mubr.msk.f32.mxu1 %vm41964_vm2, %v46150_v27 }
 0x75e   :  { %37983 = vmatprep.subr.mxu1 %v46150_v27  ;;  %38010 = vmatprep.mubr.msk.f32.mxu0 %vm41964_vm2, %v46150_v27 }
 0x75f   :  { %38013 = vmatprep.subr.mxu0 %v46150_v27 }
 0x760   :  { %v8783_v56 = vpop.xlane.xlu0 %8782  ;;  %v11958_v35 = vpop.f32.mrb[22].mxu1 }
 0x761   :  { %41789 = vrcp.f32 %v8783_v56  ;;  %v37807_v59 = vpop.f32.mrb[23].mxu1  ;;  %16024 = vrot.lane.b32.xlu1 %v11958_v35, %s41975_s8 }
 0x763   :  { %37981 = vmatmul.mubr.f32.vlgmr.msra.gmra.mrb[28].mxu1 %v43520_v33 }
 0x764   :  { %37984 = vmatpush3.msra.mxu1 %v43496_v51  ;;  %38011 = vmatmul.mubr.f32.vlgmr.msra.gmra.mrb[36].mxu0 %v43523_v42  ;;  %v1405_v47 = vpop.permute.xlu0 %1404 }
 0x765   :  { %38014 = vmatpush3.msra.mxu0 %v43508_v1  ;;  %37985 = vmatprep.mubr.msk.f32.mxu1 %vm41964_vm2, %v46150_v27  ;;  %v15109_v16 = vand.u32 4294901760, %v1405_v47 }
 0x766   :  { %38015 = vmatprep.mubr.msk.f32.mxu0 %vm41964_vm2, %v46150_v27  ;;  %38018 = vmatprep.subr.mxu1 %v46150_v27 }
 0x767   :  { %38048 = vmatprep.subr.mxu0 %v46150_v27  ;;  %v15186_v28 = vsub.f32 %v1405_v47, %v15109_v16 }
 0x768   :  { %v16005_v60 = vpop.permute.xlu0 %16004 }
 0x769   :  { %v15187_v6 = vand.u32 4294901760, %v15186_v28  ;;  %v16031_v55 = vsel %vm1412_vm3, %v43403_v43, %v16005_v60 }
 0x76b   :  { %v41790_v18 = vpop.eup %41789  ;;  %37986 = vmatmul.mubr.f32.vlgmr.msra.gmra.mrb[28].mxu1 %v43520_v33  ;;  %v12407_v49 = vpop.f32.mrb[30].mxu0  ;;  %v15188_v32 = vsub.f32 %v15186_v28, %v15187_v6 }
 0x76c   :  { %v8816_v5 = vmul.f32 %v41790_v18, %v43429_v61  ;;  %38016 = vmatmul.mubr.f32.vlgmr.msra.gmra.mrb[36].mxu0 %v43523_v42  ;;  %38019 = vmatpush3.msra.mxu1 %v15109_v16  ;;  %v37837_v2 = vpop.f32.mrb[31].mxu0  ;;  %v16009_v33 = vpop.permute.xlu0 %16008 }
 0x76d   :  { %16028 = vrot.lane.b32.xlu1 %v12407_v49, %s41976_s1  ;;  %38020 = vmatprep.mubr.msk.f32.mxu1 %vm41964_vm2, %v46150_v27  ;;  %v15189_v22 = vand.u32 4294901760, %v15188_v32  ;;  %v16032_v0 = vsel %vm68_vm0, %v16031_v55, %v16009_v33  ;;  %v595_v49 = vld [vmem:[#allocation5 + $0xc8] sm:$0xff] }
 0x76e   :  { %38023 = vmatprep.subr.mxu1 %v46150_v27  ;;  %v15106_v52 = vsel %vm1412_vm3, %v8816_v5, 0  ;;  %38050 = vmatprep.mubr.msk.f32.mxu0 %vm41964_vm2, %v46150_v27  ;;  %v593_v5 = vld [vmem:[#allocation5 + $0x18] sm:$0xff] }
 0x76f   :  { %v15174_v61 = vand.u32 4294901760, %v15106_v52  ;;  %v16085_v2 = vand.u32 4294901760, %v593_v5 }
 0x771   :  { %v15175_v15 = vsub.f32 %v15106_v52, %v15174_v61 }
 0x773   :  { %v15176_v14 = vand.u32 4294901760, %v15175_v15 }
 0x775   :  { %v15177_v44 = vsub.f32 %v15175_v15, %v15176_v14 }
 0x777   :  { %v15178_v30 = vand.u32 4294901760, %v15177_v44 }
 0x779   :  { %38021 = vmatmul.mubr.f32.vlgmr.msra.gmra.mrb[30].mxu1 %v15178_v30 }
 0x77a   :  { %38024 = vmatpush3.msra.mxu1 %v15189_v22  ;;  %38025 = vmatprep.mubr.msk.f32.mxu1 %vm41964_vm2, %v46150_v27  ;;  %v597_v22 = vld [vmem:[#allocation5 + $0x178] sm:$0xff] }
 0x77b   :  { %38028 = vmatprep.subr.mxu1 %v46150_v27 }
 0x781   :  { %38026 = vmatmul.mubr.f32.vlgmr.msra.gmra.mrb[30].mxu1 %v15174_v61 }
 0x782   :  { %38029 = vmatpush3.msra.mxu1 %v15186_v28  ;;  %38030 = vmatprep.mubr.msk.f32.mxu1 %vm41964_vm2, %v46150_v27  ;;  %v594_v28 = vld [vmem:[#allocation5 + $0x70] sm:$0xff] }
 0x783   :  { %38033 = vmatprep.subr.mxu1 %v46150_v27  ;;  %v16088_v52 = vand.u32 4294901760, %v594_v28 }
 0x789   :  { %38031 = vmatmul.mubr.f32.vlgmr.msra.gmra.mrb[30].mxu1 %v15175_v15 }
 0x78a   :  { %38034 = vmatpush3.msra.mxu1 %v15109_v16  ;;  %38035 = vmatprep.mubr.msk.f32.mxu1 %vm41964_vm2, %v46150_v27 }
 0x78b   :  { %38038 = vmatprep.subr.mxu1 %v46150_v27 }
 0x78f   :  { %v8786_v31 = vpop.xlane.xlu1 %8785 }
 0x790   :  { %41791 = vrcp.f32 %v8786_v31  ;;  %v598_v31 = vld [vmem:[#allocation5 + $0x1d0] sm:$0xff] }
 0x791   :  { %38036 = vmatmul.mubr.f32.vlgmr.msra.gmra.mrb[30].mxu1 %v15176_v14  ;;  %v43632_v14 = vpack.c.bf16 %v16088_v52, %v16085_v2 }
 0x792   :  { %38039 = vmatpush3.msra.mxu1 %v15187_v6  ;;  %38040 = vmatprep.mubr.msk.f32.mxu1 %vm41964_vm2, %v46150_v27  ;;  %v16091_v6 = vand.u32 4294901760, %v595_v49 }
 0x793   :  { %v1408_v46 = vpop.permute.xlu1 %1407  ;;  %38043 = vmatprep.subr.mxu1 %v46150_v27 }
 0x794   :  { %v15558_v54 = vand.u32 4294901760, %v1408_v46 }
 0x795   :  { %v43588_v13 = vpop.f32.mrb[24].mxu1 }
 0x796   :  { %v37867_v29 = vpop.f32.mrb[25].mxu1  ;;  %38049 = vmatpush3.msra.mxu0 %v15558_v54  ;;  %v15635_v20 = vsub.f32 %v1408_v46, %v15558_v54  ;;  %v16097_v46 = vand.u32 4294901760, %v597_v22 }
 0x797   :  { %38053 = vmatprep.subr.mxu0 %v46150_v27 }
 0x798   :  { %v15636_v51 = vand.u32 4294901760, %v15635_v20  ;;  %v16207_v55 = vsub.f32 %v597_v22, %v16097_v46 }
 0x799   :  { %38041 = vmatmul.mubr.f32.vlgmr.msra.gmra.mrb[30].mxu1 %v15174_v61 }
 0x79a   :  { %v41792_v11 = vpop.eup %41791  ;;  %38044 = vmatpush3.msra.mxu1 %v15109_v16  ;;  %38045 = vmatprep.mubr.msk.f32.mxu1 %vm41964_vm2, %v46150_v27  ;;  %v15637_v39 = vsub.f32 %v15635_v20, %v15636_v51 }
 0x79b   :  { %v8818_v4 = vmul.f32 %v41792_v11, %v43450_v58  ;;  %v16013_v58 = vpop.permute.xlu1 %16012  ;;  %40065 = vmatprep.subr.bf16.mxu1 %v43632_v14  ;;  %v16179_v11 = vsub.f32 %v593_v5, %v16085_v2 }
 0x79c   :  { %v15638_v57 = vand.u32 4294901760, %v15637_v39  ;;  %v16034_v38 = vsel %vm16033_vm4, %v16032_v0, %v16013_v58 }
 0x79d   :  { %v15555_v9 = vsel %vm1412_vm3, %v8818_v4, 0  ;;  %v16186_v4 = vsub.f32 %v594_v28, %v16088_v52 }
 0x79e   :  { %v15623_v53 = vand.u32 4294901760, %v15555_v9 }
 0x79f   :  { %v16017_v24 = vpop.permute.xlu1 %16016  ;;  %v40096_v52 = vpack.c.bf16 %v16186_v4, %v16179_v11 }
 0x7a0   :  { %v15624_v62 = vsub.f32 %v15555_v9, %v15623_v53  ;;  %v16036_v3 = vsel %vm16035_vm5, %v16034_v38, %v16017_v24  ;;  %v600_v9 = vld [vmem:[#allocation5 + $0x280] sm:$0xff] }
 0x7a1   :  { %38046 = vmatmul.mubr.f32.vlgmr.msra.gmra.mrb[30].mxu1 %v15174_v61  ;;  %v596_v61 = vld [vmem:[#allocation5 + $0x120] sm:$0xff] }
 0x7a2   :  { %v15625_v37 = vand.u32 4294901760, %v15624_v62  ;;  %v16094_v15 = vand.u32 4294901760, %v596_v61  ;;  %40067 = vmatpush3.bf16.msra.mxu1 %v43632_v14 }
 0x7a3   :  { %v16021_v48 = vpop.permute.xlu1 %16020 }
 0x7a4   :  { %v15626_v1 = vsub.f32 %v15624_v62, %v15625_v37  ;;  %v16038_v7 = vsel %vm16037_vm6, %v16036_v3, %v16021_v48  ;;  %v43634_v32 = vpack.c.bf16 %v16094_v15, %v16091_v6 }
 0x7a5   :  { %v13305_v40 = vpop.f32.mrb[32].mxu0 }
 0x7a6   :  { %16044 = vrot.lane.b32.xlu0 %v13305_v40, %s41959_s9  ;;  %v37897_v45 = vpop.f32.mrb[33].mxu0  ;;  %v15627_v50 = vand.u32 4294901760, %v15626_v1  ;;  %40069 = vmatprep.subr.bf16.mxu1 %v43634_v32 }
 0x7a7   :  { %40071 = vmatpush3.bf16.msra.mxu1 %v43634_v32  ;;  %v16193_v45 = vsub.f32 %v595_v49, %v16091_v6 }
 0x7a8   :  { %38051 = vmatmul.mubr.f32.vlgmr.msra.gmra.mrb[38].mxu0 %v15627_v50  ;;  %v16200_v50 = vsub.f32 %v596_v61, %v16094_v15 }
 0x7a9   :  { %38054 = vmatpush3.msra.mxu0 %v15638_v57  ;;  %38055 = vmatprep.mubr.msk.f32.mxu0 %vm41964_vm2, %v46150_v27  ;;  %v16194_v24 = vand.u32 4294901760, %v16193_v45 }
 0x7aa   :  { %38058 = vmatprep.subr.mxu0 %v46150_v27  ;;  %v16201_v60 = vand.u32 4294901760, %v16200_v50  ;;  %v40100_v61 = vpack.c.bf16 %v16200_v50, %v16193_v45 }
 0x7ab   :  { %v16195_v33 = vsub.f32 %v16193_v45, %v16194_v24 }
 0x7ac   :  { %v16202_v38 = vsub.f32 %v16200_v50, %v16201_v60 }
 0x7b0   :  { %38056 = vmatmul.mubr.f32.vlgmr.msra.gmra.mrb[38].mxu0 %v15623_v53 }
 0x7b1   :  { %38059 = vmatpush3.msra.mxu0 %v15635_v20  ;;  %38060 = vmatprep.mubr.msk.f32.mxu0 %vm41964_vm2, %v46150_v27  ;;  %v599_v20 = vld [vmem:[#allocation5 + $0x228] sm:$0xff] }
 0x7b2   :  { %38063 = vmatprep.subr.mxu0 %v46150_v27 }
 0x7b8   :  { %38061 = vmatmul.mubr.f32.vlgmr.msra.gmra.mrb[38].mxu0 %v15624_v62  ;;  %v16180_v62 = vand.u32 4294901760, %v16179_v11 }
 0x7b9   :  { %38064 = vmatpush3.msra.mxu0 %v15558_v54  ;;  %38065 = vmatprep.mubr.msk.f32.mxu0 %vm41964_vm2, %v46150_v27 }
 0x7ba   :  { %38068 = vmatprep.subr.mxu0 %v46150_v27  ;;  %v16181_v1 = vsub.f32 %v16179_v11, %v16180_v62 }
 0x7bc   :  { %v16182_v57 = vand.u32 4294901760, %v16181_v1 }
 0x7c0   :  { %38066 = vmatmul.mubr.f32.vlgmr.msra.gmra.mrb[38].mxu0 %v15625_v37  ;;  %v16187_v37 = vand.u32 4294901760, %v16186_v4 }
 0x7c1   :  { %38069 = vmatpush3.msra.mxu0 %v15636_v51  ;;  %38070 = vmatprep.mubr.msk.f32.mxu0 %vm41964_vm2, %v46150_v27  ;;  %v16106_v51 = vand.u32 4294901760, %v600_v9 }
 0x7c2   :  { %38073 = vmatprep.subr.mxu0 %v46150_v27  ;;  %v16188_v40 = vsub.f32 %v16186_v4, %v16187_v37 }
 0x7c4   :  { %v16189_v58 = vand.u32 4294901760, %v16188_v40 }
 0x7c6   :  { %v43649_v48 = vpack.c.bf16 %v16189_v58, %v16182_v57 }
 0x7c8   :  { %38071 = vmatmul.mubr.f32.vlgmr.msra.gmra.mrb[38].mxu0 %v15623_v53 }
 0x7c9   :  { %38074 = vmatpush3.msra.mxu0 %v15558_v54  ;;  %38075 = vmatprep.mubr.msk.f32.mxu0 %vm41964_vm2, %v46150_v27  ;;  %v16100_v54 = vand.u32 4294901760, %v598_v31 }
 0x7cb   :  { %v43641_v29 = vpack.c.bf16 %v16100_v54, %v16097_v46  ;;  %v16214_v0 = vsub.f32 %v598_v31, %v16100_v54  ;;  %v43659_v46 = vld [vmem:[#allocation5 + $0x20] sm:$0xff]  ;;  %v43661_v54 = vld [vmem:[#allocation5 + $0x78] sm:$0xff] }
 0x7cd   :  { %40073 = vmatprep.subr.bf16.mxu1 %v43641_v29  ;;  %v40104_v6 = vpack.c.bf16 %v16214_v0, %v16207_v55 }
 0x7ce   :  { %40075 = vmatpush3.bf16.msra.mxu1 %v43641_v29 }
 0x7d0   :  { %38076 = vmatmul.mubr.f32.vlgmr.msra.gmra.mrb[38].mxu0 %v15623_v53  ;;  %v16103_v53 = vand.u32 4294901760, %v599_v20 }
 0x7d2   :  { %v43645_v39 = vpack.c.bf16 %v16106_v51, %v16103_v53 }
 0x7d3   :  { %v16025_v42 = vpop.permute.xlu1 %16024 }
 0x7d4   :  { %v16040_v19 = vsel %vm16039_vm7, %v16038_v7, %v16025_v42  ;;  %40077 = vmatprep.subr.bf16.mxu1 %v43645_v39  ;;  %v16196_v7 = vand.u32 4294901760, %v16195_v33 }
 0x7d5   :  { %40079 = vmatpush3.bf16.msra.mxu1 %v43645_v39 }
 0x7d6   :  { %40081 = vmatprep.subr.bf16.mxu1 %v43649_v48 }
 0x7df   :  { %v16029_v23 = vpop.permute.xlu1 %16028 }
 0x7e0   :  { %v16042_v25 = vsel %vm16041_vm8, %v16040_v19, %v16029_v23  ;;  %v16208_v19 = vand.u32 4294901760, %v16207_v55  ;;  %v16215_v23 = vand.u32 4294901760, %v16214_v0 }
 0x7e1   :  { %v16079_v43 = vsel %vm633_vm1, %v16042_v25, 0  ;;  %v16203_v25 = vand.u32 4294901760, %v16202_v38 }
 0x7e2   :  { %v43619_v8 = vand.u32 4294901760, %v16079_v43  ;;  %v43655_v22 = vpack.c.bf16 %v16215_v23, %v16208_v19 }
 0x7e4   :  { %v43622_v10 = vsub.f32 %v16079_v43, %v43619_v8  ;;  %v16209_v43 = vsub.f32 %v16207_v55, %v16208_v19  ;;  %v606_v19 = vld [vmem:[#allocation5 + $0x1d8] sm:$0xff] }
 0x7e6   :  { %v16159_v41 = vand.u32 4294901760, %v43622_v10 }
 0x7e8   :  { %v16160_v36 = vsub.f32 %v43622_v10, %v16159_v41 }
 0x7ea   :  { %v16161_v12 = vand.u32 4294901760, %v16160_v36  ;;  %v16216_v36 = vsub.f32 %v16214_v0, %v16215_v23  ;;  %v16692_v23 = vand.u32 4294901760, %v606_v19 }
 0x7ec   :  { %38094 = vmatprep.mubr.f32.mxu1 %v16161_v12  ;;  %v16221_v12 = vsub.f32 %v599_v20, %v16103_v53  ;;  %v16677_v20 = vand.u32 4294901760, %v43659_v46 }
 0x801   :  { %v13754_v21 = vpop.f32.mrb[26].mxu1 }
 0x802   :  { %v37927_v63 = vpop.f32.mrb[27].mxu1  ;;  %16048 = vrot.lane.b32.xlu0 %v13754_v21, %s41962_s22  ;;  %v16228_v21 = vsub.f32 %v600_v9, %v16106_v51  ;;  %v16680_v9 = vand.u32 4294901760, %v43661_v54 }
 0x803   :  { %v40084_v63 = vpack.c.bf16 %v16203_v25, %v16196_v7 }
 0x804   :  { %v40108_v15 = vpack.c.bf16 %v16228_v21, %v16221_v12  ;;  %v43669_v11 = vpack.c.bf16 %v16680_v9, %v16677_v20  ;;  %v16778_v25 = vsub.f32 %v43661_v54, %v16680_v9 }
 0x806   :  { %40161 = vmatprep.subr.bf16.mxu0 %v43669_v11 }
 0x807   :  { %40163 = vmatpush3.bf16.msra.mxu0 %v43669_v11 }
 0x80a   :  { %v14203_v56 = vpop.f32.mrb[34].mxu0 }
 0x80b   :  { %16052 = vrot.lane.b32.xlu0 %v14203_v56, %s41972_s5  ;;  %v37957_v35 = vpop.f32.mrb[35].mxu0  ;;  %v16210_v56 = vand.u32 4294901760, %v16209_v43  ;;  %v607_v43 = vld [vmem:[#allocation5 + $0x230] sm:$0xff] }
 0x80c   :  { %v16217_v35 = vand.u32 4294901760, %v16216_v36  ;;  %v608_v36 = vld [vmem:[#allocation5 + $0x288] sm:$0xff] }
 0x818   :  { %v16045_v4 = vpop.permute.xlu0 %16044 }
 0x819   :  { %v16071_v1 = vsel %vm1412_vm3, %v43588_v13, %v16045_v4 }
 0x83e   :  { %v14652_v59 = vpop.f32.mrb[28].mxu1 }
 0x83f   :  { %v15101_v47 = vpop.f32.mrb[36].mxu0  ;;  %v37987_v16 = vpop.f32.mrb[29].mxu1  ;;  %16056 = vrot.lane.b32.xlu0 %v14652_v59, %s41973_s6  ;;  %v16222_v59 = vand.u32 4294901760, %v16221_v12 }
 0x840   :  { %v38017_v18 = vpop.f32.mrb[37].mxu0  ;;  %v40088_v16 = vpack.c.bf16 %v16217_v35, %v16210_v56  ;;  %v16779_v56 = vand.u32 4294901760, %v16778_v25 }
 0x841   :  { %v16223_v18 = vsub.f32 %v16221_v12, %v16222_v59  ;;  %v16695_v12 = vand.u32 4294901760, %v607_v43 }
 0x843   :  { %16060 = vrot.lane.b32.xlu0 %v15101_v47, %s41974_s7  ;;  %v16229_v47 = vand.u32 4294901760, %v16228_v21  ;;  %v16224_v28 = vand.u32 4294901760, %v16223_v18  ;;  %v16813_v9 = vsub.f32 %v607_v43, %v16695_v12 }
 0x845   :  { %v16230_v5 = vsub.f32 %v16228_v21, %v16229_v47  ;;  %v43657_v31 = vpack.c.bf16 %v16229_v47, %v16222_v59  ;;  %v16698_v21 = vand.u32 4294901760, %v608_v36  ;;  %v16780_v47 = vsub.f32 %v16778_v25, %v16779_v56 }
 0x847   :  { %v16231_v49 = vand.u32 4294901760, %v16230_v5  ;;  %v43725_v35 = vpack.c.bf16 %v16698_v21, %v16695_v12  ;;  %v16820_v4 = vsub.f32 %v608_v36, %v16698_v21 }
 0x849   :  { %v40092_v2 = vpack.c.bf16 %v16231_v49, %v16224_v28  ;;  %v16781_v28 = vand.u32 4294901760, %v16780_v47 }
 0x874   :  { %v15550_v44 = vpop.f32.mrb[30].mxu1  ;;  %v16049_v53 = vpop.permute.xlu0 %16048 }
 0x875   :  { %v38047_v30 = vpop.f32.mrb[31].mxu1  ;;  %16064 = vrot.lane.b32.xlu0 %v15550_v44, %s41975_s8  ;;  %v40128_v44 = vpack.c.bf16 %v16187_v37, %v16180_v62  ;;  %v16072_v40 = vsel %vm68_vm0, %v16071_v1, %v16049_v53  ;;  %v16821_v1 = vand.u32 4294901760, %v16820_v4 }
 0x876   :  { %v43653_v30 = vpack.c.bf16 %v16201_v60, %v16194_v24 }
 0x87d   :  { %v16053_v51 = vpop.permute.xlu0 %16052 }
 0x87e   :  { %v16073_v45 = vsel %vm16033_vm4, %v16072_v40, %v16053_v51 }
 0x8a3   :  { %v15999_v42 = vpop.f32.mrb[38].mxu0 }
 0x8a4   :  { %16068 = vrot.lane.b32.xlu1 %v15999_v42, %s41976_s1  ;;  %v38077_v3 = vpop.f32.mrb[39].mxu0 }
 0x8b1   :  { %v16057_v62 = vpop.permute.xlu0 %16056 }
 0x8b2   :  { %v16074_v57 = vsel %vm16035_vm5, %v16073_v45, %v16057_v62 }
 0x8b5   :  { %v16061_v37 = vpop.permute.xlu0 %16060 }
 0x8b6   :  { %v16075_v58 = vsel %vm16037_vm6, %v16074_v57, %v16061_v37  ;;  %v16814_v37 = vand.u32 4294901760, %v16813_v9 }
 0x8b8   :  { %v16815_v45 = vsub.f32 %v16813_v9, %v16814_v37 }
 0x8ba   :  { %v16816_v57 = vand.u32 4294901760, %v16815_v45  ;;  %v620_v45 = vld [vmem:[#allocation5 + $0x3f0] sm:$0xff] }
 0x8e7   :  { %v16065_v50 = vpop.permute.xlu0 %16064 }
 0x8e8   :  { %v16076_v24 = vsel %vm16039_vm7, %v16075_v58, %v16065_v50  ;;  %v16822_v50 = vsub.f32 %v16820_v4, %v16821_v1 }
 0x8ea   :  { %v16823_v58 = vand.u32 4294901760, %v16822_v50 }
 0x916   :  { %v16069_v60 = vpop.permute.xlu1 %16068 }
 0x917   :  { %v16077_v33 = vsel %vm16041_vm8, %v16076_v24, %v16069_v60  ;;  %v43736_v24 = vpack.c.bf16 %v16823_v58, %v16816_v57  ;;  %v17292_v57 = vand.u32 4294901760, %v620_v45 }
 0x918   :  { %v16082_v55 = vsel %vm633_vm1, %v16077_v33, 0 }
 0x919   :  { %v16167_v0 = vand.u32 4294901760, %v16082_v55 }
 0x91b   :  { %v16168_v42 = vsub.f32 %v16082_v55, %v16167_v0 }
 0x91d   :  { %v16169_v38 = vand.u32 4294901760, %v16168_v42 }
 0x91f   :  { %v16170_v13 = vsub.f32 %v16168_v42, %v16169_v38 }
 0x921   :  { %v16171_v3 = vand.u32 4294901760, %v16170_v13 }
 0x923   :  { %38095 = vmatmul.mubr.f32.vlgmr.msra.gmra.mrb[32].mxu1 %v16171_v3  ;;  %v43752_v3 = vpack.c.bf16 %v16821_v1, %v16814_v37  ;;  %v619_v1 = vld [vmem:[#allocation5 + $0x398] sm:$0xff] }
 0x924   :  { %40083 = vmatpush3.bf16.msra.mxu1 %v43649_v48  ;;  %38113 = vmatprep.mubr.f32.mxu1 %v43619_v8  ;;  %v17289_v50 = vand.u32 4294901760, %v619_v1 }
 0x925   :  { %40085 = vmatprep.subr.bf16.mxu1 %v40084_v63 }
 0x926   :  { %v43792_v58 = vpack.c.bf16 %v17292_v57, %v17289_v50 }
 0x928   :  { %40087 = vmatpush3.bf16.msra.mxu1 %v40084_v63 }
 0x929   :  { %40089 = vmatprep.subr.bf16.mxu1 %v40088_v16 }
 0x92c   :  { %40091 = vmatpush3.bf16.msra.mxu1 %v40088_v16 }
 0x92d   :  { %40093 = vmatprep.subr.bf16.mxu1 %v40092_v2 }
 0x930   :  { %40095 = vmatpush3.bf16.msra.mxu1 %v40092_v2 }
 0x931   :  { %40097 = vmatprep.subr.bf16.mxu1 %v40096_v52 }
 0x933   :  { %38114 = vmatmul.mubr.f32.vlgmr.msra.gmra.mrb[32].mxu1 %v16167_v0 }
 0x934   :  { %40099 = vmatpush3.bf16.msra.mxu1 %v40096_v52  ;;  %38132 = vmatprep.mubr.f32.mxu1 %v43622_v10  ;;  %v603_v10 = vld [vmem:[#allocation5 + $0xd0] sm:$0xff] }
 0x935   :  { %40101 = vmatprep.subr.bf16.mxu1 %v40100_v61  ;;  %v16683_v48 = vand.u32 4294901760, %v603_v10 }
 0x937   :  { %v16785_v16 = vsub.f32 %v603_v10, %v16683_v48  ;;  %v609_v10 = vld [vmem:[#allocation5 + $0x28] sm:$0xff] }
 0x938   :  { %40103 = vmatpush3.bf16.msra.mxu1 %v40100_v61 }
 0x939   :  { %40105 = vmatprep.subr.bf16.mxu1 %v40104_v6  ;;  %v16786_v49 = vand.u32 4294901760, %v16785_v16 }
 0x93b   :  { %v16787_v61 = vsub.f32 %v16785_v16, %v16786_v49 }
 0x93c   :  { %40107 = vmatpush3.bf16.msra.mxu1 %v40104_v6 }
 0x93d   :  { %40109 = vmatprep.subr.bf16.mxu1 %v40108_v15 }
 0x940   :  { %40111 = vmatpush3.bf16.msra.mxu1 %v40108_v15  ;;  %v16806_v15 = vsub.f32 %v606_v19, %v16692_v23  ;;  %v612_v19 = vld [vmem:[#allocation5 + $0x130] sm:$0xff] }
 0x941   :  { %40113 = vmatprep.subr.bf16.mxu1 %v43632_v14 }
 0x943   :  { %38133 = vmatmul.mubr.f32.vlgmr.msra.gmra.mrb[32].mxu1 %v16168_v42 }
 0x944   :  { %40115 = vmatpush3.bf16.msra.mxu1 %v43632_v14  ;;  %38151 = vmatprep.mubr.f32.mxu1 %v16159_v41  ;;  %v604_v41 = vld [vmem:[#allocation5 + $0x128] sm:$0xff] }
 0x945   :  { %40117 = vmatprep.subr.bf16.mxu1 %v43634_v32  ;;  %v16686_v7 = vand.u32 4294901760, %v604_v41 }
 0x947   :  { %v16792_v18 = vsub.f32 %v604_v41, %v16686_v7  ;;  %v610_v41 = vld [vmem:[#allocation5 + $0x80] sm:$0xff] }
 0x948   :  { %40119 = vmatpush3.bf16.msra.mxu1 %v43634_v32 }
 0x949   :  { %40121 = vmatprep.subr.bf16.mxu1 %v43641_v29  ;;  %v16793_v2 = vand.u32 4294901760, %v16792_v18  ;;  %v43740_v33 = vpack.c.bf16 %v16792_v18, %v16785_v16 }
 0x94c   :  { %40123 = vmatpush3.bf16.msra.mxu1 %v43641_v29 }
 0x94d   :  { %40125 = vmatprep.subr.bf16.mxu1 %v43645_v39 }
 0x950   :  { %40127 = vmatpush3.bf16.msra.mxu1 %v43645_v39 }
 0x951   :  { %40129 = vmatprep.subr.bf16.mxu1 %v40128_v44 }
 0x953   :  { %38152 = vmatmul.mubr.f32.vlgmr.msra.gmra.mrb[32].mxu1 %v16169_v38  ;;  %v43748_v38 = vpack.c.bf16 %v16793_v2, %v16786_v49  ;;  %v615_v49 = vld [vmem:[#allocation5 + $0x238] sm:$0xff] }
 0x954   :  { %40131 = vmatpush3.bf16.msra.mxu1 %v40128_v44  ;;  %38170 = vmatprep.mubr.f32.mxu1 %v43619_v8  ;;  %v16794_v44 = vsub.f32 %v16792_v18, %v16793_v2  ;;  %v616_v2 = vld [vmem:[#allocation5 + $0x290] sm:$0xff] }
 0x955   :  { %40133 = vmatprep.subr.bf16.mxu1 %v43653_v30 }
 0x958   :  { %40135 = vmatpush3.bf16.msra.mxu1 %v43653_v30  ;;  %v16788_v30 = vand.u32 4294901760, %v16787_v61 }
 0x959   :  { %40137 = vmatprep.subr.bf16.mxu1 %v43655_v22 }
 0x95c   :  { %40139 = vmatpush3.bf16.msra.mxu1 %v43655_v22 }
 0x95d   :  { %40141 = vmatprep.subr.bf16.mxu1 %v43657_v31 }
 0x960   :  { %40143 = vmatpush3.bf16.msra.mxu1 %v43657_v31  ;;  %v16807_v31 = vand.u32 4294901760, %v16806_v15 }
 0x961   :  { %40145 = vmatprep.subr.bf16.mxu1 %v43632_v14 }
 0x963   :  { %38171 = vmatmul.mubr.f32.vlgmr.msra.gmra.mrb[32].mxu1 %v16167_v0 }
 0x964   :  { %40147 = vmatpush3.bf16.msra.mxu1 %v43632_v14  ;;  %38189 = vmatprep.mubr.f32.mxu1 %v43619_v8  ;;  %v43711_v14 = vpack.c.bf16 %v16686_v7, %v16683_v48  ;;  %v605_v8 = vld [vmem:[#allocation5 + $0x180] sm:$0xff]  ;;  %v611_v48 = vld [vmem:[#allocation5 + $0xd8] sm:$0xff]  ;;  %v17259_v7 = vand.u32 4294901760, %v609_v10 }
 0x965   :  { %40149 = vmatprep.subr.bf16.mxu1 %v43634_v32 }
 0x966   :  { %40165 = vmatprep.subr.bf16.mxu0 %v43711_v14  ;;  %v43756_v21 = vsub.f32 %v609_v10, %v17259_v7 }
 0x967   :  { %40167 = vmatpush3.bf16.msra.mxu0 %v43711_v14 }
 0x968   :  { %40151 = vmatpush3.bf16.msra.mxu1 %v43634_v32  ;;  %v16689_v32 = vand.u32 4294901760, %v605_v8 }
 0x969   :  { %40153 = vmatprep.subr.bf16.mxu1 %v43641_v29 }
 0x96a   :  { %v16799_v6 = vsub.f32 %v605_v8, %v16689_v32  ;;  %v17262_v8 = vand.u32 4294901760, %v610_v41 }
 0x96c   :  { %40155 = vmatpush3.bf16.msra.mxu1 %v43641_v29  ;;  %v43715_v29 = vpack.c.bf16 %v16692_v23, %v16689_v32  ;;  %v16800_v22 = vand.u32 4294901760, %v16799_v6  ;;  %v43742_v55 = vpack.c.bf16 %v16806_v15, %v16799_v6  ;;  %v17265_v32 = vand.u32 4294901760, %v611_v48  ;;  %v613_v23 = vld [vmem:[#allocation5 + $0x188] sm:$0xff] }
 0x96d   :  { %40157 = vmatprep.subr.bf16.mxu1 %v43645_v39  ;;  %v17271_v43 = vand.u32 4294901760, %v613_v23  ;;  %v43754_v12 = vpack.c.bf16 %v17262_v8, %v17259_v7 }
 0x96e   :  { %40169 = vmatprep.subr.bf16.mxu0 %v43715_v29  ;;  %v16801_v54 = vsub.f32 %v16799_v6, %v16800_v22  ;;  %v43750_v13 = vpack.c.bf16 %v16807_v31, %v16800_v22  ;;  %v17277_v6 = vand.u32 4294901760, %v615_v49 }
 0x96f   :  { %40171 = vmatpush3.bf16.msra.mxu0 %v43715_v29 }
 0x970   :  { %40159 = vmatpush3.bf16.msra.mxu1 %v43645_v39  ;;  %v16771_v39 = vsub.f32 %v43659_v46, %v16677_v20  ;;  %40173 = vmatprep.subr.bf16.mxu0 %v43725_v35  ;;  %v16795_v46 = vand.u32 4294901760, %v16794_v44  ;;  %v16808_v20 = vsub.f32 %v16806_v15, %v16807_v31  ;;  %v16802_v51 = vand.u32 4294901760, %v16801_v54  ;;  %v618_v54 = vld [vmem:[#allocation5 + $0x340] sm:$0xff] }
 0x971   :  { %v17280_v15 = vand.u32 4294901760, %v616_v2  ;;  %v43780_v22 = vsub.f32 %v615_v49, %v17277_v6 }
 0x972   :  { %v16772_v63 = vand.u32 4294901760, %v16771_v39  ;;  %v43732_v53 = vpack.c.bf16 %v16795_v46, %v16788_v30  ;;  %v16809_v62 = vand.u32 4294901760, %v16808_v20  ;;  %v43738_v60 = vpack.c.bf16 %v16778_v25, %v16771_v39  ;;  %v617_v46 = vld [vmem:[#allocation5 + $0x2e8] sm:$0xff] }
 0x973   :  { %38190 = vmatmul.mubr.f32.vlgmr.msra.gmra.mrb[32].mxu1 %v16167_v0  ;;  %40175 = vmatpush3.bf16.msra.mxu0 %v43725_v35  ;;  %v43744_v0 = vpack.c.bf16 %v16820_v4, %v16813_v9  ;;  %v17268_v25 = vand.u32 4294901760, %v612_v19  ;;  %v43776_v44 = vpack.c.bf16 %v17280_v15, %v17277_v6  ;;  %v43782_v31 = vsub.f32 %v616_v2, %v17280_v15 }
 0x974   :  { %v16773_v59 = vsub.f32 %v16771_v39, %v16772_v63  ;;  %v43734_v40 = vpack.c.bf16 %v16809_v62, %v16802_v51  ;;  %v43746_v42 = vpack.c.bf16 %v16779_v56, %v16772_v63  ;;  %v614_v39 = vld [vmem:[#allocation5 + $0x1e0] sm:$0xff]  ;;  %v43758_v63 = vsub.f32 %v610_v41, %v17262_v8 }
 0x975   :  { %v17274_v36 = vand.u32 4294901760, %v614_v39  ;;  %v43760_v56 = vsub.f32 %v611_v48, %v17265_v32  ;;  %v43764_v47 = vsub.f32 %v612_v19, %v17268_v25  ;;  %v17283_v20 = vand.u32 4294901760, %v617_v46 }
 0x976   :  { %v16774_v5 = vand.u32 4294901760, %v16773_v59  ;;  %v43762_v59 = vpack.c.bf16 %v17268_v25, %v17265_v32  ;;  %v40320_v18 = vpack.c.bf16 %v43758_v63, %v43756_v21  ;;  %v17286_v9 = vand.u32 4294901760, %v618_v54 }
 0x977   :  { %v43766_v16 = vpack.c.bf16 %v17274_v36, %v17271_v43  ;;  %v40324_v61 = vpack.c.bf16 %v43764_v47, %v43760_v56  ;;  %v40332_v51 = vpack.c.bf16 %v43782_v31, %v43780_v22  ;;  %v43788_v62 = vsub.f32 %v617_v46, %v17283_v20 }
 0x978   :  { %v43729_v52 = vpack.c.bf16 %v16781_v28, %v16774_v5  ;;  %v43770_v5 = vsub.f32 %v613_v23, %v17271_v43  ;;  %v43772_v28 = vsub.f32 %v614_v39, %v17274_v36  ;;  %40321 = vmatprep.subr.bf16.mxu1 %v40320_v18  ;;  %v43784_v4 = vpack.c.bf16 %v17286_v9, %v17283_v20 }
 0x979   :  { %40323 = vmatpush3.bf16.msra.mxu1 %v40320_v18  ;;  %v43790_v37 = vsub.f32 %v618_v54, %v17286_v9  ;;  %v43796_v41 = vsub.f32 %v619_v1, %v17289_v50  ;;  %v43798_v48 = vsub.f32 %v620_v45, %v17292_v57 }
 0x97a   :  { %40177 = vmatprep.subr.bf16.mxu0 %v43729_v52  ;;  %40325 = vmatprep.subr.bf16.mxu1 %v40324_v61  ;;  %v40328_v30 = vpack.c.bf16 %v43772_v28, %v43770_v5 }
 0x97b   :  { %v40336_v10 = vpack.c.bf16 %v43790_v37, %v43788_v62  ;;  %v40340_v7 = vpack.c.bf16 %v43798_v48, %v43796_v41 }
 0x97d   :  { %40327 = vmatpush3.bf16.msra.mxu1 %v40324_v61 }
 0x97e   :  { %40329 = vmatprep.subr.bf16.mxu1 %v40328_v30 }
 0x981   :  { %40331 = vmatpush3.bf16.msra.mxu1 %v40328_v30 }
 0x982   :  { %40333 = vmatprep.subr.bf16.mxu1 %v40332_v51 }
 0x985   :  { %40335 = vmatpush3.bf16.msra.mxu1 %v40332_v51 }
 0x986   :  { %40337 = vmatprep.subr.bf16.mxu1 %v40336_v10 }
 0x989   :  { %40339 = vmatpush3.bf16.msra.mxu1 %v40336_v10 }
 0x98a   :  { %40341 = vmatprep.subr.bf16.mxu1 %v40340_v7 }
 0x98d   :  { %40343 = vmatpush3.bf16.msra.mxu1 %v40340_v7 }
 0xa46   :  { %v38191_v8 = vpop.f32.mrb[32].mxu1 }
 0xa47   :  { %v43803_v19 = vadd.f32 %v42192_v17, %v38191_v8  ;;  %v16654_v32 = vpop.f32.mrb[33].mxu1 }
 0xa48   :  { %v43806_v23 = vadd.f32 %v42194_v26, %v16654_v32  ;;  %v621_v26 = vld [vmem:[#allocation5 + $0x448] sm:$0xff] }
 0xa49   :  { %v16674_v39 = vsel %vm633_vm1, %v43803_v19, 0 }
 0xa4a   :  { %v16759_v25 = vand.u32 4294901760, %v16674_v39  ;;  %v16671_v43 = vsel %vm633_vm1, %v43806_v23, 0 }
 0xa4b   :  { %v16749_v36 = vand.u32 4294901760, %v16671_v43 }
 0xa4c   :  { %v16760_v18 = vsub.f32 %v16674_v39, %v16759_v25 }
 0xa4d   :  { %v16750_v49 = vsub.f32 %v16671_v43, %v16749_v36 }
 0xa4e   :  { %v16761_v2 = vand.u32 4294901760, %v16760_v18 }
 0xa4f   :  { %v16751_v61 = vand.u32 4294901760, %v16750_v49 }
 0xa50   :  { %v16762_v6 = vsub.f32 %v16760_v18, %v16761_v2 }
 0xa51   :  { %v16752_v15 = vsub.f32 %v16750_v49, %v16751_v61 }
 0xa52   :  { %v16763_v30 = vand.u32 4294901760, %v16762_v6  ;;  %v16668_v6 = vsub.s32 3, %v42186_v34 }
 0xa53   :  { %v16753_v17 = vand.u32 4294901760, %v16752_v15  ;;  %v43890_v15 = vld [vmem:[#allocation7] sm:$0xff] }
 0xa55   :  { %38208 = vmatprep.mubr.f32.mxu0 %v16753_v17  ;;  %v16669_v17 = vrot.slane %v43890_v15, %v16668_v6  ;;  %v17418_v6 = vand.u32 4294901760, %v43788_v62 }
 0xa56   :  { %38209 = vmatmul.mubr.f32.vlgmr.msra.gmra.mrb[40].mxu0 %v16763_v30 }
 0xa57   :  { %40179 = vmatpush3.bf16.msra.mxu0 %v43729_v52  ;;  %38227 = vmatprep.mubr.f32.mxu0 %v16749_v36 }
 0xa58   :  { %40181 = vmatprep.subr.bf16.mxu0 %v43732_v53 }
 0xa5b   :  { %40183 = vmatpush3.bf16.msra.mxu0 %v43732_v53  ;;  %v623_v53 = vld [vmem:[#allocation5 + $0x4f8] sm:$0xff] }
 0xa5c   :  { %40185 = vmatprep.subr.bf16.mxu0 %v43734_v40 }
 0xa5f   :  { %40187 = vmatpush3.bf16.msra.mxu0 %v43734_v40  ;;  %v624_v40 = vld [vmem:[#allocation5 + $0x550] sm:$0xff] }
 0xa60   :  { %40189 = vmatprep.subr.bf16.mxu0 %v43736_v24 }
 0xa63   :  { %40191 = vmatpush3.bf16.msra.mxu0 %v43736_v24 }
 0xa64   :  { %40193 = vmatprep.subr.bf16.mxu0 %v43738_v60 }
 0xa66   :  { %38228 = vmatmul.mubr.f32.vlgmr.msra.gmra.mrb[40].mxu0 %v16759_v25 }
 0xa67   :  { %40195 = vmatpush3.bf16.msra.mxu0 %v43738_v60  ;;  %38246 = vmatprep.mubr.f32.mxu0 %v16750_v49  ;;  %v17301_v60 = vand.u32 4294901760, %v623_v53 }
 0xa68   :  { %40197 = vmatprep.subr.bf16.mxu0 %v43740_v33 }
 0xa6b   :  { %40199 = vmatpush3.bf16.msra.mxu0 %v43740_v33  ;;  %v17304_v33 = vand.u32 4294901760, %v624_v40 }
 0xa6c   :  { %40201 = vmatprep.subr.bf16.mxu0 %v43742_v55 }
 0xa6d   :  { %v43870_v46 = vpack.c.bf16 %v17304_v33, %v17301_v60 }
 0xa6f   :  { %40203 = vmatpush3.bf16.msra.mxu0 %v43742_v55  ;;  %v17459_v55 = vsub.f32 %v623_v53, %v17301_v60 }
 0xa70   :  { %40205 = vmatprep.subr.bf16.mxu0 %v43744_v0 }
 0xa71   :  { %v17460_v32 = vand.u32 4294901760, %v17459_v55 }
 0xa73   :  { %40207 = vmatpush3.bf16.msra.mxu0 %v43744_v0  ;;  %v17466_v0 = vsub.f32 %v624_v40, %v17304_v33  ;;  %v17397_v33 = vand.u32 4294901760, %v43772_v28 }
 0xa74   :  { %40209 = vmatprep.subr.bf16.mxu0 %v43669_v11 }
 0xa76   :  { %38247 = vmatmul.mubr.f32.vlgmr.msra.gmra.mrb[40].mxu0 %v16760_v18 }
 0xa77   :  { %40211 = vmatpush3.bf16.msra.mxu0 %v43669_v11  ;;  %38265 = vmatprep.mubr.f32.mxu0 %v16751_v61 }
 0xa78   :  { %40213 = vmatprep.subr.bf16.mxu0 %v43711_v14 }
 0xa7b   :  { %40215 = vmatpush3.bf16.msra.mxu0 %v43711_v14 }
 0xa7c   :  { %40217 = vmatprep.subr.bf16.mxu0 %v43715_v29 }
 0xa7f   :  { %40219 = vmatpush3.bf16.msra.mxu0 %v43715_v29 }
 0xa80   :  { %40221 = vmatprep.subr.bf16.mxu0 %v43725_v35 }
 0xa83   :  { %40223 = vmatpush3.bf16.msra.mxu0 %v43725_v35 }
 0xa84   :  { %40225 = vmatprep.subr.bf16.mxu0 %v43746_v42 }
 0xa86   :  { %38266 = vmatmul.mubr.f32.vlgmr.msra.gmra.mrb[40].mxu0 %v16761_v2 }
 0xa87   :  { %40227 = vmatpush3.bf16.msra.mxu0 %v43746_v42  ;;  %38284 = vmatprep.mubr.f32.mxu0 %v16749_v36  ;;  %v40348_v42 = vpack.c.bf16 %v17466_v0, %v17459_v55 }
 0xa88   :  { %40229 = vmatprep.subr.bf16.mxu0 %v43748_v38 }
 0xa8b   :  { %40231 = vmatpush3.bf16.msra.mxu0 %v43748_v38 }
 0xa8c   :  { %40233 = vmatprep.subr.bf16.mxu0 %v43750_v13 }
 0xa8f   :  { %40235 = vmatpush3.bf16.msra.mxu0 %v43750_v13  ;;  %v17362_v13 = vand.u32 4294901760, %v43756_v21 }
 0xa90   :  { %40237 = vmatprep.subr.bf16.mxu0 %v43752_v3 }
 0xa91   :  { %v17363_v54 = vsub.f32 %v43756_v21, %v17362_v13  ;;  %v17467_v21 = vand.u32 4294901760, %v17466_v0 }
 0xa93   :  { %40239 = vmatpush3.bf16.msra.mxu0 %v43752_v3  ;;  %v17369_v3 = vand.u32 4294901760, %v43758_v63  ;;  %v17364_v9 = vand.u32 4294901760, %v17363_v54  ;;  %v43887_v61 = vpack.c.bf16 %v17467_v21, %v17460_v32 }
 0xa94   :  { %40241 = vmatprep.subr.bf16.mxu0 %v43669_v11 }
 0xa95   :  { %v17370_v20 = vsub.f32 %v43758_v63, %v17369_v3  ;;  %v17461_v63 = vsub.f32 %v17459_v55, %v17460_v32  ;;  %v43881_v43 = vpack.c.bf16 %v17369_v3, %v17362_v13 }
 0xa96   :  { %38285 = vmatmul.mubr.f32.vlgmr.msra.gmra.mrb[40].mxu0 %v16759_v25 }
 0xa97   :  { %40243 = vmatpush3.bf16.msra.mxu0 %v43669_v11  ;;  %38303 = vmatprep.mubr.f32.mxu0 %v16749_v36  ;;  %v622_v11 = vld [vmem:[#allocation5 + $0x4a0] sm:$0xff]  ;;  %v17371_v51 = vand.u32 4294901760, %v17370_v20  ;;  %v17462_v36 = vand.u32 4294901760, %v17461_v63 }
 0xa98   :  { %40245 = vmatprep.subr.bf16.mxu0 %v43711_v14 }
 0xa99   :  { %v43876_v1 = vpack.c.bf16 %v17371_v51, %v17364_v9  ;;  %v17398_v9 = vsub.f32 %v43772_v28, %v17397_v33  ;;  %v17404_v51 = vand.u32 4294901760, %v43780_v22 }
 0xa9b   :  { %40247 = vmatpush3.bf16.msra.mxu0 %v43711_v14  ;;  %v17295_v14 = vand.u32 4294901760, %v621_v26  ;;  %v17405_v63 = vsub.f32 %v43780_v22, %v17404_v51  ;;  %v17950_v22 = vld [vmem:[#allocation5 + $0x30] sm:$0xff] }
 0xa9c   :  { %40249 = vmatprep.subr.bf16.mxu0 %v43715_v29 }
 0xa9f   :  { %40251 = vmatpush3.bf16.msra.mxu0 %v43715_v29  ;;  %v17298_v29 = vand.u32 4294901760, %v622_v11 }
 0xaa0   :  { %40253 = vmatprep.subr.bf16.mxu0 %v43725_v35 }
 0xaa1   :  { %v17452_v52 = vsub.f32 %v622_v11, %v17298_v29  ;;  %v43863_v38 = vpack.c.bf16 %v17298_v29, %v17295_v14 }
 0xaa3   :  { %40255 = vmatpush3.bf16.msra.mxu0 %v43725_v35  ;;  %v17445_v35 = vsub.f32 %v621_v26, %v17295_v14  ;;  %v17453_v50 = vand.u32 4294901760, %v17452_v52 }
 0xaa4   :  { %40257 = vmatprep.subr.bf16.mxu0 %v43754_v12 }
 0xaa5   :  { %v40344_v24 = vpack.c.bf16 %v17452_v52, %v17445_v35  ;;  %v17446_v45 = vand.u32 4294901760, %v17445_v35  ;;  %v17454_v10 = vsub.f32 %v17452_v52, %v17453_v50  ;;  %v17383_v52 = vand.u32 4294901760, %v43764_v47 }
 0xaa6   :  { %38304 = vmatmul.mubr.f32.vlgmr.msra.gmra.mrb[40].mxu0 %v16759_v25  ;;  %v17468_v25 = vsub.f32 %v17466_v0, %v17467_v21  ;;  %v17399_v21 = vand.u32 4294901760, %v17398_v9 }
 0xaa7   :  { %40259 = vmatpush3.bf16.msra.mxu0 %v43754_v12  ;;  %40345 = vmatprep.subr.bf16.mxu1 %v40344_v24  ;;  %v17447_v57 = vsub.f32 %v17445_v35, %v17446_v45  ;;  %v17455_v8 = vand.u32 4294901760, %v17454_v10  ;;  %v43885_v2 = vpack.c.bf16 %v17453_v50, %v17446_v45  ;;  %v17376_v35 = vand.u32 4294901760, %v43760_v56 }
 0xaa8   :  { %40261 = vmatprep.subr.bf16.mxu0 %v43762_v59  ;;  %40347 = vmatpush3.bf16.msra.mxu1 %v40344_v24  ;;  %v17469_v18 = vand.u32 4294901760, %v17468_v25  ;;  %v17390_v24 = vand.u32 4294901760, %v43770_v5  ;;  %v17411_v45 = vand.u32 4294901760, %v43782_v31 }
 0xaa9   :  { %40349 = vmatprep.subr.bf16.mxu1 %v40348_v42  ;;  %v17448_v7 = vand.u32 4294901760, %v17447_v57  ;;  %v17377_v0 = vsub.f32 %v43760_v56, %v17376_v35 }
 0xaaa   :  { %v43883_v49 = vpack.c.bf16 %v17469_v18, %v17462_v36  ;;  %v17391_v54 = vsub.f32 %v43770_v5, %v17390_v24  ;;  %v17412_v25 = vsub.f32 %v43782_v31, %v17411_v45  ;;  %v40392_v56 = vpack.c.bf16 %v17397_v33, %v17390_v24  ;;  %v17952_v31 = vld [vmem:[#allocation5 + $0x88] sm:$0xff]  ;;  %v17959_v24 = vld [vmem:[#allocation5 + $0x198] sm:$0xff] }
 0xaab   :  { %40263 = vmatpush3.bf16.msra.mxu0 %v43762_v59  ;;  %v43879_v39 = vpack.c.bf16 %v17455_v8, %v17448_v7  ;;  %v17378_v57 = vand.u32 4294901760, %v17377_v0  ;;  %v17439_v0 = vand.u32 4294901760, %v43798_v48  ;;  %v18028_v33 = vand.u32 4294901760, %v17959_v24 }
 0xaac   :  { %40265 = vmatprep.subr.bf16.mxu0 %v43766_v16  ;;  %40351 = vmatpush3.bf16.msra.mxu1 %v40348_v42  ;;  %v17384_v42 = vsub.f32 %v43764_v47, %v17383_v52  ;;  %v17392_v8 = vand.u32 4294901760, %v17391_v54  ;;  %v40396_v47 = vpack.c.bf16 %v17411_v45, %v17404_v51  ;;  %v17960_v51 = vld [vmem:[#allocation5 + $0x1e8] sm:$0xff] }
 0xaad   :  { %40353 = vmatprep.subr.bf16.mxu1 %v43754_v12 }
 0xaae   :  { %v17385_v10 = vand.u32 4294901760, %v17384_v42 }
 0xaaf   :  { %40267 = vmatpush3.bf16.msra.mxu0 %v43766_v16 }
 0xab0   :  { %40269 = vmatprep.subr.bf16.mxu0 %v43776_v44  ;;  %v40292_v18 = vpack.c.bf16 %v17385_v10, %v17378_v57  ;;  %v18034_v10 = vand.u32 4294901760, %v17960_v51 }
 0xab3   :  { %40271 = vmatpush3.bf16.msra.mxu0 %v43776_v44 }
 0xab4   :  { %40273 = vmatprep.subr.bf16.mxu0 %v43784_v4 }
 0xab7   :  { %40275 = vmatpush3.bf16.msra.mxu0 %v43784_v4 }
 0xab8   :  { %40277 = vmatprep.subr.bf16.mxu0 %v43792_v58 }
 0xabb   :  { %40279 = vmatpush3.bf16.msra.mxu0 %v43792_v58 }
 0xabc   :  { %40281 = vmatprep.subr.bf16.mxu0 %v43863_v38 }
 0xabf   :  { %40283 = vmatpush3.bf16.msra.mxu0 %v43863_v38 }
 0xac0   :  { %40285 = vmatprep.subr.bf16.mxu0 %v43870_v46 }
 0xac3   :  { %40287 = vmatpush3.bf16.msra.mxu0 %v43870_v46 }
 0xac4   :  { %40289 = vmatprep.subr.bf16.mxu0 %v43876_v1 }
 0xb79   :  { %v38305_v30 = vpop.f32.mrb[40].mxu0 }
 0xb7a   :  { %v40935_v26 = vadd.f32 %v38305_v30, %v16669_v17  ;;  %v17246_v11 = vpop.f32.mrb[41].mxu0  ;;  %v40296_v30 = vpack.c.bf16 %v17399_v21, %v17392_v8 }
 0xb7b   :  { %v40936_v14 = vadd.f32 %v17246_v11, %v16669_v17  ;;  %v17425_v17 = vand.u32 4294901760, %v43790_v37  ;;  %v17413_v11 = vand.u32 4294901760, %v17412_v25 }
 0xb7c   :  { %v17257_v29 = vmax.f32 %v40935_v26, 0.0  ;;  %v17406_v26 = vand.u32 4294901760, %v17405_v63 }
 0xb7d   :  { %v17256_v53 = vmax.f32 %v40936_v14, 0.0  ;;  %v17419_v14 = vsub.f32 %v43788_v62, %v17418_v6  ;;  %v40400_v5 = vpack.c.bf16 %v17425_v17, %v17418_v6  ;;  %v18018_v62 = vand.u32 4294901760, %v17952_v31 }
 0xb7e   :  { %v43895_v40 = vand.u32 4294901760, %v17257_v29 }
 0xb7f   :  { %v43898_v60 = vand.u32 4294901760, %v17256_v53  ;;  %v17420_v42 = vand.u32 4294901760, %v17419_v14  ;;  %v44028_v63 = vsub.f32 %v17952_v31, %v18018_v62 }
 0xb80   :  { %v43902_v55 = vsub.f32 %v17257_v29, %v43895_v40  ;;  %v17426_v29 = vsub.f32 %v43790_v37, %v17425_v17 }
 0xb81   :  { %v17340_v13 = vsub.f32 %v17256_v53, %v43898_v60  ;;  %v17432_v53 = vand.u32 4294901760, %v43796_v41 }
 0xb82   :  { %v17351_v3 = vand.u32 4294901760, %v43902_v55 }
 0xb83   :  { %38408 = vmatprep.mubr.f32.mxu1 %v17340_v13  ;;  %v17341_v20 = vand.u32 4294901760, %v17340_v13  ;;  %v17433_v54 = vsub.f32 %v43796_v41, %v17432_v53  ;;  %v40388_v41 = vpack.c.bf16 %v17383_v52, %v17376_v35  ;;  %v40404_v28 = vpack.c.bf16 %v17439_v0, %v17432_v53 }
 0xb84   :  { %v17352_v50 = vsub.f32 %v43902_v55, %v17351_v3  ;;  %38409 = vmatmul.mubr.f32.vlgmr.msra.gmra.mrb[34].mxu1 %v43902_v55 }
 0xb85   :  { %40355 = vmatpush3.bf16.msra.mxu1 %v43754_v12  ;;  %38443 = vmatprep.mubr.f32.mxu1 %v17341_v20  ;;  %v17342_v7 = vsub.f32 %v17340_v13, %v17341_v20  ;;  %v17427_v13 = vand.u32 4294901760, %v17426_v29  ;;  %v17440_v20 = vsub.f32 %v43798_v48, %v17439_v0  ;;  %v17434_v9 = vand.u32 4294901760, %v17433_v54 }
 0xb86   :  { %40357 = vmatprep.subr.bf16.mxu1 %v43762_v59  ;;  %v17353_v36 = vand.u32 4294901760, %v17352_v50 }
 0xb87   :  { %v17343_v32 = vand.u32 4294901760, %v17342_v7  ;;  %v40304_v37 = vpack.c.bf16 %v17427_v13, %v17420_v42  ;;  %v17441_v50 = vand.u32 4294901760, %v17440_v20  ;;  %v44044_v42 = vsub.f32 %v17959_v24, %v18028_v33 }
 0xb88   :  { %v44050_v20 = vsub.f32 %v17960_v51, %v18034_v10 }
 0xb89   :  { %40359 = vmatpush3.bf16.msra.mxu1 %v43762_v59  ;;  %38338 = vmatprep.mubr.f32.mxu0 %v17343_v32  ;;  %v40308_v57 = vpack.c.bf16 %v17441_v50, %v17434_v9 }
 0xb8a   :  { %38339 = vmatmul.mubr.f32.vlgmr.msra.gmra.mrb[42].mxu0 %v17353_v36  ;;  %40361 = vmatprep.subr.bf16.mxu1 %v43766_v16  ;;  %v17963_v36 = vld [vmem:[#allocation5 + $0x248] sm:$0xff] }
 0xb8b   :  { %40291 = vmatpush3.bf16.msra.mxu0 %v43876_v1  ;;  %38373 = vmatprep.mubr.f32.mxu0 %v43898_v60  ;;  %v40300_v1 = vpack.c.bf16 %v17413_v11, %v17406_v26  ;;  %v18036_v6 = vand.u32 4294901760, %v17963_v36 }
 0xb8c   :  { %40293 = vmatprep.subr.bf16.mxu0 %v40292_v18 }
 0xb8d   :  { %40363 = vmatpush3.bf16.msra.mxu1 %v43766_v16  ;;  %v44054_v9 = vsub.f32 %v17963_v36, %v18036_v6 }
 0xb8e   :  { %40365 = vmatprep.subr.bf16.mxu1 %v43776_v44 }
 0xb8f   :  { %40295 = vmatpush3.bf16.msra.mxu0 %v40292_v18  ;;  %v17965_v18 = vld [vmem:[#allocation5 + $0x2a0] sm:$0xff] }
 0xb90   :  { %40297 = vmatprep.subr.bf16.mxu0 %v40296_v30  ;;  %v18040_v17 = vand.u32 4294901760, %v17965_v18 }
 0xb91   :  { %40367 = vmatpush3.bf16.msra.mxu1 %v43776_v44 }
 0xb92   :  { %40369 = vmatprep.subr.bf16.mxu1 %v43784_v4  ;;  %v44056_v50 = vsub.f32 %v17965_v18, %v18040_v17  ;;  %v18183_v18 = vand.u32 4294901760, %v44050_v20 }
 0xb93   :  { %40299 = vmatpush3.bf16.msra.mxu0 %v40296_v30  ;;  %v17962_v30 = vld [vmem:[#allocation5 + $0x240] sm:$0xff] }
 0xb94   :  { %40301 = vmatprep.subr.bf16.mxu0 %v40300_v1 }
 0xb95   :  { %40371 = vmatpush3.bf16.msra.mxu1 %v43784_v4 }
 0xb96   :  { %40373 = vmatprep.subr.bf16.mxu1 %v43792_v58 }
 0xb97   :  { %40303 = vmatpush3.bf16.msra.mxu0 %v40300_v1  ;;  %v17964_v1 = vld [vmem:[#allocation5 + $0x298] sm:$0xff] }
 0xb98   :  { %40305 = vmatprep.subr.bf16.mxu0 %v40304_v37 }
 0xb99   :  { %40375 = vmatpush3.bf16.msra.mxu1 %v43792_v58 }
 0xb9a   :  { %40377 = vmatprep.subr.bf16.mxu1 %v43863_v38 }
 0xb9b   :  { %40307 = vmatpush3.bf16.msra.mxu0 %v40304_v37  ;;  %v44052_v37 = vpack.c.bf16 %v18040_v17, %v18036_v6 }
 0xb9c   :  { %40309 = vmatprep.subr.bf16.mxu0 %v40308_v57 }
 0xb9d   :  { %40379 = vmatpush3.bf16.msra.mxu1 %v43863_v38 }
 0xb9e   :  { %40381 = vmatprep.subr.bf16.mxu1 %v43870_v46 }
 0xb9f   :  { %40311 = vmatpush3.bf16.msra.mxu0 %v40308_v57  ;;  %v18038_v57 = vand.u32 4294901760, %v17962_v30 }
 0xba0   :  { %40313 = vmatprep.subr.bf16.mxu0 %v43879_v39 }
 0xba1   :  { %40383 = vmatpush3.bf16.msra.mxu1 %v43870_v46 }
 0xba2   :  { %40385 = vmatprep.subr.bf16.mxu1 %v43881_v43 }
 0xba3   :  { %40315 = vmatpush3.bf16.msra.mxu0 %v43879_v39 }
 0xba4   :  { %38444 = vmatmul.mubr.f32.vlgmr.msra.gmra.mrb[34].mxu1 %v17351_v3  ;;  %40317 = vmatprep.subr.bf16.mxu0 %v43883_v49  ;;  %v17958_v3 = vld [vmem:[#allocation5 + $0x190] sm:$0xff] }
 0xba5   :  { %40387 = vmatpush3.bf16.msra.mxu1 %v43881_v43  ;;  %38478 = vmatprep.mubr.f32.mxu1 %v43898_v60  ;;  %v18030_v45 = vand.u32 4294901760, %v17958_v3 }
 0xba6   :  { %40389 = vmatprep.subr.bf16.mxu1 %v40388_v41 }
 0xba7   :  { %40319 = vmatpush3.bf16.msra.mxu0 %v43883_v49  ;;  %v17954_v49 = vld [vmem:[#allocation5 + $0xe0] sm:$0xff]  ;;  %v44030_v25 = vpack.c.bf16 %v18034_v10, %v18030_v45  ;;  %v44048_v54 = vsub.f32 %v17958_v3, %v18030_v45  ;;  %v18165_v3 = vand.u32 4294901760, %v44044_v42 }
 0xba9   :  { %40391 = vmatpush3.bf16.msra.mxu1 %v40388_v41  ;;  %v18042_v41 = vand.u32 4294901760, %v17964_v1  ;;  %v18171_v36 = vand.u32 4294901760, %v44048_v54 }
 0xbaa   :  { %38374 = vmatmul.mubr.f32.vlgmr.msra.gmra.mrb[42].mxu0 %v43895_v40  ;;  %40393 = vmatprep.subr.bf16.mxu1 %v40392_v56 }
 0xbab   :  { %18092 = vmatprep.mubr.f32.mxu0 %v46150_v27 }
 0xbad   :  { %40395 = vmatpush3.bf16.msra.mxu1 %v40392_v56 }
 0xbae   :  { %40397 = vmatprep.subr.bf16.mxu1 %v40396_v47 }
 0xbb1   :  { %40399 = vmatpush3.bf16.msra.mxu1 %v40396_v47 }
 0xbb2   :  { %40401 = vmatprep.subr.bf16.mxu1 %v40400_v5 }
 0xbb5   :  { %40403 = vmatpush3.bf16.msra.mxu1 %v40400_v5 }
 0xbb6   :  { %40405 = vmatprep.subr.bf16.mxu1 %v40404_v28 }
 0xbb9   :  { %40407 = vmatpush3.bf16.msra.mxu1 %v40404_v28  ;;  %v44066_v28 = vsub.f32 %v17962_v30, %v18038_v57  ;;  %v18166_v30 = vsub.f32 %v44044_v42, %v18165_v3 }
 0xbba   :  { %40409 = vmatprep.subr.bf16.mxu1 %v43885_v2 }
 0xbbd   :  { %40411 = vmatpush3.bf16.msra.mxu1 %v43885_v2  ;;  %v17956_v2 = vld [vmem:[#allocation5 + $0x138] sm:$0xff] }
 0xbbe   :  { %40413 = vmatprep.subr.bf16.mxu1 %v43887_v61  ;;  %v18026_v35 = vand.u32 4294901760, %v17956_v2 }
 0xbc0   :  { %v44041_v0 = vsub.f32 %v17956_v2, %v18026_v35 }
 0xbc1   :  { %40415 = vmatpush3.bf16.msra.mxu1 %v43887_v61  ;;  %v18022_v61 = vand.u32 4294901760, %v17954_v49 }
 0xbc2   :  { %40417 = vmatprep.subr.bf16.mxu1 %v43754_v12  ;;  %v18159_v2 = vand.u32 4294901760, %v44041_v0 }
 0xbc3   :  { %v44039_v53 = vsub.f32 %v17954_v49, %v18022_v61 }
 0xbc4   :  { %38479 = vmatmul.mubr.f32.vlgmr.msra.gmra.mrb[34].mxu1 %v43895_v40 }
 0xbc5   :  { %40419 = vmatpush3.bf16.msra.mxu1 %v43754_v12  ;;  %38513 = vmatprep.mubr.f32.mxu1 %v43898_v60  ;;  %v17951_v12 = vld [vmem:[#allocation5 + $0x38] sm:$0xff]  ;;  %v17961_v60 = vld [vmem:[#allocation5 + $0x1f0] sm:$0xff]  ;;  %v18147_v49 = vand.u32 4294901760, %v44039_v53 }
 0xbc6   :  { %40421 = vmatprep.subr.bf16.mxu1 %v43762_v59  ;;  %v18032_v55 = vand.u32 4294901760, %v17961_v60 }
 0xbc8   :  { %v44024_v32 = vpack.c.bf16 %v18032_v55, %v18028_v33  ;;  %v44046_v13 = vsub.f32 %v17961_v60, %v18032_v55  ;;  %v18148_v33 = vsub.f32 %v44039_v53, %v18147_v49  ;;  %v18160_v55 = vsub.f32 %v44041_v0, %v18159_v2 }
 0xbc9   :  { %40423 = vmatpush3.bf16.msra.mxu1 %v43762_v59  ;;  %v17953_v59 = vld [vmem:[#allocation5 + $0x90] sm:$0xff] }
 0xbca   :  { %40425 = vmatprep.subr.bf16.mxu1 %v43766_v16  ;;  %v18177_v51 = vand.u32 4294901760, %v44046_v13  ;;  %v18149_v6 = vand.u32 4294901760, %v18148_v33  ;;  %v18161_v17 = vand.u32 4294901760, %v18160_v55 }
 0xbcd   :  { %40427 = vmatpush3.bf16.msra.mxu1 %v43766_v16  ;;  %v18012_v16 = vand.u32 4294901760, %v17951_v12 }
 0xbce   :  { %40429 = vmatprep.subr.bf16.mxu1 %v43776_v44 }
 0xbcf   :  { %v44020_v7 = vsub.f32 %v17951_v12, %v18012_v16  ;;  %v18135_v12 = vand.u32 4294901760, %v44028_v63 }
 0xbd1   :  { %40431 = vmatpush3.bf16.msra.mxu1 %v43776_v44  ;;  %v18016_v44 = vand.u32 4294901760, %v17953_v59  ;;  %v18117_v26 = vand.u32 4294901760, %v44020_v7 }
 0xbd2   :  { %40433 = vmatprep.subr.bf16.mxu1 %v43784_v4 }
 0xbd3   :  { %v44022_v8 = vsub.f32 %v17953_v59, %v18016_v44  ;;  %v18118_v56 = vsub.f32 %v44020_v7, %v18117_v26 }
 0xbd5   :  { %40435 = vmatpush3.bf16.msra.mxu1 %v43784_v4  ;;  %v18014_v4 = vand.u32 4294901760, %v17950_v22  ;;  %v18129_v11 = vand.u32 4294901760, %v44022_v8  ;;  %v18119_v31 = vand.u32 4294901760, %v18118_v56  ;;  %v18189_v56 = vand.u32 4294901760, %v44054_v9 }
 0xbd6   :  { %40437 = vmatprep.subr.bf16.mxu1 %v43792_v58 }
 0xbd7   :  { %v44010_v48 = vpack.c.bf16 %v18018_v62, %v18014_v4  ;;  %v44026_v21 = vsub.f32 %v17950_v22, %v18014_v4  ;;  %v18130_v47 = vsub.f32 %v44022_v8, %v18129_v11  ;;  %v44073_v22 = vsub.f32 %v17964_v1, %v18042_v41 }
 0xbd8   :  { %v18178_v1 = vsub.f32 %v44046_v13, %v18177_v51 }
 0xbd9   :  { %40439 = vmatpush3.bf16.msra.mxu1 %v43792_v58  ;;  %v44008_v58 = vpack.c.bf16 %v18016_v44, %v18012_v16  ;;  %v18123_v5 = vand.u32 4294901760, %v44026_v21  ;;  %v44071_v44 = vpack.c.bf16 %v18042_v41, %v18038_v57  ;;  %v18131_v4 = vand.u32 4294901760, %v18130_v47 }
 0xbda   :  { %40441 = vmatprep.subr.bf16.mxu1 %v43863_v38  ;;  %v18172_v57 = vsub.f32 %v44048_v54, %v18171_v36  ;;  %v18184_v41 = vsub.f32 %v44050_v20, %v18183_v18  ;;  %v18201_v47 = vand.u32 4294901760, %v44056_v50 }
 0xbdb   :  { %40449 = vmatprep.subr.bf16.mxu0 %v44008_v58  ;;  %v18124_v62 = vsub.f32 %v44026_v21, %v18123_v5 }
 0xbdc   :  { %40451 = vmatpush1.bf16.msra.mxu0 %v44010_v48 }
 0xbdd   :  { %40443 = vmatpush3.bf16.msra.mxu1 %v43863_v38  ;;  %v17955_v38 = vld [vmem:[#allocation5 + $0xe8] sm:$0xff] }
 0xbde   :  { %40445 = vmatprep.subr.bf16.mxu1 %v43870_v46  ;;  %v18020_v39 = vand.u32 4294901760, %v17955_v38 }
 0xbe0   :  { %v44035_v14 = vsub.f32 %v17955_v38, %v18020_v39  ;;  %v18136_v38 = vsub.f32 %v44028_v63, %v18135_v12 }
 0xbe1   :  { %40447 = vmatpush3.bf16.msra.mxu1 %v43870_v46  ;;  %v17957_v46 = vld [vmem:[#allocation5 + $0x140] sm:$0xff] }
 0xbe2   :  { %38636 = vmatprep.subr.mxu1 %v46150_v27  ;;  %v18024_v43 = vand.u32 4294901760, %v17957_v46  ;;  %v18141_v59 = vand.u32 4294901760, %v44035_v14 }
 0xbe4   :  { %38514 = vmatmul.mubr.f32.vlgmr.msra.gmra.mrb[34].mxu1 %v43895_v40  ;;  %v44014_v52 = vpack.c.bf16 %v18024_v43, %v18020_v39  ;;  %v44016_v40 = vpack.c.bf16 %v18026_v35, %v18022_v61  ;;  %v44037_v29 = vsub.f32 %v17957_v46, %v18024_v43  ;;  %v18142_v46 = vsub.f32 %v44035_v14, %v18141_v59 }
 0xbe5   :  { %38638 = vmatprep.mubr.msk.f32.mxu1 %vm41964_vm2, %v46150_v27  ;;  %v40464_v43 = vpack.c.bf16 %v18131_v4, %v18119_v31  ;;  %v18125_v61 = vand.u32 4294901760, %v18124_v62  ;;  %v18137_v35 = vand.u32 4294901760, %v18136_v38  ;;  %v44106_v31 = vpack.c.bf16 %v18161_v17, %v18149_v6 }
 0xbe6   :  { %40453 = vmatprep.subr.bf16.mxu0 %v44014_v52  ;;  %v46152_v16 = vand.u32 4294901760, %v44037_v29  ;;  %v18143_v24 = vand.u32 4294901760, %v18142_v46  ;;  %v18167_v4 = vand.u32 4294901760, %v18166_v30  ;;  %v18179_v62 = vand.u32 4294901760, %v18178_v1 }
 0xbe7   :  { %40455 = vmatpush1.bf16.msra.mxu0 %v44016_v40  ;;  %v44094_v45 = vpack.c.bf16 %v18137_v35, %v18125_v61  ;;  %v18195_v38 = vand.u32 4294901760, %v44066_v28  ;;  %v18173_v46 = vand.u32 4294901760, %v18172_v57  ;;  %v18202_v61 = vsub.f32 %v44056_v50, %v18201_v47 }
 0xbe8   :  { %40457 = vmatprep.subr.bf16.mxu0 %v44024_v32  ;;  %v18154_v39 = vsub.f32 %v44037_v29, %v46152_v16  ;;  %v40472_v35 = vpack.c.bf16 %v18179_v62, %v18167_v4  ;;  %v40480_v57 = vpack.c.bf16 %v44022_v8, %v44020_v7  ;;  %v40484_v4 = vpack.c.bf16 %v44037_v29, %v44035_v14 }
 0xbe9   :  { %v18203_v27 = vand.u32 4294901760, %v18202_v61  ;;  %v40486_v62 = vpack.c.bf16 %v44041_v0, %v44039_v53  ;;  %v44134_v61 = vpack.c.bf16 %v18129_v11, %v18117_v26  ;;  %v44140_v53 = vpack.c.bf16 %v18135_v12, %v18123_v5 }
 0xbea   :  { %v18155_v60 = vand.u32 4294901760, %v18154_v39  ;;  %v18185_v39 = vand.u32 4294901760, %v18184_v41  ;;  %v40482_v41 = vpack.c.bf16 %v44028_v63, %v44026_v21  ;;  %v46163_v0 = vand.u32 4294901760, %v44037_v29 }
 0xbeb   :  { %40459 = vmatpush1.bf16.msra.mxu0 %v44030_v25  ;;  %v44152_v8 = vpack.c.bf16 %v18183_v18, %v18171_v36  ;;  %v44154_v26 = vpack.c.bf16 %v18201_v47, %v18189_v56  ;;  %v17946_v63 = vsub.s32 5, %v42186_v34 }
 0xbec   :  { %40461 = vmatprep.subr.bf16.mxu0 %v44052_v37  ;;  %v44096_v10 = vpack.c.bf16 %v18155_v60, %v18143_v24  ;;  %v18196_v24 = vsub.f32 %v44066_v28, %v18195_v38  ;;  %v18207_v60 = vand.u32 4294901760, %v44073_v22  ;;  %v40474_v33 = vpack.c.bf16 %v18185_v39, %v18173_v46 }
 0xbed   :  { %v40488_v46 = vpack.c.bf16 %v44046_v13, %v44044_v42  ;;  %v40492_v39 = vpack.c.bf16 %v44056_v50, %v44054_v9  ;;  %v44146_v42 = vpack.c.bf16 %v46163_v0, %v18141_v59  ;;  %v17947_v29 = vrot.slane %v43890_v15, %v17946_v63 }
 0xbee   :  { %v18197_v6 = vand.u32 4294901760, %v18196_v24  ;;  %v18208_v17 = vsub.f32 %v44073_v22, %v18207_v60  ;;  %v44156_v21 = vpack.c.bf16 %v18207_v60, %v18195_v38  ;;  %v46164_v38 = vmov 0.0  }
 0xbef   :  { %40463 = vmatpush1.bf16.msra.mxu0 %v44071_v44 }
 0xbf0   :  { %40465 = vmatprep.subr.bf16.mxu0 %v40464_v43  ;;  %v18190_v43 = vsub.f32 %v44054_v9, %v18189_v56  ;;  %v18209_v1 = vand.u32 4294901760, %v18208_v17 }
 0xbf2   :  { %v18191_v55 = vand.u32 4294901760, %v18190_v43  ;;  %v40478_v16 = vpack.c.bf16 %v18209_v1, %v18197_v6  ;;  %v40494_v43 = vpack.c.bf16 %v44073_v22, %v44066_v28 }
 0xbf4   :  { %v40476_v30 = vpack.c.bf16 %v18203_v27, %v18191_v55  ;;  %v40490_v27 = vpack.c.bf16 %v44050_v20, %v44048_v54  ;;  %v44148_v54 = vpack.c.bf16 %v18159_v2, %v18147_v49  ;;  %v44150_v20 = vpack.c.bf16 %v18177_v51, %v18165_v3 }
 0xc7d   :  { %v38375_v13 = vpop.f32.mrb[42].mxu0 }
 0xc7e   :  { %v17506_v7 = vpop.f32.mrb[43].mxu0 }
 0xcb7   :  { %v38515_v11 = vpop.f32.mrb[34].mxu1 }
 0xcb8   :  { %v40937_v14 = vadd.f32 %v38515_v11, %v38375_v13  ;;  %v17932_v9 = vpop.f32.mrb[35].mxu1 }
 0xcb9   :  { %v40938_v50 = vadd.f32 %v17932_v9, %v17506_v7 }
 0xcba   :  { %v17943_v5 = vadd.f32 %v40937_v14, %v43803_v19 }
 0xcbb   :  { %v17942_v28 = vadd.f32 %v40938_v50, %v43806_v23 }
 0xcbc   :  { %v44162_v12 = vadd.f32 %v17947_v29, %v17943_v5 }
 0xcbd   :  { %v44164_v59 = vadd.f32 %v17947_v29, %v17942_v28 }
 0xcbe   :  { %v18010_v22 = vsel %vm633_vm1, %v44162_v12, 0 }
 0xcbf   :  { %v44168_v49 = vand.u32 4294901760, %v18010_v22  ;;  %v18007_v2 = vsel %vm633_vm1, %v44164_v59, 0 }
 0xcc0   :  { %v44172_v3 = vand.u32 4294901760, %v18007_v2 }
 0xcc1   :  { %v18105_v51 = vsub.f32 %v18010_v22, %v44168_v49 }
 0xcc2   :  { %v18094_v19 = vsub.f32 %v18007_v2, %v44172_v3 }
 0xcc3   :  { %v18106_v23 = vand.u32 4294901760, %v18105_v51 }
 0xcc4   :  { %v18095_v36 = vand.u32 4294901760, %v18094_v19 }
 0xcc5   :  { %v18107_v47 = vsub.f32 %v18105_v51, %v18106_v23 }
 0xcc6   :  { %v18096_v18 = vsub.f32 %v18094_v19, %v18095_v36 }
 0xcc7   :  { %v18108_v24 = vand.u32 4294901760, %v18107_v47 }
 0xcc8   :  { %v18097_v56 = vand.u32 4294901760, %v18096_v18 }
 0xcca   :  { %18098 = vmatmul.mubr.f32.vlgmr.msra.gmra.mrb[44].mxu0 %v18097_v56 }
 0xccb   :  { %40467 = vmatpush1.bf16.msra.mxu0 %v44094_v45  ;;  %18103 = vmatprep.mubr.f32.mxu0 %v46164_v38 }
 0xccc   :  { %40469 = vmatprep.subr.bf16.mxu0 %v44096_v10 }
 0xcce   :  { %18109 = vmatmul.mubr.f32.gmra.mrb[46].mxu0 %v18108_v24 }
 0xccf   :  { %40471 = vmatpush1.bf16.msra.mxu0 %v44106_v31  ;;  %18259 = vmatprep.mubr.f32.mxu0 %v46164_v38 }
 0xcd0   :  { %40473 = vmatprep.subr.bf16.mxu0 %v40472_v35 }
 0xcd3   :  { %40475 = vmatpush1.bf16.msra.mxu0 %v40474_v33 }
 0xcd4   :  { %40477 = vmatprep.subr.bf16.mxu0 %v40476_v30 }
 0xcd7   :  { %40479 = vmatpush1.bf16.msra.mxu0 %v40478_v16 }
 0xcd8   :  { %40481 = vmatprep.subr.bf16.mxu0 %v40480_v57 }
 0xcda   :  { %18261 = vmatmul.mubr.f32.vlgmr.msra.gmra.mrb[44].mxu0 %v44172_v3 }
 0xcdb   :  { %40483 = vmatpush1.bf16.msra.mxu0 %v40482_v41  ;;  %18266 = vmatprep.mubr.f32.mxu0 %v46164_v38 }
 0xcdc   :  { %40485 = vmatprep.subr.bf16.mxu0 %v40484_v4 }
 0xcde   :  { %18268 = vmatmul.mubr.f32.gmra.mrb[46].mxu0 %v44168_v49 }
 0xcdf   :  { %40487 = vmatpush1.bf16.msra.mxu0 %v40486_v62  ;;  %18370 = vmatprep.mubr.f32.mxu0 %v46164_v38 }
 0xce0   :  { %40489 = vmatprep.subr.bf16.mxu0 %v40488_v46 }
 0xce3   :  { %40491 = vmatpush1.bf16.msra.mxu0 %v40490_v27 }
 0xce4   :  { %40493 = vmatprep.subr.bf16.mxu0 %v40492_v39 }
 0xce7   :  { %40495 = vmatpush1.bf16.msra.mxu0 %v40494_v43 }
 0xce8   :  { %40497 = vmatprep.subr.bf16.mxu0 %v44008_v58 }
 0xcea   :  { %18373 = vmatmul.mubr.f32.vlgmr.msra.gmra.mrb[44].mxu0 %v18094_v19 }
 0xceb   :  { %40499 = vmatpush1.bf16.msra.mxu0 %v44010_v48  ;;  %18378 = vmatprep.mubr.f32.mxu0 %v46164_v38 }
 0xcec   :  { %40501 = vmatprep.subr.bf16.mxu0 %v44014_v52 }
 0xcee   :  { %18381 = vmatmul.mubr.f32.gmra.mrb[46].mxu0 %v18105_v51 }
 0xcef   :  { %40503 = vmatpush1.bf16.msra.mxu0 %v44016_v40  ;;  %18467 = vmatprep.mubr.f32.mxu0 %v46164_v38 }
 0xcf0   :  { %40505 = vmatprep.subr.bf16.mxu0 %v44024_v32 }
 0xcf3   :  { %40507 = vmatpush1.bf16.msra.mxu0 %v44030_v25 }
 0xcf4   :  { %40509 = vmatprep.subr.bf16.mxu0 %v44052_v37 }
 0xcf7   :  { %40511 = vmatpush1.bf16.msra.mxu0 %v44071_v44 }
 0xcf8   :  { %40513 = vmatprep.subr.bf16.mxu0 %v44134_v61 }
 0xcfa   :  { %18471 = vmatmul.mubr.f32.vlgmr.msra.gmra.mrb[44].mxu0 %v18095_v36 }
 0xcfb   :  { %40515 = vmatpush1.bf16.msra.mxu0 %v44140_v53  ;;  %18476 = vmatprep.mubr.f32.mxu0 %v46164_v38 }
 0xcfc   :  { %40517 = vmatprep.subr.bf16.mxu0 %v44146_v42 }
 0xcfe   :  { %18480 = vmatmul.mubr.f32.gmra.mrb[46].mxu0 %v18106_v23 }
 0xcff   :  { %40519 = vmatpush1.bf16.msra.mxu0 %v44148_v54  ;;  %18598 = vmatprep.mubr.f32.mxu0 %v46164_v38 }
 0xd00   :  { %40521 = vmatprep.subr.bf16.mxu0 %v44150_v20 }
 0xd03   :  { %40523 = vmatpush1.bf16.msra.mxu0 %v44152_v8 }
 0xd04   :  { %40525 = vmatprep.subr.bf16.mxu0 %v44154_v26 }
 0xd07   :  { %40527 = vmatpush1.bf16.msra.mxu0 %v44156_v21 }
 0xd08   :  { %40529 = vmatprep.subr.bf16.mxu0 %v44008_v58  ;;  %v18000_v58 = vsub.s32 2, %v42186_v34 }
 0xd0a   :  { %18600 = vmatmul.mubr.f32.vlgmr.msra.gmra.mrb[44].mxu0 %v44172_v3 }
 0xd0b   :  { %40531 = vmatpush1.bf16.msra.mxu0 %v44010_v48  ;;  %18605 = vmatprep.mubr.f32.mxu0 %v46164_v38  ;;  %v18001_v48 = vrot.slane %v43890_v15, %v18000_v58 }
 0xd0c   :  { %40533 = vmatprep.subr.bf16.mxu0 %v44014_v52 }
 0xd0e   :  { %18607 = vmatmul.mubr.f32.gmra.mrb[46].mxu0 %v44168_v49 }
 0xd0f   :  { %40535 = vmatpush1.bf16.msra.mxu0 %v44016_v40  ;;  %18693 = vmatprep.mubr.f32.mxu0 %v46164_v38 }
 0xd10   :  { %40537 = vmatprep.subr.bf16.mxu0 %v44024_v32 }
 0xd13   :  { %40539 = vmatpush1.bf16.msra.mxu0 %v44030_v25  ;;  %v41858_v25 = vld [vmem:[#allocation7 + $0x8] sm:$0xff] }
 0xd14   :  { %40541 = vmatprep.subr.bf16.mxu0 %v44052_v37  ;;  %v44229_v37 = vrot.slane %v41858_v25, %v18000_v58 }
 0xd17   :  { %40543 = vmatpush1.bf16.msra.mxu0 %v44071_v44 }
 0xd18   :  { %38516 = vmatprep.subr.mxu0 %v46164_v38 }
 0xd1a   :  { %18695 = vmatmul.mubr.f32.vlgmr.msra.gmra.mrb[44].mxu0 %v44172_v3 }
 0xd1b   :  { %18700 = vmatprep.mubr.f32.mxu0 %v46164_v38 }
 0xd1e   :  { %18702 = vmatmul.mubr.f32.gmra.mrb[46].mxu0 %v44168_v49 }
 0xd1f   :  { %38518 = vmatprep.mubr.msk.f32.mxu0 %vm41964_vm2, %v46164_v38 }
 0xded   :  { %v18696_v52 = vpop.f32.mrb[44].mxu0 }
 0xdee   :  { %v40939_v40 = vadd.f32 %v18696_v52, %v18001_v48  ;;  %v44225_v32 = vpop.f32.mrb[45].mxu0 }
 0xdf0   :  { %18782 = vrot.lane.b32.xlu1 %v40939_v40, %s41967_s27  ;;  %18709 = vrot.lane.b32.xlu0 %v40939_v40, %s41966_s26  ;;  %v18784_v15 = vsel %vm1412_vm3, %v40939_v40, 0 }
 0xdf1   :  { %v18703_v16 = vpop.f32.mrb[46].mxu0  ;;  %v18854_v31 = vand.u32 4294901760, %v18784_v15 }
 0xdf2   :  { %v44231_v44 = vadd.f32 %v18703_v16, %v18001_v48  ;;  %v18705_v45 = vpop.f32.mrb[47].mxu0 }
 0xdf3   :  { %v44234_v10 = vadd.f32 %v18705_v45, %v44229_v37  ;;  %v18855_v35 = vsub.f32 %v18784_v15, %v18854_v31 }
 0xdf4   :  { %18711 = vrot.lane.b32.xlu0 %v40939_v40, %s41965_s2 }
 0xdf5   :  { %v18856_v60 = vand.u32 4294901760, %v18855_v35 }
 0xdf7   :  { %v18857_v17 = vsub.f32 %v18855_v35, %v18856_v60 }
 0xdf8   :  { %18713 = vrot.lane.b32.xlu0 %v40939_v40, %s41968_s28 }
 0xdf9   :  { %v18858_v41 = vand.u32 4294901760, %v18857_v17 }
 0xdfc   :  { %18715 = vrot.lane.b32.xlu0 %v40939_v40, %s41969_s29 }
 0xe62   :  { %v18783_v33 = vpop.permute.xlu1 %18782  ;;  %v18710_v55 = vpop.permute.xlu0 %18709 }
 0xe63   :  { %v18786_v6 = vsel %vm1412_vm3, %v18783_v33, 0  ;;  %19234 = vrot.lane.b32.xlu1 %v18710_v55, %s41967_s27  ;;  %v19236_v43 = vsel %vm1412_vm3, %v18710_v55, 0 }
 0xe64   :  { %v18789_v30 = vand.u32 4294901760, %v18786_v6  ;;  %v44275_v61 = vand.u32 4294901760, %v19236_v43 }
 0xe66   :  { %v18866_v1 = vsub.f32 %v18786_v6, %v18789_v30  ;;  %38517 = vmatpush3.xpose.msra.mxu0 %v18789_v30  ;;  %v44242_v57 = vpop.permute.xlu0 %18711  ;;  %v19307_v53 = vsub.f32 %v19236_v43, %v44275_v61 }
 0xe67   :  { %19686 = vrot.lane.b32.xlu1 %v44242_v57, %s41967_s27  ;;  %38521 = vmatprep.subr.mxu0 %v46164_v38  ;;  %v19688_v58 = vsel %vm1412_vm3, %v44242_v57, 0 }
 0xe68   :  { %v18867_v4 = vand.u32 4294901760, %v18866_v1  ;;  %v19308_v0 = vand.u32 4294901760, %v19307_v53  ;;  %v44340_v52 = vand.u32 4294901760, %v19688_v58 }
 0xe69   :  { %38519 = vmatmul.mubr.f32.vlgmr.msra.gmra.mrb[48].mxu0 %v18858_v41 }
 0xe6a   :  { %v18868_v62 = vsub.f32 %v18866_v1, %v18867_v4  ;;  %v44247_v46 = vpop.permute.xlu0 %18713  ;;  %38523 = vmatprep.mubr.msk.f32.mxu0 %vm41964_vm2, %v46164_v38  ;;  %v19309_v13 = vsub.f32 %v19307_v53, %v19308_v0  ;;  %v19759_v25 = vsub.f32 %v19688_v58, %v44340_v52 }
 0xe6b   :  { %18717 = vrot.lane.b32.xlu1 %v40939_v40, %s41956_s23  ;;  %20138 = vrot.lane.b32.xlu0 %v44247_v46, %s41967_s27  ;;  %v20140_v55 = vsel %vm1412_vm3, %v44247_v46, 0 }
 0xe6c   :  { %v18869_v27 = vand.u32 4294901760, %v18868_v62  ;;  %v19310_v63 = vand.u32 4294901760, %v19309_v13  ;;  %v19760_v45 = vand.u32 4294901760, %v19759_v25  ;;  %v44388_v17 = vand.u32 4294901760, %v20140_v55 }
 0xe6e   :  { %38522 = vmatpush3.xpose.msra.mxu0 %v18869_v27  ;;  %v18716_v39 = vpop.permute.xlu0 %18715 }
 0xe6f   :  { %18719 = vrot.lane.b32.xlu1 %v40939_v40, %s41970_s30  ;;  %18721 = vrot.lane.b32.xlu0 %v40939_v40, %s41971_s4  ;;  %v20592_v7 = vsel %vm1412_vm3, %v18716_v39, 0 }
 0xe70   :  { %38526 = vmatprep.subr.mxu0 %v46164_v38  ;;  %v44284_v21 = vand.u32 4294901760, %v20592_v7 }
 0xe71   :  { %38524 = vmatmul.mubr.f32.vlgmr.msra.gmra.mrb[48].mxu0 %v18854_v31 }
 0xe72   :  { %38527 = vmatpush3.xpose.msra.mxu0 %v18866_v1  ;;  %38528 = vmatprep.mubr.msk.f32.mxu0 %vm41964_vm2, %v46164_v38  ;;  %v44294_v50 = vsub.f32 %v20592_v7, %v44284_v21  ;;  %v20211_v1 = vsub.f32 %v20140_v55, %v44388_v17 }
 0xe73   :  { %20590 = vrot.lane.b32.xlu1 %v18716_v39, %s41967_s27  ;;  %38531 = vmatprep.subr.mxu0 %v46164_v38 }
 0xe74   :  { %v20664_v49 = vand.u32 4294901760, %v44294_v50  ;;  %v20212_v41 = vand.u32 4294901760, %v20211_v1 }
 0xe76   :  { %v20665_v3 = vsub.f32 %v44294_v50, %v20664_v49  ;;  %v20213_v62 = vsub.f32 %v20211_v1, %v20212_v41 }
 0xe77   :  { %18724 = vrot.lane.b32.xlu1 %v44231_v44, %s41966_s26 }
 0xe78   :  { %v20666_v18 = vand.u32 4294901760, %v20665_v3  ;;  %v20214_v27 = vand.u32 4294901760, %v20213_v62 }
 0xe79   :  { %38529 = vmatmul.mubr.f32.vlgmr.msra.gmra.mrb[48].mxu0 %v18855_v35 }
 0xe7a   :  { %38532 = vmatpush3.xpose.msra.mxu0 %v18789_v30  ;;  %38533 = vmatprep.mubr.msk.f32.mxu0 %vm41964_vm2, %v46164_v38 }
 0xe7b   :  { %38536 = vmatprep.subr.mxu0 %v46164_v38 }
 0xe81   :  { %38534 = vmatmul.mubr.f32.vlgmr.msra.gmra.mrb[48].mxu0 %v18856_v60 }
 0xe82   :  { %38537 = vmatpush3.xpose.msra.mxu0 %v18867_v4  ;;  %38538 = vmatprep.mubr.msk.f32.mxu0 %vm41964_vm2, %v46164_v38 }
 0xe83   :  { %38541 = vmatprep.subr.mxu0 %v46164_v38 }
 0xe89   :  { %38539 = vmatmul.mubr.f32.vlgmr.msra.gmra.mrb[48].mxu0 %v18854_v31 }
 0xe8a   :  { %38542 = vmatpush3.xpose.msra.mxu0 %v18789_v30  ;;  %38543 = vmatprep.mubr.msk.f32.mxu0 %vm41964_vm2, %v46164_v38 }
 0xe8b   :  { %38546 = vmatprep.subr.mxu0 %v46164_v38 }
 0xe91   :  { %38544 = vmatmul.mubr.f32.vlgmr.msra.gmra.mrb[48].mxu0 %v18854_v31  ;;  %v19761_v31 = vsub.f32 %v19759_v25, %v19760_v45 }
 0xe92   :  { %38548 = vmatprep.mubr.msk.f32.mxu0 %vm41964_vm2, %v46164_v38 }
 0xe93   :  { %v19762_v60 = vand.u32 4294901760, %v19761_v31 }
 0xed5   :  { %v19235_v42 = vpop.permute.xlu1 %19234 }
 0xed6   :  { %v19238_v54 = vsel %vm1412_vm3, %v19235_v42, 0 }
 0xed7   :  { %v44280_v20 = vand.u32 4294901760, %v19238_v54 }
 0xed9   :  { %v19318_v8 = vsub.f32 %v19238_v54, %v44280_v20  ;;  %v19687_v26 = vpop.permute.xlu1 %19686  ;;  %38547 = vmatpush3.xpose.msra.mxu0 %v44280_v20 }
 0xeda   :  { %38551 = vmatprep.subr.mxu0 %v46164_v38  ;;  %v19690_v48 = vsel %vm1412_vm3, %v19687_v26, 0 }
 0xedb   :  { %v19319_v11 = vand.u32 4294901760, %v19318_v8  ;;  %v19693_v40 = vand.u32 4294901760, %v19690_v48 }
 0xedc   :  { %38549 = vmatmul.mubr.f32.vlgmr.msra.gmra.mrb[50].mxu0 %v19310_v63 }
 0xedd   :  { %v19320_v14 = vsub.f32 %v19318_v8, %v19319_v11  ;;  %v44287_v29 = vpop.permute.xlu1 %18717  ;;  %v44289_v9 = vpop.permute.xlu0 %20138  ;;  %38553 = vmatprep.mubr.msk.f32.mxu0 %vm41964_vm2, %v46164_v38  ;;  %v19770_v16 = vsub.f32 %v19690_v48, %v19693_v40 }
 0xede   :  { %21042 = vrot.lane.b32.xlu0 %v44287_v29, %s41967_s27  ;;  %v20142_v6 = vsel %vm1412_vm3, %v44289_v9, 0 }
 0xedf   :  { %v19321_v5 = vand.u32 4294901760, %v19320_v14  ;;  %v19771_v15 = vand.u32 4294901760, %v19770_v16  ;;  %v20145_v30 = vand.u32 4294901760, %v20142_v6 }
 0xee1   :  { %v44298_v28 = vpop.permute.xlu1 %18719  ;;  %v44300_v22 = vpop.permute.xlu0 %18721  ;;  %38552 = vmatpush3.xpose.msra.mxu0 %v19321_v5  ;;  %v19772_v35 = vsub.f32 %v19770_v16, %v19771_v15  ;;  %v20222_v57 = vsub.f32 %v20142_v6, %v20145_v30 }
 0xee2   :  { %21494 = vrot.lane.b32.xlu0 %v44298_v28, %s41967_s27  ;;  %21946 = vrot.lane.b32.xlu1 %v44300_v22, %s41967_s27  ;;  %v21496_v43 = vsel %vm1412_vm3, %v44298_v28, 0 }
 0xee3   :  { %38556 = vmatprep.subr.mxu0 %v46164_v38  ;;  %v19773_v33 = vand.u32 4294901760, %v19772_v35  ;;  %v20223_v4 = vand.u32 4294901760, %v20222_v57  ;;  %v21948_v35 = vsel %vm1412_vm3, %v44300_v22, 0 }
 0xee4   :  { %38554 = vmatmul.mubr.f32.vlgmr.msra.gmra.mrb[50].mxu0 %v44275_v61 }
 0xee5   :  { %v20591_v2 = vpop.permute.xlu1 %20590  ;;  %38557 = vmatpush3.xpose.msra.mxu0 %v19318_v8  ;;  %38558 = vmatprep.mubr.msk.f32.mxu0 %vm41964_vm2, %v46164_v38  ;;  %v20224_v46 = vsub.f32 %v20222_v57, %v20223_v4 }
 0xee6   :  { %v20594_v51 = vsel %vm1412_vm3, %v20591_v2, 0  ;;  %18726 = vrot.lane.b32.xlu0 %v44231_v44, %s41965_s2  ;;  %18728 = vrot.lane.b32.xlu1 %v44231_v44, %s41968_s28 }
 0xee7   :  { %v20597_v19 = vand.u32 4294901760, %v20594_v51  ;;  %38561 = vmatprep.subr.mxu0 %v46164_v38  ;;  %v20225_v39 = vand.u32 4294901760, %v20224_v46 }
 0xee9   :  { %v20674_v36 = vsub.f32 %v20594_v51, %v20597_v19  ;;  %38637 = vmatpush3.xpose.msra.mxu1 %v20597_v19  ;;  %v44318_v23 = vpop.permute.xlu1 %18724 }
 0xeea   :  { %22398 = vrot.lane.b32.xlu0 %v44231_v44, %s41967_s27  ;;  %22850 = vrot.lane.b32.xlu1 %v44318_v23, %s41967_s27 }
 0xeeb   :  { %v20675_v56 = vand.u32 4294901760, %v20674_v36  ;;  %38641 = vmatprep.subr.mxu1 %v46164_v38 }
 0xeec   :  { %38559 = vmatmul.mubr.f32.vlgmr.msra.gmra.mrb[50].mxu0 %v19307_v53  ;;  %38639 = vmatmul.mubr.f32.vlgmr.msra.gmra.mrb[36].mxu1 %v20666_v18  ;;  %v21044_v53 = vsel %vm1412_vm3, %v44287_v29, 0 }
 0xeed   :  { %v20676_v47 = vsub.f32 %v20674_v36, %v20675_v56  ;;  %38562 = vmatpush3.xpose.msra.mxu0 %v44280_v20  ;;  %38563 = vmatprep.mubr.msk.f32.mxu0 %vm41964_vm2, %v46164_v38  ;;  %v44421_v42 = vand.u32 4294901760, %v21044_v53 }
 0xeee   :  { %18730 = vrot.lane.b32.xlu0 %v44231_v44, %s41969_s29  ;;  %18732 = vrot.lane.b32.xlu1 %v44231_v44, %s41956_s23 }
 0xeef   :  { %v20677_v24 = vand.u32 4294901760, %v20676_v47  ;;  %38566 = vmatprep.subr.mxu0 %v46164_v38  ;;  %38643 = vmatprep.mubr.msk.f32.mxu1 %vm41964_vm2, %v46164_v38 }
 0xef1   :  { %38642 = vmatpush3.xpose.msra.mxu1 %v20677_v24 }
 0xef2   :  { %38646 = vmatprep.subr.mxu1 %v46164_v38 }
 0xef4   :  { %38564 = vmatmul.mubr.f32.vlgmr.msra.gmra.mrb[50].mxu0 %v19308_v0  ;;  %38644 = vmatmul.mubr.f32.vlgmr.msra.gmra.mrb[36].mxu1 %v44284_v21 }
 0xef5   :  { %38567 = vmatpush3.xpose.msra.mxu0 %v19319_v11  ;;  %38647 = vmatpush3.xpose.msra.mxu1 %v20674_v36 }
 0xef6   :  { %38568 = vmatprep.mubr.msk.f32.mxu0 %vm41964_vm2, %v46164_v38  ;;  %38571 = vmatprep.subr.mxu0 %v46164_v38 }
 0xef7   :  { %38648 = vmatprep.mubr.msk.f32.mxu1 %vm41964_vm2, %v46164_v38  ;;  %38651 = vmatprep.subr.mxu1 %v46164_v38 }
 0xefc   :  { %38569 = vmatmul.mubr.f32.vlgmr.msra.gmra.mrb[50].mxu0 %v44275_v61  ;;  %38649 = vmatmul.mubr.f32.vlgmr.msra.gmra.mrb[36].mxu1 %v44294_v50 }
 0xefd   :  { %38572 = vmatpush3.xpose.msra.mxu0 %v44280_v20  ;;  %38652 = vmatpush3.xpose.msra.mxu1 %v20597_v19  ;;  %v44427_v20 = vsub.f32 %v21044_v53, %v44421_v42 }
 0xefe   :  { %38573 = vmatprep.mubr.msk.f32.mxu0 %vm41964_vm2, %v46164_v38  ;;  %38576 = vmatprep.subr.mxu0 %v46164_v38 }
 0xeff   :  { %38653 = vmatprep.mubr.msk.f32.mxu1 %vm41964_vm2, %v46164_v38  ;;  %38656 = vmatprep.subr.mxu1 %v46164_v38  ;;  %v21116_v29 = vand.u32 4294901760, %v44427_v20 }
 0xf01   :  { %v21117_v3 = vsub.f32 %v44427_v20, %v21116_v29 }
 0xf03   :  { %v21118_v24 = vand.u32 4294901760, %v21117_v3 }
 0xf04   :  { %38574 = vmatmul.mubr.f32.vlgmr.msra.gmra.mrb[50].mxu0 %v44275_v61  ;;  %38654 = vmatmul.mubr.f32.vlgmr.msra.gmra.mrb[36].mxu1 %v20664_v49  ;;  %v44412_v61 = vand.u32 4294901760, %v21496_v43 }
 0xf05   :  { %38577 = vmatpush3.xpose.msra.mxu0 %v19693_v40  ;;  %38657 = vmatpush3.xpose.msra.mxu1 %v20675_v56 }
 0xf06   :  { %38578 = vmatprep.mubr.msk.f32.mxu0 %vm41964_vm2, %v46164_v38  ;;  %38581 = vmatprep.subr.mxu0 %v46164_v38  ;;  %v44417_v0 = vsub.f32 %v21496_v43, %v44412_v61 }
 0xf07   :  { %38658 = vmatprep.mubr.msk.f32.mxu1 %vm41964_vm2, %v46164_v38  ;;  %38661 = vmatprep.subr.mxu1 %v46164_v38 }
 0xf08   :  { %38579 = vmatmul.mubr.f32.vlgmr.msra.gmra.mrb[52].mxu0 %v19762_v60  ;;  %v21568_v54 = vand.u32 4294901760, %v44417_v0 }
 0xf09   :  { %38582 = vmatpush3.xpose.msra.mxu0 %v19773_v33  ;;  %38583 = vmatprep.mubr.msk.f32.mxu0 %vm41964_vm2, %v46164_v38  ;;  %v44534_v33 = vand.u32 4294901760, %v21948_v35 }
 0xf0a   :  { %38586 = vmatprep.subr.mxu0 %v46164_v38  ;;  %v21569_v11 = vsub.f32 %v44417_v0, %v21568_v54 }
 0xf0c   :  { %38659 = vmatmul.mubr.f32.vlgmr.msra.gmra.mrb[36].mxu1 %v44284_v21  ;;  %v21570_v2 = vand.u32 4294901760, %v21569_v11 }
 0xf0d   :  { %38662 = vmatpush3.xpose.msra.mxu1 %v20597_v19  ;;  %38663 = vmatprep.mubr.msk.f32.mxu1 %vm41964_vm2, %v46164_v38 }
 0xf0e   :  { %38696 = vmatprep.subr.mxu1 %v46164_v38 }
 0xf10   :  { %38584 = vmatmul.mubr.f32.vlgmr.msra.gmra.mrb[52].mxu0 %v44340_v52 }
 0xf11   :  { %38587 = vmatpush3.xpose.msra.mxu0 %v19770_v16  ;;  %38588 = vmatprep.mubr.msk.f32.mxu0 %vm41964_vm2, %v46164_v38  ;;  %v22400_v16 = vsel %vm1412_vm3, %v44231_v44, 0 }
 0xf12   :  { %38591 = vmatprep.subr.mxu0 %v46164_v38 }
 0xf14   :  { %38664 = vmatmul.mubr.f32.vlgmr.msra.gmra.mrb[36].mxu1 %v44284_v21 }
 0xf15   :  { %38698 = vmatprep.mubr.msk.f32.mxu1 %vm41964_vm2, %v46164_v38 }
 0xf18   :  { %38589 = vmatmul.mubr.f32.vlgmr.msra.gmra.mrb[52].mxu0 %v19759_v25 }
 0xf19   :  { %38592 = vmatpush3.xpose.msra.mxu0 %v19693_v40  ;;  %38593 = vmatprep.mubr.msk.f32.mxu0 %vm41964_vm2, %v46164_v38 }
 0xf1a   :  { %38596 = vmatprep.subr.mxu0 %v46164_v38 }
 0xf20   :  { %38594 = vmatmul.mubr.f32.vlgmr.msra.gmra.mrb[52].mxu0 %v19760_v45 }
 0xf21   :  { %38597 = vmatpush3.xpose.msra.mxu0 %v19771_v15  ;;  %38598 = vmatprep.mubr.msk.f32.mxu0 %vm41964_vm2, %v46164_v38  ;;  %v44519_v15 = vand.u32 4294901760, %v22400_v16 }
 0xf22   :  { %38601 = vmatprep.subr.mxu0 %v46164_v38 }
 0xf23   :  { %v22471_v60 = vsub.f32 %v22400_v16, %v44519_v15 }
 0xf25   :  { %v22472_v6 = vand.u32 4294901760, %v22471_v60 }
 0xf28   :  { %38599 = vmatmul.mubr.f32.vlgmr.msra.gmra.mrb[52].mxu0 %v44340_v52 }
 0xf29   :  { %38602 = vmatpush3.xpose.msra.mxu0 %v19693_v40  ;;  %38603 = vmatprep.mubr.msk.f32.mxu0 %vm41964_vm2, %v46164_v38 }
 0xf2a   :  { %38606 = vmatprep.subr.mxu0 %v46164_v38 }
 0xf30   :  { %38604 = vmatmul.mubr.f32.vlgmr.msra.gmra.mrb[52].mxu0 %v44340_v52 }
 0xf31   :  { %38607 = vmatpush3.xpose.msra.mxu0 %v20145_v30  ;;  %38608 = vmatprep.mubr.msk.f32.mxu0 %vm41964_vm2, %v46164_v38 }
 0xf32   :  { %38611 = vmatprep.subr.mxu0 %v46164_v38 }
 0xf34   :  { %38609 = vmatmul.mubr.f32.vlgmr.msra.gmra.mrb[54].mxu0 %v20214_v27 }
 0xf35   :  { %38612 = vmatpush3.xpose.msra.mxu0 %v20225_v39  ;;  %38613 = vmatprep.mubr.msk.f32.mxu0 %vm41964_vm2, %v46164_v38 }
 0xf36   :  { %38616 = vmatprep.subr.mxu0 %v46164_v38 }
 0xf3c   :  { %38614 = vmatmul.mubr.f32.vlgmr.msra.gmra.mrb[54].mxu0 %v44388_v17 }
 0xf3d   :  { %38617 = vmatpush3.xpose.msra.mxu0 %v20222_v57  ;;  %38618 = vmatprep.mubr.msk.f32.mxu0 %vm41964_vm2, %v46164_v38  ;;  %v22473_v57 = vsub.f32 %v22471_v60, %v22472_v6 }
 0xf3e   :  { %38621 = vmatprep.subr.mxu0 %v46164_v38 }
 0xf3f   :  { %v22474_v46 = vand.u32 4294901760, %v22473_v57 }
 0xf44   :  { %38619 = vmatmul.mubr.f32.vlgmr.msra.gmra.mrb[54].mxu0 %v20211_v1 }
 0xf45   :  { %38622 = vmatpush3.xpose.msra.mxu0 %v20145_v30  ;;  %38623 = vmatprep.mubr.msk.f32.mxu0 %vm41964_vm2, %v46164_v38 }
 0xf46   :  { %38626 = vmatprep.subr.mxu0 %v46164_v38 }
 0xf4c   :  { %38624 = vmatmul.mubr.f32.vlgmr.msra.gmra.mrb[54].mxu0 %v20212_v41 }
 0xf4d   :  { %38627 = vmatpush3.xpose.msra.mxu0 %v20223_v4  ;;  %38628 = vmatprep.mubr.msk.f32.mxu0 %vm41964_vm2, %v46164_v38 }
 0xf4e   :  { %38631 = vmatprep.subr.mxu0 %v46164_v38 }
 0xf50   :  { %v21043_v13 = vpop.permute.xlu0 %21042 }
 0xf51   :  { %v21046_v7 = vsel %vm1412_vm3, %v21043_v13, 0 }
 0xf52   :  { %v44429_v8 = vand.u32 4294901760, %v21046_v7 }
 0xf54   :  { %v44432_v26 = vsub.f32 %v21046_v7, %v44429_v8  ;;  %v44434_v21 = vpop.permute.xlu1 %21946  ;;  %v21495_v63 = vpop.permute.xlu0 %21494  ;;  %38629 = vmatmul.mubr.f32.vlgmr.msra.gmra.mrb[54].mxu0 %v44388_v17 }
 0xf55   :  { %v21498_v14 = vsel %vm1412_vm3, %v21495_v63, 0  ;;  %38632 = vmatpush3.xpose.msra.mxu0 %v20145_v30  ;;  %38633 = vmatprep.mubr.msk.f32.mxu0 %vm41964_vm2, %v46164_v38 }
 0xf56   :  { %v44444_v9 = vand.u32 4294901760, %v21498_v14  ;;  %38666 = vmatprep.subr.mxu0 %v46164_v38  ;;  %v21127_v50 = vand.u32 4294901760, %v44432_v26 }
 0xf58   :  { %v21578_v5 = vsub.f32 %v21498_v14, %v44444_v9  ;;  %v44449_v28 = vpop.permute.xlu1 %18728  ;;  %38697 = vmatpush3.xpose.msra.mxu1 %v44444_v9  ;;  %v44452_v49 = vpop.permute.xlu0 %18726  ;;  %v21128_v19 = vsub.f32 %v44432_v26, %v21127_v50 }
 0xf59   :  { %23754 = vrot.lane.b32.xlu1 %v44449_v28, %s41967_s27  ;;  %23302 = vrot.lane.b32.xlu0 %v44452_v49, %s41967_s27  ;;  %v23304_v14 = vsel %vm1412_vm3, %v44452_v49, 0 }
 0xf5a   :  { %v21579_v51 = vand.u32 4294901760, %v21578_v5  ;;  %38701 = vmatprep.subr.mxu1 %v46164_v38  ;;  %v21129_v58 = vand.u32 4294901760, %v21128_v19  ;;  %v23756_v19 = vsel %vm1412_vm3, %v44449_v28, 0 }
 0xf5b   :  { %38699 = vmatmul.mubr.f32.vlgmr.msra.gmra.mrb[38].mxu1 %v21570_v2  ;;  %v44656_v28 = vand.u32 4294901760, %v23756_v19 }
 0xf5c   :  { %v21580_v36 = vsub.f32 %v21578_v5, %v21579_v51  ;;  %v44465_v18 = vpop.permute.xlu1 %22850  ;;  %v22399_v56 = vpop.permute.xlu0 %22398  ;;  %38634 = vmatmul.mubr.f32.vlgmr.msra.gmra.mrb[54].mxu0 %v44388_v17  ;;  %38703 = vmatprep.mubr.msk.f32.mxu1 %vm41964_vm2, %v46164_v38  ;;  %v22019_v17 = vsub.f32 %v21948_v35, %v44534_v33 }
 0xf5d   :  { %38667 = vmatpush3.xpose.msra.mxu0 %v44429_v8  ;;  %18736 = vrot.lane.b32.xlu1 %v44231_v44, %s41971_s4  ;;  %v22402_v45 = vsel %vm1412_vm3, %v22399_v56, 0 }
 0xf5e   :  { %v21581_v47 = vand.u32 4294901760, %v21580_v36  ;;  %18734 = vrot.lane.b32.xlu0 %v44231_v44, %s41970_s30  ;;  %38668 = vmatprep.mubr.msk.f32.mxu0 %vm41964_vm2, %v46164_v38  ;;  %v44521_v31 = vand.u32 4294901760, %v22402_v45  ;;  %v21950_v44 = vsel %vm1412_vm3, %v44434_v21, 0  ;;  %v22020_v41 = vand.u32 4294901760, %v22019_v17 }
 0xf5f   :  { %38671 = vmatprep.subr.mxu0 %v46164_v38  ;;  %v44538_v22 = vand.u32 4294901760, %v21950_v44 }
 0xf60   :  { %v44478_v48 = vpop.permute.xlu1 %18732  ;;  %38702 = vmatpush3.xpose.msra.mxu1 %v21581_v47  ;;  %v44480_v52 = vpop.permute.xlu0 %18730  ;;  %38669 = vmatmul.mubr.f32.vlgmr.msra.gmra.mrb[56].mxu0 %v21118_v24  ;;  %v22482_v55 = vsub.f32 %v22402_v45, %v44521_v31  ;;  %v22021_v27 = vsub.f32 %v22019_v17, %v22020_v41 }
 0xf61   :  { %38672 = vmatpush3.xpose.msra.mxu0 %v21129_v58  ;;  %24658 = vrot.lane.b32.xlu1 %v44478_v48, %s41967_s27  ;;  %v22030_v1 = vsub.f32 %v21950_v44, %v44538_v22 }
 0xf62   :  { %24206 = vrot.lane.b32.xlu0 %v44480_v52, %s41967_s27  ;;  %38706 = vmatprep.subr.mxu1 %v46164_v38  ;;  %v22483_v30 = vand.u32 4294901760, %v22482_v55 }
 0xf63   :  { %38704 = vmatmul.mubr.f32.vlgmr.msra.gmra.mrb[38].mxu1 %v44412_v61  ;;  %38673 = vmatprep.mubr.msk.f32.mxu0 %vm41964_vm2, %v46164_v38  ;;  %v22031_v62 = vand.u32 4294901760, %v22030_v1 }
 0xf64   :  { %v44490_v40 = vpop.f32.mrb[48].mxu0  ;;  %38707 = vmatpush3.xpose.msra.mxu1 %v21578_v5  ;;  %38676 = vmatprep.subr.mxu0 %v46164_v38  ;;  %v22484_v4 = vsub.f32 %v22482_v55, %v22483_v30 }
 0xf65   :  { %v38545_v25 = vpop.f32.mrb[49].mxu0  ;;  %38708 = vmatprep.mubr.msk.f32.mxu1 %vm41964_vm2, %v46164_v38  ;;  %38711 = vmatprep.subr.mxu1 %v46164_v38  ;;  %v22032_v43 = vsub.f32 %v22030_v1, %v22031_v62 }
 0xf66   :  { %v22485_v39 = vand.u32 4294901760, %v22484_v4 }
 0xf67   :  { %v22033_v53 = vand.u32 4294901760, %v22032_v43 }
 0xf68   :  { %38674 = vmatmul.mubr.f32.vlgmr.msra.gmra.mrb[56].mxu0 %v44421_v42 }
 0xf69   :  { %38677 = vmatpush3.xpose.msra.mxu0 %v44432_v26  ;;  %38678 = vmatprep.mubr.msk.f32.mxu0 %vm41964_vm2, %v46164_v38 }
 0xf6a   :  { %38681 = vmatprep.subr.mxu0 %v46164_v38 }
 0xf6b   :  { %38709 = vmatmul.mubr.f32.vlgmr.msra.gmra.mrb[38].mxu1 %v44417_v0  ;;  %v22852_v0 = vsel %vm1412_vm3, %v44318_v23, 0 }
 0xf6c   :  { %38712 = vmatpush3.xpose.msra.mxu1 %v44444_v9  ;;  %38713 = vmatprep.mubr.msk.f32.mxu1 %vm41964_vm2, %v46164_v38  ;;  %v44593_v13 = vand.u32 4294901760, %v22852_v0 }
 0xf6d   :  { %38716 = vmatprep.subr.mxu1 %v46164_v38 }
 0xf6e   :  { %v22923_v23 = vsub.f32 %v22852_v0, %v44593_v13 }
 0xf70   :  { %38679 = vmatmul.mubr.f32.vlgmr.msra.gmra.mrb[56].mxu0 %v44427_v20  ;;  %v22924_v20 = vand.u32 4294901760, %v22923_v23 }
 0xf71   :  { %38682 = vmatpush3.xpose.msra.mxu0 %v44429_v8  ;;  %38683 = vmatprep.mubr.msk.f32.mxu0 %vm41964_vm2, %v46164_v38 }
 0xf72   :  { %38686 = vmatprep.subr.mxu0 %v46164_v38  ;;  %v22925_v26 = vsub.f32 %v22923_v23, %v22924_v20 }
 0xf73   :  { %38714 = vmatmul.mubr.f32.vlgmr.msra.gmra.mrb[38].mxu1 %v21568_v54 }
 0xf74   :  { %38717 = vmatpush3.xpose.msra.mxu1 %v21579_v51  ;;  %38718 = vmatprep.mubr.msk.f32.mxu1 %vm41964_vm2, %v46164_v38  ;;  %v22926_v63 = vand.u32 4294901760, %v22925_v26 }
 0xf75   :  { %38721 = vmatprep.subr.mxu1 %v46164_v38 }
 0xf78   :  { %38684 = vmatmul.mubr.f32.vlgmr.msra.gmra.mrb[56].mxu0 %v21116_v29  ;;  %v44623_v29 = vand.u32 4294901760, %v23304_v14 }
 0xf79   :  { %38687 = vmatpush3.xpose.msra.mxu0 %v21127_v50  ;;  %38688 = vmatprep.mubr.msk.f32.mxu0 %vm41964_vm2, %v46164_v38 }
 0xf7a   :  { %38691 = vmatprep.subr.mxu0 %v46164_v38 }
 0xf7b   :  { %38719 = vmatmul.mubr.f32.vlgmr.msra.gmra.mrb[38].mxu1 %v44412_v61 }
 0xf7c   :  { %38722 = vmatpush3.xpose.msra.mxu1 %v44444_v9  ;;  %38723 = vmatprep.mubr.msk.f32.mxu1 %vm41964_vm2, %v46164_v38  ;;  %v44630_v9 = vsub.f32 %v23304_v14, %v44623_v29 }
 0xf7d   :  { %38756 = vmatprep.subr.mxu1 %v46164_v38 }
 0xf7e   :  { %v23376_v50 = vand.u32 4294901760, %v44630_v9 }
 0xf80   :  { %38689 = vmatmul.mubr.f32.vlgmr.msra.gmra.mrb[56].mxu0 %v44421_v42  ;;  %v23377_v2 = vsub.f32 %v44630_v9, %v23376_v50 }
 0xf81   :  { %38692 = vmatpush3.xpose.msra.mxu0 %v44429_v8  ;;  %38693 = vmatprep.mubr.msk.f32.mxu0 %vm41964_vm2, %v46164_v38 }
 0xf82   :  { %38726 = vmatprep.subr.mxu0 %v46164_v38  ;;  %v23378_v24 = vand.u32 4294901760, %v23377_v2 }
 0xf83   :  { %38724 = vmatmul.mubr.f32.vlgmr.msra.gmra.mrb[38].mxu1 %v44412_v61  ;;  %v22022_v61 = vand.u32 4294901760, %v22021_v27 }
 0xf84   :  { %38757 = vmatpush3.xpose.msra.mxu1 %v44521_v31  ;;  %38758 = vmatprep.mubr.msk.f32.mxu1 %vm41964_vm2, %v46164_v38 }
 0xf85   :  { %38761 = vmatprep.subr.mxu1 %v46164_v38 }
 0xf87   :  { %38759 = vmatmul.mubr.f32.vlgmr.msra.gmra.mrb[40].mxu1 %v22474_v46 }
 0xf88   :  { %38762 = vmatpush3.xpose.msra.mxu1 %v22485_v39  ;;  %38694 = vmatmul.mubr.f32.vlgmr.msra.gmra.mrb[56].mxu0 %v44421_v42  ;;  %v22854_v42 = vsel %vm1412_vm3, %v44465_v18, 0 }
 0xf89   :  { %38727 = vmatpush3.xpose.msra.mxu0 %v44538_v22  ;;  %38728 = vmatprep.mubr.msk.f32.mxu0 %vm41964_vm2, %v46164_v38  ;;  %v44596_v54 = vand.u32 4294901760, %v22854_v42 }
 0xf8a   :  { %38731 = vmatprep.subr.mxu0 %v46164_v38  ;;  %38763 = vmatprep.mubr.msk.f32.mxu1 %vm41964_vm2, %v46164_v38 }
 0xf8b   :  { %38766 = vmatprep.subr.mxu1 %v46164_v38  ;;  %v22934_v7 = vsub.f32 %v22854_v42, %v44596_v54 }
 0xf8c   :  { %38729 = vmatmul.mubr.f32.vlgmr.msra.gmra.mrb[58].mxu0 %v22022_v61 }
 0xf8d   :  { %38732 = vmatpush3.xpose.msra.mxu0 %v22033_v53  ;;  %38733 = vmatprep.mubr.msk.f32.mxu0 %vm41964_vm2, %v46164_v38  ;;  %v22935_v8 = vand.u32 4294901760, %v22934_v7 }
 0xf8e   :  { %38736 = vmatprep.subr.mxu0 %v46164_v38 }
 0xf8f   :  { %38764 = vmatmul.mubr.f32.vlgmr.msra.gmra.mrb[40].mxu1 %v44519_v15  ;;  %v22936_v21 = vsub.f32 %v22934_v7, %v22935_v8 }
 0xf90   :  { %38767 = vmatpush3.xpose.msra.mxu1 %v22482_v55  ;;  %38768 = vmatprep.mubr.msk.f32.mxu1 %vm41964_vm2, %v46164_v38 }
 0xf91   :  { %38771 = vmatprep.subr.mxu1 %v46164_v38  ;;  %v22937_v11 = vand.u32 4294901760, %v22936_v21 }
 0xf94   :  { %38734 = vmatmul.mubr.f32.vlgmr.msra.gmra.mrb[58].mxu0 %v44534_v33 }
 0xf95   :  { %38737 = vmatpush3.xpose.msra.mxu0 %v22030_v1  ;;  %38738 = vmatprep.mubr.msk.f32.mxu0 %vm41964_vm2, %v46164_v38 }
 0xf96   :  { %38741 = vmatprep.subr.mxu0 %v46164_v38 }
 0xf97   :  { %38769 = vmatmul.mubr.f32.vlgmr.msra.gmra.mrb[40].mxu1 %v22471_v60 }
 0xf98   :  { %38772 = vmatpush3.xpose.msra.mxu1 %v44521_v31  ;;  %38773 = vmatprep.mubr.msk.f32.mxu1 %vm41964_vm2, %v46164_v38 }
 0xf99   :  { %38776 = vmatprep.subr.mxu1 %v46164_v38 }
 0xf9c   :  { %38739 = vmatmul.mubr.f32.vlgmr.msra.gmra.mrb[58].mxu0 %v22019_v17 }
 0xf9d   :  { %38742 = vmatpush3.xpose.msra.mxu0 %v44538_v22  ;;  %38743 = vmatprep.mubr.msk.f32.mxu0 %vm41964_vm2, %v46164_v38 }
 0xf9e   :  { %38746 = vmatprep.subr.mxu0 %v46164_v38 }
 0xf9f   :  { %38774 = vmatmul.mubr.f32.vlgmr.msra.gmra.mrb[40].mxu1 %v22472_v6 }
 0xfa0   :  { %38777 = vmatpush3.xpose.msra.mxu1 %v22483_v30  ;;  %38778 = vmatprep.mubr.msk.f32.mxu1 %vm41964_vm2, %v46164_v38 }
 0xfa1   :  { %38781 = vmatprep.subr.mxu1 %v46164_v38 }
 0xfa4   :  { %38744 = vmatmul.mubr.f32.vlgmr.msra.gmra.mrb[58].mxu0 %v22020_v41  ;;  %v24208_v41 = vsel %vm1412_vm3, %v44480_v52, 0  ;;  %v26014_v52 = vsel %vm1412_vm3, %v44490_v40, -inf }
 0xfa5   :  { %38747 = vmatpush3.xpose.msra.mxu0 %v22031_v62  ;;  %38748 = vmatprep.mubr.msk.f32.mxu0 %vm41964_vm2, %v46164_v38  ;;  %v44714_v62 = vand.u32 4294901760, %v24208_v41 }
 0xfa6   :  { %38751 = vmatprep.subr.mxu0 %v46164_v38 }
 0xfa7   :  { %38779 = vmatmul.mubr.f32.vlgmr.msra.gmra.mrb[40].mxu1 %v44519_v15  ;;  %v44727_v27 = vsub.f32 %v24208_v41, %v44714_v62 }
 0xfa8   :  { %38782 = vmatpush3.xpose.msra.mxu1 %v44521_v31  ;;  %38783 = vmatprep.mubr.msk.f32.mxu1 %vm41964_vm2, %v46164_v38 }
 0xfa9   :  { %38816 = vmatprep.subr.mxu1 %v46164_v38  ;;  %v24280_v61 = vand.u32 4294901760, %v44727_v27 }
 0xfab   :  { %v24281_v42 = vsub.f32 %v44727_v27, %v24280_v61 }
 0xfac   :  { %38749 = vmatmul.mubr.f32.vlgmr.msra.gmra.mrb[58].mxu0 %v44534_v33 }
 0xfad   :  { %38752 = vmatpush3.xpose.msra.mxu0 %v44538_v22  ;;  %38753 = vmatprep.mubr.msk.f32.mxu0 %vm41964_vm2, %v46164_v38 }
 0xfae   :  { %38786 = vmatprep.subr.mxu0 %v46164_v38 }
 0xfaf   :  { %38784 = vmatmul.mubr.f32.vlgmr.msra.gmra.mrb[40].mxu1 %v44519_v15  ;;  %v44667_v15 = vsub.f32 %v23756_v19, %v44656_v28 }
 0xfb0   :  { %38818 = vmatprep.mubr.msk.f32.mxu1 %vm41964_vm2, %v46164_v38 }
 0xfb1   :  { %v23828_v60 = vand.u32 4294901760, %v44667_v15 }
 0xfb3   :  { %v23829_v55 = vsub.f32 %v44667_v15, %v23828_v60 }
 0xfb4   :  { %38754 = vmatmul.mubr.f32.vlgmr.msra.gmra.mrb[58].mxu0 %v44534_v33 }
 0xfb5   :  { %38787 = vmatpush3.xpose.msra.mxu0 %v44596_v54  ;;  %38788 = vmatprep.mubr.msk.f32.mxu0 %vm41964_vm2, %v46164_v38  ;;  %v23830_v6 = vand.u32 4294901760, %v23829_v55 }
 0xfb6   :  { %38791 = vmatprep.subr.mxu0 %v46164_v38 }
 0xfb8   :  { %38789 = vmatmul.mubr.f32.vlgmr.msra.gmra.mrb[60].mxu0 %v22926_v63 }
 0xfb9   :  { %38792 = vmatpush3.xpose.msra.mxu0 %v22937_v11  ;;  %38793 = vmatprep.mubr.msk.f32.mxu0 %vm41964_vm2, %v46164_v38 }
 0xfba   :  { %38796 = vmatprep.subr.mxu0 %v46164_v38 }
 0xfc0   :  { %38794 = vmatmul.mubr.f32.vlgmr.msra.gmra.mrb[60].mxu0 %v44593_v13 }
 0xfc1   :  { %38797 = vmatpush3.xpose.msra.mxu0 %v22934_v7  ;;  %38798 = vmatprep.mubr.msk.f32.mxu0 %vm41964_vm2, %v46164_v38 }
 0xfc2   :  { %38801 = vmatprep.subr.mxu0 %v46164_v38 }
 0xfc8   :  { %38799 = vmatmul.mubr.f32.vlgmr.msra.gmra.mrb[60].mxu0 %v22923_v23  ;;  %v24660_v23 = vsel %vm1412_vm3, %v44478_v48, 0 }
 0xfc9   :  { %38802 = vmatpush3.xpose.msra.mxu0 %v44596_v54  ;;  %38803 = vmatprep.mubr.msk.f32.mxu0 %vm41964_vm2, %v46164_v38  ;;  %v44766_v48 = vand.u32 4294901760, %v24660_v23 }
 0xfca   :  { %38806 = vmatprep.subr.mxu0 %v46164_v38 }
 0xfcb   :  { %v23755_v5 = vpop.permute.xlu1 %23754  ;;  %v23303_v49 = vpop.permute.xlu0 %23302  ;;  %v24731_v21 = vsub.f32 %v24660_v23, %v44766_v48 }
 0xfcc   :  { %v23306_v3 = vsel %vm1412_vm3, %v23303_v49, 0  ;;  %v23758_v56 = vsel %vm1412_vm3, %v23755_v5, 0 }
 0xfcd   :  { %v44641_v51 = vand.u32 4294901760, %v23306_v3  ;;  %v44659_v25 = vand.u32 4294901760, %v23758_v56 }
 0xfcf   :  { %v23386_v36 = vsub.f32 %v23306_v3, %v44641_v51  ;;  %v44646_v18 = vpop.permute.xlu1 %18736  ;;  %38817 = vmatpush3.xpose.msra.mxu1 %v44641_v51  ;;  %v44670_v31 = vsub.f32 %v23758_v56, %v44659_v25 }
 0xfd0   :  { %v44650_v47 = vpop.permute.xlu0 %18734  ;;  %25562 = vrot.lane.b32.xlu1 %v44646_v18, %s41967_s27  ;;  %38804 = vmatmul.mubr.f32.vlgmr.msra.gmra.mrb[60].mxu0 %v22924_v20  ;;  %v24282_v20 = vand.u32 4294901760, %v24281_v42 }
 0xfd1   :  { %v23387_v58 = vand.u32 4294901760, %v23386_v36  ;;  %25110 = vrot.lane.b32.xlu0 %v44650_v47, %s41967_s27  ;;  %38807 = vmatpush3.xpose.msra.mxu0 %v22935_v8  ;;  %v23839_v33 = vand.u32 4294901760, %v44670_v31  ;;  %v25112_v56 = vsel %vm1412_vm3, %v44650_v47, 0 }
 0xfd2   :  { %38819 = vmatmul.mubr.f32.vlgmr.msra.gmra.mrb[42].mxu1 %v23378_v24  ;;  %38821 = vmatprep.subr.mxu1 %v46164_v38 }
 0xfd3   :  { %v23388_v16 = vsub.f32 %v23386_v36, %v23387_v58  ;;  %38808 = vmatprep.mubr.msk.f32.mxu0 %vm41964_vm2, %v46164_v38  ;;  %38811 = vmatprep.subr.mxu0 %v46164_v38  ;;  %v23840_v22 = vsub.f32 %v44670_v31, %v23839_v33 }
 0xfd4   :  { %38823 = vmatprep.mubr.msk.f32.mxu1 %vm41964_vm2, %v46164_v38  ;;  %v24207_v30 = vpop.permute.xlu0 %24206 }
 0xfd5   :  { %v23389_v45 = vand.u32 4294901760, %v23388_v16  ;;  %v23841_v17 = vand.u32 4294901760, %v23840_v22  ;;  %v24210_v4 = vsel %vm1412_vm3, %v24207_v30, 0 }
 0xfd6   :  { %v44718_v46 = vand.u32 4294901760, %v24210_v4 }
 0xfd7   :  { %v44672_v35 = vpop.f32.mrb[50].mxu0  ;;  %38822 = vmatpush3.xpose.msra.mxu1 %v23389_v45 }
 0xfd8   :  { %v38575_v44 = vpop.f32.mrb[51].mxu0  ;;  %38809 = vmatmul.mubr.f32.vlgmr.msra.gmra.mrb[60].mxu0 %v44593_v13  ;;  %38826 = vmatprep.subr.mxu1 %v46164_v38  ;;  %v44730_v39 = vsub.f32 %v24210_v4, %v44718_v46  ;;  %v26017_v43 = vsel %vm1412_vm3, %v44672_v35, -inf }
 0xfd9   :  { %38812 = vmatpush3.xpose.msra.mxu0 %v44596_v54  ;;  %38813 = vmatprep.mubr.msk.f32.mxu0 %vm41964_vm2, %v46164_v38 }
 0xfda   :  { %38824 = vmatmul.mubr.f32.vlgmr.msra.gmra.mrb[42].mxu1 %v44623_v29  ;;  %38846 = vmatprep.subr.mxu0 %v46164_v38  ;;  %v24291_v53 = vand.u32 4294901760, %v44730_v39 }
 0xfdb   :  { %38827 = vmatpush3.xpose.msra.mxu1 %v23386_v36  ;;  %38828 = vmatprep.mubr.msk.f32.mxu1 %vm41964_vm2, %v46164_v38  ;;  %v25564_v36 = vsel %vm1412_vm3, %v44646_v18, 0 }
 0xfdc   :  { %38831 = vmatprep.subr.mxu1 %v46164_v38  ;;  %v24292_v54 = vsub.f32 %v44730_v39, %v24291_v53  ;;  %v44846_v24 = vand.u32 4294901760, %v25564_v36 }
 0xfde   :  { %v24293_v8 = vand.u32 4294901760, %v24292_v54 }
 0xfe0   :  { %38814 = vmatmul.mubr.f32.vlgmr.msra.gmra.mrb[60].mxu0 %v44593_v13  ;;  %v24659_v13 = vpop.permute.xlu1 %24658 }
 0xfe1   :  { %38847 = vmatpush3.xpose.msra.mxu0 %v44659_v25  ;;  %38848 = vmatprep.mubr.msk.f32.mxu0 %vm41964_vm2, %v46164_v38  ;;  %v24662_v7 = vsel %vm1412_vm3, %v24659_v13, 0 }
 0xfe2   :  { %38829 = vmatmul.mubr.f32.vlgmr.msra.gmra.mrb[42].mxu1 %v44630_v9  ;;  %38851 = vmatprep.subr.mxu0 %v46164_v38  ;;  %v44769_v26 = vand.u32 4294901760, %v24662_v7  ;;  %v24732_v9 = vand.u32 4294901760, %v24731_v21 }
 0xfe3   :  { %38832 = vmatpush3.xpose.msra.mxu1 %v44641_v51  ;;  %38833 = vmatprep.mubr.msk.f32.mxu1 %vm41964_vm2, %v46164_v38 }
 0xfe4   :  { %38849 = vmatmul.mubr.f32.vlgmr.msra.gmra.mrb[62].mxu0 %v23830_v6  ;;  %38836 = vmatprep.subr.mxu1 %v46164_v38  ;;  %v24742_v63 = vsub.f32 %v24662_v7, %v44769_v26  ;;  %v24733_v49 = vsub.f32 %v24731_v21, %v24732_v9 }
 0xfe5   :  { %38852 = vmatpush3.xpose.msra.mxu0 %v23841_v17  ;;  %38853 = vmatprep.mubr.msk.f32.mxu0 %vm41964_vm2, %v46164_v38 }
 0xfe6   :  { %38856 = vmatprep.subr.mxu0 %v46164_v38  ;;  %v24743_v5 = vand.u32 4294901760, %v24742_v63 }
 0xfe7   :  { %v44705_v1 = vpop.f32.mrb[36].mxu1 }
 0xfe8   :  { %v38665_v57 = vpop.f32.mrb[37].mxu1  ;;  %v26026_v0 = vsel %vm1412_vm3, %v44705_v1, -inf  ;;  %v24744_v2 = vsub.f32 %v24742_v63, %v24743_v5 }
 0xfea   :  { %38834 = vmatmul.mubr.f32.vlgmr.msra.gmra.mrb[42].mxu1 %v23376_v50  ;;  %v44787_v50 = vadd.f32 %v44225_v32, %v44229_v37  ;;  %v24734_v32 = vand.u32 4294901760, %v24733_v49  ;;  %v24745_v37 = vand.u32 4294901760, %v24744_v2 }
 0xfeb   :  { %38837 = vmatpush3.xpose.msra.mxu1 %v23387_v58  ;;  %38838 = vmatprep.mubr.msk.f32.mxu1 %vm41964_vm2, %v46164_v38  ;;  %v44848_v58 = vand.u32 4294901760, %v25112_v56 }
 0xfec   :  { %38854 = vmatmul.mubr.f32.vlgmr.msra.gmra.mrb[62].mxu0 %v44656_v28  ;;  %38841 = vmatprep.subr.mxu1 %v46164_v38 }
 0xfed   :  { %38857 = vmatpush3.xpose.msra.mxu0 %v44670_v31  ;;  %38858 = vmatprep.mubr.msk.f32.mxu0 %vm41964_vm2, %v46164_v38 }
 0xfee   :  { %38861 = vmatprep.subr.mxu0 %v46164_v38 }
 0xff0   :  { %26015 = vmax.xlane.f32.xlu0 %v26014_v52 }
 0xff2   :  { %38839 = vmatmul.mubr.f32.vlgmr.msra.gmra.mrb[42].mxu1 %v44623_v29 }
 0xff3   :  { %38842 = vmatpush3.xpose.msra.mxu1 %v44641_v51  ;;  %38843 = vmatprep.mubr.msk.f32.mxu1 %vm41964_vm2, %v46164_v38 }
 0xff4   :  { %38859 = vmatmul.mubr.f32.vlgmr.msra.gmra.mrb[62].mxu0 %v44667_v15  ;;  %26018 = vmax.xlane.f32.xlu1 %v26017_v43 }
 0xff5   :  { %38862 = vmatpush3.xpose.msra.mxu0 %v44659_v25  ;;  %38876 = vmatprep.subr.mxu1 %v46164_v38 }
 0xff6   :  { %38863 = vmatprep.mubr.msk.f32.mxu0 %vm41964_vm2, %v46164_v38  ;;  %38866 = vmatprep.subr.mxu0 %v46164_v38 }
 0xff8   :  { %26027 = vmax.xlane.f32.xlu1 %v26026_v0  ;;  %v44903_v0 = vand.u32 4294901760, %v44787_v50 }
 0xffa   :  { %38844 = vmatmul.mubr.f32.vlgmr.msra.gmra.mrb[42].mxu1 %v44623_v29 }
 0xffb   :  { %38877 = vmatpush3.xpose.msra.mxu1 %v44718_v46  ;;  %38878 = vmatprep.mubr.msk.f32.mxu1 %vm41964_vm2, %v46164_v38 }
 0xffc   :  { %38864 = vmatmul.mubr.f32.vlgmr.msra.gmra.mrb[62].mxu0 %v23828_v60  ;;  %38881 = vmatprep.subr.mxu1 %v46164_v38 }
 0xffd   :  { %38867 = vmatpush3.xpose.msra.mxu0 %v23839_v33  ;;  %38868 = vmatprep.mubr.msk.f32.mxu0 %vm41964_vm2, %v46164_v38 }
 0xffe   :  { %38879 = vmatmul.mubr.f32.vlgmr.msra.gmra.mrb[44].mxu1 %v24282_v20  ;;  %38871 = vmatprep.subr.mxu0 %v46164_v38 }
 0xfff   :  { %38882 = vmatpush3.xpose.msra.mxu1 %v24293_v8  ;;  %38883 = vmatprep.mubr.msk.f32.mxu1 %vm41964_vm2, %v46164_v38 }
0x1000   :  { %38886 = vmatprep.subr.mxu1 %v46164_v38 }
0x1003   :  { %v44776_v11 = vpop.f32.mrb[52].mxu0 }
0x1004   :  { %v38605_v14 = vpop.f32.mrb[53].mxu0  ;;  %38869 = vmatmul.mubr.f32.vlgmr.msra.gmra.mrb[62].mxu0 %v44656_v28  ;;  %v26020_v29 = vsel %vm1412_vm3, %v44776_v11, -inf }
0x1005   :  { %38872 = vmatpush3.xpose.msra.mxu0 %v44659_v25  ;;  %26021 = vmax.xlane.f32.xlu0 %v26020_v29  ;;  %v25183_v25 = vsub.f32 %v25112_v56, %v44848_v58 }
0x1006   :  { %38884 = vmatmul.mubr.f32.vlgmr.msra.gmra.mrb[44].mxu1 %v44714_v62  ;;  %38873 = vmatprep.mubr.msk.f32.mxu0 %vm41964_vm2, %v46164_v38 }
0x1007   :  { %38887 = vmatpush3.xpose.msra.mxu1 %v44730_v39  ;;  %38906 = vmatprep.subr.mxu0 %v46164_v38  ;;  %v25184_v45 = vand.u32 4294901760, %v25183_v25 }
0x1008   :  { %38888 = vmatprep.mubr.msk.f32.mxu1 %vm41964_vm2, %v46164_v38  ;;  %38891 = vmatprep.subr.mxu1 %v46164_v38 }
0x1009   :  { %18739 = vrot.lane.b32.xlu1 %v44787_v50, %s41966_s26  ;;  %v25185_v44 = vsub.f32 %v25183_v25, %v25184_v45 }
0x100b   :  { %v25186_v57 = vand.u32 4294901760, %v25185_v44 }
0x100c   :  { %38874 = vmatmul.mubr.f32.vlgmr.msra.gmra.mrb[62].mxu0 %v44656_v28  ;;  %v25635_v28 = vsub.f32 %v25564_v36, %v44846_v24 }
0x100d   :  { %38907 = vmatpush3.xpose.msra.mxu0 %v44769_v26  ;;  %38908 = vmatprep.mubr.msk.f32.mxu0 %vm41964_vm2, %v46164_v38 }
0x100e   :  { %38889 = vmatmul.mubr.f32.vlgmr.msra.gmra.mrb[44].mxu1 %v44727_v27  ;;  %38911 = vmatprep.subr.mxu0 %v46164_v38  ;;  %v25636_v16 = vand.u32 4294901760, %v25635_v28 }
0x100f   :  { %38892 = vmatpush3.xpose.msra.mxu1 %v44718_v46  ;;  %38893 = vmatprep.mubr.msk.f32.mxu1 %vm41964_vm2, %v46164_v38 }
0x1010   :  { %38909 = vmatmul.mubr.f32.vlgmr.msra.gmra.mrb[64].mxu0 %v24734_v32  ;;  %38896 = vmatprep.subr.mxu1 %v46164_v38  ;;  %v25637_v18 = vsub.f32 %v25635_v28, %v25636_v16 }
0x1011   :  { %38912 = vmatpush3.xpose.msra.mxu0 %v24745_v37  ;;  %38913 = vmatprep.mubr.msk.f32.mxu0 %vm41964_vm2, %v46164_v38 }
0x1012   :  { %38916 = vmatprep.subr.mxu0 %v46164_v38  ;;  %v25638_v17 = vand.u32 4294901760, %v25637_v18 }
0x1016   :  { %38894 = vmatmul.mubr.f32.vlgmr.msra.gmra.mrb[44].mxu1 %v24280_v61 }
0x1017   :  { %38897 = vmatpush3.xpose.msra.mxu1 %v24291_v53  ;;  %38898 = vmatprep.mubr.msk.f32.mxu1 %vm41964_vm2, %v46164_v38 }
0x1018   :  { %38914 = vmatmul.mubr.f32.vlgmr.msra.gmra.mrb[64].mxu0 %v44766_v48  ;;  %38901 = vmatprep.subr.mxu1 %v46164_v38 }
0x1019   :  { %38917 = vmatpush3.xpose.msra.mxu0 %v24742_v63  ;;  %38918 = vmatprep.mubr.msk.f32.mxu0 %vm41964_vm2, %v46164_v38 }
0x101a   :  { %38921 = vmatprep.subr.mxu0 %v46164_v38 }
0x101e   :  { %38899 = vmatmul.mubr.f32.vlgmr.msra.gmra.mrb[44].mxu1 %v44714_v62 }
0x101f   :  { %38902 = vmatpush3.xpose.msra.mxu1 %v44718_v46  ;;  %38903 = vmatprep.mubr.msk.f32.mxu1 %vm41964_vm2, %v46164_v38 }
0x1020   :  { %38919 = vmatmul.mubr.f32.vlgmr.msra.gmra.mrb[64].mxu0 %v24731_v21  ;;  %38936 = vmatprep.subr.mxu1 %v46164_v38 }
0x1021   :  { %38922 = vmatpush3.xpose.msra.mxu0 %v44769_v26  ;;  %38923 = vmatprep.mubr.msk.f32.mxu0 %vm41964_vm2, %v46164_v38 }
0x1022   :  { %38926 = vmatprep.subr.mxu0 %v46164_v38 }
0x1026   :  { %38904 = vmatmul.mubr.f32.vlgmr.msra.gmra.mrb[44].mxu1 %v44714_v62 }
0x1027   :  { %38938 = vmatprep.mubr.msk.f32.mxu1 %vm41964_vm2, %v46164_v38 }
0x1028   :  { %38924 = vmatmul.mubr.f32.vlgmr.msra.gmra.mrb[64].mxu0 %v24732_v9 }
0x1029   :  { %38927 = vmatpush3.xpose.msra.mxu0 %v24743_v5  ;;  %38928 = vmatprep.mubr.msk.f32.mxu0 %vm41964_vm2, %v46164_v38 }
0x102a   :  { %38931 = vmatprep.subr.mxu0 %v46164_v38 }
0x102f   :  { %v44833_v3 = vpop.f32.mrb[54].mxu0 }
0x1030   :  { %v38635_v51 = vpop.f32.mrb[55].mxu0  ;;  %38929 = vmatmul.mubr.f32.vlgmr.msra.gmra.mrb[64].mxu0 %v44766_v48  ;;  %v26023_v19 = vsel %vm1412_vm3, %v44833_v3, -inf }
0x1031   :  { %38932 = vmatpush3.xpose.msra.mxu0 %v44769_v26  ;;  %26024 = vmax.xlane.f32.xlu0 %v26023_v19 }
0x1032   :  { %38933 = vmatprep.mubr.msk.f32.mxu0 %vm41964_vm2, %v46164_v38  ;;  %38966 = vmatprep.subr.mxu0 %v46164_v38 }
0x1038   :  { %38934 = vmatmul.mubr.f32.vlgmr.msra.gmra.mrb[64].mxu0 %v44766_v48 }
0x1039   :  { %38968 = vmatprep.mubr.msk.f32.mxu0 %vm41964_vm2, %v46164_v38 }
0x1042   :  { %v25563_v15 = vpop.permute.xlu1 %25562 }
0x1043   :  { %v25566_v31 = vsel %vm1412_vm3, %v25563_v15, 0  ;;  %v25111_v47 = vpop.permute.xlu0 %25110 }
0x1044   :  { %v25569_v60 = vand.u32 4294901760, %v25566_v31  ;;  %v25114_v33 = vsel %vm1412_vm3, %v25111_v47, 0 }
0x1045   :  { %v25117_v55 = vand.u32 4294901760, %v25114_v33 }
0x1046   :  { %v25646_v22 = vsub.f32 %v25566_v31, %v25569_v60  ;;  %38967 = vmatpush3.xpose.msra.mxu0 %v25569_v60 }
0x1047   :  { %v25194_v6 = vsub.f32 %v25114_v33, %v25117_v55  ;;  %38937 = vmatpush3.xpose.msra.mxu1 %v25117_v55  ;;  %38971 = vmatprep.subr.mxu0 %v46164_v38 }
0x1048   :  { %v25647_v30 = vand.u32 4294901760, %v25646_v22  ;;  %38941 = vmatprep.subr.mxu1 %v46164_v38 }
0x1049   :  { %v25195_v41 = vand.u32 4294901760, %v25194_v6  ;;  %38969 = vmatmul.mubr.f32.vlgmr.msra.gmra.mrb[66].mxu0 %v25638_v17 }
0x104a   :  { %v25648_v4 = vsub.f32 %v25646_v22, %v25647_v30  ;;  %38939 = vmatmul.mubr.f32.vlgmr.msra.gmra.mrb[46].mxu1 %v25186_v57  ;;  %38973 = vmatprep.mubr.msk.f32.mxu0 %vm41964_vm2, %v46164_v38 }
0x104b   :  { %v25196_v62 = vsub.f32 %v25194_v6, %v25195_v41  ;;  %38943 = vmatprep.mubr.msk.f32.mxu1 %vm41964_vm2, %v46164_v38 }
0x104c   :  { %v25649_v46 = vand.u32 4294901760, %v25648_v4 }
0x104d   :  { %v25197_v52 = vand.u32 4294901760, %v25196_v62 }
0x104e   :  { %38972 = vmatpush3.xpose.msra.mxu0 %v25649_v46 }
0x104f   :  { %38942 = vmatpush3.xpose.msra.mxu1 %v25197_v52  ;;  %38976 = vmatprep.subr.mxu0 %v46164_v38 }
0x1050   :  { %38946 = vmatprep.subr.mxu1 %v46164_v38 }
0x1051   :  { %38974 = vmatmul.mubr.f32.vlgmr.msra.gmra.mrb[66].mxu0 %v44846_v24 }
0x1052   :  { %38944 = vmatmul.mubr.f32.vlgmr.msra.gmra.mrb[46].mxu1 %v44848_v58  ;;  %38977 = vmatpush3.xpose.msra.mxu0 %v25646_v22 }
0x1053   :  { %38947 = vmatpush3.xpose.msra.mxu1 %v25194_v6  ;;  %38948 = vmatprep.mubr.msk.f32.mxu1 %vm41964_vm2, %v46164_v38 }
0x1054   :  { %38951 = vmatprep.subr.mxu1 %v46164_v38  ;;  %38978 = vmatprep.mubr.msk.f32.mxu0 %vm41964_vm2, %v46164_v38 }
0x1055   :  { %38981 = vmatprep.subr.mxu0 %v46164_v38 }
0x1056   :  { %v44873_v27 = vpop.f32.mrb[38].mxu1 }
0x1057   :  { %v38725_v39 = vpop.f32.mrb[39].mxu1  ;;  %v26032_v51 = vsel %vm1412_vm3, %v44873_v27, -inf }
0x1059   :  { %38979 = vmatmul.mubr.f32.vlgmr.msra.gmra.mrb[66].mxu0 %v25635_v28 }
0x105a   :  { %38949 = vmatmul.mubr.f32.vlgmr.msra.gmra.mrb[46].mxu1 %v25183_v25  ;;  %38982 = vmatpush3.xpose.msra.mxu0 %v25569_v60 }
0x105b   :  { %38952 = vmatpush3.xpose.msra.mxu1 %v25117_v55  ;;  %v44875_v43 = vpop.f32.mrb[56].mxu0  ;;  %38953 = vmatprep.mubr.msk.f32.mxu1 %vm41964_vm2, %v46164_v38 }
0x105c   :  { %v38695_v61 = vpop.f32.mrb[57].mxu0  ;;  %v26029_v53 = vsel %vm1412_vm3, %v44875_v43, -inf  ;;  %38956 = vmatprep.subr.mxu1 %v46164_v38  ;;  %38983 = vmatprep.mubr.msk.f32.mxu0 %vm41964_vm2, %v46164_v38 }
0x105d   :  { %26030 = vmax.xlane.f32.xlu1 %v26029_v53  ;;  %38986 = vmatprep.subr.mxu0 %v46164_v38 }
0x1061   :  { %38984 = vmatmul.mubr.f32.vlgmr.msra.gmra.mrb[66].mxu0 %v25636_v16 }
0x1062   :  { %38954 = vmatmul.mubr.f32.vlgmr.msra.gmra.mrb[46].mxu1 %v25184_v45  ;;  %38987 = vmatpush3.xpose.msra.mxu0 %v25647_v30 }
0x1063   :  { %38957 = vmatpush3.xpose.msra.mxu1 %v25195_v41  ;;  %38958 = vmatprep.mubr.msk.f32.mxu1 %vm41964_vm2, %v46164_v38 }
0x1064   :  { %38961 = vmatprep.subr.mxu1 %v46164_v38  ;;  %38988 = vmatprep.mubr.msk.f32.mxu0 %vm41964_vm2, %v46164_v38 }
0x1065   :  { %38991 = vmatprep.subr.mxu0 %v46164_v38 }
0x1069   :  { %38989 = vmatmul.mubr.f32.vlgmr.msra.gmra.mrb[66].mxu0 %v44846_v24 }
0x106a   :  { %38959 = vmatmul.mubr.f32.vlgmr.msra.gmra.mrb[46].mxu1 %v44848_v58  ;;  %38992 = vmatpush3.xpose.msra.mxu0 %v25569_v60 }
0x106b   :  { %38962 = vmatpush3.xpose.msra.mxu1 %v25117_v55  ;;  %38963 = vmatprep.mubr.msk.f32.mxu1 %vm41964_vm2, %v46164_v38 }
0x106c   :  { %38993 = vmatprep.mubr.msk.f32.mxu0 %vm41964_vm2, %v46164_v38  ;;  %38996 = vmatprep.subr.mxu1 %v46164_v38 }
0x106d   :  { %39026 = vmatprep.subr.mxu0 %v46164_v38 }
0x106e   :  { %18742 = vrot.lane.b32.xlu1 %v44787_v50, %s41965_s2 }
0x1071   :  { %38994 = vmatmul.mubr.f32.vlgmr.msra.gmra.mrb[66].mxu0 %v44846_v24 }
0x1072   :  { %38964 = vmatmul.mubr.f32.vlgmr.msra.gmra.mrb[46].mxu1 %v44848_v58  ;;  %39028 = vmatprep.mubr.msk.f32.mxu0 %vm41964_vm2, %v46164_v38 }
0x1073   :  { %38997 = vmatpush3.msra.mxu1 %v44903_v0  ;;  %38998 = vmatprep.mubr.msk.f32.mxu1 %vm41964_vm2, %v46164_v38 }
0x1074   :  { %39001 = vmatprep.subr.mxu1 %v46164_v38 }
0x107d   :  { %v26016_v42 = vpop.xlane.xlu0 %26015 }
0x107e   :  { %v26062_v13 = vsub.f32 %v44490_v40, %v26016_v42 }
0x1080   :  { %v26078_v54 = vmul.f32 1.442695, %v26062_v13 }
0x1081   :  { %v26019_v23 = vpop.xlane.xlu1 %26018 }
0x1082   :  { %41793 = vpow2.f32 %v26078_v54  ;;  %v26063_v7 = vsub.f32 %v44672_v35, %v26019_v23  ;;  %v44914_v20 = vpop.f32.mrb[40].mxu1  ;;  %v44977_v54 = vsub.f32 %v44787_v50, %v44903_v0 }
0x1083   :  { %v38785_v8 = vpop.f32.mrb[41].mxu1  ;;  %v26038_v49 = vsel %vm1412_vm3, %v44914_v20, -inf }
0x1084   :  { %v26080_v48 = vmul.f32 1.442695, %v26063_v7 }
0x1085   :  { %v26028_v26 = vpop.xlane.xlu1 %26027 }
0x1086   :  { %41795 = vpow2.f32 %v26080_v48  ;;  %v26066_v21 = vsub.f32 %v44705_v1, %v26028_v26 }
0x1087   :  { %v44917_v63 = vpop.f32.mrb[58].mxu0 }
0x1088   :  { %v38755_v14 = vpop.f32.mrb[59].mxu0  ;;  %v26035_v19 = vsel %vm1412_vm3, %v44917_v63, -inf  ;;  %v26086_v55 = vmul.f32 1.442695, %v26066_v21 }
0x1089   :  { %v44919_v29 = vpop.permute.xlu1 %18739  ;;  %v26272_v14 = vand.u32 4294901760, %v44977_v54 }
0x108a   :  { %v44922_v40 = vand.u32 4294901760, %v44919_v29 }
0x108c   :  { %v41794_v9 = vpop.eup %41793  ;;  %39027 = vmatpush3.msra.mxu0 %v44922_v40  ;;  %v44985_v21 = vsub.f32 %v44919_v29, %v44922_v40  ;;  %v26273_v29 = vsub.f32 %v44977_v54, %v26272_v14 }
0x108d   :  { %v26110_v35 = vsel %vm1412_vm3, %v41794_v9, 0.0  ;;  %39031 = vmatprep.subr.mxu0 %v46164_v38 }
0x108e   :  { %26111 = vadd.xlane.f32.xlu0 %v26110_v35 }
0x1090   :  { %v44927_v5 = vpop.eup %41795 }
0x1091   :  { %v26113_v1 = vsel %vm1412_vm3, %v44927_v5, 0.0 }
0x1092   :  { %v26022_v2 = vpop.xlane.xlu0 %26021  ;;  %26114 = vadd.xlane.f32.xlu0 %v26113_v1  ;;  %26039 = vmax.xlane.f32.xlu1 %v26038_v49  ;;  %v26721_v49 = vand.u32 4294901760, %v44985_v21 }
0x1093   :  { %v26064_v32 = vsub.f32 %v44776_v11, %v26022_v2 }
0x1095   :  { %v26082_v37 = vmul.f32 1.442695, %v26064_v32 }
0x1096   :  { %26033 = vmax.xlane.f32.xlu0 %v26032_v51 }
0x1097   :  { %41797 = vpow2.f32 %v26082_v37 }
0x109a   :  { %26036 = vmax.xlane.f32.xlu0 %v26035_v19  ;;  %v26722_v19 = vsub.f32 %v44985_v21, %v26721_v49 }
0x10a1   :  { %v44938_v36 = vpop.eup %41797 }
0x10a2   :  { %v26116_v56 = vsel %vm1412_vm3, %v44938_v36, 0.0 }
0x10a3   :  { %26117 = vadd.xlane.f32.xlu0 %v26116_v56  ;;  %v26274_v56 = vand.u32 4294901760, %v26273_v29 }
0x10b3   :  { %v44942_v24 = vpop.f32.mrb[60].mxu0 }
0x10b4   :  { %v38815_v58 = vpop.f32.mrb[61].mxu0  ;;  %v26041_v11 = vsel %vm1412_vm3, %v44942_v24, -inf }
0x10b5   :  { %26042 = vmax.xlane.f32.xlu1 %v26041_v11 }
0x10be   :  { %v26025_v28 = vpop.xlane.xlu0 %26024 }
0x10bf   :  { %v26065_v25 = vsub.f32 %v44833_v3, %v26025_v28 }
0x10c1   :  { %v26084_v16 = vmul.f32 1.442695, %v26065_v25 }
0x10c3   :  { %41799 = vpow2.f32 %v26084_v16 }
0x10cd   :  { %v44947_v45 = vpop.eup %41799  ;;  %v44949_v15 = vpop.f32.mrb[42].mxu1 }
0x10ce   :  { %v38845_v18 = vpop.f32.mrb[43].mxu1  ;;  %v26119_v31 = vsel %vm1412_vm3, %v44947_v45, 0.0  ;;  %v26044_v2 = vsel %vm1412_vm3, %v44949_v15, -inf }
0x10cf   :  { %26120 = vadd.xlane.f32.xlu0 %v26119_v31  ;;  %v26723_v18 = vand.u32 4294901760, %v26722_v19 }
0x10df   :  { %v44953_v47 = vpop.f32.mrb[62].mxu0 }
0x10e0   :  { %v38875_v44 = vpop.f32.mrb[63].mxu0  ;;  %v26047_v58 = vsel %vm1412_vm3, %v44953_v47, -inf }
0x10e5   :  { %18745 = vrot.lane.b32.xlu0 %v44787_v50, %s41968_s28 }
0x10ea   :  { %v26031_v60 = vpop.xlane.xlu1 %26030 }
0x10eb   :  { %v26067_v3 = vsub.f32 %v44875_v43, %v26031_v60 }
0x10ed   :  { %v26088_v33 = vmul.f32 1.442695, %v26067_v3 }
0x10ef   :  { %41801 = vpow2.f32 %v26088_v33 }
0x10f0   :  { %41803 = vpow2.f32 %v26086_v55 }
0x10f9   :  { %v44958_v22 = vpop.eup %41801  ;;  %v44960_v6 = vpop.f32.mrb[44].mxu1 }
0x10fa   :  { %v38905_v17 = vpop.f32.mrb[45].mxu1  ;;  %v26125_v30 = vsel %vm1412_vm3, %v44958_v22, 0.0  ;;  %v44964_v57 = vpop.eup %41803 }
0x10fb   :  { %26126 = vadd.xlane.f32.xlu1 %v26125_v30  ;;  %v26122_v41 = vsel %vm1412_vm3, %v44964_v57, 0.0 }
0x1104   :  { %26123 = vadd.xlane.f32.xlu0 %v26122_v41 }
0x110b   :  { %v44968_v4 = vpop.f32.mrb[64].mxu0 }
0x110c   :  { %18748 = vrot.lane.b32.xlu1 %v44787_v50, %s41969_s29  ;;  %v38935_v62 = vpop.f32.mrb[65].mxu0 }
0x111a   :  { %18751 = vrot.lane.b32.xlu0 %v44787_v50, %s41956_s23 }
0x111b   :  { %v26112_v46 = vpop.xlane.xlu0 %26111 }
0x111c   :  { %41805 = vrcp.f32 %v26112_v46  ;;  %v18743_v46 = vpop.permute.xlu1 %18742 }
0x111f   :  { %v26115_v52 = vpop.xlane.xlu0 %26114 }
0x1120   :  { %41807 = vrcp.f32 %v26115_v52  ;;  %v45048_v52 = vand.u32 4294901760, %v18743_v46 }
0x1123   :  { %v26034_v39 = vpop.xlane.xlu0 %26033 }
0x1124   :  { %v26068_v43 = vsub.f32 %v44873_v27, %v26034_v39 }
0x1126   :  { %v41806_v61 = vpop.eup %41805  ;;  %v26090_v42 = vmul.f32 1.442695, %v26068_v43  ;;  %v45061_v43 = vsub.f32 %v18743_v46, %v45048_v52 }
0x1127   :  { %v26159_v53 = vmul.f32 %v41806_v61, %v41794_v9  ;;  %v26037_v13 = vpop.xlane.xlu0 %26036  ;;  %v26040_v61 = vpop.xlane.xlu1 %26039 }
0x1128   :  { %v26069_v23 = vsub.f32 %v44917_v63, %v26037_v13  ;;  %41809 = vpow2.f32 %v26090_v42  ;;  %v26070_v42 = vsub.f32 %v44914_v20, %v26040_v61 }
0x1129   :  { %v26191_v7 = vsel %vm1412_vm3, %v26159_v53, 0  ;;  %v27170_v53 = vand.u32 4294901760, %v45061_v43 }
0x112a   :  { %v41808_v8 = vpop.eup %41807  ;;  %v26092_v48 = vmul.f32 1.442695, %v26069_v23  ;;  %v44981_v26 = vand.u32 4294901760, %v26191_v7  ;;  %v26094_v23 = vmul.f32 1.442695, %v26070_v42 }
0x112b   :  { %v26161_v27 = vmul.f32 %v41808_v8, %v44927_v5 }
0x112c   :  { %41811 = vpow2.f32 %v26092_v48  ;;  %v26260_v9 = vsub.f32 %v26191_v7, %v44981_v26 }
0x112d   :  { %v26640_v63 = vsel %vm1412_vm3, %v26161_v27, 0 }
0x112e   :  { %v26261_v35 = vand.u32 4294901760, %v26260_v9  ;;  %v44991_v1 = vand.u32 4294901760, %v26640_v63 }
0x1130   :  { %26045 = vmax.xlane.f32.xlu1 %v26044_v2  ;;  %v26262_v5 = vsub.f32 %v26260_v9, %v26261_v35  ;;  %v26709_v32 = vsub.f32 %v26640_v63, %v44991_v1  ;;  %v26118_v31 = vpop.xlane.xlu0 %26117 }
0x1131   :  { %41813 = vrcp.f32 %v26118_v31 }
0x1132   :  { %v26263_v37 = vand.u32 4294901760, %v26262_v5  ;;  %v26710_v51 = vand.u32 4294901760, %v26709_v32  ;;  %v45003_v28 = vpop.eup %41809 }
0x1133   :  { %v26128_v60 = vsel %vm1412_vm3, %v45003_v28, 0.0 }
0x1134   :  { %38999 = vmatmul.mubr.f32.vlgmr.msra.gmra.mrb[48].mxu1 %v26263_v37  ;;  %26048 = vmax.xlane.f32.xlu1 %v26047_v58  ;;  %v26711_v11 = vsub.f32 %v26709_v32, %v26710_v51 }
0x1135   :  { %39002 = vmatpush3.msra.mxu1 %v26274_v56  ;;  %39003 = vmatprep.mubr.msk.f32.mxu1 %vm41964_vm2, %v46164_v38 }
0x1136   :  { %v45007_v25 = vpop.eup %41811  ;;  %v26712_v16 = vand.u32 4294901760, %v26711_v11  ;;  %39006 = vmatprep.subr.mxu1 %v46164_v38 }
0x1137   :  { %v26131_v44 = vsel %vm1412_vm3, %v45007_v25, 0.0 }
0x1138   :  { %39029 = vmatmul.mubr.f32.vlgmr.msra.gmra.mrb[68].mxu0 %v26712_v16  ;;  %26132 = vadd.xlane.f32.xlu1 %v26131_v44 }
0x1139   :  { %39032 = vmatpush3.msra.mxu0 %v26723_v18  ;;  %26129 = vadd.xlane.f32.xlu0 %v26128_v60 }
0x113a   :  { %39033 = vmatprep.mubr.msk.f32.mxu0 %vm41964_vm2, %v46164_v38  ;;  %39036 = vmatprep.subr.mxu0 %v46164_v38 }
0x113b   :  { %v41814_v3 = vpop.eup %41813 }
0x113c   :  { %39004 = vmatmul.mubr.f32.vlgmr.msra.gmra.mrb[48].mxu1 %v44981_v26  ;;  %v26163_v41 = vmul.f32 %v41814_v3, %v44938_v36 }
0x113d   :  { %39007 = vmatpush3.msra.mxu1 %v44977_v54  ;;  %39008 = vmatprep.mubr.msk.f32.mxu1 %vm41964_vm2, %v46164_v38  ;;  %v27171_v54 = vsub.f32 %v45061_v43, %v27170_v53 }
0x113e   :  { %39011 = vmatprep.subr.mxu1 %v46164_v38  ;;  %v27089_v62 = vsel %vm1412_vm3, %v26163_v41, 0 }
0x113f   :  { %v45046_v36 = vand.u32 4294901760, %v27089_v62  ;;  %v27172_v8 = vand.u32 4294901760, %v27171_v54 }
0x1140   :  { %39034 = vmatmul.mubr.f32.vlgmr.msra.gmra.mrb[68].mxu0 %v44991_v1 }
0x1141   :  { %39037 = vmatpush3.msra.mxu0 %v44985_v21  ;;  %39038 = vmatprep.mubr.msk.f32.mxu0 %vm41964_vm2, %v46164_v38  ;;  %v45058_v39 = vsub.f32 %v27089_v62, %v45046_v36 }
0x1142   :  { %39041 = vmatprep.subr.mxu0 %v46164_v38  ;;  %v26043_v13 = vpop.xlane.xlu1 %26042 }
0x1143   :  { %v26071_v20 = vsub.f32 %v44942_v24, %v26043_v13 }
0x1144   :  { %39009 = vmatmul.mubr.f32.vlgmr.msra.gmra.mrb[48].mxu1 %v26260_v9  ;;  %v45027_v33 = vpop.f32.mrb[66].mxu0 }
0x1145   :  { %39012 = vmatpush3.msra.mxu1 %v44903_v0  ;;  %v45030_v55 = vpop.f32.mrb[46].mxu1  ;;  %v38995_v17 = vpop.f32.mrb[67].mxu0  ;;  %39013 = vmatprep.mubr.msk.f32.mxu1 %vm41964_vm2, %v46164_v38  ;;  %v26096_v48 = vmul.f32 1.442695, %v26071_v20 }
0x1146   :  { %v38965_v30 = vpop.f32.mrb[47].mxu1  ;;  %39016 = vmatprep.subr.mxu1 %v46164_v38  ;;  %v26056_v11 = vsel %vm1412_vm3, %v45030_v55, -inf }
0x1148   :  { %39039 = vmatmul.mubr.f32.vlgmr.msra.gmra.mrb[68].mxu0 %v26709_v32 }
0x1149   :  { %39042 = vmatpush3.msra.mxu0 %v44922_v40  ;;  %18757 = vrot.lane.b32.xlu1 %v44787_v50, %s41971_s4 }
0x114a   :  { %39043 = vmatprep.mubr.msk.f32.mxu0 %vm41964_vm2, %v46164_v38  ;;  %39046 = vmatprep.subr.mxu0 %v46164_v38 }
0x114c   :  { %39014 = vmatmul.mubr.f32.vlgmr.msra.gmra.mrb[48].mxu1 %v26261_v35 }
0x114d   :  { %39017 = vmatpush3.msra.mxu1 %v26272_v14  ;;  %39018 = vmatprep.mubr.msk.f32.mxu1 %vm41964_vm2, %v46164_v38 }
0x114e   :  { %39021 = vmatprep.subr.mxu1 %v46164_v38 }
0x114f   :  { %18754 = vrot.lane.b32.xlu0 %v44787_v50, %s41970_s30  ;;  %v27159_v50 = vand.u32 4294901760, %v45058_v39 }
0x1150   :  { %39044 = vmatmul.mubr.f32.vlgmr.msra.gmra.mrb[68].mxu0 %v26710_v51  ;;  %v26053_v51 = vsel %vm1412_vm3, %v44968_v4, -inf }
0x1151   :  { %39047 = vmatpush3.msra.mxu0 %v26721_v49  ;;  %39048 = vmatprep.mubr.msk.f32.mxu0 %vm41964_vm2, %v46164_v38 }
0x1152   :  { %39051 = vmatprep.subr.mxu0 %v46164_v38 }
0x1154   :  { %39019 = vmatmul.mubr.f32.vlgmr.msra.gmra.mrb[48].mxu1 %v44981_v26 }
0x1155   :  { %39022 = vmatpush3.msra.mxu1 %v44903_v0  ;;  %39023 = vmatprep.mubr.msk.f32.mxu1 %vm41964_vm2, %v46164_v38  ;;  %v27160_v0 = vsub.f32 %v45058_v39, %v27159_v50 }
0x1156   :  { %39056 = vmatprep.subr.mxu1 %v46164_v38 }
0x1158   :  { %39049 = vmatmul.mubr.f32.vlgmr.msra.gmra.mrb[68].mxu0 %v44991_v1 }
0x1159   :  { %39052 = vmatpush3.msra.mxu0 %v44922_v40  ;;  %39053 = vmatprep.mubr.msk.f32.mxu0 %vm41964_vm2, %v46164_v38  ;;  %v27161_v40 = vand.u32 4294901760, %v27160_v0 }
0x115a   :  { %39086 = vmatprep.subr.mxu0 %v46164_v38 }
0x115c   :  { %39024 = vmatmul.mubr.f32.vlgmr.msra.gmra.mrb[48].mxu1 %v44981_v26  ;;  %v26121_v7 = vpop.xlane.xlu0 %26120 }
0x115d   :  { %39057 = vmatpush3.msra.mxu1 %v45048_v52  ;;  %41815 = vrcp.f32 %v26121_v7  ;;  %39058 = vmatprep.mubr.msk.f32.mxu1 %vm41964_vm2, %v46164_v38 }
0x115e   :  { %39061 = vmatprep.subr.mxu1 %v46164_v38  ;;  %41817 = vpow2.f32 %v26094_v23 }
0x115f   :  { %41819 = vpow2.f32 %v26096_v48 }
0x1160   :  { %39059 = vmatmul.mubr.f32.vlgmr.msra.gmra.mrb[50].mxu1 %v27161_v40  ;;  %39054 = vmatmul.mubr.f32.vlgmr.msra.gmra.mrb[68].mxu0 %v44991_v1  ;;  %v18746_v24 = vpop.permute.xlu0 %18745 }
0x1161   :  { %39062 = vmatpush3.msra.mxu1 %v27172_v8  ;;  %v45089_v21 = vand.u32 4294901760, %v18746_v24  ;;  %39063 = vmatprep.mubr.msk.f32.mxu1 %vm41964_vm2, %v46164_v38 }
0x1162   :  { %39066 = vmatprep.subr.mxu1 %v46164_v38  ;;  %39088 = vmatprep.mubr.msk.f32.mxu0 %vm41964_vm2, %v46164_v38 }
0x1163   :  { %39087 = vmatpush3.msra.mxu0 %v45089_v21  ;;  %v27618_v14 = vsub.f32 %v18746_v24, %v45089_v21 }
0x1164   :  { %39091 = vmatprep.subr.mxu0 %v46164_v38 }
0x1165   :  { %v27619_v1 = vand.u32 4294901760, %v27618_v14 }
0x1167   :  { %v41816_v26 = vpop.eup %41815  ;;  %v27620_v32 = vsub.f32 %v27618_v14, %v27619_v1 }
0x1168   :  { %v26165_v27 = vmul.f32 %v41816_v26, %v44947_v45  ;;  %39064 = vmatmul.mubr.f32.vlgmr.msra.gmra.mrb[50].mxu1 %v45046_v36  ;;  %v45104_v9 = vpop.eup %41817  ;;  %v26050_v45 = vsel %vm1412_vm3, %v44960_v6, -inf }
0x1169   :  { %39067 = vmatpush3.msra.mxu1 %v45061_v43  ;;  %39068 = vmatprep.mubr.msk.f32.mxu1 %vm41964_vm2, %v46164_v38  ;;  %v45112_v49 = vpop.eup %41819  ;;  %v26134_v2 = vsel %vm1412_vm3, %v45104_v9, 0.0  ;;  %v27621_v58 = vand.u32 4294901760, %v27620_v32 }
0x116a   :  { %39071 = vmatprep.subr.mxu1 %v46164_v38  ;;  %v27538_v63 = vsel %vm1412_vm3, %v26165_v27, 0  ;;  %v26137_v37 = vsel %vm1412_vm3, %v45112_v49, 0.0 }
0x116b   :  { %v45108_v35 = vand.u32 4294901760, %v27538_v63 }
0x116d   :  { %26051 = vmax.xlane.f32.xlu1 %v26050_v45  ;;  %v27607_v29 = vsub.f32 %v27538_v63, %v45108_v35 }
0x116e   :  { %26135 = vadd.xlane.f32.xlu0 %v26134_v2 }
0x116f   :  { %v27608_v5 = vand.u32 4294901760, %v27607_v29 }
0x1170   :  { %39069 = vmatmul.mubr.f32.vlgmr.msra.gmra.mrb[50].mxu1 %v45058_v39 }
0x1171   :  { %39072 = vmatpush3.msra.mxu1 %v45048_v52  ;;  %26138 = vadd.xlane.f32.xlu1 %v26137_v37  ;;  %v27609_v19 = vsub.f32 %v27607_v29, %v27608_v5 }
0x1172   :  { %26054 = vmax.xlane.f32.xlu0 %v26053_v51  ;;  %39073 = vmatprep.mubr.msk.f32.mxu1 %vm41964_vm2, %v46164_v38  ;;  %v26059_v51 = vsel %vm1412_vm3, %v45027_v33, -inf }
0x1173   :  { %v27610_v56 = vand.u32 4294901760, %v27609_v19  ;;  %39076 = vmatprep.subr.mxu1 %v46164_v38 }
0x1175   :  { %39089 = vmatmul.mubr.f32.vlgmr.msra.gmra.mrb[70].mxu0 %v27610_v56  ;;  %26057 = vmax.xlane.f32.xlu1 %v26056_v11 }
0x1176   :  { %39092 = vmatpush3.msra.mxu0 %v27621_v58  ;;  %39093 = vmatprep.mubr.msk.f32.mxu0 %vm41964_vm2, %v46164_v38 }
0x1177   :  { %39096 = vmatprep.subr.mxu0 %v46164_v38 }
0x1178   :  { %39074 = vmatmul.mubr.f32.vlgmr.msra.gmra.mrb[50].mxu1 %v27159_v50 }
0x1179   :  { %39077 = vmatpush3.msra.mxu1 %v27170_v53  ;;  %39078 = vmatprep.mubr.msk.f32.mxu1 %vm41964_vm2, %v46164_v38 }
0x117a   :  { %39081 = vmatprep.subr.mxu1 %v46164_v38 }
0x117d   :  { %39094 = vmatmul.mubr.f32.vlgmr.msra.gmra.mrb[70].mxu0 %v45108_v35 }
0x117e   :  { %39097 = vmatpush3.msra.mxu0 %v27618_v14  ;;  %39098 = vmatprep.mubr.msk.f32.mxu0 %vm41964_vm2, %v46164_v38 }
0x117f   :  { %39101 = vmatprep.subr.mxu0 %v46164_v38 }
0x1180   :  { %39079 = vmatmul.mubr.f32.vlgmr.msra.gmra.mrb[50].mxu1 %v45046_v36 }
0x1181   :  { %39082 = vmatpush3.msra.mxu1 %v45048_v52  ;;  %39083 = vmatprep.mubr.msk.f32.mxu1 %vm41964_vm2, %v46164_v38 }
0x1182   :  { %39116 = vmatprep.subr.mxu1 %v46164_v38 }
0x1185   :  { %39099 = vmatmul.mubr.f32.vlgmr.msra.gmra.mrb[70].mxu0 %v27607_v29 }
0x1186   :  { %39102 = vmatpush3.msra.mxu0 %v45089_v21  ;;  %39103 = vmatprep.mubr.msk.f32.mxu0 %vm41964_vm2, %v46164_v38 }
0x1187   :  { %39106 = vmatprep.subr.mxu0 %v46164_v38 }
0x1188   :  { %39084 = vmatmul.mubr.f32.vlgmr.msra.gmra.mrb[50].mxu1 %v45046_v36  ;;  %v26127_v16 = vpop.xlane.xlu1 %26126  ;;  %18761 = vrot.lane.b32.xlu0 %v44234_v10, %s41966_s26 }
0x1189   :  { %41821 = vrcp.f32 %v26127_v16  ;;  %39118 = vmatprep.mubr.msk.f32.mxu1 %vm41964_vm2, %v46164_v38 }
0x118c   :  { %v18749_v18 = vpop.permute.xlu1 %18748  ;;  %18767 = vrot.lane.b32.xlu0 %v44234_v10, %s41968_s28 }
0x118d   :  { %v45158_v31 = vand.u32 4294901760, %v18749_v18  ;;  %39104 = vmatmul.mubr.f32.vlgmr.msra.gmra.mrb[70].mxu0 %v27608_v5 }
0x118e   :  { %39107 = vmatpush3.msra.mxu0 %v27619_v1  ;;  %39108 = vmatprep.mubr.msk.f32.mxu0 %vm41964_vm2, %v46164_v38 }
0x118f   :  { %39117 = vmatpush3.msra.mxu1 %v45158_v31  ;;  %39111 = vmatprep.subr.mxu0 %v46164_v38  ;;  %v28067_v61 = vsub.f32 %v18749_v18, %v45158_v31 }
0x1190   :  { %39121 = vmatprep.subr.mxu1 %v46164_v38 }
0x1191   :  { %v26124_v44 = vpop.xlane.xlu0 %26123  ;;  %v28068_v20 = vand.u32 4294901760, %v28067_v61 }
0x1192   :  { %41823 = vrcp.f32 %v26124_v44 }
0x1193   :  { %v41822_v60 = vpop.eup %41821  ;;  %v28069_v7 = vsub.f32 %v28067_v61, %v28068_v20 }
0x1194   :  { %v26169_v3 = vmul.f32 %v41822_v60, %v44958_v22 }
0x1195   :  { %39109 = vmatmul.mubr.f32.vlgmr.msra.gmra.mrb[70].mxu0 %v45108_v35  ;;  %v18752_v17 = vpop.permute.xlu0 %18751  ;;  %v28070_v48 = vand.u32 4294901760, %v28069_v7  ;;  %v45302_v7 = vand.u32 4294901760, %v44234_v10 }
0x1196   :  { %39112 = vmatpush3.msra.mxu0 %v45089_v21  ;;  %v28439_v30 = vand.u32 4294901760, %v18752_v17  ;;  %39113 = vmatprep.mubr.msk.f32.mxu0 %vm41964_vm2, %v46164_v38  ;;  %v28436_v41 = vsel %vm1412_vm3, %v26169_v3, 0 }
0x1197   :  { %39146 = vmatprep.subr.mxu0 %v46164_v38  ;;  %v45172_v62 = vand.u32 4294901760, %v28436_v41 }
0x1198   :  { %v28516_v46 = vsub.f32 %v18752_v17, %v28439_v30 }
0x1199   :  { %v28505_v36 = vsub.f32 %v28436_v41, %v45172_v62 }
0x119a   :  { %v28517_v52 = vand.u32 4294901760, %v28516_v46 }
0x119b   :  { %v28506_v22 = vand.u32 4294901760, %v28505_v36 }
0x119c   :  { %v41824_v39 = vpop.eup %41823  ;;  %v28518_v43 = vsub.f32 %v28516_v46, %v28517_v52 }
0x119d   :  { %v26167_v50 = vmul.f32 %v41824_v39, %v44964_v57  ;;  %39114 = vmatmul.mubr.f32.vlgmr.msra.gmra.mrb[70].mxu0 %v45108_v35  ;;  %v28507_v53 = vsub.f32 %v28505_v36, %v28506_v22 }
0x119e   :  { %v28519_v42 = vand.u32 4294901760, %v28518_v43  ;;  %39147 = vmatpush3.msra.mxu0 %v28439_v30  ;;  %39148 = vmatprep.mubr.msk.f32.mxu0 %vm41964_vm2, %v46164_v38 }
0x119f   :  { %39151 = vmatprep.subr.mxu0 %v46164_v38  ;;  %v28508_v13 = vand.u32 4294901760, %v28507_v53  ;;  %v27987_v0 = vsel %vm1412_vm3, %v26167_v50, 0 }
0x11a0   :  { %v45182_v54 = vand.u32 4294901760, %v27987_v0 }
0x11a1   :  { %39149 = vmatmul.mubr.f32.vlgmr.msra.gmra.mrb[72].mxu0 %v28508_v13 }
0x11a2   :  { %39152 = vmatpush3.msra.mxu0 %v28519_v42  ;;  %39153 = vmatprep.mubr.msk.f32.mxu0 %vm41964_vm2, %v46164_v38  ;;  %v28056_v57 = vsub.f32 %v27987_v0, %v45182_v54 }
0x11a3   :  { %39156 = vmatprep.subr.mxu0 %v46164_v38 }
0x11a4   :  { %v28057_v23 = vand.u32 4294901760, %v28056_v57 }
0x11a6   :  { %v28058_v40 = vsub.f32 %v28056_v57, %v28057_v23 }
0x11a8   :  { %v28059_v8 = vand.u32 4294901760, %v28058_v40 }
0x11a9   :  { %39154 = vmatmul.mubr.f32.vlgmr.msra.gmra.mrb[72].mxu0 %v45172_v62 }
0x11aa   :  { %39157 = vmatpush3.msra.mxu0 %v28516_v46  ;;  %39119 = vmatmul.mubr.f32.vlgmr.msra.gmra.mrb[52].mxu1 %v28059_v8 }
0x11ab   :  { %39122 = vmatpush3.msra.mxu1 %v28070_v48  ;;  %39158 = vmatprep.mubr.msk.f32.mxu0 %vm41964_vm2, %v46164_v38  ;;  %v45310_v48 = vsub.f32 %v44234_v10, %v45302_v7 }
0x11ac   :  { %39161 = vmatprep.subr.mxu0 %v46164_v38  ;;  %39123 = vmatprep.mubr.msk.f32.mxu1 %vm41964_vm2, %v46164_v38 }
0x11ad   :  { %39126 = vmatprep.subr.mxu1 %v46164_v38 }
0x11b1   :  { %39159 = vmatmul.mubr.f32.vlgmr.msra.gmra.mrb[72].mxu0 %v28505_v36 }
0x11b2   :  { %39162 = vmatpush3.msra.mxu0 %v28439_v30  ;;  %39124 = vmatmul.mubr.f32.vlgmr.msra.gmra.mrb[52].mxu1 %v45182_v54 }
0x11b3   :  { %39127 = vmatpush3.msra.mxu1 %v28067_v61  ;;  %39163 = vmatprep.mubr.msk.f32.mxu0 %vm41964_vm2, %v46164_v38 }
0x11b4   :  { %39166 = vmatprep.subr.mxu0 %v46164_v38  ;;  %39128 = vmatprep.mubr.msk.f32.mxu1 %vm41964_vm2, %v46164_v38 }
0x11b5   :  { %39131 = vmatprep.subr.mxu1 %v46164_v38 }
0x11b9   :  { %39164 = vmatmul.mubr.f32.vlgmr.msra.gmra.mrb[72].mxu0 %v28506_v22 }
0x11ba   :  { %39167 = vmatpush3.msra.mxu0 %v28517_v52  ;;  %39129 = vmatmul.mubr.f32.vlgmr.msra.gmra.mrb[52].mxu1 %v28056_v57 }
0x11bb   :  { %39132 = vmatpush3.msra.mxu1 %v45158_v31  ;;  %39168 = vmatprep.mubr.msk.f32.mxu0 %vm41964_vm2, %v46164_v38 }
0x11bc   :  { %39171 = vmatprep.subr.mxu0 %v46164_v38  ;;  %39133 = vmatprep.mubr.msk.f32.mxu1 %vm41964_vm2, %v46164_v38 }
0x11bd   :  { %v26046_v24 = vpop.xlane.xlu1 %26045  ;;  %39136 = vmatprep.subr.mxu1 %v46164_v38 }
0x11be   :  { %v26072_v21 = vsub.f32 %v44949_v15, %v26046_v24 }
0x11c0   :  { %v26098_v26 = vmul.f32 1.442695, %v26072_v21 }
0x11c1   :  { %39169 = vmatmul.mubr.f32.vlgmr.msra.gmra.mrb[72].mxu0 %v45172_v62  ;;  %v26049_v27 = vpop.xlane.xlu1 %26048 }
0x11c2   :  { %41825 = vpow2.f32 %v26098_v26  ;;  %39172 = vmatpush3.msra.mxu0 %v28439_v30  ;;  %v26073_v14 = vsub.f32 %v44953_v47, %v26049_v27  ;;  %39134 = vmatmul.mubr.f32.vlgmr.msra.gmra.mrb[52].mxu1 %v28057_v23 }
0x11c3   :  { %39137 = vmatpush3.msra.mxu1 %v28068_v20  ;;  %39173 = vmatprep.mubr.msk.f32.mxu0 %vm41964_vm2, %v46164_v38 }
0x11c4   :  { %v26100_v63 = vmul.f32 1.442695, %v26073_v14  ;;  %39138 = vmatprep.mubr.msk.f32.mxu1 %vm41964_vm2, %v46164_v38  ;;  %39141 = vmatprep.subr.mxu1 %v46164_v38 }
0x11c5   :  { %v26133_v15 = vpop.xlane.xlu1 %26132  ;;  %39206 = vmatprep.subr.mxu0 %v46164_v38 }
0x11c6   :  { %41827 = vpow2.f32 %v26100_v63  ;;  %v26130_v35 = vpop.xlane.xlu0 %26129 }
0x11c7   :  { %41829 = vrcp.f32 %v26133_v15  ;;  %v29864_v15 = vand.u32 4294901760, %v45310_v48 }
0x11c8   :  { %41831 = vrcp.f32 %v26130_v35 }
0x11c9   :  { %39174 = vmatmul.mubr.f32.vlgmr.msra.gmra.mrb[72].mxu0 %v45172_v62  ;;  %v18758_v47 = vpop.permute.xlu1 %18757 }
0x11ca   :  { %v45219_v1 = vand.u32 4294901760, %v18758_v47  ;;  %39139 = vmatmul.mubr.f32.vlgmr.msra.gmra.mrb[52].mxu1 %v45182_v54  ;;  %39208 = vmatprep.mubr.msk.f32.mxu0 %vm41964_vm2, %v46164_v38  ;;  %v18755_v2 = vpop.permute.xlu0 %18754 }
0x11cb   :  { %39142 = vmatpush3.msra.mxu1 %v45158_v31  ;;  %39143 = vmatprep.mubr.msk.f32.mxu1 %vm41964_vm2, %v46164_v38  ;;  %v45234_v5 = vand.u32 4294901760, %v18755_v2 }
0x11cc   :  { %v45227_v45 = vpop.eup %41825  ;;  %39207 = vmatpush3.msra.mxu0 %v45219_v1  ;;  %39176 = vmatprep.subr.mxu1 %v46164_v38  ;;  %v29414_v58 = vsub.f32 %v18758_v47, %v45219_v1 }
0x11cd   :  { %v26140_v29 = vsel %vm1412_vm3, %v45227_v45, 0.0  ;;  %39211 = vmatprep.subr.mxu0 %v46164_v38  ;;  %v28965_v16 = vsub.f32 %v18755_v2, %v45234_v5 }
0x11ce   :  { %26141 = vadd.xlane.f32.xlu1 %v26140_v29  ;;  %v29415_v60 = vand.u32 4294901760, %v29414_v58 }
0x11cf   :  { %v28966_v3 = vand.u32 4294901760, %v28965_v16 }
0x11d0   :  { %v45236_v32 = vpop.eup %41827  ;;  %v29416_v62 = vsub.f32 %v29414_v58, %v29415_v60 }
0x11d1   :  { %v41830_v37 = vpop.eup %41829  ;;  %v28967_v36 = vsub.f32 %v28965_v16, %v28966_v3 }
0x11d2   :  { %v41832_v19 = vpop.eup %41831  ;;  %v26173_v56 = vmul.f32 %v41830_v37, %v45007_v25  ;;  %39144 = vmatmul.mubr.f32.vlgmr.msra.gmra.mrb[52].mxu1 %v45182_v54  ;;  %26060 = vmax.xlane.f32.xlu1 %v26059_v51  ;;  %v26143_v25 = vsel %vm1412_vm3, %v45236_v32, 0.0  ;;  %v29417_v43 = vand.u32 4294901760, %v29416_v62  ;;  %v29865_v37 = vsub.f32 %v45310_v48, %v29864_v15 }
0x11d3   :  { %v26171_v11 = vmul.f32 %v41832_v19, %v45003_v28  ;;  %39177 = vmatpush3.msra.mxu1 %v45234_v5  ;;  %39178 = vmatprep.mubr.msk.f32.mxu1 %vm41964_vm2, %v46164_v38  ;;  %v28968_v50 = vand.u32 4294901760, %v28967_v36 }
0x11d4   :  { %39181 = vmatprep.subr.mxu1 %v46164_v38  ;;  %v29334_v18 = vsel %vm1412_vm3, %v26173_v56, 0 }
0x11d5   :  { %v45252_v31 = vand.u32 4294901760, %v29334_v18  ;;  %v28885_v44 = vsel %vm1412_vm3, %v26171_v11, 0 }
0x11d6   :  { %26144 = vadd.xlane.f32.xlu1 %v26143_v25  ;;  %v45255_v28 = vand.u32 4294901760, %v28885_v44 }
0x11d7   :  { %v29403_v17 = vsub.f32 %v29334_v18, %v45252_v31 }
0x11d8   :  { %v28954_v30 = vsub.f32 %v28885_v44, %v45255_v28 }
0x11d9   :  { %v29404_v41 = vand.u32 4294901760, %v29403_v17 }
0x11da   :  { %v28955_v46 = vand.u32 4294901760, %v28954_v30 }
0x11db   :  { %v29405_v52 = vsub.f32 %v29403_v17, %v29404_v41 }
0x11dc   :  { %v28956_v22 = vsub.f32 %v28954_v30, %v28955_v46 }
0x11dd   :  { %v29406_v39 = vand.u32 4294901760, %v29405_v52 }
0x11de   :  { %v28957_v61 = vand.u32 4294901760, %v28956_v22 }
0x11df   :  { %39209 = vmatmul.mubr.f32.vlgmr.msra.gmra.mrb[74].mxu0 %v29406_v39 }
0x11e0   :  { %39212 = vmatpush3.msra.mxu0 %v29417_v43  ;;  %39179 = vmatmul.mubr.f32.vlgmr.msra.gmra.mrb[54].mxu1 %v28957_v61 }
0x11e1   :  { %39182 = vmatpush3.msra.mxu1 %v28968_v50  ;;  %39213 = vmatprep.mubr.msk.f32.mxu0 %vm41964_vm2, %v46164_v38 }
0x11e2   :  { %39216 = vmatprep.subr.mxu0 %v46164_v38  ;;  %39183 = vmatprep.mubr.msk.f32.mxu1 %vm41964_vm2, %v46164_v38 }
0x11e3   :  { %39186 = vmatprep.subr.mxu1 %v46164_v38 }
0x11e7   :  { %39214 = vmatmul.mubr.f32.vlgmr.msra.gmra.mrb[74].mxu0 %v45252_v31  ;;  %18764 = vrot.lane.b32.xlu1 %v44234_v10, %s41965_s2 }
0x11e8   :  { %39217 = vmatpush3.msra.mxu0 %v29414_v58  ;;  %39184 = vmatmul.mubr.f32.vlgmr.msra.gmra.mrb[54].mxu1 %v45255_v28 }
0x11e9   :  { %39187 = vmatpush3.msra.mxu1 %v28965_v16  ;;  %39218 = vmatprep.mubr.msk.f32.mxu0 %vm41964_vm2, %v46164_v38  ;;  %v29866_v16 = vand.u32 4294901760, %v29865_v37 }
0x11ea   :  { %39221 = vmatprep.subr.mxu0 %v46164_v38  ;;  %39188 = vmatprep.mubr.msk.f32.mxu1 %vm41964_vm2, %v46164_v38 }
0x11eb   :  { %39191 = vmatprep.subr.mxu1 %v46164_v38 }
0x11ef   :  { %39219 = vmatmul.mubr.f32.vlgmr.msra.gmra.mrb[74].mxu0 %v29403_v17 }
0x11f0   :  { %39222 = vmatpush3.msra.mxu0 %v45219_v1  ;;  %39189 = vmatmul.mubr.f32.vlgmr.msra.gmra.mrb[54].mxu1 %v28954_v30 }
0x11f1   :  { %39192 = vmatpush3.msra.mxu1 %v45234_v5  ;;  %39223 = vmatprep.mubr.msk.f32.mxu0 %vm41964_vm2, %v46164_v38 }
0x11f2   :  { %39226 = vmatprep.subr.mxu0 %v46164_v38  ;;  %39193 = vmatprep.mubr.msk.f32.mxu1 %vm41964_vm2, %v46164_v38 }
0x11f3   :  { %39196 = vmatprep.subr.mxu1 %v46164_v38 }
0x11f7   :  { %39224 = vmatmul.mubr.f32.vlgmr.msra.gmra.mrb[74].mxu0 %v29404_v41 }
0x11f8   :  { %39227 = vmatpush3.msra.mxu0 %v29415_v60  ;;  %39194 = vmatmul.mubr.f32.vlgmr.msra.gmra.mrb[54].mxu1 %v28955_v46 }
0x11f9   :  { %39197 = vmatpush3.msra.mxu1 %v28966_v3  ;;  %39228 = vmatprep.mubr.msk.f32.mxu0 %vm41964_vm2, %v46164_v38 }
0x11fa   :  { %v26052_v53 = vpop.xlane.xlu1 %26051  ;;  %39231 = vmatprep.subr.mxu0 %v46164_v38  ;;  %39198 = vmatprep.mubr.msk.f32.mxu1 %vm41964_vm2, %v46164_v38 }
0x11fb   :  { %v26074_v42 = vsub.f32 %v44960_v6, %v26052_v53  ;;  %v26136_v13 = vpop.xlane.xlu0 %26135  ;;  %39201 = vmatprep.subr.mxu1 %v46164_v38 }
0x11fc   :  { %41833 = vrcp.f32 %v26136_v13 }
0x11fd   :  { %v26102_v0 = vmul.f32 1.442695, %v26074_v42 }
0x11fe   :  { %v26139_v54 = vpop.xlane.xlu1 %26138 }
0x11ff   :  { %41835 = vpow2.f32 %v26102_v0  ;;  %39229 = vmatmul.mubr.f32.vlgmr.msra.gmra.mrb[74].mxu0 %v45252_v31  ;;  %v26055_v20 = vpop.xlane.xlu0 %26054 }
0x1200   :  { %39232 = vmatpush3.msra.mxu0 %v45219_v1  ;;  %41837 = vrcp.f32 %v26139_v54  ;;  %39199 = vmatmul.mubr.f32.vlgmr.msra.gmra.mrb[54].mxu1 %v45255_v28  ;;  %v26075_v57 = vsub.f32 %v44968_v4, %v26055_v20 }
0x1201   :  { %39202 = vmatpush3.msra.mxu1 %v45234_v5  ;;  %39233 = vmatprep.mubr.msk.f32.mxu0 %vm41964_vm2, %v46164_v38 }
0x1202   :  { %v26104_v6 = vmul.f32 1.442695, %v26075_v57  ;;  %39266 = vmatprep.subr.mxu0 %v46164_v38  ;;  %39203 = vmatprep.mubr.msk.f32.mxu1 %vm41964_vm2, %v46164_v38  ;;  %v26058_v44 = vpop.xlane.xlu1 %26057 }
0x1203   :  { %v18762_v23 = vpop.permute.xlu0 %18761  ;;  %39236 = vmatprep.subr.mxu1 %v46164_v38  ;;  %v26076_v60 = vsub.f32 %v45030_v55, %v26058_v44 }
0x1204   :  { %41839 = vpow2.f32 %v26104_v6  ;;  %v45304_v40 = vand.u32 4294901760, %v18762_v23 }
0x1206   :  { %v41834_v4 = vpop.eup %41833  ;;  %v30312_v63 = vsub.f32 %v18762_v23, %v45304_v40 }
0x1207   :  { %v26175_v8 = vmul.f32 %v41834_v4, %v45104_v9  ;;  %39234 = vmatmul.mubr.f32.vlgmr.msra.gmra.mrb[74].mxu0 %v45252_v31  ;;  %v18768_v62 = vpop.permute.xlu0 %18767 }
0x1208   :  { %39267 = vmatpush3.msra.mxu0 %v45304_v40  ;;  %39204 = vmatmul.mubr.f32.vlgmr.msra.gmra.mrb[54].mxu1 %v45255_v28  ;;  %v30313_v5 = vand.u32 4294901760, %v30312_v63  ;;  %v26106_v28 = vmul.f32 1.442695, %v26076_v60  ;;  %v45392_v46 = vand.u32 4294901760, %v18768_v62 }
0x1209   :  { %v45314_v24 = vpop.eup %41835  ;;  %39237 = vmatpush3.msra.mxu1 %v45302_v7  ;;  %39238 = vmatprep.mubr.msk.f32.mxu1 %vm41964_vm2, %v46164_v38  ;;  %v29783_v21 = vsel %vm1412_vm3, %v26175_v8, 0 }
0x120a   :  { %v41838_v9 = vpop.eup %41837  ;;  %v26146_v26 = vsel %vm1412_vm3, %v45314_v24, 0.0  ;;  %39241 = vmatprep.subr.mxu1 %v46164_v38  ;;  %v45323_v27 = vand.u32 4294901760, %v29783_v21  ;;  %39268 = vmatprep.mubr.msk.f32.mxu0 %vm41964_vm2, %v46164_v38  ;;  %v30314_v11 = vsub.f32 %v30312_v63, %v30313_v5  ;;  %41841 = vpow2.f32 %v26106_v28 }
0x120b   :  { %v26177_v14 = vmul.f32 %v41838_v9, %v45112_v49  ;;  %26147 = vadd.xlane.f32.xlu0 %v26146_v26  ;;  %39271 = vmatprep.subr.mxu0 %v46164_v38 }
0x120c   :  { %v29852_v35 = vsub.f32 %v29783_v21, %v45323_v27  ;;  %v30315_v31 = vand.u32 4294901760, %v30314_v11 }
0x120d   :  { %v30232_v47 = vsel %vm1412_vm3, %v26177_v14, 0 }
0x120e   :  { %v45333_v1 = vpop.eup %41839  ;;  %v29853_v2 = vand.u32 4294901760, %v29852_v35  ;;  %v45335_v29 = vand.u32 4294901760, %v30232_v47 }
0x120f   :  { %v26149_v49 = vsel %vm1412_vm3, %v45333_v1, 0.0 }
0x1210   :  { %26150 = vadd.xlane.f32.xlu1 %v26149_v49  ;;  %v29854_v51 = vsub.f32 %v29852_v35, %v29853_v2  ;;  %v30301_v19 = vsub.f32 %v30232_v47, %v45335_v29 }
0x1212   :  { %v29855_v56 = vand.u32 4294901760, %v29854_v51  ;;  %v30302_v58 = vand.u32 4294901760, %v30301_v19 }
0x1214   :  { %39239 = vmatmul.mubr.f32.vlgmr.msra.gmra.mrb[56].mxu1 %v29855_v56  ;;  %v30303_v18 = vsub.f32 %v30301_v19, %v30302_v58  ;;  %v45387_v41 = vpop.eup %41841 }
0x1215   :  { %39242 = vmatpush3.msra.mxu1 %v29866_v16  ;;  %39243 = vmatprep.mubr.msk.f32.mxu1 %vm41964_vm2, %v46164_v38  ;;  %v26152_v36 = vsel %vm1412_vm3, %v45387_v41, 0.0 }
0x1216   :  { %v30304_v25 = vand.u32 4294901760, %v30303_v18  ;;  %39246 = vmatprep.subr.mxu1 %v46164_v38 }
0x1218   :  { %39269 = vmatmul.mubr.f32.vlgmr.msra.gmra.mrb[76].mxu0 %v30304_v25 }
0x1219   :  { %39272 = vmatpush3.msra.mxu0 %v30315_v31  ;;  %39273 = vmatprep.mubr.msk.f32.mxu0 %vm41964_vm2, %v46164_v38 }
0x121a   :  { %39276 = vmatprep.subr.mxu0 %v46164_v38 }
0x121c   :  { %39244 = vmatmul.mubr.f32.vlgmr.msra.gmra.mrb[56].mxu1 %v45323_v27 }
0x121d   :  { %39247 = vmatpush3.msra.mxu1 %v45310_v48  ;;  %39248 = vmatprep.mubr.msk.f32.mxu1 %vm41964_vm2, %v46164_v38  ;;  %v31210_v48 = vsub.f32 %v18768_v62, %v45392_v46 }
0x121e   :  { %39251 = vmatprep.subr.mxu1 %v46164_v38 }
0x121f   :  { %v31211_v47 = vand.u32 4294901760, %v31210_v48 }
0x1220   :  { %39274 = vmatmul.mubr.f32.vlgmr.msra.gmra.mrb[76].mxu0 %v45335_v29 }
0x1221   :  { %39277 = vmatpush3.msra.mxu0 %v30312_v63  ;;  %18770 = vrot.lane.b32.xlu0 %v44234_v10, %s41969_s29 }
0x1222   :  { %18773 = vrot.lane.b32.xlu1 %v44234_v10, %s41956_s23  ;;  %39278 = vmatprep.mubr.msk.f32.mxu0 %vm41964_vm2, %v46164_v38  ;;  %s41978_s23 = smov [#allocation8]  }
0x1223   :  { %39281 = vmatprep.subr.mxu0 %v46164_v38 }
0x1224   :  { %39249 = vmatmul.mubr.f32.vlgmr.msra.gmra.mrb[56].mxu1 %v29852_v35 }
0x1225   :  { %39252 = vmatpush3.msra.mxu1 %v45302_v7  ;;  %39253 = vmatprep.mubr.msk.f32.mxu1 %vm41964_vm2, %v46164_v38 }
0x1226   :  { %39256 = vmatprep.subr.mxu1 %v46164_v38 }
0x1228   :  { %39279 = vmatmul.mubr.f32.vlgmr.msra.gmra.mrb[76].mxu0 %v30301_v19 }
0x1229   :  { %39282 = vmatpush3.msra.mxu0 %v45304_v40  ;;  %39283 = vmatprep.mubr.msk.f32.mxu0 %vm41964_vm2, %v46164_v38 }
0x122a   :  { %39286 = vmatprep.subr.mxu0 %v46164_v38 }
0x122c   :  { %39254 = vmatmul.mubr.f32.vlgmr.msra.gmra.mrb[56].mxu1 %v29853_v2 }
0x122d   :  { %39257 = vmatpush3.msra.mxu1 %v29864_v15  ;;  %39258 = vmatprep.mubr.msk.f32.mxu1 %vm41964_vm2, %v46164_v38 }
0x122e   :  { %39261 = vmatprep.subr.mxu1 %v46164_v38 }
0x122f   :  { %v45372_v3 = vpop.f32.mrb[48].mxu1 }
0x1230   :  { %v39025_v17 = vpop.f32.mrb[49].mxu1  ;;  %39284 = vmatmul.mubr.f32.vlgmr.msra.gmra.mrb[76].mxu0 %v30302_v58 }
0x1231   :  { %39287 = vmatpush3.msra.mxu0 %v30313_v5  ;;  %39288 = vmatprep.mubr.msk.f32.mxu0 %vm41964_vm2, %v46164_v38 }
0x1232   :  { %39291 = vmatprep.subr.mxu0 %v46164_v38 }
0x1233   :  { %v27084_v55 = vpop.f32.mrb[68].mxu0 }
0x1234   :  { %v39055_v30 = vpop.f32.mrb[69].mxu0  ;;  %39259 = vmatmul.mubr.f32.vlgmr.msra.gmra.mrb[56].mxu1 %v45323_v27 }
0x1235   :  { %39262 = vmatpush3.msra.mxu1 %v45302_v7  ;;  %39263 = vmatprep.mubr.msk.f32.mxu1 %vm41964_vm2, %v46164_v38 }
0x1236   :  { %39296 = vmatprep.subr.mxu1 %v46164_v38 }
0x1238   :  { %39289 = vmatmul.mubr.f32.vlgmr.msra.gmra.mrb[76].mxu0 %v45335_v29 }
0x1239   :  { %39292 = vmatpush3.msra.mxu0 %v45304_v40  ;;  %39293 = vmatprep.mubr.msk.f32.mxu0 %vm41964_vm2, %v46164_v38 }
0x123a   :  { %39326 = vmatprep.subr.mxu0 %v46164_v38 }
0x123c   :  { %39264 = vmatmul.mubr.f32.vlgmr.msra.gmra.mrb[56].mxu1 %v45323_v27 }
0x123d   :  { %39298 = vmatprep.mubr.msk.f32.mxu1 %vm41964_vm2, %v46164_v38 }
0x1240   :  { %39294 = vmatmul.mubr.f32.vlgmr.msra.gmra.mrb[76].mxu0 %v45335_v29  ;;  %26153 = vadd.xlane.f32.xlu0 %v26152_v36  ;;  %v31212_v29 = vsub.f32 %v31210_v48, %v31211_v47 }
0x1241   :  { %39327 = vmatpush3.msra.mxu0 %v45392_v46  ;;  %39328 = vmatprep.mubr.msk.f32.mxu0 %vm41964_vm2, %v46164_v38 }
0x1242   :  { %39331 = vmatprep.subr.mxu0 %v46164_v38  ;;  %v31213_v37 = vand.u32 4294901760, %v31212_v29 }
0x1256   :  { %18776 = vrot.lane.b32.xlu0 %v44234_v10, %s41970_s30 }
0x125a   :  { %33375 = vrot.lane.b32.xlu0 %v27084_v55, %s41959_s9 }
0x125b   :  { %v27533_v52 = vpop.f32.mrb[50].mxu1  ;;  %v26142_v22 = vpop.xlane.xlu1 %26141 }
0x125c   :  { %v39085_v39 = vpop.f32.mrb[51].mxu1  ;;  %41843 = vrcp.f32 %v26142_v22 }
0x125e   :  { %33379 = vrot.lane.b32.xlu0 %v27533_v52, %s41962_s22 }
0x125f   :  { %v26061_v43 = vpop.xlane.xlu1 %26060 }
0x1260   :  { %v26077_v61 = vsub.f32 %v45027_v33, %v26061_v43 }
0x1262   :  { %v26108_v50 = vmul.f32 1.442695, %v26077_v61 }
0x1263   :  { %v26145_v53 = vpop.xlane.xlu1 %26144 }
0x1264   :  { %41845 = vpow2.f32 %v26108_v50 }
0x1265   :  { %41847 = vrcp.f32 %v26145_v53 }
0x1266   :  { %v41844_v42 = vpop.eup %41843 }
0x1267   :  { %v26179_v13 = vmul.f32 %v41844_v42, %v45227_v45  ;;  %v18765_v0 = vpop.permute.xlu1 %18764 }
0x1268   :  { %v30684_v54 = vand.u32 4294901760, %v18765_v0 }
0x1269   :  { %v30681_v20 = vsel %vm1412_vm3, %v26179_v13, 0 }
0x126a   :  { %v30761_v57 = vsub.f32 %v18765_v0, %v30684_v54  ;;  %39297 = vmatpush3.msra.mxu1 %v30684_v54  ;;  %v45408_v6 = vand.u32 4294901760, %v30681_v20 }
0x126b   :  { %39301 = vmatprep.subr.mxu1 %v46164_v38 }
0x126c   :  { %v30762_v23 = vand.u32 4294901760, %v30761_v57  ;;  %v30750_v33 = vsub.f32 %v30681_v20, %v45408_v6 }
0x126e   :  { %v45412_v7 = vpop.eup %41845  ;;  %v30751_v40 = vand.u32 4294901760, %v30750_v33  ;;  %v30763_v8 = vsub.f32 %v30761_v57, %v30762_v23 }
0x126f   :  { %v41848_v4 = vpop.eup %41847  ;;  %v26155_v45 = vsel %vm1412_vm3, %v45412_v7, 0.0 }
0x1270   :  { %v26181_v21 = vmul.f32 %v41848_v4, %v45236_v32  ;;  %26156 = vadd.xlane.f32.xlu1 %v26155_v45  ;;  %v27982_v9 = vpop.f32.mrb[70].mxu0  ;;  %v30752_v26 = vsub.f32 %v30750_v33, %v30751_v40  ;;  %v30764_v15 = vand.u32 4294901760, %v30763_v8 }
0x1271   :  { %v39115_v27 = vpop.f32.mrb[71].mxu0 }
0x1272   :  { %v30753_v14 = vand.u32 4294901760, %v30752_v26  ;;  %v31130_v63 = vsel %vm1412_vm3, %v26181_v21, 0 }
0x1273   :  { %v45419_v35 = vand.u32 4294901760, %v31130_v63 }
0x1274   :  { %39299 = vmatmul.mubr.f32.vlgmr.msra.gmra.mrb[58].mxu1 %v30753_v14 }
0x1275   :  { %39302 = vmatpush3.msra.mxu1 %v30764_v15  ;;  %39303 = vmatprep.mubr.msk.f32.mxu1 %vm41964_vm2, %v46164_v38  ;;  %v31199_v2 = vsub.f32 %v31130_v63, %v45419_v35 }
0x1276   :  { %39306 = vmatprep.subr.mxu1 %v46164_v38 }
0x1277   :  { %v31200_v32 = vand.u32 4294901760, %v31199_v2 }
0x1279   :  { %v31201_v5 = vsub.f32 %v31199_v2, %v31200_v32 }
0x127b   :  { %v31202_v49 = vand.u32 4294901760, %v31201_v5 }
0x127c   :  { %39304 = vmatmul.mubr.f32.vlgmr.msra.gmra.mrb[58].mxu1 %v45408_v6 }
0x127d   :  { %39307 = vmatpush3.msra.mxu1 %v30761_v57  ;;  %39329 = vmatmul.mubr.f32.vlgmr.msra.gmra.mrb[78].mxu0 %v31202_v49 }
0x127e   :  { %39332 = vmatpush3.msra.mxu0 %v31213_v37  ;;  %39308 = vmatprep.mubr.msk.f32.mxu1 %vm41964_vm2, %v46164_v38 }
0x127f   :  { %39311 = vmatprep.subr.mxu1 %v46164_v38  ;;  %39333 = vmatprep.mubr.msk.f32.mxu0 %vm41964_vm2, %v46164_v38 }
0x1280   :  { %39336 = vmatprep.subr.mxu0 %v46164_v38 }
0x1281   :  { %18779 = vrot.lane.b32.xlu1 %v44234_v10, %s41971_s4 }
0x1284   :  { %39309 = vmatmul.mubr.f32.vlgmr.msra.gmra.mrb[58].mxu1 %v30750_v33 }
0x1285   :  { %39312 = vmatpush3.msra.mxu1 %v30684_v54  ;;  %39334 = vmatmul.mubr.f32.vlgmr.msra.gmra.mrb[78].mxu0 %v45419_v35 }
0x1286   :  { %39337 = vmatpush3.msra.mxu0 %v31210_v48  ;;  %33383 = vrot.lane.b32.xlu1 %v27982_v9, %s41972_s5 }
0x1287   :  { %39313 = vmatprep.mubr.msk.f32.mxu1 %vm41964_vm2, %v46164_v38  ;;  %39316 = vmatprep.subr.mxu1 %v46164_v38 }
0x1288   :  { %39338 = vmatprep.mubr.msk.f32.mxu0 %vm41964_vm2, %v46164_v38  ;;  %39341 = vmatprep.subr.mxu0 %v46164_v38 }
0x128c   :  { %39314 = vmatmul.mubr.f32.vlgmr.msra.gmra.mrb[58].mxu1 %v30751_v40 }
0x128d   :  { %39317 = vmatpush3.msra.mxu1 %v30762_v23  ;;  %39339 = vmatmul.mubr.f32.vlgmr.msra.gmra.mrb[78].mxu0 %v31199_v2 }
0x128e   :  { %39342 = vmatpush3.msra.mxu0 %v45392_v46  ;;  %39318 = vmatprep.mubr.msk.f32.mxu1 %vm41964_vm2, %v46164_v38 }
0x128f   :  { %39321 = vmatprep.subr.mxu1 %v46164_v38  ;;  %39343 = vmatprep.mubr.msk.f32.mxu0 %vm41964_vm2, %v46164_v38 }
0x1290   :  { %39346 = vmatprep.subr.mxu0 %v46164_v38 }
0x1294   :  { %39319 = vmatmul.mubr.f32.vlgmr.msra.gmra.mrb[58].mxu1 %v45408_v6 }
0x1295   :  { %39322 = vmatpush3.msra.mxu1 %v30684_v54  ;;  %39344 = vmatmul.mubr.f32.vlgmr.msra.gmra.mrb[78].mxu0 %v31200_v32 }
0x1296   :  { %39347 = vmatpush3.msra.mxu0 %v31211_v47  ;;  %39323 = vmatprep.mubr.msk.f32.mxu1 %vm41964_vm2, %v46164_v38 }
0x1297   :  { %39348 = vmatprep.mubr.msk.f32.mxu0 %vm41964_vm2, %v46164_v38  ;;  %39351 = vmatprep.subr.mxu0 %v46164_v38 }
0x1298   :  { %v26148_v10 = vpop.xlane.xlu0 %26147  ;;  %39356 = vmatprep.subr.mxu1 %v46164_v38 }
0x1299   :  { %41849 = vrcp.f32 %v26148_v10 }
0x129c   :  { %v18771_v51 = vpop.permute.xlu0 %18770  ;;  %v28880_v19 = vpop.f32.mrb[72].mxu0  ;;  %39324 = vmatmul.mubr.f32.vlgmr.msra.gmra.mrb[58].mxu1 %v45408_v6 }
0x129d   :  { %v45457_v56 = vand.u32 4294901760, %v18771_v51  ;;  %39349 = vmatmul.mubr.f32.vlgmr.msra.gmra.mrb[78].mxu0 %v45419_v35  ;;  %v26151_v58 = vpop.xlane.xlu1 %26150  ;;  %v39175_v11 = vpop.f32.mrb[73].mxu0  ;;  %39358 = vmatprep.mubr.msk.f32.mxu1 %vm41964_vm2, %v46164_v38 }
0x129e   :  { %39352 = vmatpush3.msra.mxu0 %v45392_v46  ;;  %41851 = vrcp.f32 %v26151_v58  ;;  %39353 = vmatprep.mubr.msk.f32.mxu0 %vm41964_vm2, %v46164_v38 }
0x129f   :  { %39357 = vmatpush3.msra.mxu1 %v45457_v56  ;;  %39386 = vmatprep.subr.mxu0 %v46164_v38  ;;  %v31659_v44 = vsub.f32 %v18771_v51, %v45457_v56 }
0x12a0   :  { %39361 = vmatprep.subr.mxu1 %v46164_v38 }
0x12a1   :  { %v18774_v16 = vpop.permute.xlu1 %18773  ;;  %v31660_v30 = vand.u32 4294901760, %v31659_v44 }
0x12a2   :  { %v45468_v18 = vand.u32 4294901760, %v18774_v16 }
0x12a3   :  { %v41850_v25 = vpop.eup %41849  ;;  %v31661_v39 = vsub.f32 %v31659_v44, %v31660_v30 }
0x12a4   :  { %v26183_v31 = vmul.f32 %v41850_v25, %v45314_v24  ;;  %v32108_v46 = vsub.f32 %v18774_v16, %v45468_v18 }
0x12a5   :  { %39354 = vmatmul.mubr.f32.vlgmr.msra.gmra.mrb[78].mxu0 %v45419_v35  ;;  %v28431_v60 = vpop.f32.mrb[52].mxu1  ;;  %v31662_v13 = vand.u32 4294901760, %v31661_v39 }
0x12a6   :  { %39387 = vmatpush3.msra.mxu0 %v45468_v18  ;;  %v39145_v28 = vpop.f32.mrb[53].mxu1  ;;  %33387 = vrot.lane.b32.xlu1 %v28431_v60, %s41973_s6  ;;  %v31579_v17 = vsel %vm1412_vm3, %v26183_v31, 0  ;;  %v32109_v61 = vand.u32 4294901760, %v32108_v46 }
0x12a7   :  { %v45476_v55 = vand.u32 4294901760, %v31579_v17  ;;  %39388 = vmatprep.mubr.msk.f32.mxu0 %vm41964_vm2, %v46164_v38  ;;  %39391 = vmatprep.subr.mxu0 %v46164_v38 }
0x12a8   :  { %v41852_v24 = vpop.eup %41851 }
0x12a9   :  { %v26185_v62 = vmul.f32 %v41852_v24, %v45333_v1  ;;  %v31648_v36 = vsub.f32 %v31579_v17, %v45476_v55  ;;  %v32110_v1 = vsub.f32 %v32108_v46, %v32109_v61 }
0x12aa   :  { %33391 = vrot.lane.b32.xlu1 %v28880_v19, %s41974_s7 }
0x12ab   :  { %v31649_v52 = vand.u32 4294901760, %v31648_v36  ;;  %v32028_v22 = vsel %vm1412_vm3, %v26185_v62, 0  ;;  %v32111_v57 = vand.u32 4294901760, %v32110_v1 }
0x12ac   :  { %v45486_v43 = vand.u32 4294901760, %v32028_v22 }
0x12ad   :  { %v31650_v50 = vsub.f32 %v31648_v36, %v31649_v52 }
0x12ae   :  { %v32097_v53 = vsub.f32 %v32028_v22, %v45486_v43 }
0x12af   :  { %v31651_v42 = vand.u32 4294901760, %v31650_v50 }
0x12b0   :  { %v32098_v0 = vand.u32 4294901760, %v32097_v53 }
0x12b1   :  { %39359 = vmatmul.mubr.f32.vlgmr.msra.gmra.mrb[60].mxu1 %v31651_v42 }
0x12b2   :  { %39362 = vmatpush3.msra.mxu1 %v31662_v13  ;;  %v32099_v54 = vsub.f32 %v32097_v53, %v32098_v0  ;;  %39363 = vmatprep.mubr.msk.f32.mxu1 %vm41964_vm2, %v46164_v38 }
0x12b3   :  { %39366 = vmatprep.subr.mxu1 %v46164_v38 }
0x12b4   :  { %v32100_v20 = vand.u32 4294901760, %v32099_v54 }
0x12b6   :  { %39389 = vmatmul.mubr.f32.vlgmr.msra.gmra.mrb[80].mxu0 %v32100_v20 }
0x12b7   :  { %39392 = vmatpush3.msra.mxu0 %v32111_v57  ;;  %39393 = vmatprep.mubr.msk.f32.mxu0 %vm41964_vm2, %v46164_v38 }
0x12b8   :  { %39396 = vmatprep.subr.mxu0 %v46164_v38 }
0x12b9   :  { %39364 = vmatmul.mubr.f32.vlgmr.msra.gmra.mrb[60].mxu1 %v45476_v55 }
0x12ba   :  { %39367 = vmatpush3.msra.mxu1 %v31659_v44  ;;  %39368 = vmatprep.mubr.msk.f32.mxu1 %vm41964_vm2, %v46164_v38 }
0x12bb   :  { %39371 = vmatprep.subr.mxu1 %v46164_v38 }
0x12be   :  { %39394 = vmatmul.mubr.f32.vlgmr.msra.gmra.mrb[80].mxu0 %v45486_v43 }
0x12bf   :  { %39397 = vmatpush3.msra.mxu0 %v32108_v46  ;;  %39398 = vmatprep.mubr.msk.f32.mxu0 %vm41964_vm2, %v46164_v38 }
0x12c0   :  { %39401 = vmatprep.subr.mxu0 %v46164_v38 }
0x12c1   :  { %39369 = vmatmul.mubr.f32.vlgmr.msra.gmra.mrb[60].mxu1 %v31648_v36 }
0x12c2   :  { %39372 = vmatpush3.msra.mxu1 %v45457_v56  ;;  %39373 = vmatprep.mubr.msk.f32.mxu1 %vm41964_vm2, %v46164_v38 }
0x12c3   :  { %39376 = vmatprep.subr.mxu1 %v46164_v38 }
0x12c6   :  { %39399 = vmatmul.mubr.f32.vlgmr.msra.gmra.mrb[80].mxu0 %v32097_v53 }
0x12c7   :  { %39402 = vmatpush3.msra.mxu0 %v45468_v18  ;;  %39403 = vmatprep.mubr.msk.f32.mxu0 %vm41964_vm2, %v46164_v38 }
0x12c8   :  { %39406 = vmatprep.subr.mxu0 %v46164_v38 }
0x12c9   :  { %39374 = vmatmul.mubr.f32.vlgmr.msra.gmra.mrb[60].mxu1 %v31649_v52 }
0x12ca   :  { %39377 = vmatpush3.msra.mxu1 %v31660_v30  ;;  %39378 = vmatprep.mubr.msk.f32.mxu1 %vm41964_vm2, %v46164_v38 }
0x12cb   :  { %39381 = vmatprep.subr.mxu1 %v46164_v38 }
0x12cd   :  { %v26154_v6 = vpop.xlane.xlu0 %26153 }
0x12ce   :  { %41853 = vrcp.f32 %v26154_v6  ;;  %39404 = vmatmul.mubr.f32.vlgmr.msra.gmra.mrb[80].mxu0 %v32098_v0 }
0x12cf   :  { %39407 = vmatpush3.msra.mxu0 %v32109_v61  ;;  %39408 = vmatprep.mubr.msk.f32.mxu0 %vm41964_vm2, %v46164_v38 }
0x12d0   :  { %39411 = vmatprep.subr.mxu0 %v46164_v38 }
0x12d1   :  { %39379 = vmatmul.mubr.f32.vlgmr.msra.gmra.mrb[60].mxu1 %v45476_v55  ;;  %v18777_v23 = vpop.permute.xlu0 %18776 }
0x12d2   :  { %39382 = vmatpush3.msra.mxu1 %v45457_v56  ;;  %39383 = vmatprep.mubr.msk.f32.mxu1 %vm41964_vm2, %v46164_v38  ;;  %v32480_v33 = vand.u32 4294901760, %v18777_v23 }
0x12d3   :  { %39416 = vmatprep.subr.mxu1 %v46164_v38 }
0x12d4   :  { %v32557_v8 = vsub.f32 %v18777_v23, %v32480_v33 }
0x12d5   :  { %v33376_v24 = vpop.permute.xlu0 %33375 }
0x12d6   :  { %39409 = vmatmul.mubr.f32.vlgmr.msra.gmra.mrb[80].mxu0 %v45486_v43  ;;  %v32558_v14 = vand.u32 4294901760, %v32557_v8  ;;  %v33402_v46 = vsel %vm1412_vm3, %v45372_v3, %v33376_v24 }
0x12d7   :  { %39412 = vmatpush3.msra.mxu0 %v45468_v18  ;;  %39413 = vmatprep.mubr.msk.f32.mxu0 %vm41964_vm2, %v46164_v38 }
0x12d8   :  { %v41854_v40 = vpop.eup %41853  ;;  %39446 = vmatprep.subr.mxu0 %v46164_v38  ;;  %v32559_v15 = vsub.f32 %v32557_v8, %v32558_v14 }
0x12d9   :  { %v26187_v4 = vmul.f32 %v41854_v40, %v45387_v41  ;;  %39384 = vmatmul.mubr.f32.vlgmr.msra.gmra.mrb[60].mxu1 %v45476_v55  ;;  %v33380_v62 = vpop.permute.xlu0 %33379 }
0x12da   :  { %39417 = vmatpush3.msra.mxu1 %v32480_v33  ;;  %v29778_v45 = vpop.f32.mrb[74].mxu0  ;;  %39418 = vmatprep.mubr.msk.f32.mxu1 %vm41964_vm2, %v46164_v38  ;;  %v32560_v2 = vand.u32 4294901760, %v32559_v15  ;;  %v33403_v36 = vsel %vm68_vm0, %v33402_v46, %v33380_v62 }
0x12db   :  { %v29329_v48 = vpop.f32.mrb[54].mxu1  ;;  %v39235_v21 = vpop.f32.mrb[75].mxu0  ;;  %39421 = vmatprep.subr.mxu1 %v46164_v38  ;;  %v32477_v9 = vsel %vm1412_vm3, %v26187_v4, 0 }
0x12dc   :  { %v39205_v26 = vpop.f32.mrb[55].mxu1  ;;  %33395 = vrot.lane.b32.xlu1 %v29329_v48, %s41975_s8  ;;  %v32545_v27 = vand.u32 4294901760, %v32477_v9  ;;  %v17967_v48 = vld [vmem:[#allocation5 + $0x98] sm:$0xff]  ;;  %v17968_v21 = vld [vmem:[#allocation5 + $0xf0] sm:$0xff] }
0x12dd   :  { %v33454_v26 = vand.u32 4294901760, %v17967_v48 }
0x12de   :  { %39414 = vmatmul.mubr.f32.vlgmr.msra.gmra.mrb[80].mxu0 %v45486_v43  ;;  %v32546_v41 = vsub.f32 %v32477_v9, %v32545_v27 }
0x12df   :  { %39448 = vmatprep.mubr.msk.f32.mxu0 %vm41964_vm2, %v46164_v38 }
0x12e0   :  { %33399 = vrot.lane.b32.xlu1 %v29778_v45, %s41976_s1  ;;  %v32547_v63 = vand.u32 4294901760, %v32546_v41  ;;  %v17966_v45 = vld [vmem:[#allocation5 + $0x40] sm:$0xff] }
0x12e1   :  { %v33451_v9 = vand.u32 4294901760, %v17966_v45 }
0x12e2   :  { %v32548_v35 = vsub.f32 %v32546_v41, %v32547_v63 }
0x12e4   :  { %v32549_v47 = vand.u32 4294901760, %v32548_v35 }
0x12e6   :  { %39419 = vmatmul.mubr.f32.vlgmr.msra.gmra.mrb[62].mxu1 %v32549_v47 }
0x12e7   :  { %39422 = vmatpush3.msra.mxu1 %v32560_v2  ;;  %39423 = vmatprep.mubr.msk.f32.mxu1 %vm41964_vm2, %v46164_v38  ;;  %v17970_v2 = vld [vmem:[#allocation5 + $0x1a0] sm:$0xff] }
0x12e8   :  { %39426 = vmatprep.subr.mxu1 %v46164_v38 }
0x12ee   :  { %39424 = vmatmul.mubr.f32.vlgmr.msra.gmra.mrb[62].mxu1 %v32545_v27 }
0x12ef   :  { %39427 = vmatpush3.msra.mxu1 %v32557_v8  ;;  %39428 = vmatprep.mubr.msk.f32.mxu1 %vm41964_vm2, %v46164_v38 }
0x12f0   :  { %39431 = vmatprep.subr.mxu1 %v46164_v38 }
0x12f6   :  { %39429 = vmatmul.mubr.f32.vlgmr.msra.gmra.mrb[62].mxu1 %v32546_v41 }
0x12f7   :  { %39432 = vmatpush3.msra.mxu1 %v32480_v33  ;;  %39433 = vmatprep.mubr.msk.f32.mxu1 %vm41964_vm2, %v46164_v38 }
0x12f8   :  { %39436 = vmatprep.subr.mxu1 %v46164_v38 }
0x12fd   :  { %v26157_v32 = vpop.xlane.xlu1 %26156 }
0x12fe   :  { %41855 = vrcp.f32 %v26157_v32  ;;  %39434 = vmatmul.mubr.f32.vlgmr.msra.gmra.mrb[62].mxu1 %v32547_v63  ;;  %v45594_v63 = vpack.c.bf16 %v33454_v26, %v33451_v9  ;;  %v17971_v32 = vld [vmem:[#allocation5 + $0x1f8] sm:$0xff] }
0x12ff   :  { %39437 = vmatpush3.msra.mxu1 %v32558_v14  ;;  %39438 = vmatprep.mubr.msk.f32.mxu1 %vm41964_vm2, %v46164_v38  ;;  %v33457_v14 = vand.u32 4294901760, %v17968_v21 }
0x1300   :  { %39441 = vmatprep.subr.mxu1 %v46164_v38 }
0x1301   :  { %v18780_v29 = vpop.permute.xlu1 %18779 }
0x1302   :  { %v32929_v5 = vand.u32 4294901760, %v18780_v29 }
0x1304   :  { %39447 = vmatpush3.msra.mxu0 %v32929_v5  ;;  %v33006_v10 = vsub.f32 %v18780_v29, %v32929_v5  ;;  %v33463_v29 = vand.u32 4294901760, %v17970_v2 }
0x1305   :  { %39451 = vmatprep.subr.mxu0 %v46164_v38 }
0x1306   :  { %39439 = vmatmul.mubr.f32.vlgmr.msra.gmra.mrb[62].mxu1 %v32545_v27  ;;  %v33007_v56 = vand.u32 4294901760, %v33006_v10  ;;  %v33573_v46 = vsub.f32 %v17970_v2, %v33463_v29 }
0x1307   :  { %39442 = vmatpush3.msra.mxu1 %v32480_v33  ;;  %39443 = vmatprep.mubr.msk.f32.mxu1 %vm41964_vm2, %v46164_v38 }
0x1308   :  { %v41856_v49 = vpop.eup %41855  ;;  %v33008_v25 = vsub.f32 %v33006_v10, %v33007_v56  ;;  %40545 = vmatprep.subr.bf16.mxu1 %v45594_v63 }
0x1309   :  { %v26189_v37 = vmul.f32 %v41856_v49, %v45412_v7  ;;  %v33384_v7 = vpop.permute.xlu1 %33383 }
0x130a   :  { %v33009_v17 = vand.u32 4294901760, %v33008_v25  ;;  %v33404_v22 = vsel %vm16033_vm4, %v33403_v36, %v33384_v7 }
0x130b   :  { %v32926_v51 = vsel %vm1412_vm3, %v26189_v37, 0  ;;  %v33545_v37 = vsub.f32 %v17966_v45, %v33451_v9 }
0x130c   :  { %v32994_v19 = vand.u32 4294901760, %v32926_v51 }
0x130e   :  { %39444 = vmatmul.mubr.f32.vlgmr.msra.gmra.mrb[62].mxu1 %v32545_v27  ;;  %v32995_v58 = vsub.f32 %v32926_v51, %v32994_v19  ;;  %v17969_v27 = vld [vmem:[#allocation5 + $0x148] sm:$0xff]  ;;  %v17972_v51 = vld [vmem:[#allocation5 + $0x250] sm:$0xff] }
0x130f   :  { %v45555_v11 = vpop.f32.mrb[56].mxu1  ;;  %v33460_v41 = vand.u32 4294901760, %v17969_v27  ;;  %40547 = vmatpush3.bf16.msra.mxu1 %v45594_v63 }
0x1310   :  { %v39265_v16 = vpop.f32.mrb[57].mxu1  ;;  %v32996_v18 = vand.u32 4294901760, %v32995_v58 }
0x1311   :  { %v45596_v15 = vpack.c.bf16 %v33460_v41, %v33457_v14  ;;  %v33546_v16 = vand.u32 4294901760, %v33545_v37 }
0x1312   :  { %v32997_v31 = vsub.f32 %v32995_v58, %v32996_v18 }
0x1313   :  { %v30676_v44 = vpop.f32.mrb[76].mxu0  ;;  %40549 = vmatprep.subr.bf16.mxu1 %v45596_v15 }
0x1314   :  { %33410 = vrot.lane.b32.xlu0 %v30676_v44, %s41959_s9  ;;  %v39295_v60 = vpop.f32.mrb[77].mxu0  ;;  %v32998_v28 = vand.u32 4294901760, %v32997_v31  ;;  %40551 = vmatpush3.bf16.msra.mxu1 %v45596_v15  ;;  %v33547_v31 = vsub.f32 %v33545_v37, %v33546_v16  ;;  %s35806_s9 = sshll.u32 %s41978_s23, 4  ;;  %s35807_s9 = int_to_ptr.vmem [resolvable:$true] %s35806_s9 }
0x1315   :  { %v33559_v60 = vsub.f32 %v17968_v21, %v33457_v14  ;;  %s41926_s10 = scalar_lea.vmem %s35807_s9, 16  ;;  %s41930_s11 = scalar_lea.vmem %s35807_s9, 32 }
0x1316   :  { %39449 = vmatmul.mubr.f32.vlgmr.msra.gmra.mrb[82].mxu0 %v32998_v28  ;;  %v33566_v28 = vsub.f32 %v17969_v27, %v33460_v41  ;;  %p41927_p10 = scmp.ne.s32.totalorder %s35807_s9, %s41926_s10  ;;  %p41931_p11 = scmp.lt.s32.totalorder %s35807_s9, %s35807_s9 }
0x1317   :  { %39452 = vmatpush3.msra.mxu0 %v33009_v17  ;;  %39453 = vmatprep.mubr.msk.f32.mxu0 %vm41964_vm2, %v46164_v38  ;;  %v33548_v17 = vand.u32 4294901760, %v33547_v31  ;;  %p41932_p12 = scmp.lt.s32.totalorder %s41930_s11, %s41926_s10 }
0x1318   :  { %39456 = vmatprep.subr.mxu0 %v46164_v38  ;;  %v33388_v55 = vpop.permute.xlu1 %33387  ;;  %v33567_v24 = vand.u32 4294901760, %v33566_v28  ;;  %v40580_v27 = vpack.c.bf16 %v33566_v28, %v33559_v60 }
0x1319   :  { %v33405_v39 = vsel %vm16035_vm5, %v33404_v22, %v33388_v55  ;;  %v33560_v55 = vand.u32 4294901760, %v33559_v60  ;;  %p41933_p13 = por %p41932_p12, %p41931_p11 }
0x131a   :  { %v33568_v22 = vsub.f32 %v33566_v28, %v33567_v24 }
0x131b   :  { %v33561_v62 = vsub.f32 %v33559_v60, %v33560_v55  ;;  %p41934_p0 = pnand %p41933_p13, %p41927_p10 }
0x131c   :  { %v33392_v30 = vpop.permute.xlu1 %33391 }
0x131d   :  { %v33406_v43 = vsel %vm16037_vm6, %v33405_v39, %v33392_v30 }
0x131e   :  { %39454 = vmatmul.mubr.f32.vlgmr.msra.gmra.mrb[82].mxu0 %v32994_v19 }
0x131f   :  { %39457 = vmatpush3.msra.mxu0 %v33006_v10  ;;  %39458 = vmatprep.mubr.msk.f32.mxu0 %vm41964_vm2, %v46164_v38  ;;  %v33552_v10 = vsub.f32 %v17967_v48, %v33454_v26 }
0x1320   :  { %39461 = vmatprep.subr.mxu0 %v46164_v38 }
0x1321   :  { %v40576_v26 = vpack.c.bf16 %v33552_v10, %v33545_v37 }
0x1326   :  { %39459 = vmatmul.mubr.f32.vlgmr.msra.gmra.mrb[82].mxu0 %v32995_v58 }
0x1327   :  { %39462 = vmatpush3.msra.mxu0 %v32929_v5  ;;  %39463 = vmatprep.mubr.msk.f32.mxu0 %vm41964_vm2, %v46164_v38 }
0x1328   :  { %39466 = vmatprep.subr.mxu0 %v46164_v38 }
0x132e   :  { %39464 = vmatmul.mubr.f32.vlgmr.msra.gmra.mrb[82].mxu0 %v32996_v18  ;;  %v33553_v18 = vand.u32 4294901760, %v33552_v10 }
0x132f   :  { %39467 = vmatpush3.msra.mxu0 %v33007_v56  ;;  %39468 = vmatprep.mubr.msk.f32.mxu0 %vm41964_vm2, %v46164_v38  ;;  %v33469_v56 = vand.u32 4294901760, %v17972_v51 }
0x1330   :  { %39471 = vmatprep.subr.mxu0 %v46164_v38  ;;  %v33554_v44 = vsub.f32 %v33552_v10, %v33553_v18 }
0x1332   :  { %v33555_v7 = vand.u32 4294901760, %v33554_v44 }
0x1334   :  { %v45611_v30 = vpack.c.bf16 %v33555_v7, %v33548_v17 }
0x1336   :  { %39469 = vmatmul.mubr.f32.vlgmr.msra.gmra.mrb[82].mxu0 %v32994_v19 }
0x1337   :  { %39472 = vmatpush3.msra.mxu0 %v32929_v5  ;;  %39473 = vmatprep.mubr.msk.f32.mxu0 %vm41964_vm2, %v46164_v38  ;;  %v33466_v5 = vand.u32 4294901760, %v17971_v32 }
0x1339   :  { %v45603_v49 = vpack.c.bf16 %v33466_v5, %v33463_v29  ;;  %v33580_v36 = vsub.f32 %v17971_v32, %v33466_v5  ;;  %v45621_v29 = vld [vmem:[#allocation5 + $0x48] sm:$0xff]  ;;  %v45623_v5 = vld [vmem:[#allocation5 + $0xa0] sm:$0xff] }
0x133b   :  { %40553 = vmatprep.subr.bf16.mxu1 %v45603_v49  ;;  %v40584_v14 = vpack.c.bf16 %v33580_v36, %v33573_v46 }
0x133c   :  { %40555 = vmatpush3.bf16.msra.mxu1 %v45603_v49 }
0x133e   :  { %39474 = vmatmul.mubr.f32.vlgmr.msra.gmra.mrb[82].mxu0 %v32994_v19  ;;  %v17973_v19 = vld [vmem:[#allocation5 + $0x2a8] sm:$0xff] }
0x133f   :  { %v33472_v58 = vand.u32 4294901760, %v17973_v19 }
0x1341   :  { %v45607_v25 = vpack.c.bf16 %v33472_v58, %v33469_v56 }
0x1343   :  { %40557 = vmatprep.subr.bf16.mxu1 %v45607_v25 }
0x1344   :  { %40559 = vmatpush3.bf16.msra.mxu1 %v45607_v25 }
0x1345   :  { %40561 = vmatprep.subr.bf16.mxu1 %v45611_v30 }
0x134e   :  { %v33396_v52 = vpop.permute.xlu1 %33395 }
0x134f   :  { %v33407_v61 = vsel %vm16039_vm7, %v33406_v43, %v33396_v52  ;;  %v33562_v43 = vand.u32 4294901760, %v33561_v62 }
0x1352   :  { %v33400_v50 = vpop.permute.xlu1 %33399 }
0x1353   :  { %v33408_v53 = vsel %vm16041_vm8, %v33407_v61, %v33400_v50  ;;  %v33574_v61 = vand.u32 4294901760, %v33573_v46  ;;  %v33581_v50 = vand.u32 4294901760, %v33580_v36 }
0x1354   :  { %v33445_v42 = vsel %vm633_vm1, %v33408_v53, 0  ;;  %v33569_v53 = vand.u32 4294901760, %v33568_v22 }
0x1355   :  { %v45581_v13 = vand.u32 4294901760, %v33445_v42  ;;  %v45617_v2 = vpack.c.bf16 %v33581_v50, %v33574_v61 }
0x1357   :  { %v45584_v3 = vsub.f32 %v33445_v42, %v45581_v13  ;;  %v33575_v42 = vsub.f32 %v33573_v46, %v33574_v61  ;;  %v17979_v61 = vld [vmem:[#allocation5 + $0x200] sm:$0xff] }
0x1359   :  { %v33525_v0 = vand.u32 4294901760, %v45584_v3 }
0x135b   :  { %v33526_v1 = vsub.f32 %v45584_v3, %v33525_v0 }
0x135d   :  { %v33527_v54 = vand.u32 4294901760, %v33526_v1  ;;  %v33582_v1 = vsub.f32 %v33580_v36, %v33581_v50  ;;  %v34058_v50 = vand.u32 4294901760, %v17979_v61 }
0x135f   :  { %39492 = vmatprep.mubr.f32.mxu1 %v33527_v54  ;;  %v33587_v54 = vsub.f32 %v17972_v51, %v33469_v56  ;;  %v34043_v51 = vand.u32 4294901760, %v45621_v29 }
0x136f   :  { %v31125_v20 = vpop.f32.mrb[58].mxu1 }
0x1370   :  { %v39325_v57 = vpop.f32.mrb[59].mxu1  ;;  %33414 = vrot.lane.b32.xlu0 %v31125_v20, %s41962_s22  ;;  %v33594_v20 = vsub.f32 %v17973_v19, %v33472_v58  ;;  %v34046_v19 = vand.u32 4294901760, %v45623_v5 }
0x1371   :  { %v40564_v57 = vpack.c.bf16 %v33569_v53, %v33562_v43 }
0x1372   :  { %v40588_v41 = vpack.c.bf16 %v33594_v20, %v33587_v54  ;;  %v45631_v37 = vpack.c.bf16 %v34046_v19, %v34043_v51  ;;  %v34144_v53 = vsub.f32 %v45623_v5, %v34046_v19 }
0x1374   :  { %40641 = vmatprep.subr.bf16.mxu0 %v45631_v37 }
0x1375   :  { %40643 = vmatpush3.bf16.msra.mxu0 %v45631_v37 }
0x1378   :  { %v31574_v6 = vpop.f32.mrb[78].mxu0 }
0x1379   :  { %33418 = vrot.lane.b32.xlu0 %v31574_v6, %s41972_s5  ;;  %v39355_v23 = vpop.f32.mrb[79].mxu0  ;;  %v33576_v6 = vand.u32 4294901760, %v33575_v42  ;;  %v17980_v42 = vld [vmem:[#allocation5 + $0x258] sm:$0xff] }
0x137a   :  { %v33583_v23 = vand.u32 4294901760, %v33582_v1  ;;  %v17981_v1 = vld [vmem:[#allocation5 + $0x2b0] sm:$0xff] }
0x1386   :  { %v33411_v10 = vpop.permute.xlu0 %33410 }
0x1387   :  { %v33437_v31 = vsel %vm1412_vm3, %v45555_v11, %v33411_v10 }
0x13ac   :  { %v32023_v33 = vpop.f32.mrb[60].mxu1 }
0x13ad   :  { %v39385_v40 = vpop.f32.mrb[61].mxu1  ;;  %33422 = vrot.lane.b32.xlu0 %v32023_v33, %s41973_s6  ;;  %v33588_v33 = vand.u32 4294901760, %v33587_v54 }
0x13ae   :  { %v33595_v40 = vand.u32 4294901760, %v33594_v20 }
0x13b0   :  { %v33596_v45 = vsub.f32 %v33594_v20, %v33595_v40  ;;  %v45619_v32 = vpack.c.bf16 %v33595_v40, %v33588_v33  ;;  %v34064_v20 = vand.u32 4294901760, %v17981_v1 }
0x13b1   :  { %v32472_v4 = vpop.f32.mrb[80].mxu0 }
0x13b2   :  { %33426 = vrot.lane.b32.xlu0 %v32472_v4, %s41974_s7  ;;  %v39415_v8 = vpop.f32.mrb[81].mxu0  ;;  %v40568_v4 = vpack.c.bf16 %v33583_v23, %v33576_v6  ;;  %v33597_v21 = vand.u32 4294901760, %v33596_v45  ;;  %v34145_v6 = vand.u32 4294901760, %v34144_v53  ;;  %v34186_v10 = vsub.f32 %v17981_v1, %v34064_v20 }
0x13b3   :  { %v33589_v8 = vsub.f32 %v33587_v54, %v33588_v33  ;;  %v34061_v54 = vand.u32 4294901760, %v17980_v42 }
0x13b4   :  { %v34146_v40 = vsub.f32 %v34144_v53, %v34145_v6 }
0x13b5   :  { %v33590_v48 = vand.u32 4294901760, %v33589_v8  ;;  %v45687_v23 = vpack.c.bf16 %v34064_v20, %v34061_v54  ;;  %v34179_v19 = vsub.f32 %v17980_v42, %v34061_v54 }
0x13b7   :  { %v40572_v9 = vpack.c.bf16 %v33597_v21, %v33590_v48  ;;  %v34147_v48 = vand.u32 4294901760, %v34146_v40 }
0x13e1   :  { %v32921_v35 = vpop.f32.mrb[62].mxu1 }
0x13e2   :  { %v39445_v47 = vpop.f32.mrb[63].mxu1  ;;  %33430 = vrot.lane.b32.xlu0 %v32921_v35, %s41975_s8  ;;  %v40608_v35 = vpack.c.bf16 %v33553_v18, %v33546_v16  ;;  %v33415_v56 = vpop.permute.xlu0 %33414 }
0x13e3   :  { %v45615_v47 = vpack.c.bf16 %v33567_v24, %v33560_v55  ;;  %v33438_v44 = vsel %vm68_vm0, %v33437_v31, %v33415_v56  ;;  %v34187_v31 = vand.u32 4294901760, %v34186_v10 }
0x13eb   :  { %v33419_v58 = vpop.permute.xlu0 %33418 }
0x13ec   :  { %v33439_v60 = vsel %vm16033_vm4, %v33438_v44, %v33419_v58 }
0x1411   :  { %v33370_v52 = vpop.f32.mrb[82].mxu0 }
0x1412   :  { %33434 = vrot.lane.b32.xlu1 %v33370_v52, %s41976_s1  ;;  %v39475_v39 = vpop.f32.mrb[83].mxu0 }
0x141f   :  { %v33423_v16 = vpop.permute.xlu0 %33422 }
0x1420   :  { %v33440_v17 = vsel %vm16035_vm5, %v33439_v60, %v33423_v16 }
0x1424   :  { %v33427_v18 = vpop.permute.xlu0 %33426 }
0x1425   :  { %v33441_v7 = vsel %vm16037_vm6, %v33440_v17, %v33427_v18  ;;  %v34180_v18 = vand.u32 4294901760, %v34179_v19 }
0x1427   :  { %v34181_v60 = vsub.f32 %v34179_v19, %v34180_v18 }
0x1429   :  { %v34182_v17 = vand.u32 4294901760, %v34181_v60 }
0x1454   :  { %v33431_v28 = vpop.permute.xlu0 %33430 }
0x1455   :  { %v33442_v55 = vsel %vm16039_vm7, %v33441_v7, %v33431_v28  ;;  %v34188_v28 = vsub.f32 %v34186_v10, %v34187_v31 }
0x1457   :  { %v34189_v7 = vand.u32 4294901760, %v34188_v28 }
0x1484   :  { %v33435_v24 = vpop.permute.xlu1 %33434 }
0x1485   :  { %v33443_v62 = vsel %vm16041_vm8, %v33442_v55, %v33435_v24  ;;  %v40668_v55 = vpack.c.bf16 %v34189_v7, %v34182_v17 }
0x1486   :  { %v33448_v46 = vsel %vm633_vm1, %v33443_v62, 0 }
0x1487   :  { %v33533_v36 = vand.u32 4294901760, %v33448_v46 }
0x1489   :  { %v33534_v52 = vsub.f32 %v33448_v46, %v33533_v36 }
0x148b   :  { %v33535_v22 = vand.u32 4294901760, %v33534_v52 }
0x148d   :  { %v33536_v11 = vsub.f32 %v33534_v52, %v33535_v22 }
0x148f   :  { %v33537_v39 = vand.u32 4294901760, %v33536_v11 }
0x1491   :  { %39493 = vmatmul.mubr.f32.vlgmr.msra.gmra.mrb[64].mxu1 %v33537_v39  ;;  %v45712_v39 = vpack.c.bf16 %v34187_v31, %v34180_v18  ;;  %v17994_v18 = vld [vmem:[#allocation5 + $0x470] sm:$0xff]  ;;  %v17995_v31 = vld [vmem:[#allocation5 + $0x4c8] sm:$0xff] }
0x1492   :  { %40563 = vmatpush3.bf16.msra.mxu1 %v45611_v30  ;;  %39511 = vmatprep.mubr.f32.mxu1 %v45581_v13  ;;  %v34664_v60 = vand.u32 4294901760, %v17995_v31 }
0x1493   :  { %40565 = vmatprep.subr.bf16.mxu1 %v40564_v57 }
0x1496   :  { %40567 = vmatpush3.bf16.msra.mxu1 %v40564_v57 }
0x1497   :  { %40569 = vmatprep.subr.bf16.mxu1 %v40568_v4 }
0x149a   :  { %40571 = vmatpush3.bf16.msra.mxu1 %v40568_v4 }
0x149b   :  { %40573 = vmatprep.subr.bf16.mxu1 %v40572_v9 }
0x149e   :  { %40575 = vmatpush3.bf16.msra.mxu1 %v40572_v9 }
0x149f   :  { %40577 = vmatprep.subr.bf16.mxu1 %v40576_v26 }
0x14a1   :  { %39512 = vmatmul.mubr.f32.vlgmr.msra.gmra.mrb[64].mxu1 %v33533_v36 }
0x14a2   :  { %40579 = vmatpush3.bf16.msra.mxu1 %v40576_v26  ;;  %39530 = vmatprep.mubr.f32.mxu1 %v45584_v3  ;;  %v17976_v3 = vld [vmem:[#allocation5 + $0xf8] sm:$0xff] }
0x14a3   :  { %40581 = vmatprep.subr.bf16.mxu1 %v40580_v27  ;;  %v34049_v30 = vand.u32 4294901760, %v17976_v3 }
0x14a5   :  { %v34151_v4 = vsub.f32 %v17976_v3, %v34049_v30  ;;  %v45714_v3 = vld [vmem:[#allocation5 + $0x50] sm:$0xff] }
0x14a6   :  { %40583 = vmatpush3.bf16.msra.mxu1 %v40580_v27 }
0x14a7   :  { %40585 = vmatprep.subr.bf16.mxu1 %v40584_v14  ;;  %v34152_v21 = vand.u32 4294901760, %v34151_v4 }
0x14a9   :  { %v34153_v27 = vsub.f32 %v34151_v4, %v34152_v21 }
0x14aa   :  { %40587 = vmatpush3.bf16.msra.mxu1 %v40584_v14 }
0x14ab   :  { %40589 = vmatprep.subr.bf16.mxu1 %v40588_v41 }
0x14ae   :  { %40591 = vmatpush3.bf16.msra.mxu1 %v40588_v41  ;;  %v34172_v41 = vsub.f32 %v17979_v61, %v34058_v50  ;;  %v45722_v61 = vld [vmem:[#allocation5 + $0x158] sm:$0xff] }
0x14af   :  { %40593 = vmatprep.subr.bf16.mxu1 %v45594_v63 }
0x14b1   :  { %39531 = vmatmul.mubr.f32.vlgmr.msra.gmra.mrb[64].mxu1 %v33534_v52 }
0x14b2   :  { %40595 = vmatpush3.bf16.msra.mxu1 %v45594_v63  ;;  %39549 = vmatprep.mubr.f32.mxu1 %v33525_v0  ;;  %v17977_v0 = vld [vmem:[#allocation5 + $0x150] sm:$0xff] }
0x14b3   :  { %40597 = vmatprep.subr.bf16.mxu1 %v45596_v15  ;;  %v34052_v43 = vand.u32 4294901760, %v17977_v0 }
0x14b5   :  { %v34158_v8 = vsub.f32 %v17977_v0, %v34052_v43  ;;  %v45716_v0 = vld [vmem:[#allocation5 + $0xa8] sm:$0xff] }
0x14b6   :  { %40599 = vmatpush3.bf16.msra.mxu1 %v45596_v15 }
0x14b7   :  { %40601 = vmatprep.subr.bf16.mxu1 %v45603_v49  ;;  %v34159_v9 = vand.u32 4294901760, %v34158_v8  ;;  %v45700_v62 = vpack.c.bf16 %v34158_v8, %v34151_v4 }
0x14ba   :  { %40603 = vmatpush3.bf16.msra.mxu1 %v45603_v49 }
0x14bb   :  { %40605 = vmatprep.subr.bf16.mxu1 %v45607_v25 }
0x14be   :  { %40607 = vmatpush3.bf16.msra.mxu1 %v45607_v25 }
0x14bf   :  { %40609 = vmatprep.subr.bf16.mxu1 %v40608_v35 }
0x14c1   :  { %39550 = vmatmul.mubr.f32.vlgmr.msra.gmra.mrb[64].mxu1 %v33535_v22  ;;  %v45708_v22 = vpack.c.bf16 %v34159_v9, %v34152_v21 }
0x14c2   :  { %40611 = vmatpush3.bf16.msra.mxu1 %v40608_v35  ;;  %39568 = vmatprep.mubr.f32.mxu1 %v45581_v13  ;;  %v34160_v35 = vsub.f32 %v34158_v8, %v34159_v9 }
0x14c3   :  { %40613 = vmatprep.subr.bf16.mxu1 %v45615_v47 }
0x14c6   :  { %40615 = vmatpush3.bf16.msra.mxu1 %v45615_v47  ;;  %v34154_v47 = vand.u32 4294901760, %v34153_v27 }
0x14c7   :  { %40617 = vmatprep.subr.bf16.mxu1 %v45617_v2 }
0x14ca   :  { %40619 = vmatpush3.bf16.msra.mxu1 %v45617_v2 }
0x14cb   :  { %40621 = vmatprep.subr.bf16.mxu1 %v45619_v32 }
0x14ce   :  { %40623 = vmatpush3.bf16.msra.mxu1 %v45619_v32  ;;  %v34173_v32 = vand.u32 4294901760, %v34172_v41 }
0x14cf   :  { %40625 = vmatprep.subr.bf16.mxu1 %v45594_v63 }
0x14d1   :  { %39569 = vmatmul.mubr.f32.vlgmr.msra.gmra.mrb[64].mxu1 %v33533_v36 }
0x14d2   :  { %40627 = vmatpush3.bf16.msra.mxu1 %v45594_v63  ;;  %39587 = vmatprep.mubr.f32.mxu1 %v45581_v13  ;;  %v45673_v63 = vpack.c.bf16 %v34052_v43, %v34049_v30  ;;  %v17978_v13 = vld [vmem:[#allocation5 + $0x1a8] sm:$0xff]  ;;  %v45718_v30 = vld [vmem:[#allocation5 + $0x100] sm:$0xff]  ;;  %v34625_v43 = vand.u32 4294901760, %v45714_v3 }
0x14d3   :  { %40629 = vmatprep.subr.bf16.mxu1 %v45596_v15 }
0x14d4   :  { %40645 = vmatprep.subr.bf16.mxu0 %v45673_v63  ;;  %v45833_v17 = vsub.f32 %v45714_v3, %v34625_v43 }
0x14d5   :  { %40647 = vmatpush3.bf16.msra.mxu0 %v45673_v63 }
0x14d6   :  { %40631 = vmatpush3.bf16.msra.mxu1 %v45596_v15  ;;  %v34055_v15 = vand.u32 4294901760, %v17978_v13 }
0x14d7   :  { %40633 = vmatprep.subr.bf16.mxu1 %v45603_v49 }
0x14d8   :  { %v34165_v14 = vsub.f32 %v17978_v13, %v34055_v15  ;;  %v34628_v13 = vand.u32 4294901760, %v45716_v0 }
0x14da   :  { %40635 = vmatpush3.bf16.msra.mxu1 %v45603_v49  ;;  %v45677_v49 = vpack.c.bf16 %v34058_v50, %v34055_v15  ;;  %v34166_v2 = vand.u32 4294901760, %v34165_v14  ;;  %v45702_v46 = vpack.c.bf16 %v34172_v41, %v34165_v14  ;;  %v34631_v15 = vand.u32 4294901760, %v45718_v30  ;;  %v45725_v50 = vld [vmem:[#allocation5 + $0x1b0] sm:$0xff] }
0x14db   :  { %40637 = vmatprep.subr.bf16.mxu1 %v45607_v25  ;;  %v45734_v42 = vpack.c.bf16 %v34628_v13, %v34625_v43  ;;  %v34637_v1 = vand.u32 4294901760, %v45725_v50  ;;  %v45838_v7 = vsub.f32 %v45716_v0, %v34628_v13 }
0x14dc   :  { %40649 = vmatprep.subr.bf16.mxu0 %v45677_v49  ;;  %v34167_v5 = vsub.f32 %v34165_v14, %v34166_v2  ;;  %v45710_v11 = vpack.c.bf16 %v34173_v32, %v34166_v2 }
0x14dd   :  { %40651 = vmatpush3.bf16.msra.mxu0 %v45677_v49 }
0x14de   :  { %40639 = vmatpush3.bf16.msra.mxu1 %v45607_v25  ;;  %v34137_v25 = vsub.f32 %v45621_v29, %v34043_v51  ;;  %40653 = vmatprep.subr.bf16.mxu0 %v45687_v23  ;;  %v34161_v29 = vand.u32 4294901760, %v34160_v35  ;;  %v34174_v51 = vsub.f32 %v34172_v41, %v34173_v32  ;;  %v34168_v58 = vand.u32 4294901760, %v34167_v5 }
0x14df   :  { %40737 = vmatprep.subr.bf16.mxu1 %v45734_v42 }
0x14e0   :  { %v34138_v57 = vand.u32 4294901760, %v34137_v25  ;;  %v45694_v56 = vpack.c.bf16 %v34161_v29, %v34154_v47  ;;  %v34175_v16 = vand.u32 4294901760, %v34174_v51  ;;  %v45698_v24 = vpack.c.bf16 %v34144_v53, %v34137_v25 }
0x14e1   :  { %39588 = vmatmul.mubr.f32.vlgmr.msra.gmra.mrb[64].mxu1 %v33533_v36  ;;  %40655 = vmatpush3.bf16.msra.mxu0 %v45687_v23  ;;  %v45704_v36 = vpack.c.bf16 %v34186_v10, %v34179_v19  ;;  %v34634_v53 = vand.u32 4294901760, %v45722_v61 }
0x14e2   :  { %v34139_v33 = vsub.f32 %v34137_v25, %v34138_v57  ;;  %v45696_v44 = vpack.c.bf16 %v34175_v16, %v34168_v58  ;;  %v45706_v52 = vpack.c.bf16 %v34145_v6, %v34138_v57  ;;  %v45727_v25 = vld [vmem:[#allocation5 + $0x208] sm:$0xff]  ;;  %v45744_v57 = vld [vmem:[#allocation5 + $0x260] sm:$0xff]  ;;  %v45746_v6 = vld [vmem:[#allocation5 + $0x2b8] sm:$0xff]  ;;  %40739 = vmatpush3.bf16.msra.mxu1 %v45734_v42 }
0x14e3   :  { %v34640_v54 = vand.u32 4294901760, %v45727_v25  ;;  %v45742_v20 = vpack.c.bf16 %v34634_v53, %v34631_v15  ;;  %v34643_v40 = vand.u32 4294901760, %v45744_v57  ;;  %v34646_v4 = vand.u32 4294901760, %v45746_v6  ;;  %v17993_v58 = vld [vmem:[#allocation5 + $0x418] sm:$0xff] }
0x14e4   :  { %v34140_v45 = vand.u32 4294901760, %v34139_v33  ;;  %v34658_v16 = vand.u32 4294901760, %v17993_v58 }
0x14e5   :  { %40741 = vmatprep.subr.bf16.mxu1 %v45742_v20  ;;  %v45755_v33 = vpack.c.bf16 %v34640_v54, %v34637_v1  ;;  %v45765_v8 = vpack.c.bf16 %v34646_v4, %v34643_v40 }
0x14e6   :  { %v45691_v26 = vpack.c.bf16 %v34147_v48, %v34140_v45  ;;  %40743 = vmatpush3.bf16.msra.mxu1 %v45742_v20 }
0x14e7   :  { %40745 = vmatprep.subr.bf16.mxu1 %v45755_v33 }
0x14e8   :  { %40657 = vmatprep.subr.bf16.mxu0 %v45691_v26 }
0x14ea   :  { %40747 = vmatpush3.bf16.msra.mxu1 %v45755_v33 }
0x14eb   :  { %40749 = vmatprep.subr.bf16.mxu1 %v45765_v8 }
0x14ee   :  { %40751 = vmatpush3.bf16.msra.mxu1 %v45765_v8 }
0x15b4   :  { %v39589_v45 = vpop.f32.mrb[64].mxu1 }
0x15b5   :  { %v45771_v48 = vadd.f32 %v39589_v45, %v44162_v12  ;;  %v34020_v21 = vpop.f32.mrb[65].mxu1 }
0x15b6   :  { %v45774_v9 = vadd.f32 %v34020_v21, %v44164_v59  ;;  %v17990_v59 = vld [vmem:[#allocation5 + $0x310] sm:$0xff] }
0x15b7   :  { %v34040_v27 = vsel %vm633_vm1, %v45771_v48, 0 }
0x15b8   :  { %v34125_v14 = vand.u32 4294901760, %v34040_v27  ;;  %v34037_v41 = vsel %vm633_vm1, %v45774_v9, 0 }
0x15b9   :  { %v34115_v35 = vand.u32 4294901760, %v34037_v41 }
0x15ba   :  { %v34126_v47 = vsub.f32 %v34040_v27, %v34125_v14 }
0x15bb   :  { %v34116_v2 = vsub.f32 %v34037_v41, %v34115_v35 }
0x15bc   :  { %v34127_v32 = vand.u32 4294901760, %v34126_v47 }
0x15bd   :  { %v34117_v29 = vand.u32 4294901760, %v34116_v2 }
0x15be   :  { %v34128_v5 = vsub.f32 %v34126_v47, %v34127_v32 }
0x15bf   :  { %v34118_v51 = vsub.f32 %v34116_v2, %v34117_v29 }
0x15c0   :  { %v34129_v19 = vand.u32 4294901760, %v34128_v5 }
0x15c1   :  { %v34119_v12 = vand.u32 4294901760, %v34118_v51 }
0x15c3   :  { %39606 = vmatprep.mubr.f32.mxu0 %v34119_v12 }
0x15c4   :  { %39607 = vmatmul.mubr.f32.vlgmr.msra.gmra.mrb[84].mxu0 %v34129_v19 }
0x15c5   :  { %40659 = vmatpush3.bf16.msra.mxu0 %v45691_v26  ;;  %39625 = vmatprep.mubr.f32.mxu0 %v34115_v35  ;;  %v34649_v26 = vand.u32 4294901760, %v17990_v59 }
0x15c6   :  { %40661 = vmatprep.subr.bf16.mxu0 %v45694_v56 }
0x15c7   :  { %v45857_v13 = vsub.f32 %v17990_v59, %v34649_v26 }
0x15c9   :  { %40663 = vmatpush3.bf16.msra.mxu0 %v45694_v56  ;;  %v46160_v21 = vand.u32 4294901760, %v45857_v13 }
0x15ca   :  { %40665 = vmatprep.subr.bf16.mxu0 %v45696_v44 }
0x15cd   :  { %40667 = vmatpush3.bf16.msra.mxu0 %v45696_v44  ;;  %v34661_v44 = vand.u32 4294901760, %v17994_v18 }
0x15ce   :  { %40669 = vmatprep.subr.bf16.mxu0 %v40668_v55 }
0x15cf   :  { %v45828_v28 = vpack.c.bf16 %v34664_v60, %v34661_v44  ;;  %v45883_v59 = vsub.f32 %v17994_v18, %v34661_v44 }
0x15d1   :  { %40671 = vmatpush3.bf16.msra.mxu0 %v40668_v55  ;;  %v17996_v55 = vld [vmem:[#allocation5 + $0x520] sm:$0xff] }
0x15d2   :  { %40673 = vmatprep.subr.bf16.mxu0 %v45698_v24 }
0x15d4   :  { %39626 = vmatmul.mubr.f32.vlgmr.msra.gmra.mrb[84].mxu0 %v34125_v14 }
0x15d5   :  { %40675 = vmatpush3.bf16.msra.mxu0 %v45698_v24  ;;  %39644 = vmatprep.mubr.f32.mxu0 %v34116_v2  ;;  %v17997_v24 = vld [vmem:[#allocation5 + $0x578] sm:$0xff] }
0x15d6   :  { %40677 = vmatprep.subr.bf16.mxu0 %v45700_v62 }
0x15d9   :  { %40679 = vmatpush3.bf16.msra.mxu0 %v45700_v62  ;;  %v34667_v62 = vand.u32 4294901760, %v17996_v55 }
0x15da   :  { %40681 = vmatprep.subr.bf16.mxu0 %v45702_v46 }
0x15dd   :  { %40683 = vmatpush3.bf16.msra.mxu0 %v45702_v46  ;;  %v34670_v46 = vand.u32 4294901760, %v17997_v24 }
0x15de   :  { %40685 = vmatprep.subr.bf16.mxu0 %v45704_v36 }
0x15e1   :  { %40687 = vmatpush3.bf16.msra.mxu0 %v45704_v36  ;;  %v34728_v36 = vand.u32 4294901760, %v45833_v17 }
0x15e2   :  { %40689 = vmatprep.subr.bf16.mxu0 %v45631_v37 }
0x15e4   :  { %39645 = vmatmul.mubr.f32.vlgmr.msra.gmra.mrb[84].mxu0 %v34126_v47  ;;  %v45871_v47 = vsub.f32 %v17993_v58, %v34658_v16 }
0x15e5   :  { %40691 = vmatpush3.bf16.msra.mxu0 %v45631_v37  ;;  %39663 = vmatprep.mubr.f32.mxu0 %v34117_v29 }
0x15e6   :  { %40693 = vmatprep.subr.bf16.mxu0 %v45673_v63  ;;  %v46157_v5 = vand.u32 4294901760, %v45871_v47 }
0x15e8   :  { %v34806_v19 = vsub.f32 %v45871_v47, %v46157_v5 }
0x15e9   :  { %40695 = vmatpush3.bf16.msra.mxu0 %v45673_v63 }
0x15ea   :  { %40697 = vmatprep.subr.bf16.mxu0 %v45677_v49 }
0x15ed   :  { %40699 = vmatpush3.bf16.msra.mxu0 %v45677_v49 }
0x15ee   :  { %40701 = vmatprep.subr.bf16.mxu0 %v45687_v23 }
0x15f1   :  { %40703 = vmatpush3.bf16.msra.mxu0 %v45687_v23 }
0x15f2   :  { %40705 = vmatprep.subr.bf16.mxu0 %v45706_v52 }
0x15f4   :  { %39664 = vmatmul.mubr.f32.vlgmr.msra.gmra.mrb[84].mxu0 %v34127_v32 }
0x15f5   :  { %40707 = vmatpush3.bf16.msra.mxu0 %v45706_v52  ;;  %39682 = vmatprep.mubr.f32.mxu0 %v34115_v35  ;;  %v34735_v52 = vand.u32 4294901760, %v45838_v7 }
0x15f6   :  { %40709 = vmatprep.subr.bf16.mxu0 %v45708_v22 }
0x15f9   :  { %40711 = vmatpush3.bf16.msra.mxu0 %v45708_v22  ;;  %v45844_v22 = vpack.c.bf16 %v34670_v46, %v34667_v62 }
0x15fa   :  { %40713 = vmatprep.subr.bf16.mxu0 %v45710_v11 }
0x15fd   :  { %40715 = vmatpush3.bf16.msra.mxu0 %v45710_v11  ;;  %v34729_v11 = vsub.f32 %v45833_v17, %v34728_v36 }
0x15fe   :  { %40717 = vmatprep.subr.bf16.mxu0 %v45712_v39 }
0x15ff   :  { %v34730_v3 = vand.u32 4294901760, %v34729_v11  ;;  %v45894_v11 = vsub.f32 %v17996_v55, %v34667_v62 }
0x1601   :  { %40719 = vmatpush3.bf16.msra.mxu0 %v45712_v39  ;;  %v34736_v39 = vsub.f32 %v45838_v7, %v34735_v52  ;;  %v46154_v44 = vand.u32 4294901760, %v45894_v11 }
0x1602   :  { %40721 = vmatprep.subr.bf16.mxu0 %v45631_v37 }
0x1603   :  { %v34737_v0 = vand.u32 4294901760, %v34736_v39  ;;  %v45896_v39 = vsub.f32 %v17997_v24, %v34670_v46 }
0x1604   :  { %39683 = vmatmul.mubr.f32.vlgmr.msra.gmra.mrb[84].mxu0 %v34125_v14 }
0x1605   :  { %40723 = vmatpush3.bf16.msra.mxu0 %v45631_v37  ;;  %39701 = vmatprep.mubr.f32.mxu0 %v34115_v35  ;;  %v17991_v37 = vld [vmem:[#allocation5 + $0x368] sm:$0xff]  ;;  %v45854_v43 = vpack.c.bf16 %v34737_v0, %v34730_v3  ;;  %v34827_v0 = vsub.f32 %v45894_v11, %v46154_v44 }
0x1606   :  { %40725 = vmatprep.subr.bf16.mxu0 %v45673_v63  ;;  %v34652_v10 = vand.u32 4294901760, %v17991_v37 }
0x1607   :  { %v34828_v62 = vand.u32 4294901760, %v34827_v0 }
0x1608   :  { %v45820_v56 = vpack.c.bf16 %v34652_v10, %v34649_v26  ;;  %v45859_v45 = vsub.f32 %v17991_v37, %v34652_v10  ;;  %v45885_v37 = vsub.f32 %v17995_v31, %v34664_v60  ;;  %v34807_v10 = vand.u32 4294901760, %v34806_v19 }
0x1609   :  { %40727 = vmatpush3.bf16.msra.mxu0 %v45673_v63  ;;  %v17992_v63 = vld [vmem:[#allocation5 + $0x3c0] sm:$0xff]  ;;  %v46153_v60 = vand.u32 4294901760, %v45896_v39  ;;  %v45931_v19 = vpack.c.bf16 %v45896_v39, %v45894_v11 }
0x160a   :  { %40729 = vmatprep.subr.bf16.mxu0 %v45677_v49  ;;  %40753 = vmatprep.subr.bf16.mxu1 %v45820_v56  ;;  %v46159_v27 = vand.u32 4294901760, %v45859_v45  ;;  %v46155_v58 = vand.u32 4294901760, %v45885_v37 }
0x160b   :  { %40755 = vmatpush3.bf16.msra.mxu1 %v45820_v56  ;;  %v34834_v55 = vsub.f32 %v45896_v39, %v46153_v60 }
0x160c   :  { %v34792_v41 = vsub.f32 %v45859_v45, %v46159_v27  ;;  %v34820_v18 = vsub.f32 %v45885_v37, %v46155_v58 }
0x160d   :  { %40731 = vmatpush3.bf16.msra.mxu0 %v45677_v49  ;;  %v34655_v49 = vand.u32 4294901760, %v17992_v63  ;;  %v34835_v46 = vand.u32 4294901760, %v34834_v55 }
0x160e   :  { %40733 = vmatprep.subr.bf16.mxu0 %v45687_v23  ;;  %v34793_v32 = vand.u32 4294901760, %v34792_v41  ;;  %v34821_v3 = vand.u32 4294901760, %v34820_v18  ;;  %v45915_v41 = vpack.c.bf16 %v45838_v7, %v45833_v17  ;;  %v45940_v18 = vsub.f32 %v45718_v30, %v34631_v15 }
0x160f   :  { %v45869_v35 = vsub.f32 %v17992_v63, %v34655_v49  ;;  %v46156_v63 = vand.u32 4294901760, %v45883_v59  ;;  %v45957_v15 = vsub.f32 %v45727_v25, %v34640_v54  ;;  %v45977_v54 = vsub.f32 %v45744_v57, %v34643_v40 }
0x1611   :  { %40735 = vmatpush3.bf16.msra.mxu0 %v45687_v23  ;;  %v45824_v23 = vpack.c.bf16 %v34658_v16, %v34655_v49  ;;  %v46158_v29 = vand.u32 4294901760, %v45869_v35  ;;  %v34813_v16 = vsub.f32 %v45883_v59, %v46156_v63  ;;  %v46162_v25 = vand.u32 4294901760, %v45957_v15 }
0x1612   :  { %39914 = vmatprep.subr.mxu0 %v46164_v38  ;;  %v34770_v40 = vand.u32 4294901760, %v45977_v54  ;;  %v46166_v7 = vand.u32 4294901760, %v45957_v15 }
0x1613   :  { %40757 = vmatprep.subr.bf16.mxu1 %v45824_v23  ;;  %v34799_v12 = vsub.f32 %v45869_v35, %v46158_v29  ;;  %v34814_v31 = vand.u32 4294901760, %v34813_v16 }
0x1614   :  { %39702 = vmatmul.mubr.f32.vlgmr.msra.gmra.mrb[84].mxu0 %v34125_v14  ;;  %40759 = vmatpush3.bf16.msra.mxu1 %v45824_v23  ;;  %v34785_v14 = vsub.f32 %v45857_v13, %v46160_v21 }
0x1615   :  { %39916 = vmatprep.mubr.msk.f32.mxu0 %vm41964_vm2, %v46164_v38  ;;  %40761 = vmatprep.subr.bf16.mxu1 %v45828_v28  ;;  %v34800_v26 = vand.u32 4294901760, %v34799_v12  ;;  %v45909_v24 = vpack.c.bf16 %v34821_v3, %v34814_v31  ;;  %v45927_v12 = vpack.c.bf16 %v45885_v37, %v45883_v59  ;;  %v45945_v31 = vsub.f32 %v45722_v61, %v34634_v53 }
0x1616   :  { %v34786_v2 = vand.u32 4294901760, %v34785_v14  ;;  %v45911_v14 = vpack.c.bf16 %v34835_v46, %v34828_v62  ;;  %v34742_v46 = vand.u32 4294901760, %v45940_v18 }
0x1617   :  { %v45889_v49 = vpack.c.bf16 %v34807_v10, %v34800_v26  ;;  %v34034_v26 = vsub.s32 4, %v42186_v34  ;;  %v45934_v10 = vld [vmem:[#allocation7] sm:$0xff]  ;;  %v34749_v60 = vand.u32 4294901760, %v45945_v31 }
0x1618   :  { %40763 = vmatpush3.bf16.msra.mxu1 %v45828_v28  ;;  %v45875_v51 = vpack.c.bf16 %v34793_v32, %v34786_v2  ;;  %v45919_v2 = vpack.c.bf16 %v45859_v45, %v45857_v13  ;;  %v45923_v32 = vpack.c.bf16 %v45871_v47, %v45869_v35 }
0x1619   :  { %40765 = vmatprep.subr.bf16.mxu1 %v45844_v22  ;;  %v34035_v16 = vrot.slane %v45934_v10, %v34034_v26  ;;  %v45952_v26 = vsub.f32 %v45725_v50, %v34637_v1  ;;  %v34750_v50 = vsub.f32 %v45945_v31, %v34749_v60 }
0x161b   :  { %v46161_v1 = vand.u32 4294901760, %v45952_v26  ;;  %v34751_v63 = vand.u32 4294901760, %v34750_v50  ;;  %v46165_v17 = vand.u32 4294901760, %v45952_v26 }
0x161c   :  { %40767 = vmatpush3.bf16.msra.mxu1 %v45844_v22 }
0x161d   :  { %40769 = vmatprep.subr.bf16.mxu1 %v45854_v43  ;;  %v34757_v5 = vsub.f32 %v45952_v26, %v46161_v1  ;;  %v34771_v1 = vsub.f32 %v45977_v54, %v34770_v40 }
0x161f   :  { %v34758_v29 = vand.u32 4294901760, %v34757_v5 }
0x16e7   :  { %v39703_v3 = vpop.f32.mrb[84].mxu0 }
0x16e8   :  { %v40943_v0 = vadd.f32 %v39703_v3, %v34035_v16  ;;  %v34612_v55 = vpop.f32.mrb[85].mxu0 }
0x16e9   :  { %v40944_v62 = vadd.f32 %v34612_v55, %v34035_v16  ;;  %v34743_v16 = vsub.f32 %v45940_v18, %v34742_v46  ;;  %v45982_v55 = vsub.f32 %v45746_v6, %v34646_v4  ;;  %v34764_v6 = vsub.f32 %v45957_v15, %v46162_v25 }
0x16ea   :  { %v34623_v30 = vmax.f32 %v40943_v0, 0.0 }
0x16eb   :  { %v34622_v61 = vmax.f32 %v40944_v62, 0.0  ;;  %v34744_v58 = vand.u32 4294901760, %v34743_v16  ;;  %v34777_v4 = vand.u32 4294901760, %v45982_v55  ;;  %v34765_v21 = vand.u32 4294901760, %v34764_v6 }
0x16ec   :  { %v45959_v53 = vand.u32 4294901760, %v34623_v30 }
0x16ed   :  { %v45961_v3 = vand.u32 4294901760, %v34622_v61  ;;  %v40772_v50 = vpack.c.bf16 %v34751_v63, %v34744_v58  ;;  %v34778_v25 = vsub.f32 %v45982_v55, %v34777_v4  ;;  %v34772_v63 = vand.u32 4294901760, %v34771_v1 }
0x16ee   :  { %v45971_v0 = vsub.f32 %v34623_v30, %v45959_v53 }
0x16ef   :  { %v45985_v62 = vsub.f32 %v34622_v61, %v45961_v3  ;;  %v34779_v5 = vand.u32 4294901760, %v34778_v25 }
0x16f0   :  { %v34717_v44 = vand.u32 4294901760, %v45971_v0 }
0x16f1   :  { %v34707_v30 = vand.u32 4294901760, %v45985_v62  ;;  %v40780_v58 = vpack.c.bf16 %v34779_v5, %v34772_v63 }
0x16f2   :  { %v34718_v57 = vsub.f32 %v45971_v0, %v34717_v44 }
0x16f3   :  { %v34708_v61 = vsub.f32 %v45985_v62, %v34707_v30 }
0x16f4   :  { %v34719_v27 = vand.u32 4294901760, %v34718_v57 }
0x16f5   :  { %v34709_v16 = vand.u32 4294901760, %v34708_v61  ;;  %v40776_v61 = vpack.c.bf16 %v34765_v21, %v34758_v29  ;;  %v60_v21 = vld [vmem:[#allocation7 + $0x10] sm:$0xff]  ;;  %v41977_v29 = vmov 0  }
0x16f6   :  { %41727 = vset.pattern.permute.xlu0 %v41977_v29  ;;  %41728 = vset.pattern.permute.xlu1 %v41977_v29 }
0x16f7   :  { %39736 = vmatprep.mubr.f32.mxu1 %v34709_v16  ;;  %35318 = vperm.xlu0 %41727, %v60_v21  }
0x16f8   :  { %39737 = vmatmul.mubr.f32.vlgmr.msra.gmra.mrb[66].mxu1 %v34719_v27  ;;  %v40808_v27 = vpack.c.bf16 %v45957_v15, %v45952_v26 }
0x16f9   :  { %40771 = vmatpush3.bf16.msra.mxu1 %v45854_v43  ;;  %39771 = vmatprep.mubr.f32.mxu1 %v45961_v3  ;;  %v40804_v43 = vpack.c.bf16 %v45945_v31, %v45940_v18 }
0x16fa   :  { %40773 = vmatprep.subr.bf16.mxu1 %v40772_v50 }
0x16fd   :  { %40775 = vmatpush3.bf16.msra.mxu1 %v40772_v50 }
0x16fe   :  { %40777 = vmatprep.subr.bf16.mxu1 %v40776_v61 }
0x1701   :  { %40779 = vmatpush3.bf16.msra.mxu1 %v40776_v61 }
0x1702   :  { %40781 = vmatprep.subr.bf16.mxu1 %v40780_v58 }
0x1705   :  { %40783 = vmatpush3.bf16.msra.mxu1 %v40780_v58 }
0x1706   :  { %40785 = vmatprep.subr.bf16.mxu1 %v45875_v51 }
0x1709   :  { %40787 = vmatpush3.bf16.msra.mxu1 %v45875_v51  ;;  %v40812_v51 = vpack.c.bf16 %v45982_v55, %v45977_v54 }
0x170a   :  { %40789 = vmatprep.subr.bf16.mxu1 %v45889_v49 }
0x170d   :  { %40791 = vmatpush3.bf16.msra.mxu1 %v45889_v49  ;;  %v40864_v49 = vpack.c.bf16 %v34735_v52, %v34728_v36  ;;  %v40872_v36 = vpack.c.bf16 %v46166_v7, %v46165_v17  ;;  %v40876_v52 = vpack.c.bf16 %v34777_v4, %v34770_v40 }
0x170e   :  { %40793 = vmatprep.subr.bf16.mxu1 %v45909_v24 }
0x1711   :  { %40795 = vmatpush3.bf16.msra.mxu1 %v45909_v24  ;;  %v40868_v24 = vpack.c.bf16 %v34749_v60, %v34742_v46  ;;  %v46168_v60 = vand.u32 4294901760, %v45859_v45  ;;  %v46174_v45 = vand.u32 4294901760, %v45896_v39 }
0x1712   :  { %40797 = vmatprep.subr.bf16.mxu1 %v45911_v14 }
0x1715   :  { %40799 = vmatpush3.bf16.msra.mxu1 %v45911_v14 }
0x1716   :  { %40801 = vmatprep.subr.bf16.mxu1 %v45915_v41 }
0x1718   :  { %39772 = vmatmul.mubr.f32.vlgmr.msra.gmra.mrb[66].mxu1 %v45959_v53 }
0x1719   :  { %40803 = vmatpush3.bf16.msra.mxu1 %v45915_v41  ;;  %39806 = vmatprep.mubr.f32.mxu1 %v45985_v62  ;;  %v46169_v41 = vand.u32 4294901760, %v45869_v35  ;;  %v35343_v35 = vrot.slane %v45934_v10, 7 }
0x171a   :  { %40805 = vmatprep.subr.bf16.mxu1 %v40804_v43 }
0x171d   :  { %40807 = vmatpush3.bf16.msra.mxu1 %v40804_v43 }
0x171e   :  { %40809 = vmatprep.subr.bf16.mxu1 %v40808_v27 }
0x1721   :  { %40811 = vmatpush3.bf16.msra.mxu1 %v40808_v27 }
0x1722   :  { %40813 = vmatprep.subr.bf16.mxu1 %v40812_v51 }
0x1725   :  { %40815 = vmatpush3.bf16.msra.mxu1 %v40812_v51 }
0x1726   :  { %40817 = vmatprep.subr.bf16.mxu1 %v45919_v2 }
0x1729   :  { %40819 = vmatpush3.bf16.msra.mxu1 %v45919_v2  ;;  %v46170_v2 = vand.u32 4294901760, %v45871_v47 }
0x172a   :  { %40821 = vmatprep.subr.bf16.mxu1 %v45923_v32 }
0x172d   :  { %40823 = vmatpush3.bf16.msra.mxu1 %v45923_v32  ;;  %v40884_v32 = vpack.c.bf16 %v46170_v2, %v46169_v41 }
0x172e   :  { %40825 = vmatprep.subr.bf16.mxu1 %v45927_v12 }
0x1731   :  { %40827 = vmatpush3.bf16.msra.mxu1 %v45927_v12  ;;  %v46171_v12 = vand.u32 4294901760, %v45883_v59 }
0x1732   :  { %40829 = vmatprep.subr.bf16.mxu1 %v45931_v19 }
0x1735   :  { %40831 = vmatpush3.bf16.msra.mxu1 %v45931_v19  ;;  %v46172_v19 = vand.u32 4294901760, %v45885_v37 }
0x1736   :  { %40833 = vmatprep.subr.bf16.mxu1 %v45734_v42 }
0x1737   :  { %v40888_v18 = vpack.c.bf16 %v46172_v19, %v46171_v12 }
0x1738   :  { %39807 = vmatmul.mubr.f32.vlgmr.msra.gmra.mrb[66].mxu1 %v45971_v0 }
0x1739   :  { %40835 = vmatpush3.bf16.msra.mxu1 %v45734_v42  ;;  %39841 = vmatprep.mubr.f32.mxu1 %v34707_v30 }
0x173a   :  { %40837 = vmatprep.subr.bf16.mxu1 %v45742_v20 }
0x173d   :  { %40839 = vmatpush3.bf16.msra.mxu1 %v45742_v20 }
0x173e   :  { %40841 = vmatprep.subr.bf16.mxu1 %v45755_v33 }
0x1741   :  { %40843 = vmatpush3.bf16.msra.mxu1 %v45755_v33 }
0x1742   :  { %40845 = vmatprep.subr.bf16.mxu1 %v45765_v8 }
0x1745   :  { %40847 = vmatpush3.bf16.msra.mxu1 %v45765_v8 }
0x1746   :  { %40849 = vmatprep.subr.bf16.mxu1 %v45820_v56 }
0x1749   :  { %40851 = vmatpush3.bf16.msra.mxu1 %v45820_v56 }
0x174a   :  { %40853 = vmatprep.subr.bf16.mxu1 %v45824_v23 }
0x174d   :  { %40855 = vmatpush3.bf16.msra.mxu1 %v45824_v23 }
0x174e   :  { %40857 = vmatprep.subr.bf16.mxu1 %v45828_v28 }
0x1751   :  { %40859 = vmatpush3.bf16.msra.mxu1 %v45828_v28 }
0x1752   :  { %40861 = vmatprep.subr.bf16.mxu1 %v45844_v22 }
0x1755   :  { %40863 = vmatpush3.bf16.msra.mxu1 %v45844_v22 }
0x1756   :  { %40865 = vmatprep.subr.bf16.mxu1 %v40864_v49 }
0x1758   :  { %39842 = vmatmul.mubr.f32.vlgmr.msra.gmra.mrb[66].mxu1 %v34717_v44  ;;  %v46167_v44 = vand.u32 4294901760, %v45857_v13  ;;  %v46173_v13 = vand.u32 4294901760, %v45894_v11  ;;  %v35348_v11 = vsel %vm633_vm1, %v35343_v35, 0 }
0x1759   :  { %40867 = vmatpush3.bf16.msra.mxu1 %v40864_v49  ;;  %39876 = vmatprep.mubr.f32.mxu1 %v45961_v3  ;;  %v35418_v15 = vand.u32 4294901760, %v35348_v11 }
0x175a   :  { %40869 = vmatprep.subr.bf16.mxu1 %v40868_v24  ;;  %v40880_v14 = vpack.c.bf16 %v46168_v60, %v46167_v44  ;;  %v40892_v31 = vpack.c.bf16 %v46174_v45, %v46173_v13 }
0x175d   :  { %40871 = vmatpush3.bf16.msra.mxu1 %v40868_v24 }
0x175e   :  { %40873 = vmatprep.subr.bf16.mxu1 %v40872_v36 }
0x1761   :  { %40875 = vmatpush3.bf16.msra.mxu1 %v40872_v36 }
0x1762   :  { %40877 = vmatprep.subr.bf16.mxu1 %v40876_v52 }
0x1765   :  { %40879 = vmatpush3.bf16.msra.mxu1 %v40876_v52 }
0x1766   :  { %40881 = vmatprep.subr.bf16.mxu1 %v40880_v14 }
0x1769   :  { %40883 = vmatpush3.bf16.msra.mxu1 %v40880_v14 }
0x176a   :  { %40885 = vmatprep.subr.bf16.mxu1 %v40884_v32 }
0x176d   :  { %40887 = vmatpush3.bf16.msra.mxu1 %v40884_v32 }
0x176e   :  { %40889 = vmatprep.subr.bf16.mxu1 %v40888_v18 }
0x1771   :  { %40891 = vmatpush3.bf16.msra.mxu1 %v40888_v18 }
0x1772   :  { %40893 = vmatprep.subr.bf16.mxu1 %v40892_v31 }
0x1775   :  { %40895 = vmatpush3.bf16.msra.mxu1 %v40892_v31 }
0x1776   :  { %40897 = vmatprep.subr.bf16.mxu1 %v45734_v42  ;;  %v35319_v47 = vpop.permute.xlu0 %35318 }
0x1778   :  { %39877 = vmatmul.mubr.f32.vlgmr.msra.gmra.mrb[66].mxu1 %v45959_v53 }
0x1779   :  { %40899 = vmatpush3.bf16.msra.mxu1 %v45734_v42  ;;  %39911 = vmatprep.mubr.f32.mxu1 %v45961_v3  ;;  %v61_v42 = vld [vmem:[#allocation7 + $0x20] sm:$0x1] }
0x177a   :  { %40901 = vmatprep.subr.bf16.mxu1 %v45742_v20  ;;  %35339 = vperm.xlu1 %41728, %v61_v42  }
0x177d   :  { %40903 = vmatpush3.bf16.msra.mxu1 %v45742_v20  ;;  %v35312_v20 = vsub.s32 6, %v42186_v34 }
0x177e   :  { %40905 = vmatprep.subr.bf16.mxu1 %v45755_v33 }
0x1781   :  { %40907 = vmatpush3.bf16.msra.mxu1 %v45755_v33  ;;  %v35313_v33 = vrot.slane %v45934_v10, %v35312_v20  ;;  %v35419_v10 = vsub.f32 %v35348_v11, %v35418_v15 }
0x1782   :  { %40909 = vmatprep.subr.bf16.mxu1 %v45765_v8 }
0x1783   :  { %v35420_v55 = vand.u32 4294901760, %v35419_v10 }
0x1785   :  { %40911 = vmatpush3.bf16.msra.mxu1 %v45765_v8  ;;  %v35421_v6 = vsub.f32 %v35419_v10, %v35420_v55 }
0x1786   :  { %40913 = vmatprep.subr.bf16.mxu1 %v45820_v56 }
0x1787   :  { %v35422_v50 = vand.u32 4294901760, %v35421_v6 }
0x1789   :  { %40915 = vmatpush3.bf16.msra.mxu1 %v45820_v56 }
0x178a   :  { %40917 = vmatprep.subr.bf16.mxu1 %v45824_v23 }
0x178d   :  { %40919 = vmatpush3.bf16.msra.mxu1 %v45824_v23 }
0x178e   :  { %40921 = vmatprep.subr.bf16.mxu1 %v45828_v28 }
0x1791   :  { %40923 = vmatpush3.bf16.msra.mxu1 %v45828_v28 }
0x1792   :  { %40925 = vmatprep.subr.bf16.mxu1 %v45844_v22 }
0x1795   :  { %40927 = vmatpush3.bf16.msra.mxu1 %v45844_v22 }
0x1798   :  { %39912 = vmatmul.mubr.f32.vlgmr.msra.gmra.mrb[66].mxu1 %v45959_v53 }
0x17f9   :  { %v35340_v43 = vpop.permute.xlu1 %35339 }
0x186b   :  { %v39913_v8 = vpop.f32.mrb[66].mxu1 }
0x186c   :  { %v35309_v56 = vadd.f32 %v39913_v8, %v45771_v48  ;;  %v35298_v23 = vpop.f32.mrb[67].mxu1 }
0x186d   :  { %v35308_v28 = vadd.f32 %v35298_v23, %v45774_v9 }
0x186e   :  { %v35315_v59 = vadd.f32 %v35313_v33, %v35309_v56 }
0x186f   :  { %v35314_v37 = vadd.f32 %v35313_v33, %v35308_v28 }
0x1870   :  { %v35322_v22 = vmul.f32 %v35319_v47, %v35315_v59 }
0x1871   :  { %v35321_v39 = vmul.f32 %v35319_v47, %v35314_v37 }
0x1872   :  { %v35330_v46 = vsel %vm633_vm1, %v35322_v22, 0.0 }
0x1873   :  { %v35323_v34 = vsel %vm633_vm1, %v35321_v39, 0.0  ;;  %v35331_v26 = vrot.slane %v35330_v46, 4 }
0x1874   :  { %v35324_v53 = vrot.slane %v35323_v34, 4 }
0x1875   :  { %v35332_v48 = vadd.f32 %v35331_v26, %v35330_v46 }
0x1876   :  { %v35325_v3 = vadd.f32 %v35324_v53, %v35323_v34 }
0x1877   :  { %v35333_v1 = vrot.slane %v35332_v48, 2 }
0x1878   :  { %v35326_v0 = vrot.slane %v35325_v3, 2 }
0x1879   :  { %v35334_v9 = vadd.f32 %v35333_v1, %v35332_v48 }
0x187a   :  { %v35327_v25 = vadd.f32 %v35326_v0, %v35325_v3 }
0x187b   :  { %v35335_v54 = vrot.slane %v35334_v9, 1 }
0x187c   :  { %v35328_v62 = vrot.slane %v35327_v25, 1 }
0x187d   :  { %v35336_v30 = vadd.f32 %v35335_v54, %v35334_v9 }
0x187e   :  { %v35329_v57 = vadd.f32 %v35328_v62, %v35327_v25 }
0x1880   :  { %v35347_v40 = vsel %vm35346_vm9, %v35336_v30, %v35329_v57 }
0x1881   :  { %v35350_v4 = vsel %vm633_vm1, %v35347_v40, 0 }
0x1882   :  { %v35353_v16 = vand.u32 4294901760, %v35350_v4 }
0x1884   :  { %39915 = vmatpush3.xpose.msra.mxu0 %v35353_v16  ;;  %v35430_v61 = vsub.f32 %v35350_v4, %v35353_v16 }
0x1885   :  { %39919 = vmatprep.subr.mxu0 %v46164_v38 }
0x1886   :  { %v35431_v63 = vand.u32 4294901760, %v35430_v61 }
0x1887   :  { %39917 = vmatmul.mubr.f32.vlgmr.msra.gmra.mrb[86].mxu0 %v35422_v50 }
0x1888   :  { %v35432_v5 = vsub.f32 %v35430_v61, %v35431_v63  ;;  %39921 = vmatprep.mubr.msk.f32.mxu0 %vm41964_vm2, %v46164_v38 }
0x188a   :  { %v35433_v58 = vand.u32 4294901760, %v35432_v5 }
0x188c   :  { %39920 = vmatpush3.xpose.msra.mxu0 %v35433_v58 }
0x188d   :  { %39924 = vmatprep.subr.mxu0 %v46164_v38 }
0x188f   :  { %39922 = vmatmul.mubr.f32.vlgmr.msra.gmra.mrb[86].mxu0 %v35418_v15 }
0x1890   :  { %39925 = vmatpush3.xpose.msra.mxu0 %v35430_v61  ;;  %39926 = vmatprep.mubr.msk.f32.mxu0 %vm41964_vm2, %v46164_v38 }
0x1891   :  { %39929 = vmatprep.subr.mxu0 %v46164_v38 }
0x1897   :  { %39927 = vmatmul.mubr.f32.vlgmr.msra.gmra.mrb[86].mxu0 %v35419_v10 }
0x1898   :  { %39930 = vmatpush3.xpose.msra.mxu0 %v35353_v16  ;;  %39931 = vmatprep.mubr.msk.f32.mxu0 %vm41964_vm2, %v46164_v38 }
0x1899   :  { %39934 = vmatprep.subr.mxu0 %v46164_v38 }
0x189f   :  { %39932 = vmatmul.mubr.f32.vlgmr.msra.gmra.mrb[86].mxu0 %v35420_v55 }
0x18a0   :  { %39935 = vmatpush3.xpose.msra.mxu0 %v35431_v63  ;;  %39936 = vmatprep.mubr.msk.f32.mxu0 %vm41964_vm2, %v46164_v38 }
0x18a1   :  { %39939 = vmatprep.subr.mxu0 %v46164_v38 }
0x18a7   :  { %39937 = vmatmul.mubr.f32.vlgmr.msra.gmra.mrb[86].mxu0 %v35418_v15 }
0x18a8   :  { %39940 = vmatpush3.xpose.msra.mxu0 %v35353_v16  ;;  %39941 = vmatprep.mubr.msk.f32.mxu0 %vm41964_vm2, %v46164_v38 }
0x18af   :  { %39942 = vmatmul.mubr.f32.vlgmr.msra.gmra.mrb[86].mxu0 %v35418_v15 }
0x1982   :  { %v35794_v21 = vpop.f32.mrb[86].mxu0 }
0x1983   :  { %v40945_v27 = vadd.f32 %v35794_v21, %v35340_v43  ;;  %v39943_v29 = vpop.f32.mrb[87].mxu0 }
0x1985   :  { %35799 = vst.msk [vmem:[#allocation8] sm:$0x1] %vm35798_vm10, %v40945_v27 }
0x1986   :  { %41937 = shalt.err (!%p41934_p0)
}
0x1987   :  { %s41938_s14 = scalar_lea.hbm %s46149_s3, 16 }
0x1988   :  { %p41939_p1 = scmp.ne.s32.totalorder %s46149_s3, %s41938_s14  ;;  %p41942_p2 = scmp.lt.u32.totalorder %s41938_s14, %s46149_s3 }
0x198a   :  { %p41944_p3 = pnand %p41942_p2, %p41939_p1 }
0x198c   :  { %41947 = shalt.err (!%p41944_p3)
}
0x198d   :  { %35809 = dma.vmem_to_hbm [thread:$0]  %s35807_s9, 16, %s46149_s3, [#allocation4]  }
0x198e   :  { %41952 = dma.done.wait [#allocation4], 16  }
0x198f   :  { %41953 = vsyncadd [#allocation4], 4294967280 }
0x1990   :  { %35813 = vsyncpa [#allocation3], 1 }
0x1991   :  { %35814 = vsyncpa [#allocation6], 1 }
0x1992   :  { %35815 = vsyncpa [#allocation4], 1 }

</bundles_post_ra>
